<compile_context>
chip_gen: v5e
topology: v5e:2x2
jax: 0.10.0
libtpu: 0.0.40
codegen_flags: <defaults>
</compile_context>

<pallas_src>
import math

import jax
import jax.numpy as jnp
from jax.experimental import pallas as pl
from jax.experimental.pallas import tpu as pltpu

# ----------------------------- model config (small) -----------------------------
IMG = 16          # img_size
PATCH = 4         # patch_size
IN_CHANS = 3
HIDDEN = 64       # hidden_size
NUM_HEADS = 4
HEAD_DIM = HIDDEN // NUM_HEADS        # 16
INTER = 128       # intermediate_size
DEPTH = 2
NUM_CLASSES = 16
GRID_HW = IMG // PATCH                # 4
NUM_PATCHES = GRID_HW * GRID_HW       # 16
SEQ = NUM_PATCHES + 1                 # +1 CLS token -> 17
S_PAD = 32                            # SEQ padded to a multiple of 8 AND 16
PATCH_DIM = IN_CHANS * PATCH * PATCH  # 48
HEAD_PAD = 128                        # classifier logits padded to a full lane group
EPS = 1e-6


# ----------------------------- in-kernel helpers -----------------------------
def _layer_norm(x, gamma, beta, eps=EPS):
    # x: (M, H) f32 ; gamma/beta: (1, H)
    mean = jnp.mean(x, axis=-1, keepdims=True)
    var = jnp.mean((x - mean) ** 2, axis=-1, keepdims=True)
    return (x - mean) * jax.lax.rsqrt(var + eps) * gamma + beta


def _gelu_exact(x):
    # matches torch.nn.functional.gelu default (erf form)
    return 0.5 * x * (1.0 + jax.lax.erf(x * (1.0 / math.sqrt(2.0))))


# ----------------------------- fused ViT forward kernel -----------------------------
def _fused_vit_kernel(xp_ref, add_ref, wpe_ref,
                      ln1g_ref, ln1b_ref, wqkv_ref, bqkv_ref, wo_ref, bo_ref,
                      ln2g_ref, ln2b_ref, w1_ref, b1_ref, w2_ref, b2_ref,
                      lng_ref, lnb_ref, wh_ref, bh_ref,
                      o_ref):
    f32 = jnp.float32
    bf16 = jnp.bfloat16
    scale = 1.0 / math.sqrt(HEAD_DIM)

    BT = xp_ref.shape[0] // S_PAD      # batch-tile size (static)
    M = BT * S_PAD                     # total rows this grid step

    # ---- patch embedding + CLS/pos assembly ----
    # xp rows per batch element: [0]=zeros (CLS slot), [1:SEQ]=patches, rest zero pad.
    # add rows per batch element: [0]=cls_token+pos0, [1:SEQ]=pos_rest+patch_bias, rest 0.
    x = jnp.dot(xp_ref[...], wpe_ref[...], preferred_element_type=f32) + add_ref[...]

    # key-padding mask: pad key columns get a big negative bias before softmax
    key_ids = jax.lax.broadcasted_iota(jnp.int32, (1, 1, S_PAD), 2)
    key_bias = jnp.where(key_ids < SEQ, 0.0, -1e30).astype(f32)

    for d in range(DEPTH):                      # statically unrolled (DEPTH=2)
        # --- attention branch ---
        xn = _layer_norm(x, ln1g_ref[d], ln1b_ref[d])

        # fused QKV: one lane-dense (M, 64) @ (64, 192) matmul, bias in f32.
        # Column layout is the reference per-head-interleaved [q_h | k_h | v_h].
        qkv = jnp.dot(xn.astype(bf16), wqkv_ref[d],
                      preferred_element_type=f32) + bqkv_ref[d]          # (M, 192)
        qkv3 = qkv.reshape(BT, S_PAD, 3 * HIDDEN)                        # major split only

        ctx_heads = []
        for h in range(NUM_HEADS):              # statically unrolled (4 heads)
            base = h * 3 * HEAD_DIM
            q = qkv3[:, :, base:base + HEAD_DIM]
            k = qkv3[:, :, base + HEAD_DIM:base + 2 * HEAD_DIM]
            v = qkv3[:, :, base + 2 * HEAD_DIM:base + 3 * HEAD_DIM]

            s = jnp.einsum('bqd,bkd->bqk', q.astype(bf16), k.astype(bf16),
                           preferred_element_type=f32) * scale + key_bias  # (BT, S, S)
            s = s - jnp.max(s, axis=-1, keepdims=True)
            p = jnp.exp(s)
            p = p * pl.reciprocal(jnp.sum(p, axis=-1, keepdims=True), approx=True)

            ctx_heads.append(jnp.einsum('bqk,bkd->bqd', p.astype(bf16), v.astype(bf16),
                                        preferred_element_type=f32))      # (BT, S, hd)

        # head-major lane concat == reference transpose(1,2)+reshape
        ctx = jnp.concatenate(ctx_heads, axis=-1).reshape(M, HIDDEN)      # (M, 64)
        attn = jnp.dot(ctx.astype(bf16), wo_ref[d],
                       preferred_element_type=f32) + bo_ref[d]            # (M, 64)
        x = x + attn                                                      # residual

        # --- MLP branch ---
        xn2 = _layer_norm(x, ln2g_ref[d], ln2b_ref[d])
        h1 = jnp.dot(xn2.astype(bf16), w1_ref[d],
                     preferred_element_type=f32) + b1_ref[d]
        h1 = _gelu_exact(h1)
        h2 = jnp.dot(h1.astype(bf16), w2_ref[d],
                     preferred_element_type=f32) + b2_ref[d]
        x = x + h2                                                        # residual

    # --- final LayerNorm + classifier head ---
    # Computed for ALL rows (lane/sublane-dense matmul + unmasked stores); the
    # wrapper extracts the CLS row and slices the 16 real classes.
    xf = _layer_norm(x, lng_ref[...], lnb_ref[...])
    o_ref[...] = (jnp.dot(xf.astype(bf16), wh_ref[...],
                          preferred_element_type=f32) + bh_ref[...]).astype(o_ref.dtype)


# ----------------------------- wrapper: pack params + pallas_call -----------------------------
def _pack_params(params, b_tile):
    """Stack per-block weights along DEPTH, keep fused QKV in its native
    (per-head interleaved) column layout, cast matmul weights to bf16, pad the
    head to 128 lanes.  Pure XLA glue (runs once under jit)."""
    bf = jnp.bfloat16
    blocks = params["blocks"]

    def per_block(fn):
        return jnp.stack([fn(b) for b in blocks], axis=0)

    add_map = jnp.concatenate(
        [params["cls_token"][0] + params["pos_embed"][0, 0:1, :],
         params["pos_embed"][0, 1:, :] + params["b_pe"],
         jnp.zeros((S_PAD - SEQ, HIDDEN), jnp.float32)], axis=0)          # (S_PAD, H)

    packed = dict(
        w_pe=params["w_pe"].astype(bf),
        add_map=jnp.tile(add_map, (b_tile, 1)),                           # (b_tile*S_PAD, H)
        ln1g=per_block(lambda b: b["ln1_g"]),
        ln1b=per_block(lambda b: b["ln1_b"]),
        wqkv=per_block(lambda b: b["w_qkv"]).astype(bf),                  # (D, H, 3H) native layout
        bqkv=per_block(lambda b: b["b_qkv"]),                             # (D, 1, 3H)
        wo=per_block(lambda b: b["w_o"]).astype(bf),
        bo=per_block(lambda b: b["b_o"]),
        ln2g=per_block(lambda b: b["ln2_g"]),
        ln2b=per_block(lambda b: b["ln2_b"]),
        w1=per_block(lambda b: b["w_1"]).astype(bf),
        b1=per_block(lambda b: b["b_1"]),
        w2=per_block(lambda b: b["w_2"]).astype(bf),
        b2=per_block(lambda b: b["b_2"]),
        lng=params["ln_g"], lnb=params["ln_b"],
        wh=jnp.pad(params["w_head"],
                   ((0, 0), (0, HEAD_PAD - NUM_CLASSES))).astype(bf),     # (H, 128)
        bh=jnp.pad(params["b_head"], ((0, 0), (0, HEAD_PAD - NUM_CLASSES))),
    )
    return packed


def vit_forward(pixel_values, params, *, b_tile=None):
    # layout: pixel_values NCHW (B, C, H, W)
    B, C, Himg, Wimg = pixel_values.shape
    gh, gw = Himg // PATCH, Wimg // PATCH
    P = gh * gw

    if b_tile is None:
        # target M = b_tile * S_PAD >= 256 rows per grid step (saturates a
        # 256-wide MXU pass on v6e/v7x, >=128 on v5e), clamped to the batch.
        b_tile = min(8, B)
    grid_b = -(-B // b_tile)
    B_pad = grid_b * b_tile

    # Patch extraction (== strided conv with kernel=stride=patch): JAX glue only.
    patches = pixel_values.reshape(B, C, gh, PATCH, gw, PATCH)
    patches = patches.transpose(0, 2, 4, 1, 3, 5).reshape(B, P, C * PATCH * PATCH)
    # Pad: batch -> B_pad; seq -> S_PAD (row 0 = CLS slot zeros, tail = pad rows);
    # then flatten (batch, seq) into a single row axis for lane/sublane-dense matmuls.
    xp = jnp.pad(patches, ((0, B_pad - B), (1, S_PAD - SEQ), (0, 0)))
    xp = xp.reshape(B_pad * S_PAD, PATCH_DIM).astype(jnp.bfloat16)

    pk = _pack_params(params, b_tile)
    args = [xp, pk["add_map"], pk["w_pe"],
            pk["ln1g"], pk["ln1b"], pk["wqkv"], pk["bqkv"], pk["wo"], pk["bo"],
            pk["ln2g"], pk["ln2b"], pk["w1"], pk["b1"], pk["w2"], pk["b2"],
            pk["lng"], pk["lnb"], pk["wh"], pk["bh"]]

    def _full(a):
        nd = a.ndim
        return pl.BlockSpec(a.shape, lambda i, _n=nd: (0,) * _n)

    in_specs = [pl.BlockSpec((b_tile * S_PAD, PATCH_DIM), lambda i: (i, 0))] \
             + [_full(a) for a in args[1:]]

    out = pl.pallas_call(
        _fused_vit_kernel,
        out_shape=jax.ShapeDtypeStruct((B_pad * S_PAD, HEAD_PAD), jnp.float32),
        grid=(grid_b,),
        in_specs=in_specs,
        out_specs=pl.BlockSpec((b_tile * S_PAD, HEAD_PAD), lambda i: (i, 0)),
        compiler_params=pltpu.CompilerParams(
            dimension_semantics=("parallel",)),
    )(*args)

    # extract CLS-row logits and drop padding (wrapper-side XLA glue)
    logits = out.reshape(B_pad, S_PAD, HEAD_PAD)[:B, 0, :NUM_CLASSES]
    return logits


# ----------------------------- deterministic parameter init -----------------------------
def _xavier_uniform(key, shape):
    fan_in, fan_out = shape
    limit = math.sqrt(6.0 / (fan_in + fan_out))
    return jax.random.uniform(key, shape, jnp.float32, -limit, limit)


def init_params(key):
    keys = iter(jax.random.split(key, 64))
    params = {}
    # patch embedding: conv weight (E, C, p, p) flattened to (C*p*p, E); lecun-normal-ish
    params["w_pe"] = jax.random.normal(next(keys), (PATCH_DIM, HIDDEN), jnp.float32) \
        * (1.0 / math.sqrt(PATCH_DIM))
    params["b_pe"] = jnp.zeros((1, HIDDEN), jnp.float32)
    params["cls_token"] = jnp.zeros((1, 1, HIDDEN), jnp.float32)
    params["pos_embed"] = jax.random.normal(next(keys), (1, SEQ, HIDDEN), jnp.float32) * 0.02

    blocks = []
    for _ in range(DEPTH):
        blk = {
            "ln1_g": jnp.ones((1, HIDDEN), jnp.float32),
            "ln1_b": jnp.zeros((1, HIDDEN), jnp.float32),
            # reference layout: per-head interleaved columns [q_h | k_h | v_h]
            "w_qkv": _xavier_uniform(next(keys), (HIDDEN, 3 * HIDDEN)),
            "b_qkv": jax.random.normal(next(keys), (1, 3 * HIDDEN), jnp.float32) * 1e-6,
            "w_o": _xavier_uniform(next(keys), (HIDDEN, HIDDEN)),
            "b_o": jax.random.normal(next(keys), (1, HIDDEN), jnp.float32) * 1e-6,
            "ln2_g": jnp.ones((1, HIDDEN), jnp.float32),
            "ln2_b": jnp.zeros((1, HIDDEN), jnp.float32),
            "w_1": _xavier_uniform(next(keys), (HIDDEN, INTER)),
            "b_1": jax.random.normal(next(keys), (1, INTER), jnp.float32) * 1e-6,
            "w_2": _xavier_uniform(next(keys), (INTER, HIDDEN)),
            "b_2": jax.random.normal(next(keys), (1, HIDDEN), jnp.float32) * 1e-6,
        }
        blocks.append(blk)
    params["blocks"] = blocks

    params["ln_g"] = jnp.ones((1, HIDDEN), jnp.float32)
    params["ln_b"] = jnp.zeros((1, HIDDEN), jnp.float32)
    # NOTE: reference __init__ zero-inits the classifier; use small random values
    # here so the output is non-degenerate (shapes identical).
    params["w_head"] = jax.random.normal(next(keys), (HIDDEN, NUM_CLASSES), jnp.float32) * 0.02
    params["b_head"] = jnp.zeros((1, NUM_CLASSES), jnp.float32)
    return params


# ----------------------------- main -----------------------------
if __name__ == "__main__":
    key = jax.random.PRNGKey(0)
    k_params, k_x = jax.random.split(key)
    params = init_params(k_params)
    pixel_values = jax.random.normal(k_x, (2, IN_CHANS, IMG, IMG), jnp.float32)  # NCHW

    fwd = jax.jit(vit_forward)
    logits = fwd(pixel_values, params)
    jax.block_until_ready(logits)
    assert logits.shape == (2, NUM_CLASSES)
    assert bool(jnp.all(jnp.isfinite(logits)))
    print("KERNEL_OK")
</pallas_src>

<mosaic_0001>
module attributes {stable_mosaic.version = 11 : i64} {
  func.func @_fused_vit_kernel(%arg0: i32, %arg1: memref<64x48xbf16, #tpu.memory_space<vmem>>, %arg2: memref<64x64xf32, #tpu.memory_space<vmem>>, %arg3: memref<48x64xbf16, #tpu.memory_space<vmem>>, %arg4: memref<2x1x64xf32, #tpu.memory_space<vmem>>, %arg5: memref<2x1x64xf32, #tpu.memory_space<vmem>>, %arg6: memref<2x64x192xbf16, #tpu.memory_space<vmem>>, %arg7: memref<2x1x192xf32, #tpu.memory_space<vmem>>, %arg8: memref<2x64x64xbf16, #tpu.memory_space<vmem>>, %arg9: memref<2x1x64xf32, #tpu.memory_space<vmem>>, %arg10: memref<2x1x64xf32, #tpu.memory_space<vmem>>, %arg11: memref<2x1x64xf32, #tpu.memory_space<vmem>>, %arg12: memref<2x64x128xbf16, #tpu.memory_space<vmem>>, %arg13: memref<2x1x128xf32, #tpu.memory_space<vmem>>, %arg14: memref<2x128x64xbf16, #tpu.memory_space<vmem>>, %arg15: memref<2x1x64xf32, #tpu.memory_space<vmem>>, %arg16: memref<1x64xf32, #tpu.memory_space<vmem>>, %arg17: memref<1x64xf32, #tpu.memory_space<vmem>>, %arg18: memref<64x128xbf16, #tpu.memory_space<vmem>>, %arg19: memref<1x128xf32, #tpu.memory_space<vmem>>, %arg20: memref<64x128xf32, #tpu.memory_space<vmem>>) attributes {dimension_semantics = [#tpu.dimension_semantics<parallel>], iteration_bounds = array<i64: 1>, scalar_prefetch = 0 : i64, scratch_operands = 0 : i64, tpu.core_type = #tpu.core_type<tc>, window_params = [{transform_indices = @transform_0, window_bounds = array<i64: 64, 48>}, {pipeline_mode = #tpu.pipeline_mode<synchronous>, transform_indices = @transform_1, window_bounds = array<i64: 64, 64>}, {pipeline_mode = #tpu.pipeline_mode<synchronous>, transform_indices = @transform_2, window_bounds = array<i64: 48, 64>}, {pipeline_mode = #tpu.pipeline_mode<synchronous>, transform_indices = @transform_3, window_bounds = array<i64: 2, 1, 64>}, {pipeline_mode = #tpu.pipeline_mode<synchronous>, transform_indices = @transform_4, window_bounds = array<i64: 2, 1, 64>}, {pipeline_mode = #tpu.pipeline_mode<synchronous>, transform_indices = @transform_5, window_bounds = array<i64: 2, 64, 192>}, {pipeline_mode = #tpu.pipeline_mode<synchronous>, transform_indices = @transform_6, window_bounds = array<i64: 2, 1, 192>}, {pipeline_mode = #tpu.pipeline_mode<synchronous>, transform_indices = @transform_7, window_bounds = array<i64: 2, 64, 64>}, {pipeline_mode = #tpu.pipeline_mode<synchronous>, transform_indices = @transform_8, window_bounds = array<i64: 2, 1, 64>}, {pipeline_mode = #tpu.pipeline_mode<synchronous>, transform_indices = @transform_9, window_bounds = array<i64: 2, 1, 64>}, {pipeline_mode = #tpu.pipeline_mode<synchronous>, transform_indices = @transform_10, window_bounds = array<i64: 2, 1, 64>}, {pipeline_mode = #tpu.pipeline_mode<synchronous>, transform_indices = @transform_11, window_bounds = array<i64: 2, 64, 128>}, {pipeline_mode = #tpu.pipeline_mode<synchronous>, transform_indices = @transform_12, window_bounds = array<i64: 2, 1, 128>}, {pipeline_mode = #tpu.pipeline_mode<synchronous>, transform_indices = @transform_13, window_bounds = array<i64: 2, 128, 64>}, {pipeline_mode = #tpu.pipeline_mode<synchronous>, transform_indices = @transform_14, window_bounds = array<i64: 2, 1, 64>}, {pipeline_mode = #tpu.pipeline_mode<synchronous>, transform_indices = @transform_15, window_bounds = array<i64: 1, 64>}, {pipeline_mode = #tpu.pipeline_mode<synchronous>, transform_indices = @transform_16, window_bounds = array<i64: 1, 64>}, {pipeline_mode = #tpu.pipeline_mode<synchronous>, transform_indices = @transform_17, window_bounds = array<i64: 64, 128>}, {pipeline_mode = #tpu.pipeline_mode<synchronous>, transform_indices = @transform_18, window_bounds = array<i64: 1, 128>}, {transform_indices = @transform_19, window_bounds = array<i64: 64, 128>}]} {
    %c0 = arith.constant 0 : index
    %c0_0 = arith.constant 0 : index
    %0 = vector.load %arg1[%c0, %c0_0] : memref<64x48xbf16, #tpu.memory_space<vmem>>, vector<64x48xbf16>
    %c0_1 = arith.constant 0 : index
    %c0_2 = arith.constant 0 : index
    %1 = vector.load %arg3[%c0_1, %c0_2] : memref<48x64xbf16, #tpu.memory_space<vmem>>, vector<48x64xbf16>
    %cst = arith.constant dense<0.000000e+00> : vector<64x64xf32>
    %2 = tpu.matmul %0, %1, %cst {dimension_numbers = #tpu.dot_dimension_numbers<[1], [0], [0], [1], [0, 0, 1, 1], [], []>} : vector<64x48xbf16>, vector<48x64xbf16>, vector<64x64xf32> -> vector<64x64xf32>
    %c0_3 = arith.constant 0 : index
    %c0_4 = arith.constant 0 : index
    %3 = vector.load %arg2[%c0_3, %c0_4] : memref<64x64xf32, #tpu.memory_space<vmem>>, vector<64x64xf32>
    %4 = arith.addf %2, %3 : vector<64x64xf32>
    %5 = tpu.iota {dimensions = array<i32: 2>} : vector<1x1x32xi32>
    %c17_i32 = arith.constant 17 : i32
    %6 = vector.broadcast %c17_i32 : i32 to vector<1x1x32xi32>
    %7 = arith.cmpi slt, %5, %6 : vector<1x1x32xi32>
    %cst_5 = arith.constant 0.000000e+00 : f32
    %cst_6 = arith.constant -1.000000e+30 : f32
    %8 = vector.broadcast %cst_5 : f32 to vector<1x1x32xf32>
    %9 = vector.broadcast %cst_6 : f32 to vector<1x1x32xf32>
    %10 = arith.select %7, %8, %9 : vector<1x1x32xi1>, vector<1x1x32xf32>
    %c0_7 = arith.constant 0 : index
    %c0_8 = arith.constant 0 : index
    %c0_9 = arith.constant 0 : index
    %11 = vector.load %arg4[%c0_7, %c0_8, %c0_9] : memref<2x1x64xf32, #tpu.memory_space<vmem>>, vector<1x1x64xf32>
    %12 = vector.shape_cast %11 : vector<1x1x64xf32> to vector<1x64xf32>
    %c0_10 = arith.constant 0 : index
    %c0_11 = arith.constant 0 : index
    %c0_12 = arith.constant 0 : index
    %13 = vector.load %arg5[%c0_10, %c0_11, %c0_12] : memref<2x1x64xf32, #tpu.memory_space<vmem>>, vector<1x1x64xf32>
    %14 = vector.shape_cast %13 : vector<1x1x64xf32> to vector<1x64xf32>
    %cst_13 = arith.constant dense<0.000000e+00> : vector<64xf32>
    %15 = vector.multi_reduction <add>, %4, %cst_13 [1] : vector<64x64xf32> to vector<64xf32>
    %16 = vector.shape_cast %15 : vector<64xf32> to vector<64x1xf32>
    %cst_14 = arith.constant 6.400000e+01 : f32
    %17 = vector.broadcast %cst_14 : f32 to vector<64x1xf32>
    %18 = arith.divf %16, %17 : vector<64x1xf32>
    %19 = vector.broadcast %18 : vector<64x1xf32> to vector<64x64xf32>
    %20 = arith.subf %4, %19 : vector<64x64xf32>
    %21 = arith.mulf %20, %20 : vector<64x64xf32>
    %cst_15 = arith.constant dense<0.000000e+00> : vector<64xf32>
    %22 = vector.multi_reduction <add>, %21, %cst_15 [1] : vector<64x64xf32> to vector<64xf32>
    %23 = vector.shape_cast %22 : vector<64xf32> to vector<64x1xf32>
    %cst_16 = arith.constant 6.400000e+01 : f32
    %24 = vector.broadcast %cst_16 : f32 to vector<64x1xf32>
    %25 = arith.divf %23, %24 : vector<64x1xf32>
    %26 = vector.broadcast %18 : vector<64x1xf32> to vector<64x64xf32>
    %27 = arith.subf %4, %26 : vector<64x64xf32>
    %cst_17 = arith.constant 9.99999997E-7 : f32
    %28 = vector.broadcast %cst_17 : f32 to vector<64x1xf32>
    %29 = arith.addf %25, %28 : vector<64x1xf32>
    %30 = math.rsqrt %29 : vector<64x1xf32>
    %31 = vector.broadcast %30 : vector<64x1xf32> to vector<64x64xf32>
    %32 = arith.mulf %27, %31 : vector<64x64xf32>
    %33 = vector.broadcast %12 : vector<1x64xf32> to vector<64x64xf32>
    %34 = arith.mulf %32, %33 : vector<64x64xf32>
    %35 = vector.broadcast %14 : vector<1x64xf32> to vector<64x64xf32>
    %36 = arith.addf %34, %35 : vector<64x64xf32>
    %37 = arith.truncf %36 : vector<64x64xf32> to vector<64x64xbf16>
    %c0_18 = arith.constant 0 : index
    %c0_19 = arith.constant 0 : index
    %c0_20 = arith.constant 0 : index
    %38 = vector.load %arg6[%c0_18, %c0_19, %c0_20] : memref<2x64x192xbf16, #tpu.memory_space<vmem>>, vector<1x64x192xbf16>
    %39 = vector.shape_cast %38 : vector<1x64x192xbf16> to vector<64x192xbf16>
    %cst_21 = arith.constant dense<0.000000e+00> : vector<64x192xf32>
    %40 = tpu.matmul %37, %39, %cst_21 {dimension_numbers = #tpu.dot_dimension_numbers<[1], [0], [0], [1], [0, 0, 1, 1], [], []>} : vector<64x64xbf16>, vector<64x192xbf16>, vector<64x192xf32> -> vector<64x192xf32>
    %c0_22 = arith.constant 0 : index
    %c0_23 = arith.constant 0 : index
    %c0_24 = arith.constant 0 : index
    %41 = vector.load %arg7[%c0_22, %c0_23, %c0_24] : memref<2x1x192xf32, #tpu.memory_space<vmem>>, vector<1x1x192xf32>
    %42 = vector.shape_cast %41 : vector<1x1x192xf32> to vector<1x192xf32>
    %43 = vector.broadcast %42 : vector<1x192xf32> to vector<64x192xf32>
    %44 = arith.addf %40, %43 : vector<64x192xf32>
    %45 = vector.shape_cast %44 : vector<64x192xf32> to vector<2x32x192xf32>
    %46 = vector.extract_strided_slice %45 {offsets = [0, 0, 0], sizes = [2, 32, 16], strides = [1, 1, 1]} : vector<2x32x192xf32> to vector<2x32x16xf32>
    %47 = vector.extract_strided_slice %45 {offsets = [0, 0, 16], sizes = [2, 32, 16], strides = [1, 1, 1]} : vector<2x32x192xf32> to vector<2x32x16xf32>
    %48 = vector.extract_strided_slice %45 {offsets = [0, 0, 32], sizes = [2, 32, 16], strides = [1, 1, 1]} : vector<2x32x192xf32> to vector<2x32x16xf32>
    %49 = arith.truncf %46 : vector<2x32x16xf32> to vector<2x32x16xbf16>
    %50 = arith.truncf %47 : vector<2x32x16xf32> to vector<2x32x16xbf16>
    "tpu.trace_start"() <{level = 10 : i32, message = "bqd,bkd->bqk"}> : () -> ()
    %cst_25 = arith.constant dense<0.000000e+00> : vector<2x32x32xf32>
    %51 = tpu.matmul %49, %50, %cst_25 {dimension_numbers = #tpu.dot_dimension_numbers<[2], [2], [1], [1], [0, 0, 0, 1, 1, 1], [0], [0]>} : vector<2x32x16xbf16>, vector<2x32x16xbf16>, vector<2x32x32xf32> -> vector<2x32x32xf32>
    "tpu.trace_stop"() : () -> ()
    %cst_26 = arith.constant 2.500000e-01 : f32
    %52 = vector.broadcast %cst_26 : f32 to vector<2x32x32xf32>
    %53 = arith.mulf %51, %52 : vector<2x32x32xf32>
    %54 = vector.broadcast %10 : vector<1x1x32xf32> to vector<2x32x32xf32>
    %55 = arith.addf %53, %54 : vector<2x32x32xf32>
    %cst_27 = arith.constant dense<0xFF800000> : vector<2x32xf32>
    %56 = vector.multi_reduction <maximumf>, %55, %cst_27 [2] : vector<2x32x32xf32> to vector<2x32xf32>
    %57 = vector.shape_cast %56 : vector<2x32xf32> to vector<2x32x1xf32>
    %58 = vector.broadcast %57 : vector<2x32x1xf32> to vector<2x32x32xf32>
    %59 = arith.subf %55, %58 : vector<2x32x32xf32>
    %60 = math.exp %59 : vector<2x32x32xf32>
    %cst_28 = arith.constant dense<0.000000e+00> : vector<2x32xf32>
    %61 = vector.multi_reduction <add>, %60, %cst_28 [2] : vector<2x32x32xf32> to vector<2x32xf32>
    %62 = vector.shape_cast %61 : vector<2x32xf32> to vector<2x32x1xf32>
    %63 = tpu.reciprocal %62 {approx = true} : vector<2x32x1xf32> -> vector<2x32x1xf32>
    %64 = vector.broadcast %63 : vector<2x32x1xf32> to vector<2x32x32xf32>
    %65 = arith.mulf %60, %64 : vector<2x32x32xf32>
    %66 = arith.truncf %65 : vector<2x32x32xf32> to vector<2x32x32xbf16>
    %67 = arith.truncf %48 : vector<2x32x16xf32> to vector<2x32x16xbf16>
    "tpu.trace_start"() <{level = 10 : i32, message = "bqk,bkd->bqd"}> : () -> ()
    %cst_29 = arith.constant dense<0.000000e+00> : vector<2x32x16xf32>
    %68 = tpu.matmul %66, %67, %cst_29 {dimension_numbers = #tpu.dot_dimension_numbers<[2], [1], [1], [2], [0, 0, 0, 1, 1, 2], [0], [0]>} : vector<2x32x32xbf16>, vector<2x32x16xbf16>, vector<2x32x16xf32> -> vector<2x32x16xf32>
    "tpu.trace_stop"() : () -> ()
    %69 = vector.extract_strided_slice %45 {offsets = [0, 0, 48], sizes = [2, 32, 16], strides = [1, 1, 1]} : vector<2x32x192xf32> to vector<2x32x16xf32>
    %70 = vector.extract_strided_slice %45 {offsets = [0, 0, 64], sizes = [2, 32, 16], strides = [1, 1, 1]} : vector<2x32x192xf32> to vector<2x32x16xf32>
    %71 = vector.extract_strided_slice %45 {offsets = [0, 0, 80], sizes = [2, 32, 16], strides = [1, 1, 1]} : vector<2x32x192xf32> to vector<2x32x16xf32>
    %72 = arith.truncf %69 : vector<2x32x16xf32> to vector<2x32x16xbf16>
    %73 = arith.truncf %70 : vector<2x32x16xf32> to vector<2x32x16xbf16>
    "tpu.trace_start"() <{level = 10 : i32, message = "bqd,bkd->bqk"}> : () -> ()
    %cst_30 = arith.constant dense<0.000000e+00> : vector<2x32x32xf32>
    %74 = tpu.matmul %72, %73, %cst_30 {dimension_numbers = #tpu.dot_dimension_numbers<[2], [2], [1], [1], [0, 0, 0, 1, 1, 1], [0], [0]>} : vector<2x32x16xbf16>, vector<2x32x16xbf16>, vector<2x32x32xf32> -> vector<2x32x32xf32>
    "tpu.trace_stop"() : () -> ()
    %cst_31 = arith.constant 2.500000e-01 : f32
    %75 = vector.broadcast %cst_31 : f32 to vector<2x32x32xf32>
    %76 = arith.mulf %74, %75 : vector<2x32x32xf32>
    %77 = vector.broadcast %10 : vector<1x1x32xf32> to vector<2x32x32xf32>
    %78 = arith.addf %76, %77 : vector<2x32x32xf32>
    %cst_32 = arith.constant dense<0xFF800000> : vector<2x32xf32>
    %79 = vector.multi_reduction <maximumf>, %78, %cst_32 [2] : vector<2x32x32xf32> to vector<2x32xf32>
    %80 = vector.shape_cast %79 : vector<2x32xf32> to vector<2x32x1xf32>
    %81 = vector.broadcast %80 : vector<2x32x1xf32> to vector<2x32x32xf32>
    %82 = arith.subf %78, %81 : vector<2x32x32xf32>
    %83 = math.exp %82 : vector<2x32x32xf32>
    %cst_33 = arith.constant dense<0.000000e+00> : vector<2x32xf32>
    %84 = vector.multi_reduction <add>, %83, %cst_33 [2] : vector<2x32x32xf32> to vector<2x32xf32>
    %85 = vector.shape_cast %84 : vector<2x32xf32> to vector<2x32x1xf32>
    %86 = tpu.reciprocal %85 {approx = true} : vector<2x32x1xf32> -> vector<2x32x1xf32>
    %87 = vector.broadcast %86 : vector<2x32x1xf32> to vector<2x32x32xf32>
    %88 = arith.mulf %83, %87 : vector<2x32x32xf32>
    %89 = arith.truncf %88 : vector<2x32x32xf32> to vector<2x32x32xbf16>
    %90 = arith.truncf %71 : vector<2x32x16xf32> to vector<2x32x16xbf16>
    "tpu.trace_start"() <{level = 10 : i32, message = "bqk,bkd->bqd"}> : () -> ()
    %cst_34 = arith.constant dense<0.000000e+00> : vector<2x32x16xf32>
    %91 = tpu.matmul %89, %90, %cst_34 {dimension_numbers = #tpu.dot_dimension_numbers<[2], [1], [1], [2], [0, 0, 0, 1, 1, 2], [0], [0]>} : vector<2x32x32xbf16>, vector<2x32x16xbf16>, vector<2x32x16xf32> -> vector<2x32x16xf32>
    "tpu.trace_stop"() : () -> ()
    %92 = vector.extract_strided_slice %45 {offsets = [0, 0, 96], sizes = [2, 32, 16], strides = [1, 1, 1]} : vector<2x32x192xf32> to vector<2x32x16xf32>
    %93 = vector.extract_strided_slice %45 {offsets = [0, 0, 112], sizes = [2, 32, 16], strides = [1, 1, 1]} : vector<2x32x192xf32> to vector<2x32x16xf32>
    %94 = vector.extract_strided_slice %45 {offsets = [0, 0, 128], sizes = [2, 32, 16], strides = [1, 1, 1]} : vector<2x32x192xf32> to vector<2x32x16xf32>
    %95 = arith.truncf %92 : vector<2x32x16xf32> to vector<2x32x16xbf16>
    %96 = arith.truncf %93 : vector<2x32x16xf32> to vector<2x32x16xbf16>
    "tpu.trace_start"() <{level = 10 : i32, message = "bqd,bkd->bqk"}> : () -> ()
    %cst_35 = arith.constant dense<0.000000e+00> : vector<2x32x32xf32>
    %97 = tpu.matmul %95, %96, %cst_35 {dimension_numbers = #tpu.dot_dimension_numbers<[2], [2], [1], [1], [0, 0, 0, 1, 1, 1], [0], [0]>} : vector<2x32x16xbf16>, vector<2x32x16xbf16>, vector<2x32x32xf32> -> vector<2x32x32xf32>
    "tpu.trace_stop"() : () -> ()
    %cst_36 = arith.constant 2.500000e-01 : f32
    %98 = vector.broadcast %cst_36 : f32 to vector<2x32x32xf32>
    %99 = arith.mulf %97, %98 : vector<2x32x32xf32>
    %100 = vector.broadcast %10 : vector<1x1x32xf32> to vector<2x32x32xf32>
    %101 = arith.addf %99, %100 : vector<2x32x32xf32>
    %cst_37 = arith.constant dense<0xFF800000> : vector<2x32xf32>
    %102 = vector.multi_reduction <maximumf>, %101, %cst_37 [2] : vector<2x32x32xf32> to vector<2x32xf32>
    %103 = vector.shape_cast %102 : vector<2x32xf32> to vector<2x32x1xf32>
    %104 = vector.broadcast %103 : vector<2x32x1xf32> to vector<2x32x32xf32>
    %105 = arith.subf %101, %104 : vector<2x32x32xf32>
    %106 = math.exp %105 : vector<2x32x32xf32>
    %cst_38 = arith.constant dense<0.000000e+00> : vector<2x32xf32>
    %107 = vector.multi_reduction <add>, %106, %cst_38 [2] : vector<2x32x32xf32> to vector<2x32xf32>
    %108 = vector.shape_cast %107 : vector<2x32xf32> to vector<2x32x1xf32>
    %109 = tpu.reciprocal %108 {approx = true} : vector<2x32x1xf32> -> vector<2x32x1xf32>
    %110 = vector.broadcast %109 : vector<2x32x1xf32> to vector<2x32x32xf32>
    %111 = arith.mulf %106, %110 : vector<2x32x32xf32>
    %112 = arith.truncf %111 : vector<2x32x32xf32> to vector<2x32x32xbf16>
    %113 = arith.truncf %94 : vector<2x32x16xf32> to vector<2x32x16xbf16>
    "tpu.trace_start"() <{level = 10 : i32, message = "bqk,bkd->bqd"}> : () -> ()
    %cst_39 = arith.constant dense<0.000000e+00> : vector<2x32x16xf32>
    %114 = tpu.matmul %112, %113, %cst_39 {dimension_numbers = #tpu.dot_dimension_numbers<[2], [1], [1], [2], [0, 0, 0, 1, 1, 2], [0], [0]>} : vector<2x32x32xbf16>, vector<2x32x16xbf16>, vector<2x32x16xf32> -> vector<2x32x16xf32>
    "tpu.trace_stop"() : () -> ()
    %115 = vector.extract_strided_slice %45 {offsets = [0, 0, 144], sizes = [2, 32, 16], strides = [1, 1, 1]} : vector<2x32x192xf32> to vector<2x32x16xf32>
    %116 = vector.extract_strided_slice %45 {offsets = [0, 0, 160], sizes = [2, 32, 16], strides = [1, 1, 1]} : vector<2x32x192xf32> to vector<2x32x16xf32>
    %117 = vector.extract_strided_slice %45 {offsets = [0, 0, 176], sizes = [2, 32, 16], strides = [1, 1, 1]} : vector<2x32x192xf32> to vector<2x32x16xf32>
    %118 = arith.truncf %115 : vector<2x32x16xf32> to vector<2x32x16xbf16>
    %119 = arith.truncf %116 : vector<2x32x16xf32> to vector<2x32x16xbf16>
    "tpu.trace_start"() <{level = 10 : i32, message = "bqd,bkd->bqk"}> : () -> ()
    %cst_40 = arith.constant dense<0.000000e+00> : vector<2x32x32xf32>
    %120 = tpu.matmul %118, %119, %cst_40 {dimension_numbers = #tpu.dot_dimension_numbers<[2], [2], [1], [1], [0, 0, 0, 1, 1, 1], [0], [0]>} : vector<2x32x16xbf16>, vector<2x32x16xbf16>, vector<2x32x32xf32> -> vector<2x32x32xf32>
    "tpu.trace_stop"() : () -> ()
    %cst_41 = arith.constant 2.500000e-01 : f32
    %121 = vector.broadcast %cst_41 : f32 to vector<2x32x32xf32>
    %122 = arith.mulf %120, %121 : vector<2x32x32xf32>
    %123 = vector.broadcast %10 : vector<1x1x32xf32> to vector<2x32x32xf32>
    %124 = arith.addf %122, %123 : vector<2x32x32xf32>
    %cst_42 = arith.constant dense<0xFF800000> : vector<2x32xf32>
    %125 = vector.multi_reduction <maximumf>, %124, %cst_42 [2] : vector<2x32x32xf32> to vector<2x32xf32>
    %126 = vector.shape_cast %125 : vector<2x32xf32> to vector<2x32x1xf32>
    %127 = vector.broadcast %126 : vector<2x32x1xf32> to vector<2x32x32xf32>
    %128 = arith.subf %124, %127 : vector<2x32x32xf32>
    %129 = math.exp %128 : vector<2x32x32xf32>
    %cst_43 = arith.constant dense<0.000000e+00> : vector<2x32xf32>
    %130 = vector.multi_reduction <add>, %129, %cst_43 [2] : vector<2x32x32xf32> to vector<2x32xf32>
    %131 = vector.shape_cast %130 : vector<2x32xf32> to vector<2x32x1xf32>
    %132 = tpu.reciprocal %131 {approx = true} : vector<2x32x1xf32> -> vector<2x32x1xf32>
    %133 = vector.broadcast %132 : vector<2x32x1xf32> to vector<2x32x32xf32>
    %134 = arith.mulf %129, %133 : vector<2x32x32xf32>
    %135 = arith.truncf %134 : vector<2x32x32xf32> to vector<2x32x32xbf16>
    %136 = arith.truncf %117 : vector<2x32x16xf32> to vector<2x32x16xbf16>
    "tpu.trace_start"() <{level = 10 : i32, message = "bqk,bkd->bqd"}> : () -> ()
    %cst_44 = arith.constant dense<0.000000e+00> : vector<2x32x16xf32>
    %137 = tpu.matmul %135, %136, %cst_44 {dimension_numbers = #tpu.dot_dimension_numbers<[2], [1], [1], [2], [0, 0, 0, 1, 1, 2], [0], [0]>} : vector<2x32x32xbf16>, vector<2x32x16xbf16>, vector<2x32x16xf32> -> vector<2x32x16xf32>
    "tpu.trace_stop"() : () -> ()
    %138 = tpu.concatenate %68, %91, %114, %137 in 2 : vector<2x32x16xf32>, vector<2x32x16xf32>, vector<2x32x16xf32>, vector<2x32x16xf32> -> vector<2x32x64xf32>
    %139 = vector.shape_cast %138 : vector<2x32x64xf32> to vector<64x64xf32>
    %140 = arith.truncf %139 : vector<64x64xf32> to vector<64x64xbf16>
    %c0_45 = arith.constant 0 : index
    %c0_46 = arith.constant 0 : index
    %c0_47 = arith.constant 0 : index
    %141 = vector.load %arg8[%c0_45, %c0_46, %c0_47] : memref<2x64x64xbf16, #tpu.memory_space<vmem>>, vector<1x64x64xbf16>
    %142 = vector.shape_cast %141 : vector<1x64x64xbf16> to vector<64x64xbf16>
    %cst_48 = arith.constant dense<0.000000e+00> : vector<64x64xf32>
    %143 = tpu.matmul %140, %142, %cst_48 {dimension_numbers = #tpu.dot_dimension_numbers<[1], [0], [0], [1], [0, 0, 1, 1], [], []>} : vector<64x64xbf16>, vector<64x64xbf16>, vector<64x64xf32> -> vector<64x64xf32>
    %c0_49 = arith.constant 0 : index
    %c0_50 = arith.constant 0 : index
    %c0_51 = arith.constant 0 : index
    %144 = vector.load %arg9[%c0_49, %c0_50, %c0_51] : memref<2x1x64xf32, #tpu.memory_space<vmem>>, vector<1x1x64xf32>
    %145 = vector.shape_cast %144 : vector<1x1x64xf32> to vector<1x64xf32>
    %146 = vector.broadcast %145 : vector<1x64xf32> to vector<64x64xf32>
    %147 = arith.addf %143, %146 : vector<64x64xf32>
    %148 = arith.addf %4, %147 : vector<64x64xf32>
    %c0_52 = arith.constant 0 : index
    %c0_53 = arith.constant 0 : index
    %c0_54 = arith.constant 0 : index
    %149 = vector.load %arg10[%c0_52, %c0_53, %c0_54] : memref<2x1x64xf32, #tpu.memory_space<vmem>>, vector<1x1x64xf32>
    %150 = vector.shape_cast %149 : vector<1x1x64xf32> to vector<1x64xf32>
    %c0_55 = arith.constant 0 : index
    %c0_56 = arith.constant 0 : index
    %c0_57 = arith.constant 0 : index
    %151 = vector.load %arg11[%c0_55, %c0_56, %c0_57] : memref<2x1x64xf32, #tpu.memory_space<vmem>>, vector<1x1x64xf32>
    %152 = vector.shape_cast %151 : vector<1x1x64xf32> to vector<1x64xf32>
    %cst_58 = arith.constant dense<0.000000e+00> : vector<64xf32>
    %153 = vector.multi_reduction <add>, %148, %cst_58 [1] : vector<64x64xf32> to vector<64xf32>
    %154 = vector.shape_cast %153 : vector<64xf32> to vector<64x1xf32>
    %cst_59 = arith.constant 6.400000e+01 : f32
    %155 = vector.broadcast %cst_59 : f32 to vector<64x1xf32>
    %156 = arith.divf %154, %155 : vector<64x1xf32>
    %157 = vector.broadcast %156 : vector<64x1xf32> to vector<64x64xf32>
    %158 = arith.subf %148, %157 : vector<64x64xf32>
    %159 = arith.mulf %158, %158 : vector<64x64xf32>
    %cst_60 = arith.constant dense<0.000000e+00> : vector<64xf32>
    %160 = vector.multi_reduction <add>, %159, %cst_60 [1] : vector<64x64xf32> to vector<64xf32>
    %161 = vector.shape_cast %160 : vector<64xf32> to vector<64x1xf32>
    %cst_61 = arith.constant 6.400000e+01 : f32
    %162 = vector.broadcast %cst_61 : f32 to vector<64x1xf32>
    %163 = arith.divf %161, %162 : vector<64x1xf32>
    %164 = vector.broadcast %156 : vector<64x1xf32> to vector<64x64xf32>
    %165 = arith.subf %148, %164 : vector<64x64xf32>
    %cst_62 = arith.constant 9.99999997E-7 : f32
    %166 = vector.broadcast %cst_62 : f32 to vector<64x1xf32>
    %167 = arith.addf %163, %166 : vector<64x1xf32>
    %168 = math.rsqrt %167 : vector<64x1xf32>
    %169 = vector.broadcast %168 : vector<64x1xf32> to vector<64x64xf32>
    %170 = arith.mulf %165, %169 : vector<64x64xf32>
    %171 = vector.broadcast %150 : vector<1x64xf32> to vector<64x64xf32>
    %172 = arith.mulf %170, %171 : vector<64x64xf32>
    %173 = vector.broadcast %152 : vector<1x64xf32> to vector<64x64xf32>
    %174 = arith.addf %172, %173 : vector<64x64xf32>
    %175 = arith.truncf %174 : vector<64x64xf32> to vector<64x64xbf16>
    %c0_63 = arith.constant 0 : index
    %c0_64 = arith.constant 0 : index
    %c0_65 = arith.constant 0 : index
    %176 = vector.load %arg12[%c0_63, %c0_64, %c0_65] : memref<2x64x128xbf16, #tpu.memory_space<vmem>>, vector<1x64x128xbf16>
    %177 = vector.shape_cast %176 : vector<1x64x128xbf16> to vector<64x128xbf16>
    %cst_66 = arith.constant dense<0.000000e+00> : vector<64x128xf32>
    %178 = tpu.matmul %175, %177, %cst_66 {dimension_numbers = #tpu.dot_dimension_numbers<[1], [0], [0], [1], [0, 0, 1, 1], [], []>} : vector<64x64xbf16>, vector<64x128xbf16>, vector<64x128xf32> -> vector<64x128xf32>
    %c0_67 = arith.constant 0 : index
    %c0_68 = arith.constant 0 : index
    %c0_69 = arith.constant 0 : index
    %179 = vector.load %arg13[%c0_67, %c0_68, %c0_69] : memref<2x1x128xf32, #tpu.memory_space<vmem>>, vector<1x1x128xf32>
    %180 = vector.shape_cast %179 : vector<1x1x128xf32> to vector<1x128xf32>
    %181 = vector.broadcast %180 : vector<1x128xf32> to vector<64x128xf32>
    %182 = arith.addf %178, %181 : vector<64x128xf32>
    %cst_70 = arith.constant 5.000000e-01 : f32
    %183 = vector.broadcast %cst_70 : f32 to vector<64x128xf32>
    %184 = arith.mulf %183, %182 : vector<64x128xf32>
    %cst_71 = arith.constant 0.707106769 : f32
    %185 = vector.broadcast %cst_71 : f32 to vector<64x128xf32>
    %186 = arith.mulf %182, %185 : vector<64x128xf32>
    %187 = math.erf %186 : vector<64x128xf32>
    %cst_72 = arith.constant 1.000000e+00 : f32
    %188 = vector.broadcast %cst_72 : f32 to vector<64x128xf32>
    %189 = arith.addf %188, %187 : vector<64x128xf32>
    %190 = arith.mulf %184, %189 : vector<64x128xf32>
    %191 = arith.truncf %190 : vector<64x128xf32> to vector<64x128xbf16>
    %c0_73 = arith.constant 0 : index
    %c0_74 = arith.constant 0 : index
    %c0_75 = arith.constant 0 : index
    %192 = vector.load %arg14[%c0_73, %c0_74, %c0_75] : memref<2x128x64xbf16, #tpu.memory_space<vmem>>, vector<1x128x64xbf16>
    %193 = vector.shape_cast %192 : vector<1x128x64xbf16> to vector<128x64xbf16>
    %cst_76 = arith.constant dense<0.000000e+00> : vector<64x64xf32>
    %194 = tpu.matmul %191, %193, %cst_76 {dimension_numbers = #tpu.dot_dimension_numbers<[1], [0], [0], [1], [0, 0, 1, 1], [], []>} : vector<64x128xbf16>, vector<128x64xbf16>, vector<64x64xf32> -> vector<64x64xf32>
    %c0_77 = arith.constant 0 : index
    %c0_78 = arith.constant 0 : index
    %c0_79 = arith.constant 0 : index
    %195 = vector.load %arg15[%c0_77, %c0_78, %c0_79] : memref<2x1x64xf32, #tpu.memory_space<vmem>>, vector<1x1x64xf32>
    %196 = vector.shape_cast %195 : vector<1x1x64xf32> to vector<1x64xf32>
    %197 = vector.broadcast %196 : vector<1x64xf32> to vector<64x64xf32>
    %198 = arith.addf %194, %197 : vector<64x64xf32>
    %199 = arith.addf %148, %198 : vector<64x64xf32>
    %c1 = arith.constant 1 : index
    %c0_80 = arith.constant 0 : index
    %c0_81 = arith.constant 0 : index
    %200 = vector.load %arg4[%c1, %c0_80, %c0_81] : memref<2x1x64xf32, #tpu.memory_space<vmem>>, vector<1x1x64xf32>
    %201 = vector.shape_cast %200 : vector<1x1x64xf32> to vector<1x64xf32>
    %c1_82 = arith.constant 1 : index
    %c0_83 = arith.constant 0 : index
    %c0_84 = arith.constant 0 : index
    %202 = vector.load %arg5[%c1_82, %c0_83, %c0_84] : memref<2x1x64xf32, #tpu.memory_space<vmem>>, vector<1x1x64xf32>
    %203 = vector.shape_cast %202 : vector<1x1x64xf32> to vector<1x64xf32>
    %cst_85 = arith.constant dense<0.000000e+00> : vector<64xf32>
    %204 = vector.multi_reduction <add>, %199, %cst_85 [1] : vector<64x64xf32> to vector<64xf32>
    %205 = vector.shape_cast %204 : vector<64xf32> to vector<64x1xf32>
    %cst_86 = arith.constant 6.400000e+01 : f32
    %206 = vector.broadcast %cst_86 : f32 to vector<64x1xf32>
    %207 = arith.divf %205, %206 : vector<64x1xf32>
    %208 = vector.broadcast %207 : vector<64x1xf32> to vector<64x64xf32>
    %209 = arith.subf %199, %208 : vector<64x64xf32>
    %210 = arith.mulf %209, %209 : vector<64x64xf32>
    %cst_87 = arith.constant dense<0.000000e+00> : vector<64xf32>
    %211 = vector.multi_reduction <add>, %210, %cst_87 [1] : vector<64x64xf32> to vector<64xf32>
    %212 = vector.shape_cast %211 : vector<64xf32> to vector<64x1xf32>
    %cst_88 = arith.constant 6.400000e+01 : f32
    %213 = vector.broadcast %cst_88 : f32 to vector<64x1xf32>
    %214 = arith.divf %212, %213 : vector<64x1xf32>
    %215 = vector.broadcast %207 : vector<64x1xf32> to vector<64x64xf32>
    %216 = arith.subf %199, %215 : vector<64x64xf32>
    %cst_89 = arith.constant 9.99999997E-7 : f32
    %217 = vector.broadcast %cst_89 : f32 to vector<64x1xf32>
    %218 = arith.addf %214, %217 : vector<64x1xf32>
    %219 = math.rsqrt %218 : vector<64x1xf32>
    %220 = vector.broadcast %219 : vector<64x1xf32> to vector<64x64xf32>
    %221 = arith.mulf %216, %220 : vector<64x64xf32>
    %222 = vector.broadcast %201 : vector<1x64xf32> to vector<64x64xf32>
    %223 = arith.mulf %221, %222 : vector<64x64xf32>
    %224 = vector.broadcast %203 : vector<1x64xf32> to vector<64x64xf32>
    %225 = arith.addf %223, %224 : vector<64x64xf32>
    %226 = arith.truncf %225 : vector<64x64xf32> to vector<64x64xbf16>
    %c1_90 = arith.constant 1 : index
    %c0_91 = arith.constant 0 : index
    %c0_92 = arith.constant 0 : index
    %227 = vector.load %arg6[%c1_90, %c0_91, %c0_92] : memref<2x64x192xbf16, #tpu.memory_space<vmem>>, vector<1x64x192xbf16>
    %228 = vector.shape_cast %227 : vector<1x64x192xbf16> to vector<64x192xbf16>
    %cst_93 = arith.constant dense<0.000000e+00> : vector<64x192xf32>
    %229 = tpu.matmul %226, %228, %cst_93 {dimension_numbers = #tpu.dot_dimension_numbers<[1], [0], [0], [1], [0, 0, 1, 1], [], []>} : vector<64x64xbf16>, vector<64x192xbf16>, vector<64x192xf32> -> vector<64x192xf32>
    %c1_94 = arith.constant 1 : index
    %c0_95 = arith.constant 0 : index
    %c0_96 = arith.constant 0 : index
    %230 = vector.load %arg7[%c1_94, %c0_95, %c0_96] : memref<2x1x192xf32, #tpu.memory_space<vmem>>, vector<1x1x192xf32>
    %231 = vector.shape_cast %230 : vector<1x1x192xf32> to vector<1x192xf32>
    %232 = vector.broadcast %231 : vector<1x192xf32> to vector<64x192xf32>
    %233 = arith.addf %229, %232 : vector<64x192xf32>
    %234 = vector.shape_cast %233 : vector<64x192xf32> to vector<2x32x192xf32>
    %235 = vector.extract_strided_slice %234 {offsets = [0, 0, 0], sizes = [2, 32, 16], strides = [1, 1, 1]} : vector<2x32x192xf32> to vector<2x32x16xf32>
    %236 = vector.extract_strided_slice %234 {offsets = [0, 0, 16], sizes = [2, 32, 16], strides = [1, 1, 1]} : vector<2x32x192xf32> to vector<2x32x16xf32>
    %237 = vector.extract_strided_slice %234 {offsets = [0, 0, 32], sizes = [2, 32, 16], strides = [1, 1, 1]} : vector<2x32x192xf32> to vector<2x32x16xf32>
    %238 = arith.truncf %235 : vector<2x32x16xf32> to vector<2x32x16xbf16>
    %239 = arith.truncf %236 : vector<2x32x16xf32> to vector<2x32x16xbf16>
    "tpu.trace_start"() <{level = 10 : i32, message = "bqd,bkd->bqk"}> : () -> ()
    %cst_97 = arith.constant dense<0.000000e+00> : vector<2x32x32xf32>
    %240 = tpu.matmul %238, %239, %cst_97 {dimension_numbers = #tpu.dot_dimension_numbers<[2], [2], [1], [1], [0, 0, 0, 1, 1, 1], [0], [0]>} : vector<2x32x16xbf16>, vector<2x32x16xbf16>, vector<2x32x32xf32> -> vector<2x32x32xf32>
    "tpu.trace_stop"() : () -> ()
    %cst_98 = arith.constant 2.500000e-01 : f32
    %241 = vector.broadcast %cst_98 : f32 to vector<2x32x32xf32>
    %242 = arith.mulf %240, %241 : vector<2x32x32xf32>
    %243 = vector.broadcast %10 : vector<1x1x32xf32> to vector<2x32x32xf32>
    %244 = arith.addf %242, %243 : vector<2x32x32xf32>
    %cst_99 = arith.constant dense<0xFF800000> : vector<2x32xf32>
    %245 = vector.multi_reduction <maximumf>, %244, %cst_99 [2] : vector<2x32x32xf32> to vector<2x32xf32>
    %246 = vector.shape_cast %245 : vector<2x32xf32> to vector<2x32x1xf32>
    %247 = vector.broadcast %246 : vector<2x32x1xf32> to vector<2x32x32xf32>
    %248 = arith.subf %244, %247 : vector<2x32x32xf32>
    %249 = math.exp %248 : vector<2x32x32xf32>
    %cst_100 = arith.constant dense<0.000000e+00> : vector<2x32xf32>
    %250 = vector.multi_reduction <add>, %249, %cst_100 [2] : vector<2x32x32xf32> to vector<2x32xf32>
    %251 = vector.shape_cast %250 : vector<2x32xf32> to vector<2x32x1xf32>
    %252 = tpu.reciprocal %251 {approx = true} : vector<2x32x1xf32> -> vector<2x32x1xf32>
    %253 = vector.broadcast %252 : vector<2x32x1xf32> to vector<2x32x32xf32>
    %254 = arith.mulf %249, %253 : vector<2x32x32xf32>
    %255 = arith.truncf %254 : vector<2x32x32xf32> to vector<2x32x32xbf16>
    %256 = arith.truncf %237 : vector<2x32x16xf32> to vector<2x32x16xbf16>
    "tpu.trace_start"() <{level = 10 : i32, message = "bqk,bkd->bqd"}> : () -> ()
    %cst_101 = arith.constant dense<0.000000e+00> : vector<2x32x16xf32>
    %257 = tpu.matmul %255, %256, %cst_101 {dimension_numbers = #tpu.dot_dimension_numbers<[2], [1], [1], [2], [0, 0, 0, 1, 1, 2], [0], [0]>} : vector<2x32x32xbf16>, vector<2x32x16xbf16>, vector<2x32x16xf32> -> vector<2x32x16xf32>
    "tpu.trace_stop"() : () -> ()
    %258 = vector.extract_strided_slice %234 {offsets = [0, 0, 48], sizes = [2, 32, 16], strides = [1, 1, 1]} : vector<2x32x192xf32> to vector<2x32x16xf32>
    %259 = vector.extract_strided_slice %234 {offsets = [0, 0, 64], sizes = [2, 32, 16], strides = [1, 1, 1]} : vector<2x32x192xf32> to vector<2x32x16xf32>
    %260 = vector.extract_strided_slice %234 {offsets = [0, 0, 80], sizes = [2, 32, 16], strides = [1, 1, 1]} : vector<2x32x192xf32> to vector<2x32x16xf32>
    %261 = arith.truncf %258 : vector<2x32x16xf32> to vector<2x32x16xbf16>
    %262 = arith.truncf %259 : vector<2x32x16xf32> to vector<2x32x16xbf16>
    "tpu.trace_start"() <{level = 10 : i32, message = "bqd,bkd->bqk"}> : () -> ()
    %cst_102 = arith.constant dense<0.000000e+00> : vector<2x32x32xf32>
    %263 = tpu.matmul %261, %262, %cst_102 {dimension_numbers = #tpu.dot_dimension_numbers<[2], [2], [1], [1], [0, 0, 0, 1, 1, 1], [0], [0]>} : vector<2x32x16xbf16>, vector<2x32x16xbf16>, vector<2x32x32xf32> -> vector<2x32x32xf32>
    "tpu.trace_stop"() : () -> ()
    %cst_103 = arith.constant 2.500000e-01 : f32
    %264 = vector.broadcast %cst_103 : f32 to vector<2x32x32xf32>
    %265 = arith.mulf %263, %264 : vector<2x32x32xf32>
    %266 = vector.broadcast %10 : vector<1x1x32xf32> to vector<2x32x32xf32>
    %267 = arith.addf %265, %266 : vector<2x32x32xf32>
    %cst_104 = arith.constant dense<0xFF800000> : vector<2x32xf32>
    %268 = vector.multi_reduction <maximumf>, %267, %cst_104 [2] : vector<2x32x32xf32> to vector<2x32xf32>
    %269 = vector.shape_cast %268 : vector<2x32xf32> to vector<2x32x1xf32>
    %270 = vector.broadcast %269 : vector<2x32x1xf32> to vector<2x32x32xf32>
    %271 = arith.subf %267, %270 : vector<2x32x32xf32>
    %272 = math.exp %271 : vector<2x32x32xf32>
    %cst_105 = arith.constant dense<0.000000e+00> : vector<2x32xf32>
    %273 = vector.multi_reduction <add>, %272, %cst_105 [2] : vector<2x32x32xf32> to vector<2x32xf32>
    %274 = vector.shape_cast %273 : vector<2x32xf32> to vector<2x32x1xf32>
    %275 = tpu.reciprocal %274 {approx = true} : vector<2x32x1xf32> -> vector<2x32x1xf32>
    %276 = vector.broadcast %275 : vector<2x32x1xf32> to vector<2x32x32xf32>
    %277 = arith.mulf %272, %276 : vector<2x32x32xf32>
    %278 = arith.truncf %277 : vector<2x32x32xf32> to vector<2x32x32xbf16>
    %279 = arith.truncf %260 : vector<2x32x16xf32> to vector<2x32x16xbf16>
    "tpu.trace_start"() <{level = 10 : i32, message = "bqk,bkd->bqd"}> : () -> ()
    %cst_106 = arith.constant dense<0.000000e+00> : vector<2x32x16xf32>
    %280 = tpu.matmul %278, %279, %cst_106 {dimension_numbers = #tpu.dot_dimension_numbers<[2], [1], [1], [2], [0, 0, 0, 1, 1, 2], [0], [0]>} : vector<2x32x32xbf16>, vector<2x32x16xbf16>, vector<2x32x16xf32> -> vector<2x32x16xf32>
    "tpu.trace_stop"() : () -> ()
    %281 = vector.extract_strided_slice %234 {offsets = [0, 0, 96], sizes = [2, 32, 16], strides = [1, 1, 1]} : vector<2x32x192xf32> to vector<2x32x16xf32>
    %282 = vector.extract_strided_slice %234 {offsets = [0, 0, 112], sizes = [2, 32, 16], strides = [1, 1, 1]} : vector<2x32x192xf32> to vector<2x32x16xf32>
    %283 = vector.extract_strided_slice %234 {offsets = [0, 0, 128], sizes = [2, 32, 16], strides = [1, 1, 1]} : vector<2x32x192xf32> to vector<2x32x16xf32>
    %284 = arith.truncf %281 : vector<2x32x16xf32> to vector<2x32x16xbf16>
    %285 = arith.truncf %282 : vector<2x32x16xf32> to vector<2x32x16xbf16>
    "tpu.trace_start"() <{level = 10 : i32, message = "bqd,bkd->bqk"}> : () -> ()
    %cst_107 = arith.constant dense<0.000000e+00> : vector<2x32x32xf32>
    %286 = tpu.matmul %284, %285, %cst_107 {dimension_numbers = #tpu.dot_dimension_numbers<[2], [2], [1], [1], [0, 0, 0, 1, 1, 1], [0], [0]>} : vector<2x32x16xbf16>, vector<2x32x16xbf16>, vector<2x32x32xf32> -> vector<2x32x32xf32>
    "tpu.trace_stop"() : () -> ()
    %cst_108 = arith.constant 2.500000e-01 : f32
    %287 = vector.broadcast %cst_108 : f32 to vector<2x32x32xf32>
    %288 = arith.mulf %286, %287 : vector<2x32x32xf32>
    %289 = vector.broadcast %10 : vector<1x1x32xf32> to vector<2x32x32xf32>
    %290 = arith.addf %288, %289 : vector<2x32x32xf32>
    %cst_109 = arith.constant dense<0xFF800000> : vector<2x32xf32>
    %291 = vector.multi_reduction <maximumf>, %290, %cst_109 [2] : vector<2x32x32xf32> to vector<2x32xf32>
    %292 = vector.shape_cast %291 : vector<2x32xf32> to vector<2x32x1xf32>
    %293 = vector.broadcast %292 : vector<2x32x1xf32> to vector<2x32x32xf32>
    %294 = arith.subf %290, %293 : vector<2x32x32xf32>
    %295 = math.exp %294 : vector<2x32x32xf32>
    %cst_110 = arith.constant dense<0.000000e+00> : vector<2x32xf32>
    %296 = vector.multi_reduction <add>, %295, %cst_110 [2] : vector<2x32x32xf32> to vector<2x32xf32>
    %297 = vector.shape_cast %296 : vector<2x32xf32> to vector<2x32x1xf32>
    %298 = tpu.reciprocal %297 {approx = true} : vector<2x32x1xf32> -> vector<2x32x1xf32>
    %299 = vector.broadcast %298 : vector<2x32x1xf32> to vector<2x32x32xf32>
    %300 = arith.mulf %295, %299 : vector<2x32x32xf32>
    %301 = arith.truncf %300 : vector<2x32x32xf32> to vector<2x32x32xbf16>
    %302 = arith.truncf %283 : vector<2x32x16xf32> to vector<2x32x16xbf16>
    "tpu.trace_start"() <{level = 10 : i32, message = "bqk,bkd->bqd"}> : () -> ()
    %cst_111 = arith.constant dense<0.000000e+00> : vector<2x32x16xf32>
    %303 = tpu.matmul %301, %302, %cst_111 {dimension_numbers = #tpu.dot_dimension_numbers<[2], [1], [1], [2], [0, 0, 0, 1, 1, 2], [0], [0]>} : vector<2x32x32xbf16>, vector<2x32x16xbf16>, vector<2x32x16xf32> -> vector<2x32x16xf32>
    "tpu.trace_stop"() : () -> ()
    %304 = vector.extract_strided_slice %234 {offsets = [0, 0, 144], sizes = [2, 32, 16], strides = [1, 1, 1]} : vector<2x32x192xf32> to vector<2x32x16xf32>
    %305 = vector.extract_strided_slice %234 {offsets = [0, 0, 160], sizes = [2, 32, 16], strides = [1, 1, 1]} : vector<2x32x192xf32> to vector<2x32x16xf32>
    %306 = vector.extract_strided_slice %234 {offsets = [0, 0, 176], sizes = [2, 32, 16], strides = [1, 1, 1]} : vector<2x32x192xf32> to vector<2x32x16xf32>
    %307 = arith.truncf %304 : vector<2x32x16xf32> to vector<2x32x16xbf16>
    %308 = arith.truncf %305 : vector<2x32x16xf32> to vector<2x32x16xbf16>
    "tpu.trace_start"() <{level = 10 : i32, message = "bqd,bkd->bqk"}> : () -> ()
    %cst_112 = arith.constant dense<0.000000e+00> : vector<2x32x32xf32>
    %309 = tpu.matmul %307, %308, %cst_112 {dimension_numbers = #tpu.dot_dimension_numbers<[2], [2], [1], [1], [0, 0, 0, 1, 1, 1], [0], [0]>} : vector<2x32x16xbf16>, vector<2x32x16xbf16>, vector<2x32x32xf32> -> vector<2x32x32xf32>
    "tpu.trace_stop"() : () -> ()
    %cst_113 = arith.constant 2.500000e-01 : f32
    %310 = vector.broadcast %cst_113 : f32 to vector<2x32x32xf32>
    %311 = arith.mulf %309, %310 : vector<2x32x32xf32>
    %312 = vector.broadcast %10 : vector<1x1x32xf32> to vector<2x32x32xf32>
    %313 = arith.addf %311, %312 : vector<2x32x32xf32>
    %cst_114 = arith.constant dense<0xFF800000> : vector<2x32xf32>
    %314 = vector.multi_reduction <maximumf>, %313, %cst_114 [2] : vector<2x32x32xf32> to vector<2x32xf32>
    %315 = vector.shape_cast %314 : vector<2x32xf32> to vector<2x32x1xf32>
    %316 = vector.broadcast %315 : vector<2x32x1xf32> to vector<2x32x32xf32>
    %317 = arith.subf %313, %316 : vector<2x32x32xf32>
    %318 = math.exp %317 : vector<2x32x32xf32>
    %cst_115 = arith.constant dense<0.000000e+00> : vector<2x32xf32>
    %319 = vector.multi_reduction <add>, %318, %cst_115 [2] : vector<2x32x32xf32> to vector<2x32xf32>
    %320 = vector.shape_cast %319 : vector<2x32xf32> to vector<2x32x1xf32>
    %321 = tpu.reciprocal %320 {approx = true} : vector<2x32x1xf32> -> vector<2x32x1xf32>
    %322 = vector.broadcast %321 : vector<2x32x1xf32> to vector<2x32x32xf32>
    %323 = arith.mulf %318, %322 : vector<2x32x32xf32>
    %324 = arith.truncf %323 : vector<2x32x32xf32> to vector<2x32x32xbf16>
    %325 = arith.truncf %306 : vector<2x32x16xf32> to vector<2x32x16xbf16>
    "tpu.trace_start"() <{level = 10 : i32, message = "bqk,bkd->bqd"}> : () -> ()
    %cst_116 = arith.constant dense<0.000000e+00> : vector<2x32x16xf32>
    %326 = tpu.matmul %324, %325, %cst_116 {dimension_numbers = #tpu.dot_dimension_numbers<[2], [1], [1], [2], [0, 0, 0, 1, 1, 2], [0], [0]>} : vector<2x32x32xbf16>, vector<2x32x16xbf16>, vector<2x32x16xf32> -> vector<2x32x16xf32>
    "tpu.trace_stop"() : () -> ()
    %327 = tpu.concatenate %257, %280, %303, %326 in 2 : vector<2x32x16xf32>, vector<2x32x16xf32>, vector<2x32x16xf32>, vector<2x32x16xf32> -> vector<2x32x64xf32>
    %328 = vector.shape_cast %327 : vector<2x32x64xf32> to vector<64x64xf32>
    %329 = arith.truncf %328 : vector<64x64xf32> to vector<64x64xbf16>
    %c1_117 = arith.constant 1 : index
    %c0_118 = arith.constant 0 : index
    %c0_119 = arith.constant 0 : index
    %330 = vector.load %arg8[%c1_117, %c0_118, %c0_119] : memref<2x64x64xbf16, #tpu.memory_space<vmem>>, vector<1x64x64xbf16>
    %331 = vector.shape_cast %330 : vector<1x64x64xbf16> to vector<64x64xbf16>
    %cst_120 = arith.constant dense<0.000000e+00> : vector<64x64xf32>
    %332 = tpu.matmul %329, %331, %cst_120 {dimension_numbers = #tpu.dot_dimension_numbers<[1], [0], [0], [1], [0, 0, 1, 1], [], []>} : vector<64x64xbf16>, vector<64x64xbf16>, vector<64x64xf32> -> vector<64x64xf32>
    %c1_121 = arith.constant 1 : index
    %c0_122 = arith.constant 0 : index
    %c0_123 = arith.constant 0 : index
    %333 = vector.load %arg9[%c1_121, %c0_122, %c0_123] : memref<2x1x64xf32, #tpu.memory_space<vmem>>, vector<1x1x64xf32>
    %334 = vector.shape_cast %333 : vector<1x1x64xf32> to vector<1x64xf32>
    %335 = vector.broadcast %334 : vector<1x64xf32> to vector<64x64xf32>
    %336 = arith.addf %332, %335 : vector<64x64xf32>
    %337 = arith.addf %199, %336 : vector<64x64xf32>
    %c1_124 = arith.constant 1 : index
    %c0_125 = arith.constant 0 : index
    %c0_126 = arith.constant 0 : index
    %338 = vector.load %arg10[%c1_124, %c0_125, %c0_126] : memref<2x1x64xf32, #tpu.memory_space<vmem>>, vector<1x1x64xf32>
    %339 = vector.shape_cast %338 : vector<1x1x64xf32> to vector<1x64xf32>
    %c1_127 = arith.constant 1 : index
    %c0_128 = arith.constant 0 : index
    %c0_129 = arith.constant 0 : index
    %340 = vector.load %arg11[%c1_127, %c0_128, %c0_129] : memref<2x1x64xf32, #tpu.memory_space<vmem>>, vector<1x1x64xf32>
    %341 = vector.shape_cast %340 : vector<1x1x64xf32> to vector<1x64xf32>
    %cst_130 = arith.constant dense<0.000000e+00> : vector<64xf32>
    %342 = vector.multi_reduction <add>, %337, %cst_130 [1] : vector<64x64xf32> to vector<64xf32>
    %343 = vector.shape_cast %342 : vector<64xf32> to vector<64x1xf32>
    %cst_131 = arith.constant 6.400000e+01 : f32
    %344 = vector.broadcast %cst_131 : f32 to vector<64x1xf32>
    %345 = arith.divf %343, %344 : vector<64x1xf32>
    %346 = vector.broadcast %345 : vector<64x1xf32> to vector<64x64xf32>
    %347 = arith.subf %337, %346 : vector<64x64xf32>
    %348 = arith.mulf %347, %347 : vector<64x64xf32>
    %cst_132 = arith.constant dense<0.000000e+00> : vector<64xf32>
    %349 = vector.multi_reduction <add>, %348, %cst_132 [1] : vector<64x64xf32> to vector<64xf32>
    %350 = vector.shape_cast %349 : vector<64xf32> to vector<64x1xf32>
    %cst_133 = arith.constant 6.400000e+01 : f32
    %351 = vector.broadcast %cst_133 : f32 to vector<64x1xf32>
    %352 = arith.divf %350, %351 : vector<64x1xf32>
    %353 = vector.broadcast %345 : vector<64x1xf32> to vector<64x64xf32>
    %354 = arith.subf %337, %353 : vector<64x64xf32>
    %cst_134 = arith.constant 9.99999997E-7 : f32
    %355 = vector.broadcast %cst_134 : f32 to vector<64x1xf32>
    %356 = arith.addf %352, %355 : vector<64x1xf32>
    %357 = math.rsqrt %356 : vector<64x1xf32>
    %358 = vector.broadcast %357 : vector<64x1xf32> to vector<64x64xf32>
    %359 = arith.mulf %354, %358 : vector<64x64xf32>
    %360 = vector.broadcast %339 : vector<1x64xf32> to vector<64x64xf32>
    %361 = arith.mulf %359, %360 : vector<64x64xf32>
    %362 = vector.broadcast %341 : vector<1x64xf32> to vector<64x64xf32>
    %363 = arith.addf %361, %362 : vector<64x64xf32>
    %364 = arith.truncf %363 : vector<64x64xf32> to vector<64x64xbf16>
    %c1_135 = arith.constant 1 : index
    %c0_136 = arith.constant 0 : index
    %c0_137 = arith.constant 0 : index
    %365 = vector.load %arg12[%c1_135, %c0_136, %c0_137] : memref<2x64x128xbf16, #tpu.memory_space<vmem>>, vector<1x64x128xbf16>
    %366 = vector.shape_cast %365 : vector<1x64x128xbf16> to vector<64x128xbf16>
    %cst_138 = arith.constant dense<0.000000e+00> : vector<64x128xf32>
    %367 = tpu.matmul %364, %366, %cst_138 {dimension_numbers = #tpu.dot_dimension_numbers<[1], [0], [0], [1], [0, 0, 1, 1], [], []>} : vector<64x64xbf16>, vector<64x128xbf16>, vector<64x128xf32> -> vector<64x128xf32>
    %c1_139 = arith.constant 1 : index
    %c0_140 = arith.constant 0 : index
    %c0_141 = arith.constant 0 : index
    %368 = vector.load %arg13[%c1_139, %c0_140, %c0_141] : memref<2x1x128xf32, #tpu.memory_space<vmem>>, vector<1x1x128xf32>
    %369 = vector.shape_cast %368 : vector<1x1x128xf32> to vector<1x128xf32>
    %370 = vector.broadcast %369 : vector<1x128xf32> to vector<64x128xf32>
    %371 = arith.addf %367, %370 : vector<64x128xf32>
    %cst_142 = arith.constant 5.000000e-01 : f32
    %372 = vector.broadcast %cst_142 : f32 to vector<64x128xf32>
    %373 = arith.mulf %372, %371 : vector<64x128xf32>
    %cst_143 = arith.constant 0.707106769 : f32
    %374 = vector.broadcast %cst_143 : f32 to vector<64x128xf32>
    %375 = arith.mulf %371, %374 : vector<64x128xf32>
    %376 = math.erf %375 : vector<64x128xf32>
    %cst_144 = arith.constant 1.000000e+00 : f32
    %377 = vector.broadcast %cst_144 : f32 to vector<64x128xf32>
    %378 = arith.addf %377, %376 : vector<64x128xf32>
    %379 = arith.mulf %373, %378 : vector<64x128xf32>
    %380 = arith.truncf %379 : vector<64x128xf32> to vector<64x128xbf16>
    %c1_145 = arith.constant 1 : index
    %c0_146 = arith.constant 0 : index
    %c0_147 = arith.constant 0 : index
    %381 = vector.load %arg14[%c1_145, %c0_146, %c0_147] : memref<2x128x64xbf16, #tpu.memory_space<vmem>>, vector<1x128x64xbf16>
    %382 = vector.shape_cast %381 : vector<1x128x64xbf16> to vector<128x64xbf16>
    %cst_148 = arith.constant dense<0.000000e+00> : vector<64x64xf32>
    %383 = tpu.matmul %380, %382, %cst_148 {dimension_numbers = #tpu.dot_dimension_numbers<[1], [0], [0], [1], [0, 0, 1, 1], [], []>} : vector<64x128xbf16>, vector<128x64xbf16>, vector<64x64xf32> -> vector<64x64xf32>
    %c1_149 = arith.constant 1 : index
    %c0_150 = arith.constant 0 : index
    %c0_151 = arith.constant 0 : index
    %384 = vector.load %arg15[%c1_149, %c0_150, %c0_151] : memref<2x1x64xf32, #tpu.memory_space<vmem>>, vector<1x1x64xf32>
    %385 = vector.shape_cast %384 : vector<1x1x64xf32> to vector<1x64xf32>
    %386 = vector.broadcast %385 : vector<1x64xf32> to vector<64x64xf32>
    %387 = arith.addf %383, %386 : vector<64x64xf32>
    %388 = arith.addf %337, %387 : vector<64x64xf32>
    %c0_152 = arith.constant 0 : index
    %c0_153 = arith.constant 0 : index
    %389 = vector.load %arg16[%c0_152, %c0_153] : memref<1x64xf32, #tpu.memory_space<vmem>>, vector<1x64xf32>
    %c0_154 = arith.constant 0 : index
    %c0_155 = arith.constant 0 : index
    %390 = vector.load %arg17[%c0_154, %c0_155] : memref<1x64xf32, #tpu.memory_space<vmem>>, vector<1x64xf32>
    %cst_156 = arith.constant dense<0.000000e+00> : vector<64xf32>
    %391 = vector.multi_reduction <add>, %388, %cst_156 [1] : vector<64x64xf32> to vector<64xf32>
    %392 = vector.shape_cast %391 : vector<64xf32> to vector<64x1xf32>
    %cst_157 = arith.constant 6.400000e+01 : f32
    %393 = vector.broadcast %cst_157 : f32 to vector<64x1xf32>
    %394 = arith.divf %392, %393 : vector<64x1xf32>
    %395 = vector.broadcast %394 : vector<64x1xf32> to vector<64x64xf32>
    %396 = arith.subf %388, %395 : vector<64x64xf32>
    %397 = arith.mulf %396, %396 : vector<64x64xf32>
    %cst_158 = arith.constant dense<0.000000e+00> : vector<64xf32>
    %398 = vector.multi_reduction <add>, %397, %cst_158 [1] : vector<64x64xf32> to vector<64xf32>
    %399 = vector.shape_cast %398 : vector<64xf32> to vector<64x1xf32>
    %cst_159 = arith.constant 6.400000e+01 : f32
    %400 = vector.broadcast %cst_159 : f32 to vector<64x1xf32>
    %401 = arith.divf %399, %400 : vector<64x1xf32>
    %402 = vector.broadcast %394 : vector<64x1xf32> to vector<64x64xf32>
    %403 = arith.subf %388, %402 : vector<64x64xf32>
    %cst_160 = arith.constant 9.99999997E-7 : f32
    %404 = vector.broadcast %cst_160 : f32 to vector<64x1xf32>
    %405 = arith.addf %401, %404 : vector<64x1xf32>
    %406 = math.rsqrt %405 : vector<64x1xf32>
    %407 = vector.broadcast %406 : vector<64x1xf32> to vector<64x64xf32>
    %408 = arith.mulf %403, %407 : vector<64x64xf32>
    %409 = vector.broadcast %389 : vector<1x64xf32> to vector<64x64xf32>
    %410 = arith.mulf %408, %409 : vector<64x64xf32>
    %411 = vector.broadcast %390 : vector<1x64xf32> to vector<64x64xf32>
    %412 = arith.addf %410, %411 : vector<64x64xf32>
    %413 = arith.truncf %412 : vector<64x64xf32> to vector<64x64xbf16>
    %c0_161 = arith.constant 0 : index
    %c0_162 = arith.constant 0 : index
    %414 = vector.load %arg18[%c0_161, %c0_162] : memref<64x128xbf16, #tpu.memory_space<vmem>>, vector<64x128xbf16>
    %cst_163 = arith.constant dense<0.000000e+00> : vector<64x128xf32>
    %415 = tpu.matmul %413, %414, %cst_163 {dimension_numbers = #tpu.dot_dimension_numbers<[1], [0], [0], [1], [0, 0, 1, 1], [], []>} : vector<64x64xbf16>, vector<64x128xbf16>, vector<64x128xf32> -> vector<64x128xf32>
    %c0_164 = arith.constant 0 : index
    %c0_165 = arith.constant 0 : index
    %416 = vector.load %arg19[%c0_164, %c0_165] : memref<1x128xf32, #tpu.memory_space<vmem>>, vector<1x128xf32>
    %417 = vector.broadcast %416 : vector<1x128xf32> to vector<64x128xf32>
    %418 = arith.addf %415, %417 : vector<64x128xf32>
    %c0_166 = arith.constant 0 : index
    %c0_167 = arith.constant 0 : index
    %419 = vector.load %arg20[%c0_166, %c0_167] : memref<64x128xf32, #tpu.memory_space<vmem>>, vector<64x128xf32>
    tpu.vector_store %arg20[%c0_166, %c0_167], %418 {strides = array<i32>} : memref<64x128xf32, #tpu.memory_space<vmem>>, vector<64x128xf32>,
    return
  }
  func.func @transform_0(%arg0: i32) -> (i32, i32) {
    %c0_i32 = arith.constant 0 : i32
    %c0_i32_0 = arith.constant 0 : i32
    return %arg0, %c0_i32 : i32, i32
  }
  func.func @transform_1(%arg0: i32) -> (i32, i32) {
    %c0_i32 = arith.constant 0 : i32
    %c0_i32_0 = arith.constant 0 : i32
    %c0_i32_1 = arith.constant 0 : i32
    return %c0_i32, %c0_i32_0 : i32, i32
  }
  func.func @transform_2(%arg0: i32) -> (i32, i32) {
    %c0_i32 = arith.constant 0 : i32
    %c0_i32_0 = arith.constant 0 : i32
    %c0_i32_1 = arith.constant 0 : i32
    return %c0_i32, %c0_i32_0 : i32, i32
  }
  func.func @transform_3(%arg0: i32) -> (i32, i32, i32) {
    %c0_i32 = arith.constant 0 : i32
    %c0_i32_0 = arith.constant 0 : i32
    %c0_i32_1 = arith.constant 0 : i32
    %c0_i32_2 = arith.constant 0 : i32
    return %c0_i32, %c0_i32_0, %c0_i32_1 : i32, i32, i32
  }
  func.func @transform_4(%arg0: i32) -> (i32, i32, i32) {
    %c0_i32 = arith.constant 0 : i32
    %c0_i32_0 = arith.constant 0 : i32
    %c0_i32_1 = arith.constant 0 : i32
    %c0_i32_2 = arith.constant 0 : i32
    return %c0_i32, %c0_i32_0, %c0_i32_1 : i32, i32, i32
  }
  func.func @transform_5(%arg0: i32) -> (i32, i32, i32) {
    %c0_i32 = arith.constant 0 : i32
    %c0_i32_0 = arith.constant 0 : i32
    %c0_i32_1 = arith.constant 0 : i32
    %c0_i32_2 = arith.constant 0 : i32
    return %c0_i32, %c0_i32_0, %c0_i32_1 : i32, i32, i32
  }
  func.func @transform_6(%arg0: i32) -> (i32, i32, i32) {
    %c0_i32 = arith.constant 0 : i32
    %c0_i32_0 = arith.constant 0 : i32
    %c0_i32_1 = arith.constant 0 : i32
    %c0_i32_2 = arith.constant 0 : i32
    return %c0_i32, %c0_i32_0, %c0_i32_1 : i32, i32, i32
  }
  func.func @transform_7(%arg0: i32) -> (i32, i32, i32) {
    %c0_i32 = arith.constant 0 : i32
    %c0_i32_0 = arith.constant 0 : i32
    %c0_i32_1 = arith.constant 0 : i32
    %c0_i32_2 = arith.constant 0 : i32
    return %c0_i32, %c0_i32_0, %c0_i32_1 : i32, i32, i32
  }
  func.func @transform_8(%arg0: i32) -> (i32, i32, i32) {
    %c0_i32 = arith.constant 0 : i32
    %c0_i32_0 = arith.constant 0 : i32
    %c0_i32_1 = arith.constant 0 : i32
    %c0_i32_2 = arith.constant 0 : i32
    return %c0_i32, %c0_i32_0, %c0_i32_1 : i32, i32, i32
  }
  func.func @transform_9(%arg0: i32) -> (i32, i32, i32) {
    %c0_i32 = arith.constant 0 : i32
    %c0_i32_0 = arith.constant 0 : i32
    %c0_i32_1 = arith.constant 0 : i32
    %c0_i32_2 = arith.constant 0 : i32
    return %c0_i32, %c0_i32_0, %c0_i32_1 : i32, i32, i32
  }
  func.func @transform_10(%arg0: i32) -> (i32, i32, i32) {
    %c0_i32 = arith.constant 0 : i32
    %c0_i32_0 = arith.constant 0 : i32
    %c0_i32_1 = arith.constant 0 : i32
    %c0_i32_2 = arith.constant 0 : i32
    return %c0_i32, %c0_i32_0, %c0_i32_1 : i32, i32, i32
  }
  func.func @transform_11(%arg0: i32) -> (i32, i32, i32) {
    %c0_i32 = arith.constant 0 : i32
    %c0_i32_0 = arith.constant 0 : i32
    %c0_i32_1 = arith.constant 0 : i32
    %c0_i32_2 = arith.constant 0 : i32
    return %c0_i32, %c0_i32_0, %c0_i32_1 : i32, i32, i32
  }
  func.func @transform_12(%arg0: i32) -> (i32, i32, i32) {
    %c0_i32 = arith.constant 0 : i32
    %c0_i32_0 = arith.constant 0 : i32
    %c0_i32_1 = arith.constant 0 : i32
    %c0_i32_2 = arith.constant 0 : i32
    return %c0_i32, %c0_i32_0, %c0_i32_1 : i32, i32, i32
  }
  func.func @transform_13(%arg0: i32) -> (i32, i32, i32) {
    %c0_i32 = arith.constant 0 : i32
    %c0_i32_0 = arith.constant 0 : i32
    %c0_i32_1 = arith.constant 0 : i32
    %c0_i32_2 = arith.constant 0 : i32
    return %c0_i32, %c0_i32_0, %c0_i32_1 : i32, i32, i32
  }
  func.func @transform_14(%arg0: i32) -> (i32, i32, i32) {
    %c0_i32 = arith.constant 0 : i32
    %c0_i32_0 = arith.constant 0 : i32
    %c0_i32_1 = arith.constant 0 : i32
    %c0_i32_2 = arith.constant 0 : i32
    return %c0_i32, %c0_i32_0, %c0_i32_1 : i32, i32, i32
  }
  func.func @transform_15(%arg0: i32) -> (i32, i32) {
    %c0_i32 = arith.constant 0 : i32
    %c0_i32_0 = arith.constant 0 : i32
    %c0_i32_1 = arith.constant 0 : i32
    return %c0_i32, %c0_i32_0 : i32, i32
  }
  func.func @transform_16(%arg0: i32) -> (i32, i32) {
    %c0_i32 = arith.constant 0 : i32
    %c0_i32_0 = arith.constant 0 : i32
    %c0_i32_1 = arith.constant 0 : i32
    return %c0_i32, %c0_i32_0 : i32, i32
  }
  func.func @transform_17(%arg0: i32) -> (i32, i32) {
    %c0_i32 = arith.constant 0 : i32
    %c0_i32_0 = arith.constant 0 : i32
    %c0_i32_1 = arith.constant 0 : i32
    return %c0_i32, %c0_i32_0 : i32, i32
  }
  func.func @transform_18(%arg0: i32) -> (i32, i32) {
    %c0_i32 = arith.constant 0 : i32
    %c0_i32_0 = arith.constant 0 : i32
    %c0_i32_1 = arith.constant 0 : i32
    return %c0_i32, %c0_i32_0 : i32, i32
  }
  func.func @transform_19(%arg0: i32) -> (i32, i32) {
    %c0_i32 = arith.constant 0 : i32
    %c0_i32_0 = arith.constant 0 : i32
    return %arg0, %c0_i32 : i32, i32
  }
}

</mosaic_0001>

<bundles_post_ra>
// kernel: vit_forward.1
= control target key start
LH: loop header
LB: loop body
LE: loop exit
PB: predicated region body
PF: predicated region fallthrough
CT: control target
= control target key end

     0   :  { %vm123_vm0 = vcmask 392192   ;;  %vm171_vm1 = vcmask 523264   ;;  %v6277_v23 = vmov 64.0   ;;  %s6278_s27 = smov 112   ;;  %s6279_s28 = smov 80   ;;  %s8998_s2 = inlined_call_operand.vmem [shape: bf16[48,64], index: 2, kind: input, shape index: {}]   ;;  %s8999_s0 = inlined_call_operand.vmem [shape: bf16[64,48], index: 0, kind: input, shape index: {}]   ;;  %s9000_s1 = inlined_call_operand.vmem [shape: f32[64,64], index: 1, kind: input, shape index: {}]   ;;  %s9001_s3 = inlined_call_operand.vmem [shape: f32[2,1,64], index: 3, kind: input, shape index: {}]   ;;  %s9002_s4 = inlined_call_operand.vmem [shape: f32[2,1,64], index: 4, kind: input, shape index: {}]   ;;  %s9003_s5 = inlined_call_operand.vmem [shape: bf16[2,64,192], index: 5, kind: input, shape index: {}]   ;;  %s9004_s6 = inlined_call_operand.vmem [shape: f32[2,1,192], index: 6, kind: input, shape index: {}]   ;;  %s9005_s7 = inlined_call_operand.vmem [shape: bf16[2,64,64], index: 7, kind: input, shape index: {}]   ;;  %s9006_s8 = inlined_call_operand.vmem [shape: f32[2,1,64], index: 8, kind: input, shape index: {}]   ;;  %s9007_s9 = inlined_call_operand.vmem [shape: f32[2,1,64], index: 9, kind: input, shape index: {}]   ;;  %s9008_s10 = inlined_call_operand.vmem [shape: f32[2,1,64], index: 10, kind: input, shape index: {}]   ;;  %s9009_s11 = inlined_call_operand.vmem [shape: bf16[2,64,128], index: 11, kind: input, shape index: {}]   ;;  %s9010_s12 = inlined_call_operand.vmem [shape: f32[2,1,128], index: 12, kind: input, shape index: {}]   ;;  %s9011_s13 = inlined_call_operand.vmem [shape: bf16[2,128,64], index: 13, kind: input, shape index: {}]   ;;  %s9012_s14 = inlined_call_operand.vmem [shape: f32[2,1,64], index: 14, kind: input, shape index: {}]   ;;  %s9013_s15 = inlined_call_operand.vmem [shape: f32[1,64], index: 15, kind: input, shape index: {}]   ;;  %s9014_s16 = inlined_call_operand.vmem [shape: f32[1,64], index: 16, kind: input, shape index: {}]   ;;  %s9015_s17 = inlined_call_operand.vmem [shape: bf16[64,128], index: 17, kind: input, shape index: {}]   ;;  %s9016_s18 = inlined_call_operand.vmem [shape: f32[1,128], index: 18, kind: input, shape index: {}]   ;;  %s9017_s19 = inlined_call_operand.vmem [shape: f32[64,128], index: 19, kind: output, shape index: {}]  }
   0x1   :  { %9026 = sst [smem:[#allocation2_spill]] %s8998_s2  ;;  %5907 = vrcp.f32 %v6277_v23  ;;  %s6280_s29 = smov 64  }
   0x2   :  { %9027 = sst [smem:[#allocation3_spill]] %s8999_s0  ;;  %s9024_s2 = smov 32  }
   0x3   :  { %9028 = sst [smem:[#allocation4_spill]] %s9000_s1  ;;  %s6282_s30 = smov 16  }
   0x4   :  { %9029 = sst [smem:[#allocation5_spill]] %s9001_s3  ;;  %s9022_s0 = smov 48  }
   0x5   :  { %s9030_s20 = sld [smem:[#allocation2_spill]] }
   0x6   :  { %s9031_s25 = sld [smem:[#allocation3_spill]] }
   0x7   :  { %s9032_s21 = sld [smem:[#allocation4_spill]]  ;;  %v5908_v24 = vpop.eup %5907 }
   0x8   :  { %v197_v25 = vmul.f32 64.0, %v5908_v24  ;;  %vm201_vm2 = vweird.f32 %v5908_v24  ;;  %s9035_s23 = sld [smem:[#allocation5_spill]] }
   0xa   :  { %v198_v26 = vsub.f32 1.0, %v197_v25 }
   0xb   :  { %v5708_v0 = vld [vmem:[%s9030_s20 + $0x10] sm:$0xff]  ;;  %v5707_v1 = vld [vmem:[%s9030_s20 + $0x8] sm:$0xff]  ;;  %v5706_v2 = vld [vmem:[%s9030_s20] sm:$0xff]  ;;  %s6283_s20 = smov 96  }
   0xc   :  { %141 = vmatpush.bf16.msra.mxu0 %v5708_v0  ;;  %v5702_v3 = vld [vmem:[%s9031_s25] sm:$0xff]  ;;  %v5703_v4 = vld [vmem:[%s9031_s25 + $0x8] sm:$0xff]  ;;  %v5704_v5 = vld [vmem:[%s9031_s25 + $0x10] sm:$0xff]  ;;  %v199_v27 = vmul.f32 %v5908_v24, %v198_v26 }
   0xd   :  { %v5705_v6 = vld [vmem:[%s9031_s25 + $0x18] sm:$0xff]  ;;  %v77_v7 = vld [vmem:[%s9032_s21] sm:$0xff]  ;;  %v78_v11 = vld [vmem:[%s9032_s21 + $0x8] sm:$0xff] }
   0xe   :  { %v79_v15 = vld [vmem:[%s9032_s21 + $0x10] sm:$0xff]  ;;  %v80_v19 = vld [vmem:[%s9032_s21 + $0x18] sm:$0xff]  ;;  %v200_v29 = vadd.f32 %v5908_v24, %v199_v27  ;;  %v81_v42 = vld [vmem:[%s9032_s21 + $0x20] sm:$0xff] }
   0xf   :  { %v82_v50 = vld [vmem:[%s9032_s21 + $0x28] sm:$0xff]  ;;  %v84_v52 = vld [vmem:[%s9032_s21 + $0x38] sm:$0xff]  ;;  %v83_v61 = vld [vmem:[%s9032_s21 + $0x30] sm:$0xff] }
  0x10   :  { %142 = vmatpush.bf16.msra.mxu0 %v5707_v1  ;;  %v6439_v30 = vsel %vm201_vm2, %v5908_v24, %v200_v29  ;;  %v5332_v26 = vld [vmem:[%s9003_s5] sm:$0xf]  ;;  %v5710_v27 = vld [vmem:[%s9003_s5 + $0x4] sm:$0xf0] }
  0x14   :  { %143 = vmatpush.bf16.msra.mxu0 %v5706_v2  ;;  %v5356_v2 = vld [vmem:[%s9003_s5 + $0x30] sm:$0xf] }
  0x17   :  { %5326 = vmatmul.msk.bf16.vlgmr.msra.gmra.mxu0 %vm123_vm0, %v5702_v3  ;;  %v5716_v3 = vld [vmem:[%s9003_s5 + $0x34] sm:$0xf0] }
  0x27   :  { %5327 = vmatmul.msk.bf16.gmra.mxu0 %vm123_vm0, %v5703_v4  ;;  %v5715_v4 = vld [vmem:[%s9003_s5 + $0x34] sm:$0xf] }
  0x37   :  { %5328 = vmatmul.msk.bf16.gmra.mxu0 %vm123_vm0, %v5704_v5  ;;  %v5357_v5 = vor.u32 %v5716_v3, %v5356_v2 }
  0x39   :  { %451 = vmatpush.bf16.msra.mxu1 %v5357_v5 }
  0x47   :  { %5329 = vmatmul.msk.bf16.gmra.mxu0 %vm123_vm0, %v5705_v6  ;;  %v5358_v6 = vld [vmem:[%s9003_s5 + $0x38] sm:$0xf0] }
  0x94   :  { %v145_v8 = vpop.f32.mrf.mxu0 }
  0x95   :  { %v6414_v9 = vadd.f32 %v145_v8, %v77_v7  ;;  %v5361_v7 = vor.u32 %v5715_v4, %v5358_v6  ;;  %v5348_v8 = vld [vmem:[%s9003_s5 + $0x20] sm:$0xf] }
  0x97   :  { %v172_v10 = vsel %vm171_vm1, %v6414_v9, 0.0  ;;  %480 = vmatpush.bf16.msra.mxu2 %v5361_v7 }
  0x98   :  { %173 = vadd.xlane.f32.xlu0 %v172_v10  ;;  %v5714_v10 = vld [vmem:[%s9003_s5 + $0x24] sm:$0xf0] }
  0x9c   :  { %v147_v12 = vpop.f32.mrf.mxu0 }
  0x9d   :  { %v6421_v13 = vadd.f32 %v147_v12, %v78_v11  ;;  %v5713_v11 = vld [vmem:[%s9003_s5 + $0x24] sm:$0xf]  ;;  %v5349_v12 = vor.u32 %v5714_v10, %v5348_v8 }
  0x9f   :  { %v175_v14 = vsel %vm171_vm1, %v6421_v13, 0.0  ;;  %452 = vmatpush.bf16.msra.mxu1 %v5349_v12 }
  0xa0   :  { %176 = vadd.xlane.f32.xlu0 %v175_v14  ;;  %v5350_v14 = vld [vmem:[%s9003_s5 + $0x28] sm:$0xf0] }
  0xa4   :  { %v150_v16 = vpop.f32.mrf.mxu0 }
  0xa5   :  { %v6428_v17 = vadd.f32 %v150_v16, %v79_v15  ;;  %v5353_v15 = vor.u32 %v5713_v11, %v5350_v14  ;;  %v5340_v16 = vld [vmem:[%s9003_s5 + $0x10] sm:$0xf]  ;;  %v6571_v14 = vld [vmem:[%s9035_s23] ss:$0 sm:$0xff] }
  0xa7   :  { %v178_v18 = vsel %vm171_vm1, %v6428_v17, 0.0  ;;  %481 = vmatpush.bf16.msra.mxu2 %v5353_v15 }
  0xa8   :  { %179 = vadd.xlane.f32.xlu1 %v178_v18  ;;  %v5712_v18 = vld [vmem:[%s9003_s5 + $0x14] sm:$0xf0] }
  0xac   :  { %v152_v20 = vpop.f32.mrf.mxu0 }
  0xad   :  { %v6435_v21 = vadd.f32 %v152_v20, %v80_v19  ;;  %v5711_v19 = vld [vmem:[%s9003_s5 + $0x14] sm:$0xf]  ;;  %v5341_v20 = vor.u32 %v5712_v18, %v5340_v16 }
  0xaf   :  { %v181_v22 = vsel %vm171_vm1, %v6435_v21, 0.0  ;;  %453 = vmatpush.bf16.msra.mxu1 %v5341_v20 }
  0xb0   :  { %182 = vadd.xlane.f32.xlu1 %v181_v22  ;;  %v5342_v22 = vld [vmem:[%s9003_s5 + $0x18] sm:$0xf0] }
  0xb1   :  { %v5345_v24 = vor.u32 %v5711_v19, %v5342_v22 }
  0xb3   :  { %482 = vmatpush.bf16.msra.mxu2 %v5345_v24 }
  0xb4   :  { %v155_v28 = vpop.f32.mrf.mxu0 }
  0xb5   :  { %v6458_v45 = vadd.f32 %v155_v28, %v81_v42  ;;  %v5709_v28 = vld [vmem:[%s9003_s5 + $0x4] sm:$0xf] }
  0xb7   :  { %v184_v49 = vsel %vm171_vm1, %v6458_v45, 0.0 }
  0xbc   :  { %v157_v34 = vpop.f32.mrf.mxu0 }
  0xbd   :  { %v6475_v55 = vadd.f32 %v157_v34, %v82_v50 }
  0xbf   :  { %v187_v60 = vsel %vm171_vm1, %v6475_v55, 0.0 }
  0xc4   :  { %v160_v41 = vpop.f32.mrf.mxu0 }
  0xc5   :  { %v6493_v0 = vadd.f32 %v160_v41, %v83_v61 }
  0xc7   :  { %v190_v1 = vsel %vm171_vm1, %v6493_v0, 0.0 }
  0xcc   :  { %v162_v53 = vpop.f32.mrf.mxu0 }
  0xcd   :  { %v6478_v57 = vadd.f32 %v162_v53, %v84_v52 }
  0xcf   :  { %v193_v62 = vsel %vm171_vm1, %v6478_v57, 0.0 }
 0x10b   :  { %v174_v31 = vpop.xlane.xlu0 %173 }
 0x10c   :  { %v203_v32 = vmul.f32 %v6439_v30, %v174_v31  ;;  %v5333_v31 = vor.u32 %v5710_v27, %v5332_v26 }
 0x10e   :  { %v6443_v33 = vsub.f32 %v6414_v9, %v203_v32  ;;  %v5334_v32 = vld [vmem:[%s9003_s5 + $0x8] sm:$0xf0]  ;;  %454 = vmatpush.bf16.msra.mxu1 %v5333_v31 }
 0x10f   :  { %v5337_v34 = vor.u32 %v5709_v28, %v5334_v32 }
 0x110   :  { %v219_v35 = vmul.f32 %v6443_v33, %v6443_v33 }
 0x111   :  { %483 = vmatpush.bf16.msra.mxu2 %v5337_v34 }
 0x112   :  { %v227_v36 = vsel %vm171_vm1, %v219_v35, 0.0 }
 0x113   :  { %228 = vadd.xlane.f32.xlu2 %v227_v36  ;;  %v177_v37 = vpop.xlane.xlu0 %176 }
 0x114   :  { %v204_v38 = vmul.f32 %v6439_v30, %v177_v37 }
 0x116   :  { %v6450_v39 = vsub.f32 %v6421_v13, %v204_v38 }
 0x118   :  { %v220_v40 = vmul.f32 %v6450_v39, %v6450_v39 }
 0x11a   :  { %v230_v43 = vsel %vm171_vm1, %v220_v40, 0.0 }
 0x11b   :  { %v180_v44 = vpop.xlane.xlu1 %179  ;;  %231 = vadd.xlane.f32.xlu2 %v230_v43 }
 0x11c   :  { %v205_v46 = vmul.f32 %v6439_v30, %v180_v44 }
 0x11e   :  { %v6462_v47 = vsub.f32 %v6428_v17, %v205_v46 }
 0x120   :  { %v221_v48 = vmul.f32 %v6462_v47, %v6462_v47 }
 0x122   :  { %v233_v51 = vsel %vm171_vm1, %v221_v48, 0.0 }
 0x123   :  { %v183_v54 = vpop.xlane.xlu1 %182  ;;  %234 = vadd.xlane.f32.xlu0 %v233_v51  ;;  %185 = vadd.xlane.f32.xlu2 %v184_v49 }
 0x124   :  { %v206_v56 = vmul.f32 %v6439_v30, %v183_v54 }
 0x126   :  { %v6481_v58 = vsub.f32 %v6435_v21, %v206_v56 }
 0x128   :  { %v222_v59 = vmul.f32 %v6481_v58, %v6481_v58 }
 0x12a   :  { %v236_v63 = vsel %vm171_vm1, %v222_v59, 0.0 }
 0x12b   :  { %237 = vadd.xlane.f32.xlu1 %v236_v63  ;;  %188 = vadd.xlane.f32.xlu0 %v187_v60 }
 0x12c   :  { %194 = vadd.xlane.f32.xlu2 %v193_v62 }
 0x133   :  { %191 = vadd.xlane.f32.xlu1 %v190_v1 }
 0x186   :  { %v229_v23 = vpop.xlane.xlu2 %228 }
 0x187   :  { %v251_v25 = vmul.f32 %v229_v23, %v6439_v30 }
 0x189   :  { %v259_v29 = vadd.f32 1e-06, %v251_v25  ;;  %v6584_v25 = vld [vmem:[%s9002_s4] ss:$0 sm:$0xff] }
 0x18b   :  { %5909 = vrsqrt.f32 %v259_v29  ;;  %vm273_vm4 = vweird.f32 %v259_v29 }
 0x18e   :  { %v232_v35 = vpop.xlane.xlu2 %231 }
 0x18f   :  { %v252_v36 = vmul.f32 %v232_v35, %v6439_v30 }
 0x191   :  { %v5910_v37 = vpop.eup %5909  ;;  %v260_v38 = vadd.f32 1e-06, %v252_v36 }
 0x192   :  { %v268_v40 = vmul.f32 %v5910_v37, %v259_v29  ;;  %vm274_vm3 = vweird.f32 %v5910_v37 }
 0x193   :  { %5911 = vrsqrt.f32 %v260_v38  ;;  %vm6554_vm5 = vmor %vm273_vm4, %vm274_vm3  ;;  %vm283_vm7 = vweird.f32 %v260_v38 }
 0x194   :  { %v269_v41 = vmul.f32 %v5910_v37, %v268_v40 }
 0x196   :  { %v270_v42 = vmul.f32 0.5, %v269_v41  ;;  %v186_v43 = vpop.xlane.xlu2 %185  ;;  %v235_v44 = vpop.xlane.xlu0 %234 }
 0x197   :  { %v207_v46 = vmul.f32 %v6439_v30, %v186_v43  ;;  %v253_v48 = vmul.f32 %v235_v44, %v6439_v30 }
 0x198   :  { %v271_v49 = vsub.f32 1.5, %v270_v42 }
 0x199   :  { %v5912_v50 = vpop.eup %5911  ;;  %v6550_v51 = vsub.f32 %v6458_v45, %v207_v46  ;;  %v261_v52 = vadd.f32 1e-06, %v253_v48 }
 0x19a   :  { %v272_v53 = vmul.f32 %v5910_v37, %v271_v49  ;;  %v278_v54 = vmul.f32 %v5912_v50, %v260_v38  ;;  %vm284_vm6 = vweird.f32 %v5912_v50 }
 0x19b   :  { %5913 = vrsqrt.f32 %v261_v52  ;;  %v223_v56 = vmul.f32 %v6550_v51, %v6550_v51  ;;  %vm285_vm8 = vmor %vm283_vm7, %vm284_vm6  ;;  %vm293_vm10 = vweird.f32 %v261_v52 }
 0x19c   :  { %v279_v59 = vmul.f32 %v5912_v50, %v278_v54  ;;  %v276_v62 = vsel %vm6554_vm5, %v5910_v37, %v272_v53 }
 0x19d   :  { %v239_v61 = vsel %vm171_vm1, %v223_v56, 0.0  ;;  %v347_v12 = vmul.f32 %v276_v62, %v6443_v33 }
 0x19e   :  { %v280_v63 = vmul.f32 0.5, %v279_v59  ;;  %v238_v1 = vpop.xlane.xlu1 %237  ;;  %240 = vadd.xlane.f32.xlu0 %v239_v61  ;;  %v189_v2 = vpop.xlane.xlu0 %188 }
 0x19f   :  { %v254_v3 = vmul.f32 %v238_v1, %v6439_v30  ;;  %v195_v4 = vpop.xlane.xlu2 %194  ;;  %v208_v5 = vmul.f32 %v6439_v30, %v189_v2  ;;  %v358_v24 = vmul.f32 %v6571_v14, %v347_v12 }
 0x1a0   :  { %v281_v6 = vsub.f32 1.5, %v280_v63  ;;  %v210_v10 = vmul.f32 %v6439_v30, %v195_v4 }
 0x1a1   :  { %v5914_v7 = vpop.eup %5913  ;;  %v262_v8 = vadd.f32 1e-06, %v254_v3  ;;  %v6565_v11 = vsub.f32 %v6475_v55, %v208_v5 }
 0x1a2   :  { %v282_v15 = vmul.f32 %v5912_v50, %v281_v6  ;;  %v288_v16 = vmul.f32 %v5914_v7, %v261_v52  ;;  %v6576_v22 = vsub.f32 %v6478_v57, %v210_v10  ;;  %vm294_vm9 = vweird.f32 %v5914_v7 }
 0x1a3   :  { %5915 = vrsqrt.f32 %v262_v8  ;;  %v224_v18 = vmul.f32 %v6565_v11, %v6565_v11  ;;  %vm295_vm11 = vmor %vm293_vm10, %vm294_vm9  ;;  %vm303_vm13 = vweird.f32 %v262_v8 }
 0x1a4   :  { %v286_v19 = vsel %vm285_vm8, %v5912_v50, %v282_v15  ;;  %v289_v20 = vmul.f32 %v5914_v7, %v288_v16  ;;  %v226_v36 = vmul.f32 %v6576_v22, %v6576_v22 }
 0x1a5   :  { %v242_v33 = vsel %vm171_vm1, %v224_v18, 0.0  ;;  %v348_v23 = vmul.f32 %v286_v19, %v6450_v39  ;;  %v369_v39 = vadd.f32 %v6584_v25, %v358_v24 }
 0x1a6   :  { %v290_v26 = vmul.f32 0.5, %v289_v20  ;;  %v192_v27 = vpop.xlane.xlu1 %191  ;;  %243 = vadd.xlane.f32.xlu1 %v242_v33  ;;  %v248_v44 = vsel %vm171_vm1, %v226_v36, 0.0 }
 0x1a7   :  { %v209_v28 = vmul.f32 %v6439_v30, %v192_v27  ;;  %v359_v29 = vmul.f32 %v6571_v14, %v348_v23 }
 0x1a8   :  { %v291_v31 = vsub.f32 1.5, %v290_v26  ;;  %v6616_v26 = vld [vmem:[%s9004_s6] sm:$0x3] }
 0x1a9   :  { %v5916_v32 = vpop.eup %5915  ;;  %v6589_v34 = vsub.f32 %v6493_v0, %v209_v28  ;;  %v370_v35 = vadd.f32 %v6584_v25, %v359_v29 }
 0x1aa   :  { %v292_v37 = vmul.f32 %v5914_v7, %v291_v31  ;;  %v298_v38 = vmul.f32 %v5916_v32, %v262_v8  ;;  %vm304_vm12 = vweird.f32 %v5916_v32 }
 0x1ab   :  { %v377_v40 = vpack.c.bf16 %v370_v35, %v369_v39  ;;  %v225_v41 = vmul.f32 %v6589_v34, %v6589_v34  ;;  %vm305_vm14 = vmor %vm303_vm13, %vm304_vm12  ;;  %vm527_vm13 = vcmask 130048  }
 0x1ac   :  { %v299_v42 = vmul.f32 %v5916_v32, %v298_v38  ;;  %v296_v46 = vsel %vm295_vm11, %v5914_v7, %v292_v37 }
 0x1ad   :  { %5362 = vmatmul.msk.bf16.vlgmr.msra.gmra.mxu1 %vm171_vm1, %v377_v40  ;;  %5366 = vmatmul.msk.bf16.vlgmr.msra.gmra.mxu2 %vm171_vm1, %v377_v40  ;;  %v245_v43 = vsel %vm171_vm1, %v225_v41, 0.0  ;;  %v349_v50 = vmul.f32 %v296_v46, %v6462_v47 }
 0x1ae   :  { %v300_v48 = vmul.f32 0.5, %v299_v42  ;;  %246 = vadd.xlane.f32.xlu0 %v245_v43  ;;  %249 = vadd.xlane.f32.xlu1 %v248_v44 }
 0x1af   :  { %v360_v56 = vmul.f32 %v6571_v14, %v349_v50 }
 0x1b0   :  { %v301_v49 = vsub.f32 1.5, %v300_v48 }
 0x1b1   :  { %v371_v60 = vadd.f32 %v6584_v25, %v360_v56 }
 0x1b2   :  { %v302_v53 = vmul.f32 %v5916_v32, %v301_v49 }
 0x1b4   :  { %v306_v52 = vsel %vm305_vm14, %v5916_v32, %v302_v53  ;;  %v6619_v32 = vperm.slane %v6616_v26, 0 }
 0x1b5   :  { %v350_v54 = vmul.f32 %v306_v52, %v6481_v58 }
 0x1b7   :  { %v361_v59 = vmul.f32 %v6571_v14, %v350_v54 }
 0x1b9   :  { %v372_v61 = vadd.f32 %v6584_v25, %v361_v59 }
 0x1bb   :  { %v378_v62 = vpack.c.bf16 %v372_v61, %v371_v60 }
 0x1bd   :  { %5363 = vmatmul.msk.bf16.gmra.mxu1 %vm171_vm1, %v378_v62  ;;  %5367 = vmatmul.msk.bf16.gmra.mxu2 %vm171_vm1, %v378_v62 }
 0x211   :  { %v241_v47 = vpop.xlane.xlu0 %240 }
 0x212   :  { %v255_v63 = vmul.f32 %v241_v47, %v6439_v30 }
 0x214   :  { %v263_v1 = vadd.f32 1e-06, %v255_v63 }
 0x216   :  { %5917 = vrsqrt.f32 %v263_v1  ;;  %vm313_vm2 = vweird.f32 %v263_v1 }
 0x219   :  { %v244_v2 = vpop.xlane.xlu1 %243 }
 0x21a   :  { %v256_v58 = vmul.f32 %v244_v2, %v6439_v30 }
 0x21c   :  { %v5918_v3 = vpop.eup %5917  ;;  %v264_v4 = vadd.f32 1e-06, %v256_v58 }
 0x21d   :  { %v308_v5 = vmul.f32 %v5918_v3, %v263_v1  ;;  %vm314_vm15 = vweird.f32 %v5918_v3 }
 0x21e   :  { %5919 = vrsqrt.f32 %v264_v4  ;;  %vm315_vm3 = vmor %vm313_vm2, %vm314_vm15  ;;  %vm323_vm5 = vweird.f32 %v264_v4  ;;  %vm620_vm15 = vcmask 261120  }
 0x21f   :  { %v309_v6 = vmul.f32 %v5918_v3, %v308_v5 }
 0x221   :  { %v310_v7 = vmul.f32 0.5, %v309_v6  ;;  %v250_v8 = vpop.xlane.xlu1 %249  ;;  %v247_v10 = vpop.xlane.xlu0 %246 }
 0x222   :  { %v258_v12 = vmul.f32 %v250_v8, %v6439_v30  ;;  %v257_v15 = vmul.f32 %v247_v10, %v6439_v30 }
 0x223   :  { %v311_v16 = vsub.f32 1.5, %v310_v7 }
 0x224   :  { %v5920_v18 = vpop.eup %5919  ;;  %v266_v19 = vadd.f32 1e-06, %v258_v12  ;;  %v265_v20 = vadd.f32 1e-06, %v257_v15 }
 0x225   :  { %v312_v33 = vmul.f32 %v5918_v3, %v311_v16  ;;  %v318_v23 = vmul.f32 %v5920_v18, %v264_v4  ;;  %vm324_vm4 = vweird.f32 %v5920_v18 }
 0x226   :  { %5921 = vrsqrt.f32 %v266_v19  ;;  %vm325_vm6 = vmor %vm323_vm5, %vm324_vm4  ;;  %vm343_vm9 = vweird.f32 %v266_v19  ;;  %vm333_vm11 = vweird.f32 %v265_v20 }
 0x227   :  { %v319_v24 = vmul.f32 %v5920_v18, %v318_v23  ;;  %5923 = vrsqrt.f32 %v265_v20  ;;  %v316_v27 = vsel %vm315_vm3, %v5918_v3, %v312_v33 }
 0x228   :  { %v351_v35 = vmul.f32 %v316_v27, %v6550_v51 }
 0x229   :  { %v320_v28 = vmul.f32 0.5, %v319_v24 }
 0x22a   :  { %v456_v29 = vpop.f32.mrf.mxu1  ;;  %v362_v49 = vmul.f32 %v6571_v14, %v351_v35 }
 0x22b   :  { %v321_v31 = vsub.f32 1.5, %v320_v28  ;;  %v457_v43 = vadd.f32 %v456_v29, %v6619_v32  ;;  %v6648_v29 = vperm.slane %v6616_v26, 1 }
 0x22c   :  { %v5922_v39 = vpop.eup %5921  ;;  %v373_v61 = vadd.f32 %v6584_v25, %v362_v49 }
 0x22d   :  { %v5924_v36 = vpop.eup %5923  ;;  %v322_v37 = vmul.f32 %v5920_v18, %v321_v31  ;;  %v338_v38 = vmul.f32 %v5922_v39, %v266_v19  ;;  %vm344_vm7 = vweird.f32 %v5922_v39  ;;  %v505_v56 = vpack.c.bf16 %v457_v43, %v457_v43 }
 0x22e   :  { %v328_v40 = vmul.f32 %v5924_v36, %v265_v20  ;;  %vm334_vm8 = vweird.f32 %v5924_v36  ;;  %vm345_vm10 = vmor %vm343_vm9, %vm344_vm7 }
 0x22f   :  { %v326_v41 = vsel %vm325_vm6, %v5920_v18, %v322_v37  ;;  %v339_v42 = vmul.f32 %v5922_v39, %v338_v38  ;;  %vm335_vm12 = vmor %vm333_vm11, %vm334_vm8  ;;  %v517_v58 = vunpack.c.l.b16 %v505_v56 }
 0x230   :  { %v329_v44 = vmul.f32 %v5924_v36, %v328_v40  ;;  %v485_v46 = vpop.f32.mrf.mxu2  ;;  %v352_v48 = vmul.f32 %v326_v41, %v6565_v11 }
 0x231   :  { %v340_v50 = vmul.f32 0.5, %v339_v42  ;;  %v486_v35 = vadd.f32 %v485_v46, %v6648_v29 }
 0x232   :  { %v330_v53 = vmul.f32 0.5, %v329_v44  ;;  %v458_v52 = vpop.f32.mrf.mxu1  ;;  %v363_v51 = vmul.f32 %v6571_v14, %v352_v48 }
 0x233   :  { %v341_v54 = vsub.f32 1.5, %v340_v50  ;;  %v459_v59 = vadd.f32 %v458_v52, %v6619_v32  ;;  %v1261_v38 = vpack.c.bf16 %v486_v35, %v486_v35 }
 0x234   :  { %v331_v60 = vsub.f32 1.5, %v330_v53  ;;  %v374_v62 = vadd.f32 %v6584_v25, %v363_v51 }
 0x235   :  { %v342_v47 = vmul.f32 %v5922_v39, %v341_v54  ;;  %v506_v11 = vpack.c.bf16 %v459_v59, %v459_v59  ;;  %v1283_v43 = vunpack.c.l.b16 %v1261_v38 }
 0x236   :  { %v332_v63 = vmul.f32 %v5924_v36, %v331_v60  ;;  %v379_v1 = vpack.c.bf16 %v374_v62, %v373_v61 }
 0x237   :  { %v346_v2 = vsel %vm345_vm10, %v5922_v39, %v342_v47  ;;  %v518_v3 = vunpack.c.l.b16 %v506_v11 }
 0x238   :  { %v336_v4 = vsel %vm335_vm12, %v5924_v36, %v332_v63  ;;  %5364 = vmatmul.msk.bf16.gmra.mxu1 %vm171_vm1, %v379_v1  ;;  %v487_v5 = vpop.f32.mrf.mxu2  ;;  %5368 = vmatmul.msk.bf16.gmra.mxu2 %vm171_vm1, %v379_v1  ;;  %v354_v10 = vmul.f32 %v346_v2, %v6576_v22 }
 0x239   :  { %v6631_v6 = vpack.c.b16 %v518_v3, %v517_v58  ;;  %v353_v8 = vmul.f32 %v336_v4, %v6589_v34 }
 0x23a   :  { %v461_v7 = vpop.f32.mrf.mxu1  ;;  %v365_v15 = vmul.f32 %v6571_v14, %v354_v10 }
 0x23b   :  { %523 = vrot.lane.b32.xlu0 %v6631_v6, %s6278_s27  ;;  %v364_v12 = vmul.f32 %v6571_v14, %v353_v8  ;;  %v462_v16 = vadd.f32 %v461_v7, %v6619_v32 }
 0x23c   :  { %v376_v33 = vadd.f32 %v6584_v25, %v365_v15 }
 0x23d   :  { %v375_v20 = vadd.f32 %v6584_v25, %v364_v12  ;;  %v507_v23 = vpack.c.bf16 %v462_v16, %v462_v16  ;;  %v488_v25 = vadd.f32 %v487_v5, %v6648_v29 }
 0x23f   :  { %v380_v24 = vpack.c.bf16 %v376_v33, %v375_v20  ;;  %v519_v27 = vunpack.c.l.b16 %v507_v23  ;;  %v1262_v36 = vpack.c.bf16 %v488_v25, %v488_v25 }
 0x240   :  { %v490_v18 = vpop.f32.mrf.mxu2 }
 0x241   :  { %v491_v26 = vadd.f32 %v490_v18, %v6648_v29  ;;  %v1284_v41 = vunpack.c.l.b16 %v1262_v36 }
 0x242   :  { %v463_v19 = vpop.f32.mrf.mxu1 }
 0x243   :  { %v464_v34 = vadd.f32 %v463_v19, %v6619_v32  ;;  %v1263_v40 = vpack.c.bf16 %v491_v26, %v491_v26  ;;  %v6666_v46 = vpack.c.b16 %v1284_v41, %v1283_v43 }
 0x245   :  { %v508_v22 = vpack.c.bf16 %v464_v34, %v464_v34  ;;  %v1285_v44 = vunpack.c.l.b16 %v1263_v40 }
 0x247   :  { %v520_v28 = vunpack.c.l.b16 %v508_v22 }
 0x248   :  { %5365 = vmatmul.msk.bf16.gmra.mxu1 %vm171_vm1, %v380_v24  ;;  %5369 = vmatmul.msk.bf16.gmra.mxu2 %vm171_vm1, %v380_v24  ;;  %v492_v31 = vpop.f32.mrf.mxu2 }
 0x249   :  { %v6645_v14 = vpack.c.b16 %v520_v28, %v519_v27  ;;  %v493_v39 = vadd.f32 %v492_v31, %v6648_v29 }
 0x24b   :  { %801 = vrot.lane.b32.xlu0 %v6645_v14, %s6279_s28  ;;  %525 = vrot.lane.b32.xlu2 %v6645_v14, %s6278_s27  ;;  %v1264_v37 = vpack.c.bf16 %v493_v39, %v493_v39 }
 0x24c   :  { %805 = vrot.lane.b32.xlu1 %v6645_v14, %s6280_s29 }
 0x24d   :  { %v1286_v42 = vunpack.c.l.b16 %v1264_v37 }
 0x24f   :  { %v6668_v48 = vpack.c.b16 %v1286_v42, %v1285_v44 }
 0x253   :  { %1071 = vrot.lane.b32.xlu0 %v6631_v6, %s9024_s2  ;;  %803 = vrot.lane.b32.xlu2 %v6631_v6, %s6280_s29 }
 0x254   :  { %1075 = vrot.lane.b32.xlu1 %v6631_v6, %s6282_s30 }
 0x25b   :  { %1367 = vrot.lane.b32.xlu0 %v6666_v46, %s6283_s20  ;;  %799 = vrot.lane.b32.xlu2 %v6631_v6, %s6279_s28 }
 0x25c   :  { %1369 = vrot.lane.b32.xlu1 %v6668_v48, %s6283_s20 }
 0x263   :  { %729 = vrot.lane.b32.xlu0 %v6645_v14, %s6283_s20  ;;  %1077 = vrot.lane.b32.xlu2 %v6645_v14, %s6282_s30 }
 0x264   :  { %1365 = vrot.lane.b32.xlu1 %v6668_v48, %s6278_s27 }
 0x26b   :  { %727 = vrot.lane.b32.xlu0 %v6631_v6, %s6283_s20  ;;  %1073 = vrot.lane.b32.xlu2 %v6645_v14, %s9024_s2 }
 0x26c   :  { %1001 = vrot.lane.b32.xlu1 %v6645_v14, %s9022_s0 }
 0x273   :  { %1363 = vrot.lane.b32.xlu2 %v6666_v46, %s6278_s27 }
 0x274   :  { %999 = vrot.lane.b32.xlu1 %v6631_v6, %s9022_s0 }
 0x2a5   :  { %v526_v49 = vpop.permute.xlu2 %525 }
 0x2a6   :  { %v538_v50 = vsel %vm527_vm13, %v526_v49, 0 }
 0x2a7   :  { %546 = vmatpush.bf16.xpose.msra.mxu3 %v538_v50 }
 0x2ad   :  { %v524_v53 = vpop.permute.xlu0 %523  ;;  %v804_v51 = vpop.permute.xlu2 %803 }
 0x2ae   :  { %v535_v52 = vsel %vm527_vm13, %v524_v53, 0  ;;  %v814_v19 = vsel %vm527_vm13, %v804_v51, 0 }
 0x2af   :  { %547 = vmatpush.bf16.xpose.msra.mxu3 %v535_v52 }
 0x2b5   :  { %v466_v54 = vpop.f32.mrf.mxu1  ;;  %v800_v59 = vpop.permute.xlu2 %799 }
 0x2b6   :  { %5370 = vmatmul.msk.bf16.vlgmr.msra.gmra.mxu3 %vm527_vm13, %v6631_v6  ;;  %v467_v56 = vadd.f32 %v466_v54, %v6619_v32 }
 0x2b8   :  { %v509_v62 = vpack.c.bf16 %v467_v56, %v467_v56 }
 0x2ba   :  { %v563_v58 = vunpack.c.l.b16 %v509_v62  ;;  %v165_v62 = vlaneseq }
 0x2bb   :  { %v495_v60 = vpop.f32.mrf.mxu2 }
 0x2bc   :  { %v496_v4 = vadd.f32 %v495_v60, %v6648_v29 }
 0x2bd   :  { %v468_v61 = vpop.f32.mrf.mxu1  ;;  %v6698_v63 = vpop.permute.xlu0 %801 }
 0x2be   :  { %v806_v47 = vpop.permute.xlu1 %805  ;;  %v469_v11 = vadd.f32 %v468_v61, %v6619_v32  ;;  %v1078_v8 = vpop.permute.xlu2 %1077  ;;  %v1265_v18 = vpack.c.bf16 %v496_v4, %v496_v4 }
 0x2bf   :  { %v817_v1 = vsel %vm527_vm13, %v806_v47, 0  ;;  %v1089_v20 = vsel %vm527_vm13, %v1078_v8, 0 }
 0x2c0   :  { %v510_v2 = vpack.c.bf16 %v469_v11, %v469_v11  ;;  %825 = vmatpush.bf16.xpose.msrb.mxu2 %v817_v1  ;;  %v1330_v34 = vunpack.c.l.b16 %v1265_v18 }
 0x2c2   :  { %v564_v3 = vunpack.c.l.b16 %v510_v2 }
 0x2c3   :  { %v497_v5 = vpop.f32.mrf.mxu2 }
 0x2c4   :  { %v6702_v6 = vpack.c.b16 %v564_v3, %v563_v58  ;;  %v498_v7 = vadd.f32 %v497_v5, %v6648_v29  ;;  %v6285_v3 = vmov -1e+30  }
 0x2c5   :  { %v471_v10 = vpop.f32.mrf.mxu1  ;;  %v1072_v16 = vpop.permute.xlu0 %1071 }
 0x2c6   :  { %v1266_v12 = vpack.c.bf16 %v498_v7, %v498_v7  ;;  %v1076_v15 = vpop.permute.xlu1 %1075  ;;  %1114 = vrot.lane.b32.xlu2 %v6702_v6, %s6282_s30  ;;  %842 = vrot.lane.b32.xlu0 %v6702_v6, %s6280_s29  ;;  %v472_v23 = vadd.f32 %v471_v10, %v6619_v32 }
 0x2c7   :  { %569 = vrot.lane.b32.xlu1 %v6702_v6, %s6278_s27  ;;  %5371 = vmatmul.msk.bf16.gmra.mxu3 %vm527_vm13, %v6645_v14  ;;  %v1086_v26 = vsel %vm527_vm13, %v1076_v15, 0 }
 0x2c8   :  { %826 = vmatpush.bf16.xpose.msrb.mxu2 %v814_v19  ;;  %v1331_v33 = vunpack.c.l.b16 %v1266_v12  ;;  %v511_v28 = vpack.c.bf16 %v472_v23, %v472_v23 }
 0x2ca   :  { %v6716_v24 = vpack.c.b16 %v1331_v33, %v1330_v34  ;;  %v565_v37 = vunpack.c.l.b16 %v511_v28 }
 0x2cb   :  { %v500_v22 = vpop.f32.mrf.mxu2 }
 0x2cc   :  { %v501_v14 = vadd.f32 %v500_v22, %v6648_v29 }
 0x2cd   :  { %v473_v27 = vpop.f32.mrf.mxu1  ;;  %v1368_v39 = vpop.permute.xlu0 %1367 }
 0x2ce   :  { %v1370_v31 = vpop.permute.xlu1 %1369  ;;  %v474_v25 = vadd.f32 %v473_v27, %v6619_v32  ;;  %838 = vrot.lane.b32.xlu0 %v6702_v6, %s6279_s28  ;;  %v1267_v40 = vpack.c.bf16 %v501_v14, %v501_v14  ;;  %v1378_v52 = vsel %vm527_vm13, %v1368_v39, 0 }
 0x2cf   :  { %1406 = vrot.lane.b32.xlu1 %v6716_v24, %s6283_s20  ;;  %5378 = vmatmul.msk.bf16.vlgmr.msrb.gmra.mxu2 %vm527_vm13, %v800_v59  ;;  %v1381_v36 = vsel %vm527_vm13, %v1370_v31, 0  ;;  %v1074_v59 = vpop.permute.xlu2 %1073 }
 0x2d0   :  { %1097 = vmatpush.bf16.xpose.msra.mxu2 %v1089_v20  ;;  %v512_v35 = vpack.c.bf16 %v474_v25, %v474_v25  ;;  %v1332_v50 = vunpack.c.l.b16 %v1267_v40 }
 0x2d2   :  { %v566_v38 = vunpack.c.l.b16 %v512_v35 }
 0x2d3   :  { %v502_v32 = vpop.f32.mrf.mxu2 }
 0x2d4   :  { %v6727_v41 = vpack.c.b16 %v566_v38, %v565_v37  ;;  %v503_v42 = vadd.f32 %v502_v32, %v6648_v29 }
 0x2d5   :  { %v730_v49 = vpop.permute.xlu0 %729 }
 0x2d6   :  { %v1268_v43 = vpack.c.bf16 %v503_v42, %v503_v42  ;;  %v1366_v44 = vpop.permute.xlu1 %1365  ;;  %1110 = vrot.lane.b32.xlu0 %v6702_v6, %s9024_s2  ;;  %571 = vrot.lane.b32.xlu2 %v6727_v41, %s6278_s27 }
 0x2d7   :  { %745 = vmatpush.bf16.msrb.mxu0 %v730_v49  ;;  %v1364_v60 = vpop.permute.xlu2 %1363 }
 0x2d8   :  { %1098 = vmatpush.bf16.xpose.msra.mxu2 %v1086_v26  ;;  %v1333_v53 = vunpack.c.l.b16 %v1268_v43 }
 0x2da   :  { %v6735_v51 = vpack.c.b16 %v1333_v53, %v1332_v50 }
 0x2dc   :  { %1404 = vrot.lane.b32.xlu1 %v6735_v51, %s6278_s27 }
 0x2dd   :  { %v728_v54 = vpop.permute.xlu0 %727 }
 0x2de   :  { %v1002_v29 = vpop.permute.xlu1 %1001  ;;  %844 = vrot.lane.b32.xlu0 %v6727_v41, %s6280_s29  ;;  %746 = vmatpush.bf16.msrb.mxu0 %v728_v54 }
 0x2df   :  { %5379 = vmatmul.msk.bf16.gmra.mxu2 %vm527_vm13, %v6698_v63  ;;  %v166_v63 = vand.u32 127, %v165_v62 }
 0x2e0   :  { %1389 = vmatpush.bf16.xpose.msrb.mxu2 %v1381_v36 }
 0x2e1   :  { %vm167_vm14 = vcmp.lt.s32.totalorder %v166_v63, 17 }
 0x2e2   :  { %1017 = vmatpush.bf16.msra.mxu0 %v1002_v29  ;;  %v6758_v4 = vsel %vm167_vm14, 0.0, %v6285_v3 }
 0x2e6   :  { %v1000_v56 = vpop.permute.xlu1 %999  ;;  %840 = vrot.lane.b32.xlu0 %v6727_v41, %s6279_s28 }
 0x2e7   :  { %1018 = vmatpush.bf16.msra.mxu0 %v1000_v56 }
 0x2e8   :  { %1390 = vmatpush.bf16.xpose.msrb.mxu2 %v1378_v52 }
 0x2ee   :  { %1116 = vrot.lane.b32.xlu0 %v6727_v41, %s6282_s30 }
 0x2ef   :  { %5386 = vmatmul.msk.bf16.vlgmr.msra.gmra.mxu2 %vm527_vm13, %v1072_v16 }
 0x2f6   :  { %1112 = vrot.lane.b32.xlu0 %v6727_v41, %s9024_s2 }
 0x2fe   :  { %1408 = vrot.lane.b32.xlu0 %v6735_v51, %s6283_s20 }
 0x2ff   :  { %5387 = vmatmul.msk.bf16.gmra.mxu2 %vm527_vm13, %v1074_v59 }
 0x30f   :  { %5394 = vmatmul.msk.bf16.vlgmr.msrb.gmra.mxu2 %vm527_vm13, %v1364_v60 }
 0x31f   :  { %5395 = vmatmul.msk.bf16.gmra.mxu2 %vm527_vm13, %v1366_v44 }
 0x320   :  { %v6755_v61 = vpop.permute.xlu2 %1114 }
 0x321   :  { %v1125_v56 = vsel %vm527_vm13, %v6755_v61, 0 }
 0x330   :  { %v572_v47 = vpop.permute.xlu2 %571 }
 0x331   :  { %v583_v11 = vsel %vm527_vm13, %v572_v47, 0 }
 0x332   :  { %591 = vmatpush.bf16.xpose.msrb.mxu3 %v583_v11 }
 0x338   :  { %v843_v1 = vpop.permute.xlu0 %842 }
 0x339   :  { %v570_v2 = vpop.permute.xlu1 %569  ;;  %v549_v58 = vpop.f32.mrf.mxu3  ;;  %v853_v36 = vsel %vm527_vm13, %v843_v1, 0 }
 0x33a   :  { %v604_v5 = vmul.f32 0.25, %v549_v58  ;;  %v580_v7 = vsel %vm527_vm13, %v570_v2, 0 }
 0x33b   :  { %592 = vmatpush.bf16.xpose.msrb.mxu3 %v580_v7 }
 0x33c   :  { %v6762_v8 = vadd.f32 %v604_v5, %v6758_v4 }
 0x33e   :  { %v621_v10 = vsel %vm620_vm15, %v6762_v8, -inf }
 0x33f   :  { %622 = vmax.xlane.f32.xlu0 %v621_v10 }
 0x340   :  { %v839_v12 = vpop.permute.xlu0 %838 }
 0x341   :  { %v551_v15 = vpop.f32.mrf.mxu3  ;;  %v1407_v63 = vpop.permute.xlu1 %1406 }
 0x342   :  { %v605_v16 = vmul.f32 0.25, %v551_v15  ;;  %5372 = vmatmul.msk.bf16.vlgmr.msrb.gmra.mxu3 %vm527_vm13, %v6702_v6  ;;  %v1417_v2 = vsel %vm527_vm13, %v1407_v63, 0 }
 0x344   :  { %v6769_v18 = vadd.f32 %v605_v16, %v6758_v4 }
 0x346   :  { %v624_v19 = vsel %vm620_vm15, %v6769_v18, -inf }
 0x347   :  { %625 = vmax.xlane.f32.xlu2 %v624_v19 }
 0x348   :  { %v1111_v20 = vpop.permute.xlu0 %1110 }
 0x34a   :  { %v554_v33 = vpop.f32.mrf.mxu3 }
 0x34b   :  { %v606_v23 = vmul.f32 0.25, %v554_v33 }
 0x34d   :  { %v6774_v34 = vadd.f32 %v606_v23, %v6758_v4 }
 0x34f   :  { %v627_v22 = vsel %vm620_vm15, %v6774_v34, -inf }
 0x350   :  { %628 = vmax.xlane.f32.xlu1 %v627_v22  ;;  %v845_v27 = vpop.permute.xlu0 %844 }
 0x351   :  { %v856_v28 = vsel %vm527_vm13, %v845_v27, 0 }
 0x352   :  { %5373 = vmatmul.msk.bf16.gmra.mxu3 %vm527_vm13, %v6727_v41  ;;  %v828_v31 = vpop.f32.mrf.mxu2  ;;  %v556_v49 = vpop.f32.mrf.mxu3 }
 0x353   :  { %v877_v25 = vmul.f32 0.25, %v828_v31  ;;  %864 = vmatpush.bf16.xpose.msra.mxu3 %v856_v28  ;;  %v607_v53 = vmul.f32 0.25, %v556_v49 }
 0x355   :  { %v6782_v39 = vadd.f32 %v877_v25, %v6758_v4  ;;  %v6804_v59 = vadd.f32 %v607_v53, %v6758_v4 }
 0x357   :  { %v893_v14 = vsel %vm620_vm15, %v6782_v39, -inf  ;;  %v630_v60 = vsel %vm620_vm15, %v6804_v59, -inf }
 0x358   :  { %894 = vmax.xlane.f32.xlu0 %v893_v14  ;;  %v841_v35 = vpop.permute.xlu0 %840 }
 0x35a   :  { %v830_v26 = vpop.f32.mrf.mxu2 }
 0x35b   :  { %v878_v37 = vmul.f32 0.25, %v830_v26  ;;  %865 = vmatpush.bf16.xpose.msra.mxu3 %v853_v36 }
 0x35d   :  { %v6788_v38 = vadd.f32 %v878_v37, %v6758_v4 }
 0x35f   :  { %v896_v32 = vsel %vm620_vm15, %v6788_v38, -inf  ;;  %1402 = vrot.lane.b32.xlu2 %v6716_v24, %s6278_s27 }
 0x360   :  { %897 = vmax.xlane.f32.xlu0 %v896_v32  ;;  %v1117_v40 = vpop.permute.xlu0 %1116 }
 0x361   :  { %v1128_v42 = vsel %vm527_vm13, %v1117_v40, 0 }
 0x362   :  { %v833_v43 = vpop.f32.mrf.mxu2  ;;  %5380 = vmatmul.msk.bf16.vlgmr.msra.gmra.mxu3 %vm527_vm13, %v839_v12 }
 0x363   :  { %v879_v44 = vmul.f32 0.25, %v833_v43  ;;  %1136 = vmatpush.bf16.xpose.msrb.mxu3 %v1128_v42 }
 0x365   :  { %v6797_v50 = vadd.f32 %v879_v44, %v6758_v4 }
 0x367   :  { %v899_v52 = vsel %vm620_vm15, %v6797_v50, -inf }
 0x368   :  { %900 = vmax.xlane.f32.xlu0 %v899_v52  ;;  %v1113_v29 = vpop.permute.xlu0 %1112 }
 0x36a   :  { %v835_v54 = vpop.f32.mrf.mxu2 }
 0x36b   :  { %1137 = vmatpush.bf16.xpose.msrb.mxu3 %v1125_v56  ;;  %v880_v3 = vmul.f32 0.25, %v835_v54 }
 0x36d   :  { %v6818_v10 = vadd.f32 %v880_v3, %v6758_v4  ;;  %v1405_v3 = vpop.permute.xlu1 %1404 }
 0x36f   :  { %v902_v15 = vsel %vm620_vm15, %v6818_v10, -inf }
 0x370   :  { %631 = vmax.xlane.f32.xlu0 %v630_v60  ;;  %v1409_v62 = vpop.permute.xlu0 %1408 }
 0x371   :  { %v1420_v47 = vsel %vm527_vm13, %v1409_v62, 0 }
 0x372   :  { %5381 = vmatmul.msk.bf16.gmra.mxu3 %vm527_vm13, %v841_v35  ;;  %v1100_v11 = vpop.f32.mrf.mxu2 }
 0x373   :  { %1428 = vmatpush.bf16.xpose.msra.mxu3 %v1420_v47  ;;  %v1149_v12 = vmul.f32 0.25, %v1100_v11 }
 0x375   :  { %v6823_v33 = vadd.f32 %v1149_v12, %v6758_v4 }
 0x377   :  { %v1165_v27 = vsel %vm620_vm15, %v6823_v33, -inf }
 0x37a   :  { %v1102_v1 = vpop.f32.mrf.mxu2 }
 0x37b   :  { %v1150_v61 = vmul.f32 0.25, %v1102_v1  ;;  %1429 = vmatpush.bf16.xpose.msra.mxu3 %v1417_v2 }
 0x37d   :  { %v6812_v58 = vadd.f32 %v1150_v61, %v6758_v4 }
 0x37f   :  { %v1168_v5 = vsel %vm620_vm15, %v6812_v58, -inf }
 0x380   :  { %1169 = vmax.xlane.f32.xlu1 %v1168_v5 }
 0x382   :  { %v1105_v7 = vpop.f32.mrf.mxu2  ;;  %5388 = vmatmul.msk.bf16.vlgmr.msrb.gmra.mxu3 %vm527_vm13, %v1111_v20 }
 0x383   :  { %v1151_v22 = vmul.f32 0.25, %v1105_v7 }
 0x385   :  { %v6834_v25 = vadd.f32 %v1151_v22, %v6758_v4 }
 0x387   :  { %v1171_v26 = vsel %vm620_vm15, %v6834_v25, -inf }
 0x388   :  { %903 = vmax.xlane.f32.xlu2 %v902_v15 }
 0x38a   :  { %v1107_v16 = vpop.f32.mrf.mxu2 }
 0x38b   :  { %v1152_v19 = vmul.f32 0.25, %v1107_v16 }
 0x38d   :  { %v6826_v23 = vadd.f32 %v1152_v19, %v6758_v4 }
 0x38f   :  { %v1174_v20 = vsel %vm620_vm15, %v6826_v23, -inf }
 0x390   :  { %1175 = vmax.xlane.f32.xlu1 %v1174_v20  ;;  %1166 = vmax.xlane.f32.xlu2 %v1165_v27 }
 0x392   :  { %5389 = vmatmul.msk.bf16.gmra.mxu3 %vm527_vm13, %v1113_v29  ;;  %v1392_v28 = vpop.f32.mrf.mxu2 }
 0x393   :  { %v1441_v31 = vmul.f32 0.25, %v1392_v28 }
 0x395   :  { %v6837_v14 = vadd.f32 %v1441_v31, %v6758_v4 }
 0x397   :  { %v1457_v35 = vsel %vm620_vm15, %v6837_v14, -inf }
 0x398   :  { %1458 = vmax.xlane.f32.xlu0 %v1457_v35  ;;  %1172 = vmax.xlane.f32.xlu2 %v1171_v26 }
 0x39a   :  { %v1394_v36 = vpop.f32.mrf.mxu2 }
 0x39b   :  { %v1442_v37 = vmul.f32 0.25, %v1394_v36 }
 0x39d   :  { %v6844_v32 = vadd.f32 %v1442_v37, %v6758_v4 }
 0x39f   :  { %v1460_v40 = vsel %vm620_vm15, %v6844_v32, -inf }
 0x3a0   :  { %1461 = vmax.xlane.f32.xlu2 %v1460_v40 }
 0x3a2   :  { %v1397_v42 = vpop.f32.mrf.mxu2 }
 0x3a3   :  { %v1443_v43 = vmul.f32 0.25, %v1397_v42 }
 0x3a5   :  { %v6849_v44 = vadd.f32 %v1443_v43, %v6758_v4 }
 0x3a7   :  { %v1463_v49 = vsel %vm620_vm15, %v6849_v44, -inf }
 0x3a8   :  { %1464 = vmax.xlane.f32.xlu2 %v1463_v49 }
 0x3aa   :  { %v1399_v53 = vpop.f32.mrf.mxu2 }
 0x3ab   :  { %v1444_v52 = vmul.f32 0.25, %v1399_v53 }
 0x3ad   :  { %v6854_v29 = vadd.f32 %v1444_v52, %v6758_v4 }
 0x3af   :  { %v1466_v54 = vsel %vm620_vm15, %v6854_v29, -inf }
 0x3b0   :  { %1467 = vmax.xlane.f32.xlu2 %v1466_v54 }
 0x3b2   :  { %v623_v56 = vpop.xlane.xlu0 %622 }
 0x3b3   :  { %v645_v60 = vsub.f32 %v6762_v8, %v623_v56 }
 0x3b5   :  { %v653_v62 = vmul.f32 1.442695, %v645_v60 }
 0x3b7   :  { %5925 = vpow2.f32 %v653_v62 }
 0x3ba   :  { %v626_v47 = vpop.xlane.xlu2 %625 }
 0x3bb   :  { %v646_v11 = vsub.f32 %v6769_v18, %v626_v47 }
 0x3bd   :  { %v6860_v63 = vpop.eup %5925  ;;  %v655_v1 = vmul.f32 1.442695, %v646_v11 }
 0x3be   :  { %v669_v2 = vsel %vm620_vm15, %v6860_v63, 0.0 }
 0x3bf   :  { %5927 = vpow2.f32 %v655_v1  ;;  %670 = vadd.xlane.f32.xlu1 %v669_v2 }
 0x3c2   :  { %v1403_v61 = vpop.permute.xlu2 %1402 }
 0x3c3   :  { %5396 = vmatmul.msk.bf16.vlgmr.msra.gmra.mxu3 %vm527_vm13, %v1403_v61  ;;  %v629_v7 = vpop.xlane.xlu1 %628 }
 0x3c4   :  { %v647_v15 = vsub.f32 %v6774_v34, %v629_v7 }
 0x3c5   :  { %v6865_v5 = vpop.eup %5927  ;;  %v6884_v36 = vpop.f32.mrf.mxu3 }
 0x3c6   :  { %v672_v8 = vsel %vm620_vm15, %v6865_v5, 0.0  ;;  %v657_v19 = vmul.f32 1.442695, %v647_v15 }
 0x3c7   :  { %673 = vadd.xlane.f32.xlu0 %v672_v8 }
 0x3cb   :  { %v895_v18 = vpop.xlane.xlu0 %894 }
 0x3cc   :  { %v917_v12 = vsub.f32 %v6782_v39, %v895_v18 }
 0x3cd   :  { %v596_v52 = vpop.f32.mrf.mxu3 }
 0x3ce   :  { %v925_v16 = vmul.f32 1.442695, %v917_v12 }
 0x3d0   :  { %5929 = vpow2.f32 %v925_v16 }
 0x3d1   :  { %5931 = vpow2.f32 %v657_v19 }
 0x3d3   :  { %v898_v22 = vpop.xlane.xlu0 %897  ;;  %5397 = vmatmul.msk.bf16.gmra.mxu3 %vm527_vm13, %v1405_v3 }
 0x3d4   :  { %v918_v20 = vsub.f32 %v6788_v38, %v898_v22 }
 0x3d5   :  { %v599_v60 = vpop.f32.mrf.mxu3 }
 0x3d6   :  { %v6873_v27 = vpop.eup %5929  ;;  %v927_v28 = vmul.f32 1.442695, %v918_v20 }
 0x3d7   :  { %v941_v31 = vsel %vm620_vm15, %v6873_v27, 0.0  ;;  %v6879_v34 = vpop.eup %5931 }
 0x3d8   :  { %5933 = vpow2.f32 %v927_v28  ;;  %942 = vadd.xlane.f32.xlu2 %v941_v31  ;;  %v675_v37 = vsel %vm620_vm15, %v6879_v34, 0.0 }
 0x3db   :  { %v901_v39 = vpop.xlane.xlu0 %900  ;;  %1565 = vrot.lane.b32.xlu0 %v6668_v48, %s6279_s28 }
 0x3dc   :  { %v919_v35 = vsub.f32 %v6797_v50, %v901_v39 }
 0x3dd   :  { %v601_v2 = vpop.f32.mrf.mxu3 }
 0x3de   :  { %v6882_v26 = vpop.eup %5933  ;;  %v929_v38 = vmul.f32 1.442695, %v919_v35  ;;  %v609_v35 = vmul.f32 0.25, %v596_v52 }
 0x3df   :  { %v944_v40 = vsel %vm620_vm15, %v6882_v26, 0.0 }
 0x3e0   :  { %5935 = vpow2.f32 %v929_v38  ;;  %676 = vadd.xlane.f32.xlu2 %v675_v37  ;;  %945 = vadd.xlane.f32.xlu1 %v944_v40  ;;  %v6921_v40 = vadd.f32 %v609_v35, %v6758_v4 }
 0x3e3   :  { %v632_v42 = vpop.xlane.xlu0 %631 }
 0x3e4   :  { %v648_v43 = vsub.f32 %v6804_v59, %v632_v42  ;;  %v610_v42 = vmul.f32 0.25, %v599_v60 }
 0x3e6   :  { %v6891_v49 = vpop.eup %5935  ;;  %v659_v50 = vmul.f32 1.442695, %v648_v43  ;;  %v611_v43 = vmul.f32 0.25, %v601_v2 }
 0x3e7   :  { %v947_v53 = vsel %vm620_vm15, %v6891_v49, 0.0 }
 0x3e8   :  { %5937 = vpow2.f32 %v659_v50  ;;  %948 = vadd.xlane.f32.xlu1 %v947_v53  ;;  %v636_v53 = vsel %vm620_vm15, %v6921_v40, -inf }
 0x3ee   :  { %v6895_v54 = vpop.eup %5937 }
 0x3ef   :  { %v678_v56 = vsel %vm620_vm15, %v6895_v54, 0.0 }
 0x3f0   :  { %679 = vadd.xlane.f32.xlu1 %v678_v56  ;;  %v6930_v56 = vadd.f32 %v610_v42, %v6758_v4 }
 0x3f2   :  { %v639_v60 = vsel %vm620_vm15, %v6930_v56, -inf }
 0x3f3   :  { %v1170_v62 = vpop.xlane.xlu1 %1169 }
 0x3f4   :  { %v1190_v47 = vsub.f32 %v6812_v58, %v1170_v62  ;;  %v6933_v62 = vadd.f32 %v611_v43, %v6758_v4 }
 0x3f6   :  { %v1199_v59 = vmul.f32 1.442695, %v1190_v47 }
 0x3f8   :  { %5939 = vpow2.f32 %v1199_v59 }
 0x3fb   :  { %v904_v11 = vpop.xlane.xlu2 %903 }
 0x3fc   :  { %v920_v1 = vsub.f32 %v6818_v10, %v904_v11  ;;  %v867_v10 = vpop.f32.mrf.mxu3  ;;  %v642_v11 = vsel %vm620_vm15, %v6933_v62, -inf }
 0x3fd   :  { %v881_v47 = vmul.f32 0.25, %v867_v10 }
 0x3fe   :  { %v6901_v61 = vpop.eup %5939  ;;  %v931_v3 = vmul.f32 1.442695, %v920_v1 }
 0x3ff   :  { %v1216_v8 = vsel %vm620_vm15, %v6901_v61, 0.0  ;;  %v6942_v1 = vadd.f32 %v881_v47, %v6758_v4 }
 0x400   :  { %5941 = vpow2.f32 %v931_v3  ;;  %1217 = vadd.xlane.f32.xlu2 %v1216_v8 }
 0x403   :  { %v1176_v7 = vpop.xlane.xlu1 %1175  ;;  %v1167_v18 = vpop.xlane.xlu2 %1166 }
 0x404   :  { %v1192_v12 = vsub.f32 %v6826_v23, %v1176_v7  ;;  %v1189_v58 = vsub.f32 %v6823_v33, %v1167_v18  ;;  %v869_v37 = vpop.f32.mrf.mxu3  ;;  %v905_v18 = vsel %vm620_vm15, %v6942_v1, -inf }
 0x405   :  { %v882_v59 = vmul.f32 0.25, %v869_v37 }
 0x406   :  { %v6907_v15 = vpop.eup %5941  ;;  %v1203_v16 = vmul.f32 1.442695, %v1192_v12  ;;  %v1197_v19 = vmul.f32 1.442695, %v1189_v58 }
 0x407   :  { %v950_v22 = vsel %vm620_vm15, %v6907_v15, 0.0  ;;  %v6945_v2 = vadd.f32 %v882_v59, %v6758_v4 }
 0x408   :  { %5943 = vpow2.f32 %v1203_v16  ;;  %951 = vadd.xlane.f32.xlu0 %v950_v22 }
 0x409   :  { %5945 = vpow2.f32 %v1197_v19  ;;  %v908_v12 = vsel %vm620_vm15, %v6945_v2, -inf }
 0x40b   :  { %v1173_v20 = vpop.xlane.xlu2 %1172  ;;  %v6961_v22 = vpop.xlane.xlu0 %1458 }
 0x40c   :  { %v1191_v28 = vsub.f32 %v6834_v25, %v1173_v20  ;;  %v872_v52 = vpop.f32.mrf.mxu3 }
 0x40d   :  { %v883_v8 = vmul.f32 0.25, %v872_v52 }
 0x40e   :  { %v6912_v31 = vpop.eup %5943  ;;  %v1201_v39 = vmul.f32 1.442695, %v1191_v28 }
 0x40f   :  { %v6914_v23 = vpop.eup %5945  ;;  %v1222_v33 = vsel %vm620_vm15, %v6912_v31, 0.0  ;;  %v6952_v58 = vadd.f32 %v883_v8, %v6758_v4 }
 0x410   :  { %1223 = vadd.xlane.f32.xlu0 %v1222_v33  ;;  %v1213_v38 = vsel %vm620_vm15, %v6914_v23, 0.0  ;;  %5947 = vpow2.f32 %v1201_v39 }
 0x411   :  { %1214 = vadd.xlane.f32.xlu1 %v1213_v38  ;;  %v911_v19 = vsel %vm620_vm15, %v6952_v58, -inf }
 0x413   :  { %v6963_v28 = vpop.xlane.xlu2 %1461 }
 0x414   :  { %v874_v3 = vpop.f32.mrf.mxu3 }
 0x415   :  { %v884_v7 = vmul.f32 0.25, %v874_v3 }
 0x416   :  { %v6923_v25 = vpop.eup %5947 }
 0x417   :  { %v1219_v50 = vsel %vm620_vm15, %v6923_v25, 0.0  ;;  %v6955_v16 = vadd.f32 %v884_v7, %v6758_v4 }
 0x418   :  { %1220 = vadd.xlane.f32.xlu2 %v1219_v50 }
 0x419   :  { %637 = vmax.xlane.f32.xlu1 %v636_v53  ;;  %v914_v10 = vsel %vm620_vm15, %v6955_v16, -inf  ;;  %v608_v53 = vmul.f32 0.25, %v6884_v36 }
 0x41b   :  { %v6966_v38 = vpop.xlane.xlu2 %1464 }
 0x41c   :  { %v1139_v3 = vpop.f32.mrf.mxu3 }
 0x420   :  { %640 = vmax.xlane.f32.xlu2 %v639_v60 }
 0x421   :  { %643 = vmax.xlane.f32.xlu1 %v642_v11  ;;  %v6973_v11 = vadd.f32 %v608_v53, %v6758_v4 }
 0x423   :  { %v6970_v60 = vpop.xlane.xlu2 %1467 }
 0x424   :  { %1563 = vrot.lane.b32.xlu0 %v6666_v46, %s6279_s28 }
 0x428   :  { %906 = vmax.xlane.f32.xlu2 %v905_v18 }
 0x429   :  { %909 = vmax.xlane.f32.xlu1 %v908_v12 }
 0x430   :  { %912 = vmax.xlane.f32.xlu2 %v911_v19 }
 0x431   :  { %915 = vmax.xlane.f32.xlu1 %v914_v10 }
 0x432   :  { %v671_v20 = vpop.xlane.xlu1 %670 }
 0x433   :  { %5949 = vrcp.f32 %v671_v20 }
 0x439   :  { %v5950_v33 = vpop.eup %5949 }
 0x43a   :  { %v674_v39 = vpop.xlane.xlu0 %673  ;;  %v701_v35 = vmul.f32 %v5950_v33, %v6860_v63  ;;  %v1153_v63 = vmul.f32 0.25, %v1139_v3 }
 0x43b   :  { %5951 = vrcp.f32 %v674_v39 }
 0x43c   :  { %v709_v42 = vpack.c.bf16 %v701_v35, %v701_v35  ;;  %v6981_v8 = vadd.f32 %v1153_v63, %v6758_v4 }
 0x43e   :  { %v721_v52 = vunpack.c.l.b16 %v709_v42  ;;  %v1177_v18 = vsel %vm620_vm15, %v6981_v8, -inf }
 0x441   :  { %v5952_v37 = vpop.eup %5951 }
 0x442   :  { %v702_v43 = vmul.f32 %v5952_v37, %v6865_v5  ;;  %v633_v5 = vsel %vm620_vm15, %v6973_v11, -inf }
 0x444   :  { %v710_v50 = vpack.c.bf16 %v702_v43, %v702_v43 }
 0x446   :  { %v722_v47 = vunpack.c.l.b16 %v710_v50 }
 0x448   :  { %v725_v59 = vpack.c.b16 %v722_v47, %v721_v52  ;;  %v6990_v47 = vpop.f32.mrf.mxu3 }
 0x44a   :  { %5374 = vmatmul.msk.bf16.vlgmr.msrb.gmra.mxu0 %vm620_vm15, %v725_v59 }
 0x44b   :  { %1303 = vmatpush.bf16.msrb.mxu0 %v6668_v48  ;;  %v943_v36 = vpop.xlane.xlu2 %942 }
 0x44d   :  { %v1566_v53 = vpop.permute.xlu0 %1565 }
 0x44e   :  { %634 = vmax.xlane.f32.xlu0 %v633_v5 }
 0x44f   :  { %1304 = vmatpush.bf16.msrb.mxu0 %v6666_v46 }
 0x453   :  { %v946_v7 = vpop.xlane.xlu1 %945  ;;  %v677_v12 = vpop.xlane.xlu2 %676 }
 0x454   :  { %5953 = vrcp.f32 %v677_v12 }
 0x456   :  { %1178 = vmax.xlane.f32.xlu0 %v1177_v18 }
 0x45a   :  { %v5954_v10 = vpop.eup %5953 }
 0x45b   :  { %v949_v19 = vpop.xlane.xlu1 %948  ;;  %v703_v20 = vmul.f32 %v5954_v10, %v6879_v34 }
 0x45d   :  { %v711_v33 = vpack.c.bf16 %v703_v20, %v703_v20 }
 0x45f   :  { %v723_v37 = vunpack.c.l.b16 %v711_v33 }
 0x463   :  { %v680_v48 = vpop.xlane.xlu1 %679 }
 0x464   :  { %5955 = vrcp.f32 %v680_v48 }
 0x465   :  { %5957 = vrcp.f32 %v946_v7 }
 0x466   :  { %5959 = vrcp.f32 %v943_v36  ;;  %v6994_v36 = vpop.f32.mrf.mxu3 }
 0x46a   :  { %v5956_v39 = vpop.eup %5955  ;;  %768 = vrot.lane.b32.xlu0 %v6702_v6, %s6283_s20 }
 0x46b   :  { %v704_v46 = vmul.f32 %v5956_v39, %v6895_v54  ;;  %v5958_v50 = vpop.eup %5957 }
 0x46c   :  { %v5960_v52 = vpop.eup %5959  ;;  %v974_v34 = vmul.f32 %v5958_v50, %v6882_v26 }
 0x46d   :  { %v712_v35 = vpack.c.bf16 %v704_v46, %v704_v46  ;;  %v973_v59 = vmul.f32 %v5960_v52, %v6873_v27 }
 0x46e   :  { %v982_v3 = vpack.c.bf16 %v974_v34, %v974_v34  ;;  %v1146_v39 = vpop.f32.mrf.mxu3 }
 0x46f   :  { %v724_v42 = vunpack.c.l.b16 %v712_v35  ;;  %v981_v54 = vpack.c.bf16 %v973_v59, %v973_v59  ;;  %v1156_v33 = vmul.f32 0.25, %v1146_v39 }
 0x470   :  { %v994_v5 = vunpack.c.l.b16 %v982_v3 }
 0x471   :  { %v726_v43 = vpack.c.b16 %v724_v42, %v723_v37  ;;  %v993_v7 = vunpack.c.l.b16 %v981_v54 }
 0x473   :  { %5375 = vmatmul.msk.bf16.gmra.mxu0 %vm620_vm15, %v726_v43  ;;  %v997_v18 = vpack.c.b16 %v994_v5, %v993_v7  ;;  %v1218_v10 = vpop.xlane.xlu2 %1217  ;;  %v1483_v7 = vsub.f32 %v6849_v44, %v6966_v38 }
 0x47b   :  { %v952_v63 = vpop.xlane.xlu0 %951 }
 0x47c   :  { %5961 = vrcp.f32 %v952_v63 }
 0x47d   :  { %5963 = vrcp.f32 %v949_v19 }
 0x482   :  { %v5962_v12 = vpop.eup %5961 }
 0x483   :  { %5382 = vmatmul.msk.bf16.vlgmr.msra.gmra.mxu0 %vm620_vm15, %v997_v18  ;;  %v5964_v48 = vpop.eup %5963  ;;  %v976_v26 = vmul.f32 %v5962_v12, %v6907_v15  ;;  %v1224_v50 = vpop.xlane.xlu0 %1223  ;;  %v7003_v15 = vadd.f32 %v1156_v33, %v6758_v4 }
 0x484   :  { %1581 = vmatpush.bf16.msra.mxu0 %v1566_v53  ;;  %v1215_v20 = vpop.xlane.xlu1 %1214  ;;  %v975_v27 = vmul.f32 %v5964_v48, %v6891_v49  ;;  %v1481_v53 = vsub.f32 %v6837_v14, %v6961_v22 }
 0x485   :  { %v984_v46 = vpack.c.bf16 %v976_v26, %v976_v26  ;;  %5965 = vrcp.f32 %v1215_v20  ;;  %v1493_v26 = vmul.f32 1.442695, %v1483_v7 }
 0x486   :  { %v983_v35 = vpack.c.bf16 %v975_v27, %v975_v27  ;;  %5967 = vrcp.f32 %v1218_v10  ;;  %v1489_v3 = vmul.f32 1.442695, %v1481_v53  ;;  %v7016_v10 = vpop.f32.mrf.mxu3 }
 0x487   :  { %v996_v43 = vunpack.c.l.b16 %v984_v46 }
 0x488   :  { %v995_v34 = vunpack.c.l.b16 %v983_v35 }
 0x48a   :  { %v998_v49 = vpack.c.b16 %v996_v43, %v995_v34 }
 0x48b   :  { %v1221_v37 = vpop.xlane.xlu2 %1220  ;;  %v5966_v59 = vpop.eup %5965 }
 0x48c   :  { %v638_v19 = vpop.xlane.xlu1 %637  ;;  %v5968_v54 = vpop.eup %5967  ;;  %v1245_v5 = vmul.f32 %v5966_v59, %v6914_v23  ;;  %v1154_v59 = vmul.f32 0.25, %v6990_v47 }
 0x48d   :  { %v650_v42 = vsub.f32 %v6921_v40, %v638_v19  ;;  %v1186_v40 = vsel %vm620_vm15, %v7003_v15, -inf  ;;  %v1246_v18 = vmul.f32 %v5968_v54, %v6901_v61 }
 0x48e   :  { %v1253_v20 = vpack.c.bf16 %v1245_v5, %v1245_v5  ;;  %v7022_v19 = vpop.f32.mrf.mxu3 }
 0x48f   :  { %v663_v52 = vmul.f32 1.442695, %v650_v42  ;;  %v1254_v23 = vpack.c.bf16 %v1246_v18, %v1246_v18 }
 0x490   :  { %v1273_v46 = vunpack.c.l.b16 %v1253_v20 }
 0x491   :  { %5969 = vpow2.f32 %v663_v52  ;;  %v1274_v44 = vunpack.c.l.b16 %v1254_v23 }
 0x492   :  { %5971 = vpow2.f32 %v1489_v3 }
 0x493   :  { %5383 = vmatmul.msk.bf16.gmra.mxu0 %vm620_vm15, %v998_v49  ;;  %v641_v63 = vpop.xlane.xlu2 %640  ;;  %5973 = vrcp.f32 %v1221_v37  ;;  %v1277_v38 = vpack.c.b16 %v1274_v44, %v1273_v46 }
 0x494   :  { %1187 = vmax.xlane.f32.xlu0 %v1186_v40  ;;  %v644_v12 = vpop.xlane.xlu1 %643  ;;  %5975 = vrcp.f32 %v1224_v50  ;;  %v651_v52 = vsub.f32 %v6930_v56, %v641_v63 }
 0x495   :  { %5977 = vpow2.f32 %v1493_v26  ;;  %v652_v56 = vsub.f32 %v6933_v62, %v644_v12 }
 0x496   :  { %v1564_v14 = vpop.permute.xlu0 %1563  ;;  %v665_v54 = vmul.f32 1.442695, %v651_v52 }
 0x497   :  { %v7009_v22 = vpop.eup %5969  ;;  %1582 = vmatpush.bf16.msra.mxu0 %v1564_v14  ;;  %v667_v23 = vmul.f32 1.442695, %v652_v56 }
 0x498   :  { %v684_v48 = vsel %vm620_vm15, %v7009_v22, 0.0  ;;  %v7018_v39 = vpop.eup %5971 }
 0x499   :  { %685 = vadd.xlane.f32.xlu1 %v684_v48  ;;  %v1505_v61 = vsel %vm620_vm15, %v7018_v39, 0.0  ;;  %v5974_v33 = vpop.eup %5973 }
 0x49a   :  { %v5976_v42 = vpop.eup %5975  ;;  %v1247_v50 = vmul.f32 %v5974_v33, %v6923_v25  ;;  %v1436_v25 = vpop.f32.mrf.mxu3 }
 0x49b   :  { %v907_v27 = vpop.xlane.xlu2 %906  ;;  %v7025_v43 = vpop.eup %5977  ;;  %v1248_v49 = vmul.f32 %v5976_v42, %v6912_v31  ;;  %v1447_v18 = vmul.f32 0.25, %v1436_v25 }
 0x49c   :  { %v910_v35 = vpop.xlane.xlu1 %909  ;;  %v1511_v3 = vsel %vm620_vm15, %v7025_v43, 0.0  ;;  %v1255_v40 = vpack.c.bf16 %v1247_v50, %v1247_v50 }
 0x49d   :  { %v1256_v5 = vpack.c.bf16 %v1248_v49, %v1248_v49  ;;  %v7047_v62 = vadd.f32 %v1447_v18, %v6758_v4 }
 0x49e   :  { %v1275_v7 = vunpack.c.l.b16 %v1255_v40 }
 0x49f   :  { %v1276_v47 = vunpack.c.l.b16 %v1256_v5  ;;  %v1475_v44 = vsel %vm620_vm15, %v7047_v62, -inf }
 0x4a1   :  { %1506 = vadd.xlane.f32.xlu1 %v1505_v61  ;;  %v1278_v26 = vpack.c.b16 %v1276_v47, %v1275_v7 }
 0x4a3   :  { %5390 = vmatmul.msk.bf16.vlgmr.msrb.gmra.mxu0 %vm620_vm15, %v1277_v38  ;;  %v913_v37 = vpop.xlane.xlu2 %912 }
 0x4a4   :  { %v923_v53 = vsub.f32 %v6952_v58, %v913_v37  ;;  %v916_v14 = vpop.xlane.xlu1 %915  ;;  %v7035_v58 = vadd.f32 %v1154_v59, %v6758_v4  ;;  %v922_v37 = vsub.f32 %v6945_v2, %v910_v35 }
 0x4a5   :  { %v924_v31 = vsub.f32 %v6955_v16, %v916_v14  ;;  %v921_v16 = vsub.f32 %v6942_v1, %v907_v27 }
 0x4a6   :  { %v937_v34 = vmul.f32 1.442695, %v923_v53  ;;  %v1180_v20 = vsel %vm620_vm15, %v7035_v58, -inf  ;;  %v935_v52 = vmul.f32 1.442695, %v922_v37 }
 0x4a7   :  { %v939_v46 = vmul.f32 1.442695, %v924_v31  ;;  %v933_v38 = vmul.f32 1.442695, %v921_v16 }
 0x4a8   :  { %5979 = vpow2.f32 %v937_v34  ;;  %v1482_v34 = vsub.f32 %v6844_v32, %v6963_v28 }
 0x4a9   :  { %1512 = vadd.xlane.f32.xlu1 %v1511_v3  ;;  %5981 = vpow2.f32 %v665_v54 }
 0x4aa   :  { %5983 = vpow2.f32 %v667_v23  ;;  %v1491_v2 = vmul.f32 1.442695, %v1482_v34 }
 0x4ab   :  { %5985 = vpow2.f32 %v939_v46 }
 0x4ac   :  { %5987 = vpow2.f32 %v933_v38 }
 0x4ae   :  { %v7038_v63 = vpop.eup %5979 }
 0x4af   :  { %v959_v48 = vsel %vm620_vm15, %v7038_v63, 0.0  ;;  %v7049_v12 = vpop.eup %5981 }
 0x4b0   :  { %960 = vadd.xlane.f32.xlu0 %v959_v48  ;;  %v687_v61 = vsel %vm620_vm15, %v7049_v12, 0.0  ;;  %v7056_v33 = vpop.eup %5983 }
 0x4b1   :  { %1181 = vmax.xlane.f32.xlu1 %v1180_v20  ;;  %v7058_v42 = vpop.eup %5985  ;;  %v690_v27 = vsel %vm620_vm15, %v7056_v33, 0.0  ;;  %v1446_v20 = vmul.f32 0.25, %v7022_v19 }
 0x4b2   :  { %v962_v1 = vsel %vm620_vm15, %v7058_v42, 0.0  ;;  %v7068_v59 = vpop.eup %5987 }
 0x4b3   :  { %5391 = vmatmul.msk.bf16.gmra.mxu0 %vm620_vm15, %v1278_v26  ;;  %v953_v35 = vsel %vm620_vm15, %v7068_v59, 0.0  ;;  %v7105_v46 = vadd.f32 %v1446_v20, %v6758_v4 }
 0x4b8   :  { %1476 = vmax.xlane.f32.xlu0 %v1475_v44  ;;  %v1472_v44 = vsel %vm620_vm15, %v7105_v46, -inf }
 0x4b9   :  { %688 = vadd.xlane.f32.xlu1 %v687_v61  ;;  %v1155_v61 = vmul.f32 0.25, %v6994_v36 }
 0x4c0   :  { %963 = vadd.xlane.f32.xlu0 %v962_v1 }
 0x4c1   :  { %691 = vadd.xlane.f32.xlu1 %v690_v27  ;;  %v635_v53 = vpop.xlane.xlu0 %634  ;;  %v1445_v27 = vmul.f32 0.25, %v7016_v10 }
 0x4c2   :  { %v649_v50 = vsub.f32 %v6973_v11, %v635_v53  ;;  %v1484_v11 = vsub.f32 %v6854_v29, %v6970_v60 }
 0x4c4   :  { %v661_v49 = vmul.f32 1.442695, %v649_v50  ;;  %v1495_v28 = vmul.f32 1.442695, %v1484_v11  ;;  %v7121_v50 = vadd.f32 %v1445_v27, %v6758_v4 }
 0x4c6   :  { %5989 = vpow2.f32 %v661_v49  ;;  %v1469_v49 = vsel %vm620_vm15, %v7121_v50, -inf }
 0x4c7   :  { %5991 = vpow2.f32 %v935_v52  ;;  %v7090_v60 = vpop.f32.mrf.mxu0 }
 0x4c8   :  { %5993 = vpow2.f32 %v1491_v2 }
 0x4c9   :  { %954 = vadd.xlane.f32.xlu1 %v953_v35  ;;  %5995 = vpow2.f32 %v1495_v28  ;;  %v1179_v18 = vpop.xlane.xlu0 %1178 }
 0x4ca   :  { %v1193_v48 = vsub.f32 %v6981_v8, %v1179_v18  ;;  %v7113_v8 = vadd.f32 %v1155_v61, %v6758_v4 }
 0x4cc   :  { %v7072_v3 = vpop.eup %5989  ;;  %v1205_v23 = vmul.f32 1.442695, %v1193_v48  ;;  %v1183_v53 = vsel %vm620_vm15, %v7113_v8, -inf }
 0x4cd   :  { %v7076_v40 = vpop.eup %5991  ;;  %v681_v32 = vsel %vm620_vm15, %v7072_v3, 0.0 }
 0x4ce   :  { %682 = vadd.xlane.f32.xlu2 %v681_v32  ;;  %v956_v54 = vsel %vm620_vm15, %v7076_v40, 0.0  ;;  %v7082_v5 = vpop.eup %5993  ;;  %5997 = vpow2.f32 %v1205_v23 }
 0x4cf   :  { %v1508_v14 = vsel %vm620_vm15, %v7082_v5, 0.0  ;;  %v7086_v25 = vpop.eup %5995  ;;  %v7092_v7 = vpop.f32.mrf.mxu0 }
 0x4d0   :  { %v1514_v29 = vsel %vm620_vm15, %v7086_v25, 0.0 }
 0x4d1   :  { %957 = vadd.xlane.f32.xlu1 %v956_v54 }
 0x4d4   :  { %v7110_v38 = vpop.eup %5997 }
 0x4d5   :  { %v1225_v19 = vsel %vm620_vm15, %v7110_v38, 0.0 }
 0x4d6   :  { %1509 = vadd.xlane.f32.xlu2 %v1508_v14 }
 0x4de   :  { %1515 = vadd.xlane.f32.xlu2 %v1514_v29 }
 0x4ea   :  { %1042 = vrot.lane.b32.xlu1 %v6727_v41, %s9022_s0 }
 0x4f0   :  { %v7096_v56 = vpop.f32.mrf.mxu0 }
 0x4f6   :  { %770 = vrot.lane.b32.xlu2 %v6727_v41, %s6283_s20 }
 0x4f8   :  { %v7100_v31 = vpop.f32.mrf.mxu0 }
 0x500   :  { %v1020_v47 = vpop.f32.mrf.mxu0 }
 0x508   :  { %v1022_v16 = vpop.f32.mrf.mxu0 }
 0x509   :  { %v5770_v18 = vpack.i.bf16 %v1022_v16, %v1020_v47  ;;  %v769_v47 = vpop.permute.xlu0 %768 }
 0x50c   :  { %v686_v26 = vpop.xlane.xlu1 %685 }
 0x510   :  { %v1025_v37 = vpop.f32.mrf.mxu0 }
 0x514   :  { %1473 = vmax.xlane.f32.xlu1 %v1472_v44  ;;  %v1507_v41 = vpop.xlane.xlu1 %1506 }
 0x518   :  { %v1027_v36 = vpop.f32.mrf.mxu0 }
 0x519   :  { %v5775_v32 = vpack.i.bf16 %v1027_v36, %v1025_v37 }
 0x51c   :  { %v1513_v1 = vpop.xlane.xlu1 %1512  ;;  %1226 = vadd.xlane.f32.xlu1 %v1225_v19 }
 0x51f   :  { %1184 = vmax.xlane.f32.xlu2 %v1183_v53 }
 0x520   :  { %v1306_v35 = vpop.f32.mrf.mxu0 }
 0x524   :  { %v1182_v52 = vpop.xlane.xlu1 %1181 }
 0x525   :  { %v1194_v34 = vsub.f32 %v7035_v58, %v1182_v52 }
 0x527   :  { %v1207_v2 = vmul.f32 1.442695, %v1194_v34  ;;  %1470 = vmax.xlane.f32.xlu2 %v1469_v49 }
 0x528   :  { %v1308_v28 = vpop.f32.mrf.mxu0 }
 0x529   :  { %5999 = vpow2.f32 %v1207_v2  ;;  %v5780_v14 = vpack.i.bf16 %v1308_v28, %v1306_v35 }
 0x52a   :  { %6001 = vrcp.f32 %v1507_v41 }
 0x52c   :  { %v689_v54 = vpop.xlane.xlu1 %688 }
 0x52f   :  { %v7126_v11 = vpop.eup %5999 }
 0x530   :  { %v1228_v10 = vsel %vm620_vm15, %v7126_v11, 0.0  ;;  %v6002_v20 = vpop.eup %6001 }
 0x531   :  { %1229 = vadd.xlane.f32.xlu0 %v1228_v10  ;;  %v1537_v44 = vmul.f32 %v6002_v20, %v7018_v39 }
 0x533   :  { %v1545_v19 = vpack.c.bf16 %v1537_v44, %v1537_v44 }
 0x534   :  { %v692_v29 = vpop.xlane.xlu1 %691 }
 0x535   :  { %5776 = vrot.lane.b32.xlu1 %v5775_v32, %s6282_s30  ;;  %v1188_v32 = vpop.xlane.xlu0 %1187 }
 0x53c   :  { %v7135_v23 = vpop.xlane.xlu1 %954 }
 0x53d   :  { %5781 = vrot.lane.b32.xlu1 %v5780_v14, %s9024_s2 }
 0x53f   :  { %1040 = vrot.lane.b32.xlu2 %v6702_v6, %s9022_s0 }
 0x541   :  { %v683_v58 = vpop.xlane.xlu2 %682 }
 0x542   :  { %6003 = vrcp.f32 %v683_v58 }
 0x544   :  { %v958_v34 = vpop.xlane.xlu1 %957 }
 0x545   :  { %5771 = vrot.lane.b32.xlu0 %v5770_v18, %s6282_s30 }
 0x548   :  { %v6004_v61 = vpop.eup %6003 }
 0x549   :  { %v1510_v48 = vpop.xlane.xlu2 %1509  ;;  %v705_v16 = vmul.f32 %v6004_v61, %v7072_v3 }
 0x54a   :  { %6005 = vrcp.f32 %v1510_v48 }
 0x54b   :  { %6007 = vrcp.f32 %v686_v26  ;;  %v1557_v26 = vunpack.c.l.b16 %v1545_v19  ;;  %v713_v49 = vpack.c.bf16 %v705_v16, %v705_v16 }
 0x54d   :  { %v762_v28 = vunpack.c.l.b16 %v713_v49  ;;  %v1311_v49 = vpop.f32.mrf.mxu0 }
 0x550   :  { %v6006_v37 = vpop.eup %6005 }
 0x551   :  { %v1538_v6 = vmul.f32 %v6006_v37, %v7082_v5  ;;  %v1516_v27 = vpop.xlane.xlu2 %1515  ;;  %v6008_v53 = vpop.eup %6007 }
 0x552   :  { %6009 = vrcp.f32 %v1516_v27  ;;  %v706_v36 = vmul.f32 %v6008_v53, %v7009_v22  ;;  %v1196_v22 = vsub.f32 %v7003_v15, %v1188_v32 }
 0x553   :  { %v1546_v41 = vpack.c.bf16 %v1538_v6, %v1538_v6  ;;  %6011 = vrcp.f32 %v1513_v1  ;;  %v1438_v1 = vpop.f32.mrf.mxu3 }
 0x554   :  { %v714_v35 = vpack.c.bf16 %v706_v36, %v706_v36  ;;  %6013 = vrcp.f32 %v692_v29  ;;  %v1448_v48 = vmul.f32 0.25, %v1438_v1  ;;  %v1211_v37 = vmul.f32 1.442695, %v1196_v22 }
 0x555   :  { %v1558_v52 = vunpack.c.l.b16 %v1546_v41  ;;  %6015 = vrcp.f32 %v689_v54 }
 0x556   :  { %v763_v14 = vunpack.c.l.b16 %v714_v35  ;;  %6017 = vpow2.f32 %v1211_v37 }
 0x557   :  { %v1561_v39 = vpack.c.b16 %v1558_v52, %v1557_v26  ;;  %6019 = vrcp.f32 %v958_v34 }
 0x558   :  { %v6010_v2 = vpop.eup %6009  ;;  %v766_v20 = vpack.c.b16 %v763_v14, %v762_v28  ;;  %6021 = vrcp.f32 %v7135_v23 }
 0x559   :  { %5398 = vmatmul.msk.bf16.vlgmr.msra.gmra.mxu0 %vm620_vm15, %v1561_v39  ;;  %v771_v5 = vpop.permute.xlu2 %770  ;;  %v6012_v10 = vpop.eup %6011  ;;  %v1540_v3 = vmul.f32 %v6010_v2, %v7086_v25  ;;  %v7147_v25 = vadd.f32 %v1448_v48, %v6758_v4 }
 0x55a   :  { %786 = vmatpush.bf16.msrb.mxu1 %v771_v5  ;;  %v1539_v58 = vmul.f32 %v6012_v10, %v7025_v43  ;;  %v6014_v61 = vpop.eup %6013  ;;  %v961_v2 = vpop.xlane.xlu0 %960 }
 0x55b   :  { %v1548_v44 = vpack.c.bf16 %v1540_v3, %v1540_v3  ;;  %v6016_v19 = vpop.eup %6015  ;;  %v708_v15 = vmul.f32 %v6014_v61, %v7056_v33  ;;  %v1478_v27 = vsel %vm620_vm15, %v7147_v25, -inf }
 0x55c   :  { %v1043_v18 = vpop.permute.xlu1 %1042  ;;  %v1547_v29 = vpack.c.bf16 %v1539_v58, %v1539_v58  ;;  %v707_v6 = vmul.f32 %v6016_v19, %v7049_v12  ;;  %v7154_v41 = vpop.eup %6017 }
 0x55d   :  { %v1560_v54 = vunpack.c.l.b16 %v1548_v44  ;;  %v1234_v33 = vsel %vm620_vm15, %v7154_v41, 0.0  ;;  %v1313_v12 = vpop.f32.mrf.mxu0  ;;  %v6020_v32 = vpop.eup %6019 }
 0x55e   :  { %787 = vmatpush.bf16.msrb.mxu1 %v769_v47  ;;  %v1559_v43 = vunpack.c.l.b16 %v1547_v29  ;;  %v716_v47 = vpack.c.bf16 %v708_v15, %v708_v15  ;;  %v715_v16 = vpack.c.bf16 %v707_v6, %v707_v6  ;;  %v5785_v39 = vpack.i.bf16 %v1313_v12, %v1311_v49  ;;  %v6022_v3 = vpop.eup %6021 }
 0x55f   :  { %v978_v1 = vmul.f32 %v6020_v32, %v7076_v40  ;;  %v977_v22 = vmul.f32 %v6022_v3, %v7068_v59 }
 0x560   :  { %v1562_v53 = vpack.c.b16 %v1560_v54, %v1559_v43  ;;  %v765_v36 = vunpack.c.l.b16 %v716_v47  ;;  %v764_v26 = vunpack.c.l.b16 %v715_v16 }
 0x561   :  { %5376 = vmatmul.msk.bf16.vlgmr.msrb.gmra.mxu1 %vm620_vm15, %v766_v20  ;;  %v985_v34 = vpack.c.bf16 %v977_v22, %v977_v22 }
 0x562   :  { %1058 = vmatpush.bf16.msra.mxu1 %v1043_v18  ;;  %v767_v52 = vpack.c.b16 %v765_v36, %v764_v26  ;;  %v1477_v35 = vpop.xlane.xlu0 %1476  ;;  %v986_v18 = vpack.c.bf16 %v978_v1, %v978_v1 }
 0x563   :  { %v1034_v20 = vunpack.c.l.b16 %v985_v34 }
 0x568   :  { %1479 = vmax.xlane.f32.xlu2 %v1478_v27 }
 0x569   :  { %5399 = vmatmul.msk.bf16.gmra.mxu0 %vm620_vm15, %v1562_v53 }
 0x56a   :  { %v964_v58 = vpop.xlane.xlu0 %963 }
 0x56f   :  { %1235 = vadd.xlane.f32.xlu0 %v1234_v33 }
 0x571   :  { %5377 = vmatmul.msk.bf16.gmra.mxu1 %vm620_vm15, %v767_v52 }
 0x580   :  { %5786 = vrot.lane.b32.xlu2 %v5785_v39, %s9024_s2  ;;  %v1487_v39 = vsub.f32 %v7047_v62, %v1477_v35 }
 0x587   :  { %v1474_v40 = vpop.xlane.xlu1 %1473 }
 0x58f   :  { %v1227_v43 = vpop.xlane.xlu1 %1226 }
 0x592   :  { %v1185_v5 = vpop.xlane.xlu2 %1184 }
 0x593   :  { %v1195_v10 = vsub.f32 %v7113_v8, %v1185_v5  ;;  %v1035_v8 = vunpack.c.l.b16 %v986_v18 }
 0x595   :  { %v1209_v28 = vmul.f32 1.442695, %v1195_v10  ;;  %v1038_v61 = vpack.c.b16 %v1035_v8, %v1034_v20 }
 0x597   :  { %6023 = vpow2.f32 %v1209_v28 }
 0x598   :  { %6025 = vrcp.f32 %v964_v58 }
 0x599   :  { %6027 = vrcp.f32 %v961_v2  ;;  %v1501_v2 = vmul.f32 1.442695, %v1487_v39 }
 0x59a   :  { %v1471_v14 = vpop.xlane.xlu2 %1470 }
 0x59b   :  { %v1485_v62 = vsub.f32 %v7121_v50, %v1471_v14  ;;  %v5720_v50 = vld [vmem:[%s9005_s7 + $0x18] sm:$0xff] }
 0x59c   :  { %1811 = vmatpush.bf16.msra.mxu2 %v5720_v50 }
 0x59d   :  { %v7164_v48 = vpop.eup %6023  ;;  %v1497_v35 = vmul.f32 1.442695, %v1485_v62 }
 0x59e   :  { %v1231_v23 = vsel %vm620_vm15, %v7164_v48, 0.0  ;;  %v6026_v59 = vpop.eup %6025 }
 0x59f   :  { %1232 = vadd.xlane.f32.xlu1 %v1231_v23  ;;  %v6028_v37 = vpop.eup %6027  ;;  %v980_v29 = vmul.f32 %v6026_v59, %v7058_v42  ;;  %v1486_v23 = vsub.f32 %v7105_v46, %v1474_v40 }
 0x5a0   :  { %v979_v19 = vmul.f32 %v6028_v37, %v7038_v63 }
 0x5a1   :  { %v988_v15 = vpack.c.bf16 %v980_v29, %v980_v29  ;;  %v1499_v14 = vmul.f32 1.442695, %v1486_v23  ;;  %v5719_v29 = vld [vmem:[%s9005_s7 + $0x10] sm:$0xff] }
 0x5a2   :  { %v1041_v44 = vpop.permute.xlu2 %1040  ;;  %v987_v6 = vpack.c.bf16 %v979_v19, %v979_v19  ;;  %1812 = vmatpush.bf16.msra.mxu2 %v5719_v29 }
 0x5a3   :  { %1059 = vmatpush.bf16.msra.mxu1 %v1041_v44  ;;  %v1037_v27 = vunpack.c.l.b16 %v988_v15 }
 0x5a4   :  { %v1230_v54 = vpop.xlane.xlu0 %1229  ;;  %v1036_v53 = vunpack.c.l.b16 %v987_v6 }
 0x5a5   :  { %6029 = vrcp.f32 %v1230_v54 }
 0x5a6   :  { %5384 = vmatmul.msk.bf16.vlgmr.msra.gmra.mxu1 %vm620_vm15, %v1038_v61  ;;  %6031 = vrcp.f32 %v1227_v43  ;;  %v1039_v47 = vpack.c.b16 %v1037_v27, %v1036_v53  ;;  %v5718_v43 = vld [vmem:[%s9005_s7 + $0x8] sm:$0xff] }
 0x5a7   :  { %1350 = vmatpush.bf16.msrb.mxu1 %v6735_v51  ;;  %6033 = vpow2.f32 %v1501_v2  ;;  %v7189_v22 = vpop.permute.xlu1 %5776  ;;  %1813 = vmatpush.bf16.msra.mxu2 %v5718_v43 }
 0x5a8   :  { %6035 = vpow2.f32 %v1497_v35 }
 0x5ab   :  { %1351 = vmatpush.bf16.msrb.mxu1 %v6716_v24  ;;  %v6030_v16 = vpop.eup %6029 }
 0x5ac   :  { %v6032_v36 = vpop.eup %6031  ;;  %v1250_v26 = vmul.f32 %v6030_v16, %v7126_v11 }
 0x5ad   :  { %v1249_v63 = vmul.f32 %v6032_v36, %v7110_v38  ;;  %v7180_v10 = vpop.eup %6033 }
 0x5ae   :  { %v1258_v42 = vpack.c.bf16 %v1250_v26, %v1250_v26  ;;  %v7191_v18 = vpop.eup %6035  ;;  %v5717_v26 = vld [vmem:[%s9005_s7] sm:$0xff] }
 0x5af   :  { %v1257_v33 = vpack.c.bf16 %v1249_v63, %v1249_v63  ;;  %v1517_v8 = vsel %vm620_vm15, %v7191_v18, 0.0  ;;  %v5782_v20 = vpop.permute.xlu1 %5781  ;;  %1814 = vmatpush.bf16.msra.mxu2 %v5717_v26 }
 0x5b0   :  { %v1321_v52 = vunpack.c.l.b16 %v1258_v42 }
 0x5b1   :  { %v1320_v49 = vunpack.c.l.b16 %v1257_v33 }
 0x5b3   :  { %v1324_v12 = vpack.c.b16 %v1321_v52, %v1320_v49 }
 0x5b6   :  { %5385 = vmatmul.msk.bf16.gmra.mxu1 %vm620_vm15, %v1039_v47 }
 0x5b7   :  { %v5772_v58 = vpop.permute.xlu0 %5771 }
 0x5b8   :  { %1606 = vrot.lane.b32.xlu1 %v6735_v51, %s6279_s28  ;;  %v1523_v51 = vsel %vm620_vm15, %v7180_v10, 0.0 }
 0x5c6   :  { %5392 = vmatmul.msk.bf16.vlgmr.msrb.gmra.mxu1 %vm620_vm15, %v1324_v12 }
 0x5d6   :  { %v1584_v5 = vpop.f32.mrf.mxu0 }
 0x5db   :  { %v1480_v61 = vpop.xlane.xlu2 %1479 }
 0x5dc   :  { %v1488_v59 = vsub.f32 %v7147_v25, %v1480_v61  ;;  %v5778_v61 = vunpack.i.l.bf16 %v7189_v22 }
 0x5de   :  { %v1586_v11 = vpop.f32.mrf.mxu0  ;;  %v7187_v1 = vpop.f32.mrf.mxu1  ;;  %v1503_v19 = vmul.f32 1.442695, %v1488_v59 }
 0x5df   :  { %v5790_v32 = vpack.i.bf16 %v1586_v11, %v1584_v5  ;;  %v5774_v5 = vunpack.i.h.bf16 %v5772_v58  ;;  %v5773_v11 = vunpack.i.l.bf16 %v5772_v58 }
 0x5e1   :  { %5791 = vrot.lane.b32.xlu2 %v5790_v32, %s9022_s0  ;;  %v1731_v32 = vsel %vm527_vm13, %v7090_v60, %v5773_v11 }
 0x5e2   :  { %1524 = vadd.xlane.f32.xlu1 %v1523_v51  ;;  %v1236_v44 = vpop.xlane.xlu0 %1235  ;;  %v5784_v51 = vunpack.i.h.bf16 %v5782_v20 }
 0x5e3   :  { %6037 = vrcp.f32 %v1236_v44  ;;  %v5787_v12 = vpop.permute.xlu2 %5786 }
 0x5e4   :  { %6039 = vpow2.f32 %v1499_v14  ;;  %v5789_v59 = vunpack.i.h.bf16 %v5787_v12 }
 0x5e6   :  { %v1589_v38 = vpop.f32.mrf.mxu0  ;;  %v7193_v34 = vpop.f32.mrf.mxu1 }
 0x5e9   :  { %v6038_v40 = vpop.eup %6037 }
 0x5ea   :  { %v1252_v54 = vmul.f32 %v6038_v40, %v7154_v41  ;;  %v7208_v15 = vpop.eup %6039 }
 0x5eb   :  { %v1520_v6 = vsel %vm620_vm15, %v7208_v15, 0.0 }
 0x5ec   :  { %v1260_v53 = vpack.c.bf16 %v1252_v54, %v1252_v54 }
 0x5ee   :  { %v1591_v28 = vpop.f32.mrf.mxu0  ;;  %v7202_v37 = vpop.f32.mrf.mxu1  ;;  %v1323_v36 = vunpack.c.l.b16 %v1260_v53 }
 0x5ef   :  { %v5795_v3 = vpack.i.bf16 %v1591_v28, %v1589_v38  ;;  %v5783_v38 = vunpack.i.l.bf16 %v5782_v20  ;;  %v5779_v20 = vunpack.i.h.bf16 %v7189_v22 }
 0x5f1   :  { %5796 = vrot.lane.b32.xlu0 %v5795_v3, %s9022_s0  ;;  %v1739_v23 = vsel %vm620_vm15, %v1731_v32, %v5783_v38  ;;  %v1734_v29 = vsel %vm527_vm13, %v7100_v31, %v5779_v20 }
 0x5f6   :  { %v7216_v47 = vpop.f32.mrf.mxu1 }
 0x60a   :  { %1518 = vadd.xlane.f32.xlu2 %v1517_v8 }
 0x612   :  { %v1233_v46 = vpop.xlane.xlu1 %1232 }
 0x613   :  { %6041 = vrcp.f32 %v1233_v46  ;;  %v5788_v46 = vunpack.i.l.bf16 %v5787_v12 }
 0x614   :  { %6043 = vpow2.f32 %v1503_v19  ;;  %v1733_v19 = vsel %vm527_vm13, %v7096_v56, %v5778_v61 }
 0x619   :  { %v6042_v25 = vpop.eup %6041 }
 0x61a   :  { %v1251_v27 = vmul.f32 %v6042_v25, %v7164_v48  ;;  %v7221_v63 = vpop.eup %6043  ;;  %v1741_v25 = vsel %vm620_vm15, %v1733_v19, %v5788_v46 }
 0x61b   :  { %1521 = vadd.xlane.f32.xlu0 %v1520_v6  ;;  %v1526_v48 = vsel %vm620_vm15, %v7221_v63, 0.0  ;;  %v1742_v6 = vsel %vm620_vm15, %v1734_v29, %v5789_v59 }
 0x61c   :  { %v1259_v16 = vpack.c.bf16 %v1251_v27, %v1251_v27 }
 0x61e   :  { %v1322_v41 = vunpack.c.l.b16 %v1259_v16 }
 0x620   :  { %v1325_v42 = vpack.c.b16 %v1323_v36, %v1322_v41 }
 0x622   :  { %1604 = vrot.lane.b32.xlu2 %v6716_v24, %s6279_s28  ;;  %5393 = vmatmul.msk.bf16.gmra.mxu1 %vm620_vm15, %v1325_v42  ;;  %v1732_v24 = vsel %vm527_vm13, %v7092_v7, %v5774_v5 }
 0x623   :  { %v1061_v33 = vpop.f32.mrf.mxu1  ;;  %1527 = vadd.xlane.f32.xlu0 %v1526_v48  ;;  %v1740_v8 = vsel %vm620_vm15, %v1732_v24, %v5784_v51 }
 0x62a   :  { %v1607_v52 = vpop.permute.xlu1 %1606 }
 0x62b   :  { %v1063_v49 = vpop.f32.mrf.mxu1  ;;  %1622 = vmatpush.bf16.msra.mxu1 %v1607_v52 }
 0x62c   :  { %v5800_v2 = vpack.i.bf16 %v1063_v49, %v1061_v33 }
 0x633   :  { %v7228_v39 = vpop.f32.mrf.mxu1 }
 0x637   :  { %5801 = vrot.lane.b32.xlu0 %v5800_v2, %s6282_s30 }
 0x63b   :  { %v5792_v28 = vpop.permute.xlu2 %5791  ;;  %v7235_v3 = vpop.f32.mrf.mxu1 }
 0x63c   :  { %v5794_v62 = vunpack.i.h.bf16 %v5792_v28  ;;  %v5793_v35 = vunpack.i.l.bf16 %v5792_v28  ;;  %v5815_v46 = vpack.i.bf16 %v7235_v3, %v7228_v39 }
 0x63e   :  { %v1747_v58 = vsel %vm123_vm0, %v1739_v23, %v5793_v35  ;;  %v1748_v44 = vsel %vm123_vm0, %v1740_v8, %v5794_v62  ;;  %v7263_v23 = vld [vmem:[%s9006_s8] ss:$0 sm:$0xff] }
 0x63f   :  { %v1755_v50 = vpack.c.bf16 %v1748_v44, %v1747_v58 }
 0x641   :  { %5418 = vmatmul.msk.bf16.vlgmr.msra.gmra.mxu2 %vm171_vm1, %v1755_v50 }
 0x643   :  { %v1353_v7 = vpop.f32.mrf.mxu1 }
 0x64b   :  { %v1355_v60 = vpop.f32.mrf.mxu1 }
 0x64c   :  { %v5805_v14 = vpack.i.bf16 %v1355_v60, %v1353_v7 }
 0x64e   :  { %5806 = vrot.lane.b32.xlu1 %v5805_v14, %s9024_s2 }
 0x655   :  { %v1525_v42 = vpop.xlane.xlu1 %1524 }
 0x663   :  { %v5797_v40 = vpop.permute.xlu0 %5796 }
 0x664   :  { %v5799_v54 = vunpack.i.h.bf16 %v5797_v40  ;;  %v5798_v43 = vunpack.i.l.bf16 %v5797_v40 }
 0x666   :  { %v1749_v27 = vsel %vm123_vm0, %v1741_v25, %v5798_v43  ;;  %v1750_v53 = vsel %vm123_vm0, %v1742_v6, %v5799_v54 }
 0x667   :  { %v1756_v22 = vpack.c.bf16 %v1750_v53, %v1749_v27 }
 0x669   :  { %5419 = vmatmul.msk.bf16.gmra.mxu2 %vm171_vm1, %v1756_v22 }
 0x67d   :  { %v1519_v16 = vpop.xlane.xlu2 %1518 }
 0x67e   :  { %6045 = vrcp.f32 %v1519_v16 }
 0x684   :  { %v6046_v36 = vpop.eup %6045 }
 0x685   :  { %v1605_v41 = vpop.permute.xlu2 %1604  ;;  %v1541_v56 = vmul.f32 %v6046_v36, %v7191_v18 }
 0x686   :  { %1623 = vmatpush.bf16.msra.mxu1 %v1605_v41 }
 0x687   :  { %v1549_v48 = vpack.c.bf16 %v1541_v56, %v1541_v56 }
 0x689   :  { %v1598_v12 = vunpack.c.l.b16 %v1549_v48 }
 0x68e   :  { %v1522_v31 = vpop.xlane.xlu0 %1521 }
 0x68f   :  { %6047 = vrcp.f32 %v1522_v31 }
 0x695   :  { %v6048_v26 = vpop.eup %6047 }
 0x696   :  { %v1542_v33 = vmul.f32 %v6048_v26, %v7208_v15  ;;  %v1528_v52 = vpop.xlane.xlu0 %1527 }
 0x697   :  { %6049 = vrcp.f32 %v1528_v52 }
 0x698   :  { %v1550_v49 = vpack.c.bf16 %v1542_v33, %v1542_v33  ;;  %6051 = vrcp.f32 %v1525_v42 }
 0x69a   :  { %v1599_v2 = vunpack.c.l.b16 %v1550_v49 }
 0x69c   :  { %v1602_v5 = vpack.c.b16 %v1599_v2, %v1598_v12 }
 0x69d   :  { %v6050_v11 = vpop.eup %6049 }
 0x69e   :  { %5400 = vmatmul.msk.bf16.vlgmr.msra.gmra.mxu1 %vm620_vm15, %v1602_v5  ;;  %v6052_v24 = vpop.eup %6051  ;;  %v1544_v32 = vmul.f32 %v6050_v11, %v7221_v63 }
 0x69f   :  { %v1543_v18 = vmul.f32 %v6052_v24, %v7180_v10  ;;  %v1358_v59 = vpop.f32.mrf.mxu1 }
 0x6a0   :  { %v1552_v51 = vpack.c.bf16 %v1544_v32, %v1544_v32 }
 0x6a1   :  { %v1551_v38 = vpack.c.bf16 %v1543_v18, %v1543_v18 }
 0x6a2   :  { %v1601_v28 = vunpack.c.l.b16 %v1552_v51 }
 0x6a3   :  { %v1600_v62 = vunpack.c.l.b16 %v1551_v38 }
 0x6a5   :  { %v1603_v15 = vpack.c.b16 %v1601_v28, %v1600_v62 }
 0x6a9   :  { %v5802_v54 = vpop.permute.xlu0 %5801 }
 0x6aa   :  { %v5804_v36 = vunpack.i.h.bf16 %v5802_v54  ;;  %v5803_v56 = vunpack.i.l.bf16 %v5802_v54 }
 0x6ac   :  { %v1736_v33 = vsel %vm527_vm13, %v7193_v34, %v5804_v36  ;;  %v1735_v52 = vsel %vm527_vm13, %v7187_v1, %v5803_v56 }
 0x6ae   :  { %5401 = vmatmul.msk.bf16.gmra.mxu1 %vm620_vm15, %v1603_v15 }
 0x6c4   :  { %v1816_v35 = vpop.f32.mrf.mxu2 }
 0x6cc   :  { %v1818_v8 = vpop.f32.mrf.mxu2 }
 0x6cd   :  { %v1819_v58 = vadd.f32 %v7263_v23, %v1818_v8 }
 0x6cf   :  { %v7267_v63 = vadd.f32 %v1819_v58, %v6421_v13 }
 0x6d1   :  { %v1849_v10 = vsel %vm171_vm1, %v7267_v63, 0.0 }
 0x6d2   :  { %1850 = vadd.xlane.f32.xlu0 %v1849_v10 }
 0x6ec   :  { %v1821_v44 = vpop.f32.mrf.mxu2 }
 0x6ed   :  { %v1822_v50 = vadd.f32 %v7263_v23, %v1821_v44 }
 0x6ef   :  { %v7273_v7 = vadd.f32 %v1822_v50, %v6428_v17  ;;  %v1360_v17 = vpop.f32.mrf.mxu1 }
 0x6f0   :  { %v5820_v16 = vpack.i.bf16 %v1360_v17, %v1358_v59 }
 0x6f1   :  { %v1852_v60 = vsel %vm171_vm1, %v7273_v7, 0.0 }
 0x6f2   :  { %1853 = vadd.xlane.f32.xlu0 %v1852_v60 }
 0x6f4   :  { %v1823_v14 = vpop.f32.mrf.mxu2 }
 0x6f5   :  { %v1824_v20 = vadd.f32 %v7263_v23, %v1823_v14 }
 0x6f7   :  { %v7279_v13 = vadd.f32 %v1824_v20, %v6435_v21  ;;  %v1817_v21 = vadd.f32 %v7263_v23, %v1816_v35 }
 0x6f9   :  { %v1855_v61 = vsel %vm171_vm1, %v7279_v13, 0.0  ;;  %v7293_v27 = vadd.f32 %v1817_v21, %v6414_v9  ;;  %v5807_v9 = vpop.permute.xlu1 %5806 }
 0x6fa   :  { %1856 = vadd.xlane.f32.xlu0 %v1855_v61  ;;  %v5809_v26 = vunpack.i.h.bf16 %v5807_v9  ;;  %v5808_v42 = vunpack.i.l.bf16 %v5807_v9 }
 0x6fb   :  { %v1846_v53 = vsel %vm171_vm1, %v7293_v27, 0.0 }
 0x6fc   :  { %v1743_v2 = vsel %vm620_vm15, %v1735_v52, %v5808_v42  ;;  %v1744_v5 = vsel %vm620_vm15, %v1736_v33, %v5809_v26  ;;  %v5722_v33 = vld [vmem:[%s9009_s11 + $0x8] sm:$0xff] }
 0x70e   :  { %5816 = vrot.lane.b32.xlu0 %v5815_v46, %s6282_s30 }
 0x71b   :  { %v1625_v40 = vpop.f32.mrf.mxu1 }
 0x723   :  { %v1627_v29 = vpop.f32.mrf.mxu1 }
 0x724   :  { %v5810_v19 = vpack.i.bf16 %v1627_v29, %v1625_v40 }
 0x726   :  { %5811 = vrot.lane.b32.xlu2 %v5810_v19, %s9022_s0 }
 0x72b   :  { %v1630_v22 = vpop.f32.mrf.mxu1 }
 0x733   :  { %v1632_v41 = vpop.f32.mrf.mxu1 }
 0x734   :  { %v5825_v31 = vpack.i.bf16 %v1632_v41, %v1630_v22 }
 0x745   :  { %v1851_v43 = vpop.xlane.xlu0 %1850 }
 0x746   :  { %v1871_v25 = vmul.f32 %v1851_v43, %v6439_v30 }
 0x748   :  { %v7290_v6 = vsub.f32 %v7267_v63, %v1871_v25 }
 0x74a   :  { %v1887_v39 = vmul.f32 %v7290_v6, %v7290_v6 }
 0x74c   :  { %v1897_v3 = vsel %vm171_vm1, %v1887_v39, 0.0 }
 0x74d   :  { %1898 = vadd.xlane.f32.xlu1 %v1897_v3 }
 0x74f   :  { %1847 = vadd.xlane.f32.xlu2 %v1846_v53 }
 0x765   :  { %v1854_v18 = vpop.xlane.xlu0 %1853 }
 0x766   :  { %v1872_v51 = vmul.f32 %v1854_v18, %v6439_v30 }
 0x767   :  { %5821 = vrot.lane.b32.xlu2 %v5820_v16, %s9024_s2 }
 0x768   :  { %v7313_v34 = vsub.f32 %v7273_v7, %v1872_v51 }
 0x76a   :  { %v1888_v1 = vmul.f32 %v7313_v34, %v7313_v34 }
 0x76c   :  { %v1900_v38 = vsel %vm171_vm1, %v1888_v1, 0.0 }
 0x76d   :  { %v1857_v28 = vpop.xlane.xlu0 %1856 }
 0x76e   :  { %v1873_v35 = vmul.f32 %v1857_v28, %v6439_v30 }
 0x76f   :  { %5826 = vrot.lane.b32.xlu2 %v5825_v31, %s9022_s0 }
 0x770   :  { %v7326_v10 = vsub.f32 %v7279_v13, %v1873_v35 }
 0x772   :  { %v1889_v14 = vmul.f32 %v7326_v10, %v7326_v10 }
 0x774   :  { %v1903_v17 = vsel %vm171_vm1, %v1889_v14, 0.0 }
 0x780   :  { %v5812_v48 = vpop.permute.xlu2 %5811  ;;  %v5817_v60 = vpop.permute.xlu0 %5816 }
 0x781   :  { %v5814_v49 = vunpack.i.h.bf16 %v5812_v48  ;;  %v5813_v12 = vunpack.i.l.bf16 %v5812_v48  ;;  %v5819_v20 = vunpack.i.h.bf16 %v5817_v60  ;;  %v5818_v61 = vunpack.i.l.bf16 %v5817_v60  ;;  %v5723_v48 = vld [vmem:[%s9009_s11 + $0x10] sm:$0xff] }
 0x783   :  { %v1751_v11 = vsel %vm123_vm0, %v1743_v2, %v5813_v12  ;;  %v1752_v24 = vsel %vm123_vm0, %v1744_v5, %v5814_v49  ;;  %v1738_v29 = vsel %vm527_vm13, %v7216_v47, %v5819_v20  ;;  %v1737_v19 = vsel %vm527_vm13, %v7202_v37, %v5818_v61  ;;  %v5721_v2 = vld [vmem:[%s9009_s11] sm:$0xff] }
 0x784   :  { %v1757_v32 = vpack.c.bf16 %v1752_v24, %v1751_v11 }
 0x786   :  { %5420 = vmatmul.msk.bf16.gmra.mxu2 %vm171_vm1, %v1757_v32 }
 0x798   :  { %1901 = vadd.xlane.f32.xlu2 %v1900_v38 }
 0x7c0   :  { %v1899_v56 = vpop.xlane.xlu1 %1898 }
 0x7c1   :  { %v1919_v26 = vmul.f32 %v1899_v56, %v6439_v30 }
 0x7c2   :  { %v1848_v62 = vpop.xlane.xlu2 %1847 }
 0x7c3   :  { %v1870_v15 = vmul.f32 %v1848_v62, %v6439_v30  ;;  %v1927_v42 = vadd.f32 1e-06, %v1919_v26 }
 0x7c5   :  { %v7321_v8 = vsub.f32 %v7293_v27, %v1870_v15  ;;  %6053 = vrsqrt.f32 %v1927_v42  ;;  %vm1950_vm3 = vweird.f32 %v1927_v42 }
 0x7c7   :  { %v1886_v58 = vmul.f32 %v7321_v8, %v7321_v8 }
 0x7c9   :  { %v1894_v44 = vsel %vm171_vm1, %v1886_v58, 0.0 }
 0x7ca   :  { %1895 = vadd.xlane.f32.xlu0 %v1894_v44  ;;  %v5822_v50 = vpop.permute.xlu2 %5821 }
 0x7cb   :  { %v5824_v59 = vunpack.i.h.bf16 %v5822_v50  ;;  %v5823_v46 = vunpack.i.l.bf16 %v5822_v50  ;;  %v6054_v52 = vpop.eup %6053 }
 0x7cc   :  { %v1945_v12 = vmul.f32 %v6054_v52, %v1927_v42  ;;  %vm1951_vm2 = vweird.f32 %v6054_v52 }
 0x7cd   :  { %v1746_v21 = vsel %vm620_vm15, %v1738_v29, %v5824_v59  ;;  %v1745_v25 = vsel %vm620_vm15, %v1737_v19, %v5823_v46  ;;  %vm1952_vm4 = vmor %vm1950_vm3, %vm1951_vm2 }
 0x7ce   :  { %v1946_v11 = vmul.f32 %v6054_v52, %v1945_v12 }
 0x7d0   :  { %v1947_v51 = vmul.f32 0.5, %v1946_v11 }
 0x7d2   :  { %1904 = vadd.xlane.f32.xlu0 %v1903_v17  ;;  %v5827_v40 = vpop.permute.xlu2 %5826  ;;  %v1948_v1 = vsub.f32 1.5, %v1947_v51  ;;  %v7372_v17 = vld [vmem:[%s9007_s9] ss:$0 sm:$0xff] }
 0x7d3   :  { %v5829_v54 = vunpack.i.h.bf16 %v5827_v40  ;;  %v5828_v43 = vunpack.i.l.bf16 %v5827_v40 }
 0x7d4   :  { %v1949_v58 = vmul.f32 %v6054_v52, %v1948_v1 }
 0x7d5   :  { %v1753_v39 = vsel %vm123_vm0, %v1745_v25, %v5828_v43  ;;  %v1754_v3 = vsel %vm123_vm0, %v1746_v21, %v5829_v54 }
 0x7d6   :  { %v1758_v53 = vpack.c.bf16 %v1754_v3, %v1753_v39  ;;  %v1953_v14 = vsel %vm1952_vm4, %v6054_v52, %v1949_v58  ;;  %v7380_v3 = vld [vmem:[%s9008_s10] ss:$0 sm:$0xff] }
 0x7d7   :  { %v2015_v40 = vmul.f32 %v1953_v14, %v7290_v6 }
 0x7d8   :  { %5421 = vmatmul.msk.bf16.gmra.mxu2 %vm171_vm1, %v1758_v53 }
 0x7d9   :  { %v2026_v25 = vmul.f32 %v7372_v17, %v2015_v40 }
 0x809   :  { %v1826_v22 = vpop.f32.mrf.mxu2 }
 0x80a   :  { %v1827_v16 = vadd.f32 %v7263_v23, %v1826_v22 }
 0x80c   :  { %v7343_v47 = vadd.f32 %v1827_v16, %v6458_v45  ;;  %v5724_v45 = vld [vmem:[%s9009_s11 + $0x18] sm:$0xff] }
 0x80d   :  { %2100 = vmatpush.bf16.msrb.mxu3 %v5724_v45 }
 0x80e   :  { %v1858_v37 = vsel %vm171_vm1, %v7343_v47, 0.0 }
 0x80f   :  { %1859 = vadd.xlane.f32.xlu1 %v1858_v37 }
 0x811   :  { %v1828_v41 = vpop.f32.mrf.mxu2  ;;  %2101 = vmatpush.bf16.msrb.mxu3 %v5723_v48 }
 0x812   :  { %v1829_v31 = vadd.f32 %v7263_v23, %v1828_v41  ;;  %v2037_v41 = vadd.f32 %v7380_v3, %v2026_v25 }
 0x814   :  { %v7349_v9 = vadd.f32 %v1829_v31, %v6475_v55  ;;  %v1902_v55 = vpop.xlane.xlu2 %1901 }
 0x815   :  { %2102 = vmatpush.bf16.msrb.mxu3 %v5722_v33  ;;  %v1920_v49 = vmul.f32 %v1902_v55, %v6439_v30 }
 0x816   :  { %v1861_v36 = vsel %vm171_vm1, %v7349_v9, 0.0 }
 0x817   :  { %1862 = vadd.xlane.f32.xlu0 %v1861_v36  ;;  %v1928_v5 = vadd.f32 1e-06, %v1920_v49 }
 0x819   :  { %2103 = vmatpush.bf16.msrb.mxu3 %v5721_v2  ;;  %6055 = vrsqrt.f32 %v1928_v5  ;;  %vm1960_vm12 = vweird.f32 %v1928_v5 }
 0x81f   :  { %v6056_v28 = vpop.eup %6055 }
 0x820   :  { %v1955_v44 = vmul.f32 %v6056_v28, %v1928_v5  ;;  %vm1961_vm9 = vweird.f32 %v6056_v28 }
 0x821   :  { %vm1962_vm14 = vmor %vm1960_vm12, %vm1961_vm9 }
 0x822   :  { %v1956_v20 = vmul.f32 %v6056_v28, %v1955_v44 }
 0x824   :  { %v1957_v29 = vmul.f32 0.5, %v1956_v20  ;;  %v7429_v20 = vld [vmem:[%s9010_s12] ss:$0 sm:$0xff] }
 0x826   :  { %v1958_v53 = vsub.f32 1.5, %v1957_v29 }
 0x828   :  { %v1959_v31 = vmul.f32 %v6056_v28, %v1958_v53 }
 0x82a   :  { %v1963_v45 = vsel %vm1962_vm14, %v6056_v28, %v1959_v31 }
 0x82b   :  { %v2016_v52 = vmul.f32 %v1963_v45, %v7313_v34 }
 0x82d   :  { %v2027_v5 = vmul.f32 %v7372_v17, %v2016_v52 }
 0x83d   :  { %v1896_v24 = vpop.xlane.xlu0 %1895 }
 0x83e   :  { %v1918_v32 = vmul.f32 %v1896_v24, %v6439_v30  ;;  %v2038_v24 = vadd.f32 %v7380_v3, %v2027_v5 }
 0x840   :  { %v1926_v18 = vadd.f32 1e-06, %v1918_v32 }
 0x842   :  { %6057 = vrsqrt.f32 %v1926_v18  ;;  %vm1940_vm6 = vweird.f32 %v1926_v18 }
 0x845   :  { %v1905_v38 = vpop.xlane.xlu0 %1904 }
 0x846   :  { %v1921_v62 = vmul.f32 %v1905_v38, %v6439_v30 }
 0x848   :  { %v6058_v15 = vpop.eup %6057  ;;  %v1929_v35 = vadd.f32 1e-06, %v1921_v62 }
 0x849   :  { %v1935_v50 = vmul.f32 %v6058_v15, %v1926_v18  ;;  %vm1941_vm5 = vweird.f32 %v6058_v15 }
 0x84a   :  { %6059 = vrsqrt.f32 %v1929_v35  ;;  %vm1942_vm7 = vmor %vm1940_vm6, %vm1941_vm5  ;;  %vm1970_vm10 = vweird.f32 %v1929_v35 }
 0x84b   :  { %v1936_v60 = vmul.f32 %v6058_v15, %v1935_v50 }
 0x84d   :  { %v1937_v61 = vmul.f32 0.5, %v1936_v60 }
 0x84f   :  { %v1938_v59 = vsub.f32 1.5, %v1937_v61 }
 0x850   :  { %v6060_v46 = vpop.eup %6059 }
 0x851   :  { %v1939_v19 = vmul.f32 %v6058_v15, %v1938_v59  ;;  %v1965_v54 = vmul.f32 %v6060_v46, %v1929_v35  ;;  %vm1971_vm8 = vweird.f32 %v6060_v46 }
 0x852   :  { %vm1972_vm11 = vmor %vm1970_vm10, %vm1971_vm8 }
 0x853   :  { %v1943_v43 = vsel %vm1942_vm7, %v6058_v15, %v1939_v19  ;;  %v1966_v21 = vmul.f32 %v6060_v46, %v1965_v54 }
 0x854   :  { %v2014_v39 = vmul.f32 %v1943_v43, %v7321_v8 }
 0x855   :  { %v1967_v22 = vmul.f32 0.5, %v1966_v21  ;;  %v5732_v21 = vld [vmem:[%s9011_s13 + $0x38] sm:$0xff] }
 0x856   :  { %v2025_v6 = vmul.f32 %v7372_v17, %v2014_v39  ;;  %2549 = vmatpush.bf16.msrb.mxu0 %v5732_v21 }
 0x857   :  { %v1968_v16 = vsub.f32 1.5, %v1967_v22 }
 0x858   :  { %v2036_v37 = vadd.f32 %v7380_v3, %v2025_v6 }
 0x859   :  { %v1969_v36 = vmul.f32 %v6060_v46, %v1968_v16  ;;  %v5731_v16 = vld [vmem:[%s9011_s13 + $0x30] sm:$0xff] }
 0x85a   :  { %v2044_v8 = vpack.c.bf16 %v2037_v41, %v2036_v37  ;;  %2550 = vmatpush.bf16.msrb.mxu0 %v5731_v16 }
 0x85b   :  { %v1973_v56 = vsel %vm1972_vm11, %v6060_v46, %v1969_v36  ;;  %v1831_v26 = vpop.f32.mrf.mxu2 }
 0x85c   :  { %v1832_v42 = vadd.f32 %v7263_v23, %v1831_v26  ;;  %5438 = vmatmul.msk.bf16.vlgmr.msrb.gmra.mxu3 %vm171_vm1, %v2044_v8  ;;  %v2017_v55 = vmul.f32 %v1973_v56, %v7326_v10 }
 0x85e   :  { %v7388_v48 = vadd.f32 %v1832_v42, %v6493_v0  ;;  %v2028_v49 = vmul.f32 %v7372_v17, %v2017_v55 }
 0x860   :  { %v1864_v33 = vsel %vm171_vm1, %v7388_v48, 0.0  ;;  %v2039_v0 = vadd.f32 %v7380_v3, %v2028_v49 }
 0x861   :  { %1865 = vadd.xlane.f32.xlu1 %v1864_v33 }
 0x862   :  { %v2045_v34 = vpack.c.bf16 %v2039_v0, %v2038_v24 }
 0x863   :  { %v1833_v12 = vpop.f32.mrf.mxu2 }
 0x864   :  { %v1834_v2 = vadd.f32 %v7263_v23, %v1833_v12 }
 0x866   :  { %v7398_v11 = vadd.f32 %v1834_v2, %v6478_v57  ;;  %v5730_v2 = vld [vmem:[%s9011_s13 + $0x28] sm:$0xff] }
 0x867   :  { %2551 = vmatpush.bf16.msrb.mxu0 %v5730_v2 }
 0x868   :  { %v1867_v10 = vsel %vm171_vm1, %v7398_v11, 0.0 }
 0x869   :  { %1868 = vadd.xlane.f32.xlu0 %v1867_v10 }
 0x86c   :  { %5439 = vmatmul.msk.bf16.gmra.mxu3 %vm171_vm1, %v2045_v34 }
 0x882   :  { %v1860_v32 = vpop.xlane.xlu1 %1859 }
 0x883   :  { %v1874_v18 = vmul.f32 %v1860_v32, %v6439_v30 }
 0x885   :  { %v7407_v23 = vsub.f32 %v7343_v47, %v1874_v18 }
 0x887   :  { %v1890_v57 = vmul.f32 %v7407_v23, %v7407_v23 }
 0x889   :  { %v1906_v51 = vsel %vm171_vm1, %v1890_v57, 0.0 }
 0x88a   :  { %v1863_v1 = vpop.xlane.xlu0 %1862  ;;  %1907 = vadd.xlane.f32.xlu1 %v1906_v51 }
 0x88b   :  { %v1875_v38 = vmul.f32 %v1863_v1, %v6439_v30  ;;  %v5729_v1 = vld [vmem:[%s9011_s13 + $0x20] sm:$0xff] }
 0x88c   :  { %2552 = vmatpush.bf16.msrb.mxu0 %v5729_v1 }
 0x88d   :  { %v7414_v28 = vsub.f32 %v7349_v9, %v1875_v38 }
 0x88f   :  { %v1891_v62 = vmul.f32 %v7414_v28, %v7414_v28 }
 0x891   :  { %v1909_v15 = vsel %vm171_vm1, %v1891_v62, 0.0 }
 0x892   :  { %1910 = vadd.xlane.f32.xlu0 %v1909_v15 }
 0x8d4   :  { %v1866_v35 = vpop.xlane.xlu1 %1865 }
 0x8d5   :  { %v1876_v58 = vmul.f32 %v1866_v35, %v6439_v30 }
 0x8d7   :  { %v7421_v44 = vsub.f32 %v7388_v48, %v1876_v58 }
 0x8d9   :  { %v1892_v50 = vmul.f32 %v7421_v44, %v7421_v44 }
 0x8db   :  { %v1912_v60 = vsel %vm171_vm1, %v1892_v50, 0.0 }
 0x8dc   :  { %v1869_v14 = vpop.xlane.xlu0 %1868  ;;  %1913 = vadd.xlane.f32.xlu1 %v1912_v60 }
 0x8dd   :  { %v1877_v61 = vmul.f32 %v1869_v14, %v6439_v30 }
 0x8df   :  { %v7433_v59 = vsub.f32 %v7398_v11, %v1877_v61  ;;  %v2105_v46 = vpop.f32.mrf.mxu3 }
 0x8e0   :  { %v7436_v40 = vadd.f32 %v7429_v20, %v2105_v46 }
 0x8e1   :  { %v1893_v29 = vmul.f32 %v7433_v59, %v7433_v59 }
 0x8e2   :  { %v7441_v19 = vmul.f32 0.70710677, %v7436_v40 }
 0x8e3   :  { %v1915_v54 = vsel %vm171_vm1, %v1893_v29, 0.0 }
 0x8e4   :  { %v2141_v43 = vmul.f32 %v7441_v19, %v7441_v19  ;;  %1916 = vadd.xlane.f32.xlu2 %v1915_v54  ;;  %v5728_v54 = vld [vmem:[%s9011_s13 + $0x18] sm:$0xff] }
 0x8e5   :  { %2553 = vmatpush.bf16.msrb.mxu0 %v5728_v54 }
 0x8e6   :  { %v7449_v25 = vmin.f32 %v2141_v43, 16.0 }
 0x8e7   :  { %v2107_v39 = vpop.f32.mrf.mxu3 }
 0x8e8   :  { %v2143_v53 = vmul.f32 2.1237322e-06, %v7449_v25  ;;  %v2154_v22 = vmul.f32 3.8918573e-05, %v7449_v25  ;;  %v7454_v6 = vadd.f32 %v7429_v20, %v2107_v39 }
 0x8ea   :  { %v2144_v37 = vadd.f32 0.00028619796, %v2143_v53  ;;  %v2155_v41 = vadd.f32 0.001143296, %v2154_v22  ;;  %v7460_v31 = vmul.f32 0.70710677, %v7454_v6 }
 0x8ec   :  { %v2145_v36 = vmul.f32 %v2144_v37, %v7449_v25  ;;  %v2156_v8 = vmul.f32 %v2155_v41, %v7449_v25  ;;  %v2181_v56 = vmul.f32 %v7460_v31, %v7460_v31 }
 0x8ee   :  { %v2157_v26 = vadd.f32 0.014752088, %v2156_v8  ;;  %v7466_v42 = vmin.f32 %v2181_v56, 16.0  ;;  %v2146_v55 = vadd.f32 0.0036580483, %v2145_v36  ;;  %v5727_v8 = vld [vmem:[%s9011_s13 + $0x10] sm:$0xff] }
 0x8ef   :  { %v2110_v45 = vpop.f32.mrf.mxu3  ;;  %2554 = vmatpush.bf16.msrb.mxu0 %v5727_v8 }
 0x8f0   :  { %v2158_v33 = vmul.f32 %v2157_v26, %v7449_v25  ;;  %v7470_v52 = vadd.f32 %v7429_v20, %v2110_v45  ;;  %v2183_v49 = vmul.f32 2.1237322e-06, %v7466_v42  ;;  %v2194_v12 = vmul.f32 3.8918573e-05, %v7466_v42 }
 0x8f1   :  { %v2147_v34 = vmul.f32 %v2146_v55, %v7449_v25 }
 0x8f2   :  { %v2159_v5 = vadd.f32 0.112945676, %v2158_v33  ;;  %v2184_v0 = vadd.f32 0.00028619796, %v2183_v49  ;;  %v2195_v10 = vadd.f32 0.001143296, %v2194_v12 }
 0x8f3   :  { %v7478_v24 = vmul.f32 0.70710677, %v7470_v52  ;;  %v2148_v50 = vadd.f32 0.05243302, %v2147_v34 }
 0x8f4   :  { %v2160_v32 = vmul.f32 %v2159_v5, %v7449_v25  ;;  %v2185_v18 = vmul.f32 %v2184_v0, %v7466_v42  ;;  %v2196_v57 = vmul.f32 %v2195_v10, %v7466_v42  ;;  %v5726_v10 = vld [vmem:[%s9011_s13 + $0x8] sm:$0xff] }
 0x8f5   :  { %v2221_v51 = vmul.f32 %v7478_v24, %v7478_v24  ;;  %v2149_v22 = vmul.f32 %v2148_v50, %v7449_v25  ;;  %2555 = vmatpush.bf16.msrb.mxu0 %v5726_v10 }
 0x8f6   :  { %v2161_v38 = vadd.f32 0.4994258, %v2160_v32  ;;  %v2186_v62 = vadd.f32 0.0036580483, %v2185_v18  ;;  %v2197_v15 = vadd.f32 0.014752088, %v2196_v57 }
 0x8f7   :  { %v7489_v35 = vmin.f32 %v2221_v51, 16.0  ;;  %v2112_v58 = vpop.f32.mrf.mxu3  ;;  %v2150_v33 = vadd.f32 0.18741608, %v2149_v22 }
 0x8f8   :  { %v2162_v60 = vmul.f32 %v2161_v38, %v7449_v25  ;;  %v7493_v14 = vadd.f32 %v7429_v20, %v2112_v58  ;;  %v2187_v61 = vmul.f32 %v2186_v62, %v7466_v42  ;;  %v2198_v46 = vmul.f32 %v2197_v15, %v7466_v42 }
 0x8f9   :  { %v2223_v29 = vmul.f32 2.1237322e-06, %v7489_v35  ;;  %v2234_v21 = vmul.f32 3.8918573e-05, %v7489_v35  ;;  %v2151_v62 = vmul.f32 %v2150_v33, %v7449_v25 }
 0x8fa   :  { %v7501_v43 = vadd.f32 1.0, %v2162_v60  ;;  %v7505_v39 = vmul.f32 0.70710677, %v7493_v14  ;;  %v2199_v53 = vadd.f32 0.112945676, %v2198_v46 }
 0x8fb   :  { %v2188_v16 = vadd.f32 0.05243302, %v2187_v61  ;;  %v2224_v41 = vadd.f32 0.00028619796, %v2223_v29  ;;  %v2235_v56 = vadd.f32 0.001143296, %v2234_v21 }
 0x8fc   :  { %6061 = vrcp.f32 %v7501_v43  ;;  %v2200_v37 = vmul.f32 %v2199_v53, %v7466_v42  ;;  %v2261_v26 = vmul.f32 %v7505_v39, %v7505_v39  ;;  %v5725_v29 = vld [vmem:[%s9011_s13] sm:$0xff]  ;;  %v2173_v54 = vand.u32 2147483647, %v7501_v43 }
 0x8fd   :  { %v1908_v36 = vpop.xlane.xlu1 %1907  ;;  %v2236_v49 = vmul.f32 %v2235_v56, %v7489_v35  ;;  %v2189_v2 = vmul.f32 %v2188_v16, %v7466_v42  ;;  %v2225_v0 = vmul.f32 %v2224_v41, %v7489_v35  ;;  %v2175_v21 = vand.u32 2147483648, %v7501_v43  ;;  %2556 = vmatpush.bf16.msrb.mxu0 %v5725_v29 }
 0x8fe   :  { %v2201_v45 = vadd.f32 0.4994258, %v2200_v37  ;;  %v1922_v55 = vmul.f32 %v1908_v36, %v6439_v30  ;;  %v7517_v12 = vmin.f32 %v2261_v26, 16.0  ;;  %v2152_v37 = vadd.f32 1.1283791, %v2151_v62 }
 0x8ff   :  { %v2237_v32 = vadd.f32 0.014752088, %v2236_v49  ;;  %v2190_v61 = vadd.f32 0.18741608, %v2189_v2  ;;  %v2226_v46 = vadd.f32 0.0036580483, %v2225_v0  ;;  %vm2169_vm3 = vweird.f32 %v7501_v43 }
 0x900   :  { %v2202_v5 = vmul.f32 %v2201_v45, %v7466_v42  ;;  %v2263_v18 = vmul.f32 2.1237322e-06, %v7517_v12  ;;  %v2274_v57 = vmul.f32 3.8918573e-05, %v7517_v12  ;;  %v7530_v38 = vadd.f32 1e-06, %v1922_v55 }
 0x901   :  { %v2238_v15 = vmul.f32 %v2237_v32, %v7489_v35  ;;  %v2191_v8 = vmul.f32 %v2190_v61, %v7466_v42  ;;  %v2227_v56 = vmul.f32 %v2226_v46, %v7489_v35  ;;  %v2176_v55 = vor.u32 1.1754944e-38, %v2175_v21 }
 0x902   :  { %v6062_v34 = vpop.eup %6061  ;;  %v7528_v1 = vadd.f32 1.0, %v2202_v5  ;;  %v2264_v58 = vadd.f32 0.00028619796, %v2263_v18  ;;  %v2275_v50 = vadd.f32 0.001143296, %v2274_v57  ;;  %vm2174_vm5 = vcmp.eq.f32.partialorder %v2173_v54, 8.507059e+37 }
 0x903   :  { %v2165_v51 = vmul.f32 %v6062_v34, %v7501_v43  ;;  %vm2170_vm2 = vweird.f32 %v6062_v34  ;;  %v2239_v53 = vadd.f32 0.112945676, %v2238_v15  ;;  %v2153_v43 = vmul.f32 %v2152_v37, %v7441_v19 }
 0x904   :  { %6063 = vrcp.f32 %v7528_v1  ;;  %v2265_v22 = vmul.f32 %v2264_v58, %v7517_v12  ;;  %v2276_v16 = vmul.f32 %v2275_v50, %v7517_v12  ;;  %vm2171_vm4 = vmor %vm2169_vm3, %vm2170_vm2  ;;  %v2192_v57 = vadd.f32 1.1283791, %v2191_v8 }
 0x905   :  { %v2166_v60 = vsub.f32 1.0, %v2165_v51  ;;  %6065 = vrsqrt.f32 %v7530_v38  ;;  %v2240_v41 = vmul.f32 %v2239_v53, %v7489_v35  ;;  %v1911_v45 = vpop.xlane.xlu0 %1910  ;;  %v2228_v51 = vadd.f32 0.05243302, %v2227_v56 }
 0x906   :  { %v2277_v26 = vadd.f32 0.014752088, %v2276_v16  ;;  %v2266_v5 = vadd.f32 0.0036580483, %v2265_v22  ;;  %v1923_v42 = vmul.f32 %v1911_v45, %v6439_v30  ;;  %v2215_v50 = vand.u32 2147483648, %v7528_v1 }
 0x907   :  { %v2167_v25 = vmul.f32 %v6062_v34, %v2166_v60  ;;  %v2241_v33 = vadd.f32 0.4994258, %v2240_v41  ;;  %vm2209_vm7 = vweird.f32 %v7528_v1  ;;  %v2193_v56 = vmul.f32 %v2192_v57, %v7460_v31 }
 0x908   :  { %v2278_v0 = vmul.f32 %v2277_v26, %v7517_v12  ;;  %v2267_v46 = vmul.f32 %v2266_v5, %v7517_v12  ;;  %v7562_v53 = vadd.f32 1e-06, %v1923_v42  ;;  %v2216_v16 = vor.u32 1.1754944e-38, %v2215_v50 }
 0x909   :  { %v2168_v36 = vadd.f32 %v6062_v34, %v2167_v25  ;;  %v2242_v62 = vmul.f32 %v2241_v33, %v7489_v35  ;;  %v2229_v25 = vmul.f32 %v2228_v51, %v7489_v35  ;;  %v2126_v42 = vmul.f32 0.5, %v7454_v6 }
 0x90a   :  { %v6064_v49 = vpop.eup %6063  ;;  %v2279_v15 = vadd.f32 0.112945676, %v2278_v0  ;;  %vm1980_vm10 = vweird.f32 %v7530_v38 }
 0x90b   :  { %v2172_v2 = vsel %vm2171_vm4, %v6062_v34, %v2168_v36  ;;  %v2205_v32 = vmul.f32 %v6064_v49, %v7528_v1  ;;  %v7552_v18 = vpop.eup %6065  ;;  %v2213_v34 = vand.u32 2147483647, %v7528_v1  ;;  %v2243_v61 = vadd.f32 1.0, %v2242_v62 }
 0x90c   :  { %v2177_v10 = vsel %vm2174_vm5, %v2176_v55, %v2172_v2  ;;  %v1975_v19 = vmul.f32 %v7552_v18, %v7530_v38  ;;  %v2280_v29 = vmul.f32 %v2279_v15, %v7517_v12  ;;  %vm2210_vm6 = vweird.f32 %v6064_v49 }
 0x90d   :  { %v2206_v58 = vsub.f32 1.0, %v2205_v32  ;;  %v2178_v60 = vmul.f32 %v2177_v10, %v2153_v43  ;;  %6067 = vrcp.f32 %v2243_v61  ;;  %vm2211_vm8 = vmor %vm2209_vm7, %vm2210_vm6  ;;  %v2268_v36 = vadd.f32 0.05243302, %v2267_v46 }
 0x90e   :  { %v1976_v21 = vmul.f32 %v7552_v18, %v1975_v19  ;;  %v2281_v37 = vadd.f32 0.4994258, %v2280_v29  ;;  %6069 = vrsqrt.f32 %v7562_v53  ;;  %vm2214_vm9 = vcmp.eq.f32.partialorder %v2213_v34, 8.507059e+37 }
 0x90f   :  { %v2207_v54 = vmul.f32 %v6064_v49, %v2206_v58  ;;  %v5442_v41 = vclamps-f32 %v2178_v60, 1.0  ;;  %v2230_v33 = vadd.f32 0.18741608, %v2229_v25  ;;  %v2269_v10 = vmul.f32 %v2268_v36, %v7517_v12 }
 0x910   :  { %v1977_v8 = vmul.f32 0.5, %v1976_v21  ;;  %v2282_v45 = vmul.f32 %v2281_v37, %v7517_v12  ;;  %v2125_v32 = vmul.f32 0.5, %v7436_v40  ;;  %vm1981_vm11 = vweird.f32 %v7552_v18 }
 0x911   :  { %v2208_v22 = vadd.f32 %v6064_v49, %v2207_v54  ;;  %v2461_v43 = vadd.f32 1.0, %v5442_v41  ;;  %v2231_v57 = vmul.f32 %v2230_v33, %v7489_v35  ;;  %v2253_v50 = vand.u32 2147483647, %v2243_v61  ;;  %vm7584_vm2 = vmor %vm1980_vm10, %vm1981_vm11 }
 0x912   :  { %v7569_v5 = vadd.f32 1.0, %v2282_v45  ;;  %v1978_v1 = vsub.f32 1.5, %v1977_v8  ;;  %v2255_v6 = vand.u32 2147483648, %v2243_v61  ;;  %v2270_v19 = vadd.f32 0.18741608, %v2269_v10 }
 0x913   :  { %v2212_v26 = vsel %vm2211_vm8, %v6064_v49, %v2208_v22  ;;  %v6068_v0 = vpop.eup %6067  ;;  %v2469_v40 = vmul.f32 %v2461_v43, %v2125_v32  ;;  %v2232_v29 = vadd.f32 1.1283791, %v2231_v57  ;;  %vm2249_vm14 = vweird.f32 %v2243_v61 }
 0x914   :  { %v2217_v55 = vsel %vm2214_vm9, %v2216_v16, %v2212_v26  ;;  %v2245_v31 = vmul.f32 %v6068_v0, %v2243_v61  ;;  %v6070_v49 = vpop.eup %6069  ;;  %6071 = vrcp.f32 %v7569_v5  ;;  %v1979_v58 = vmul.f32 %v7552_v18, %v1978_v1 }
 0x915   :  { %v2218_v2 = vmul.f32 %v2217_v55, %v2193_v56  ;;  %v1985_v34 = vmul.f32 %v6070_v49, %v7562_v53  ;;  %vm2250_vm12 = vweird.f32 %v6068_v0  ;;  %vm2254_vm4 = vcmp.eq.f32.partialorder %v2253_v50, 8.507059e+37 }
 0x916   :  { %v2246_v15 = vsub.f32 1.0, %v2245_v31  ;;  %v1983_v22 = vsel %vm7584_vm2, %v7552_v18, %v1979_v58  ;;  %vm2251_vm3 = vmor %vm2249_vm14, %vm2250_vm12  ;;  %v2256_v41 = vor.u32 1.1754944e-38, %v2255_v6  ;;  %v2271_v61 = vmul.f32 %v2270_v19, %v7517_v12 }
 0x917   :  { %v5443_v51 = vclamps-f32 %v2218_v2, 1.0  ;;  %v1986_v35 = vmul.f32 %v6070_v49, %v1985_v34  ;;  %vm1991_vm5 = vweird.f32 %v6070_v49  ;;  %v2018_v26 = vmul.f32 %v1983_v22, %v7407_v23 }
 0x918   :  { %v2247_v46 = vmul.f32 %v6068_v0, %v2246_v15  ;;  %v2233_v45 = vmul.f32 %v2232_v29, %v7478_v24  ;;  %vm1990_vm6 = vweird.f32 %v7562_v53  ;;  %v2272_v33 = vadd.f32 1.1283791, %v2271_v61 }
 0x919   :  { %v2462_v62 = vadd.f32 1.0, %v5443_v51  ;;  %v1987_v16 = vmul.f32 0.5, %v1986_v35  ;;  %v2293_v2 = vand.u32 2147483647, %v7569_v5  ;;  %v2295_v12 = vand.u32 2147483648, %v7569_v5  ;;  %vm1992_vm7 = vmor %vm1990_vm6, %vm1991_vm5 }
 0x91a   :  { %v2248_v25 = vadd.f32 %v6068_v0, %v2247_v46  ;;  %v6072_v37 = vpop.eup %6071  ;;  %v2029_v23 = vmul.f32 %v7372_v17, %v2018_v26  ;;  %vm2289_vm9 = vweird.f32 %v7569_v5  ;;  %v2273_v51 = vmul.f32 %v2272_v33, %v7505_v39 }
 0x91b   :  { %v2470_v60 = vmul.f32 %v2462_v62, %v2126_v42  ;;  %v2285_v38 = vmul.f32 %v6072_v37, %v7569_v5  ;;  %v1988_v8 = vsub.f32 1.5, %v1987_v16  ;;  %vm2290_vm8 = vweird.f32 %v6072_v37 }
 0x91c   :  { %v2252_v36 = vsel %vm2251_vm3, %v6068_v0, %v2248_v25  ;;  %vm2291_vm10 = vmor %vm2289_vm9, %vm2290_vm8  ;;  %v2296_v24 = vor.u32 1.1754944e-38, %v2295_v12  ;;  %vm2294_vm11 = vcmp.eq.f32.partialorder %v2293_v2, 8.507059e+37  ;;  %v2040_v62 = vadd.f32 %v7380_v3, %v2029_v23 }
 0x91d   :  { %v2477_v21 = vpack.c.bf16 %v2470_v60, %v2469_v40  ;;  %v2257_v56 = vsel %vm2254_vm4, %v2256_v41, %v2252_v36  ;;  %v2286_v55 = vsub.f32 1.0, %v2285_v38  ;;  %v1989_v18 = vmul.f32 %v6070_v49, %v1988_v8 }
 0x91e   :  { %v2258_v1 = vmul.f32 %v2257_v56, %v2233_v45  ;;  %v2127_v5 = vmul.f32 0.5, %v7470_v52  ;;  %v2128_v40 = vmul.f32 0.5, %v7493_v14 }
 0x91f   :  { %2557 = vmatmul.bf16.vlgmr.msrb.gmra.mxu0 %v2477_v21  ;;  %v2287_v0 = vmul.f32 %v6072_v37, %v2286_v55  ;;  %v1993_v43 = vsel %vm1992_vm7, %v6070_v49, %v1989_v18 }
 0x920   :  { %v2019_v10 = vmul.f32 %v1993_v43, %v7414_v28  ;;  %v5444_v42 = vclamps-f32 %v2258_v1, 1.0 }
 0x921   :  { %v2288_v32 = vadd.f32 %v6072_v37, %v2287_v0 }
 0x922   :  { %v2030_v53 = vmul.f32 %v7372_v17, %v2019_v10  ;;  %v2463_v58 = vadd.f32 1.0, %v5444_v42 }
 0x923   :  { %v2292_v31 = vsel %vm2291_vm10, %v6072_v37, %v2288_v32 }
 0x924   :  { %v2297_v57 = vsel %vm2294_vm11, %v2296_v24, %v2292_v31  ;;  %v2041_v49 = vadd.f32 %v7380_v3, %v2030_v53  ;;  %v2471_v6 = vmul.f32 %v2463_v58, %v2127_v5 }
 0x925   :  { %v2298_v28 = vmul.f32 %v2297_v57, %v2273_v51 }
 0x926   :  { %v2046_v15 = vpack.c.bf16 %v2041_v49, %v2040_v62 }
 0x927   :  { %v5445_v34 = vclamps-f32 %v2298_v28, 1.0 }
 0x928   :  { %5440 = vmatmul.msk.bf16.gmra.mxu3 %vm171_vm1, %v2046_v15 }
 0x929   :  { %v2464_v50 = vadd.f32 1.0, %v5445_v34 }
 0x92b   :  { %v2472_v39 = vmul.f32 %v2464_v50, %v2128_v40 }
 0x92d   :  { %v2478_v19 = vpack.c.bf16 %v2472_v39, %v2471_v6 }
 0x92f   :  { %2562 = vmatmul.bf16.gmra.mxu0 %v2478_v19 }
 0x94f   :  { %v1914_v60 = vpop.xlane.xlu1 %1913 }
 0x950   :  { %v1924_v46 = vmul.f32 %v1914_v60, %v6439_v30 }
 0x952   :  { %v1932_v35 = vadd.f32 1e-06, %v1924_v46 }
 0x954   :  { %6073 = vrsqrt.f32 %v1932_v35  ;;  %vm2000_vm14 = vweird.f32 %v1932_v35 }
 0x957   :  { %v1917_v29 = vpop.xlane.xlu2 %1916 }
 0x958   :  { %v1925_v54 = vmul.f32 %v1917_v29, %v6439_v30 }
 0x95a   :  { %v6074_v21 = vpop.eup %6073  ;;  %v1933_v25 = vadd.f32 1e-06, %v1925_v54 }
 0x95b   :  { %v1995_v22 = vmul.f32 %v6074_v21, %v1932_v35  ;;  %vm2001_vm12 = vweird.f32 %v6074_v21 }
 0x95c   :  { %6075 = vrsqrt.f32 %v1933_v25  ;;  %vm2002_vm2 = vmor %vm2000_vm14, %vm2001_vm12  ;;  %vm2010_vm4 = vweird.f32 %v1933_v25 }
 0x95d   :  { %v1996_v52 = vmul.f32 %v6074_v21, %v1995_v22 }
 0x95f   :  { %v1997_v16 = vmul.f32 0.5, %v1996_v52 }
 0x961   :  { %v1998_v14 = vsub.f32 1.5, %v1997_v16 }
 0x962   :  { %v6076_v37 = vpop.eup %6075 }
 0x963   :  { %v1999_v41 = vmul.f32 %v6074_v21, %v1998_v14  ;;  %v2005_v61 = vmul.f32 %v6076_v37, %v1933_v25  ;;  %vm2011_vm3 = vweird.f32 %v6076_v37 }
 0x964   :  { %vm2012_vm5 = vmor %vm2010_vm4, %vm2011_vm3 }
 0x965   :  { %v2006_v36 = vmul.f32 %v6076_v37, %v2005_v61  ;;  %v2003_v38 = vsel %vm2002_vm2, %v6074_v21, %v1999_v41 }
 0x966   :  { %v2020_v26 = vmul.f32 %v2003_v38, %v7421_v44  ;;  %v7620_v44 = vld [vmem:[%s9012_s14] ss:$0 sm:$0xff] }
 0x967   :  { %v2007_v8 = vmul.f32 0.5, %v2006_v36 }
 0x968   :  { %v2031_v33 = vmul.f32 %v7372_v17, %v2020_v26 }
 0x969   :  { %v2008_v56 = vsub.f32 1.5, %v2007_v8 }
 0x96a   :  { %v2042_v12 = vadd.f32 %v7380_v3, %v2031_v33 }
 0x96b   :  { %v2009_v45 = vmul.f32 %v6076_v37, %v2008_v56 }
 0x96d   :  { %v2013_v55 = vsel %vm2012_vm5, %v6076_v37, %v2009_v45 }
 0x96e   :  { %v2021_v18 = vmul.f32 %v2013_v55, %v7433_v59 }
 0x970   :  { %v2032_v2 = vmul.f32 %v7372_v17, %v2021_v18 }
 0x972   :  { %v2043_v1 = vadd.f32 %v7380_v3, %v2032_v2 }
 0x974   :  { %v2047_v0 = vpack.c.bf16 %v2043_v1, %v2042_v12 }
 0x976   :  { %5441 = vmatmul.msk.bf16.gmra.mxu3 %vm171_vm1, %v2047_v0 }
 0x99c   :  { %v2558_v43 = vpop.f32.mrf.mxu0 }
 0x99d   :  { %v2559_v10 = vadd.f32 %v7620_v44, %v2558_v43 }
 0x99f   :  { %v7624_v59 = vadd.f32 %v2559_v10, %v7293_v27 }
 0x9a1   :  { %v2590_v17 = vsel %vm171_vm1, %v7624_v59, 0.0 }
 0x9a2   :  { %2591 = vadd.xlane.f32.xlu0 %v2590_v17 }
 0x9a4   :  { %v2560_v23 = vpop.f32.mrf.mxu0 }
 0x9a5   :  { %v2561_v3 = vadd.f32 %v7620_v44, %v2560_v23 }
 0x9a7   :  { %v7630_v32 = vadd.f32 %v2561_v3, %v7267_v63 }
 0x9a9   :  { %v2593_v24 = vsel %vm171_vm1, %v7630_v32, 0.0 }
 0x9aa   :  { %2594 = vadd.xlane.f32.xlu1 %v2593_v24 }
 0x9ab   :  { %v2115_v53 = vpop.f32.mrf.mxu3 }
 0x9ac   :  { %v7635_v42 = vadd.f32 %v7429_v20, %v2115_v53  ;;  %v2563_v27 = vpop.f32.mrf.mxu0 }
 0x9ad   :  { %v2564_v51 = vadd.f32 %v7620_v44, %v2563_v27 }
 0x9ae   :  { %v7639_v31 = vmul.f32 0.70710677, %v7635_v42 }
 0x9af   :  { %v7642_v57 = vadd.f32 %v2564_v51, %v7273_v7 }
 0x9b0   :  { %v2301_v63 = vmul.f32 %v7639_v31, %v7639_v31 }
 0x9b1   :  { %v2596_v62 = vsel %vm171_vm1, %v7642_v57, 0.0 }
 0x9b2   :  { %v2302_v49 = vmin.f32 %v2301_v63, 16.0  ;;  %2597 = vadd.xlane.f32.xlu2 %v2596_v62 }
 0x9b3   :  { %v2117_v28 = vpop.f32.mrf.mxu3 }
 0x9b4   :  { %v2303_v15 = vmul.f32 2.1237322e-06, %v2302_v49  ;;  %v2314_v58 = vmul.f32 3.8918573e-05, %v2302_v49  ;;  %v7649_v34 = vadd.f32 %v7429_v20, %v2117_v28  ;;  %v2565_v5 = vpop.f32.mrf.mxu0 }
 0x9b5   :  { %v2566_v40 = vadd.f32 %v7620_v44, %v2565_v5 }
 0x9b6   :  { %v2304_v50 = vadd.f32 0.00028619796, %v2303_v15  ;;  %v2315_v7 = vadd.f32 0.001143296, %v2314_v58  ;;  %v7653_v6 = vmul.f32 0.70710677, %v7649_v34 }
 0x9b7   :  { %v7656_v39 = vadd.f32 %v2566_v40, %v7279_v13 }
 0x9b8   :  { %v2316_v19 = vmul.f32 %v2315_v7, %v2302_v49  ;;  %v2341_v60 = vmul.f32 %v7653_v6, %v7653_v6  ;;  %v2305_v35 = vmul.f32 %v2304_v50, %v2302_v49 }
 0x9b9   :  { %v2599_v46 = vsel %vm171_vm1, %v7656_v39, 0.0 }
 0x9ba   :  { %v2317_v29 = vadd.f32 0.014752088, %v2316_v19  ;;  %2600 = vadd.xlane.f32.xlu0 %v2599_v46  ;;  %v2342_v54 = vmin.f32 %v2341_v60, 16.0  ;;  %v2306_v52 = vadd.f32 0.0036580483, %v2305_v35 }
 0x9bc   :  { %v2318_v21 = vmul.f32 %v2317_v29, %v2302_v49  ;;  %v2343_v25 = vmul.f32 2.1237322e-06, %v2342_v54  ;;  %v2354_v22 = vmul.f32 3.8918573e-05, %v2342_v54  ;;  %v2307_v36 = vmul.f32 %v2306_v52, %v2302_v49 }
 0x9be   :  { %v2319_v16 = vadd.f32 0.112945676, %v2318_v21  ;;  %v2344_v14 = vadd.f32 0.00028619796, %v2343_v25  ;;  %v2355_v37 = vadd.f32 0.001143296, %v2354_v22 }
 0x9bf   :  { %v2308_v55 = vadd.f32 0.05243302, %v2307_v36 }
 0x9c0   :  { %v2320_v13 = vmul.f32 %v2319_v16, %v2302_v49  ;;  %v2345_v41 = vmul.f32 %v2344_v14, %v2342_v54  ;;  %v2356_v61 = vmul.f32 %v2355_v37, %v2342_v54 }
 0x9c1   :  { %v2309_v1 = vmul.f32 %v2308_v55, %v2302_v49 }
 0x9c2   :  { %v2321_v38 = vadd.f32 0.4994258, %v2320_v13  ;;  %v2346_v8 = vadd.f32 0.0036580483, %v2345_v41  ;;  %v2357_v56 = vadd.f32 0.014752088, %v2356_v61 }
 0x9c3   :  { %v2310_v23 = vadd.f32 0.18741608, %v2309_v1 }
 0x9c4   :  { %v2322_v26 = vmul.f32 %v2321_v38, %v2302_v49  ;;  %v2358_v45 = vmul.f32 %v2357_v56, %v2342_v54  ;;  %v2347_v33 = vmul.f32 %v2346_v8, %v2342_v54  ;;  %v2129_v38 = vmul.f32 0.5, %v7635_v42 }
 0x9c5   :  { %v2311_v51 = vmul.f32 %v2310_v23, %v2302_v49  ;;  %v2130_v8 = vmul.f32 0.5, %v7649_v34 }
 0x9c6   :  { %v2323_v18 = vadd.f32 1.0, %v2322_v26  ;;  %v2359_v2 = vadd.f32 0.112945676, %v2358_v45  ;;  %v2348_v0 = vadd.f32 0.05243302, %v2347_v33 }
 0x9c7   :  { %v2312_v5 = vadd.f32 1.1283791, %v2311_v51 }
 0x9c8   :  { %6077 = vrcp.f32 %v2323_v18  ;;  %v2360_v12 = vmul.f32 %v2359_v2, %v2342_v54  ;;  %v2349_v24 = vmul.f32 %v2348_v0, %v2342_v54  ;;  %v2335_v62 = vand.u32 2147483648, %v2323_v18 }
 0x9c9   :  { %v2333_v15 = vand.u32 2147483647, %v2323_v18  ;;  %vm2329_vm7 = vweird.f32 %v2323_v18  ;;  %v2313_v35 = vmul.f32 %v2312_v5, %v7639_v31 }
 0x9ca   :  { %v2361_v43 = vadd.f32 0.4994258, %v2360_v12  ;;  %v2350_v28 = vadd.f32 0.18741608, %v2349_v24  ;;  %v2336_v7 = vor.u32 1.1754944e-38, %v2335_v62 }
 0x9cb   :  { %vm2334_vm9 = vcmp.eq.f32.partialorder %v2333_v15, 8.507059e+37 }
 0x9cc   :  { %v2362_v10 = vmul.f32 %v2361_v43, %v2342_v54  ;;  %v2351_v19 = vmul.f32 %v2350_v28, %v2342_v54 }
 0x9ce   :  { %v6078_v17 = vpop.eup %6077  ;;  %v2363_v53 = vadd.f32 1.0, %v2362_v10  ;;  %v2352_v49 = vadd.f32 1.1283791, %v2351_v19 }
 0x9cf   :  { %v2325_v3 = vmul.f32 %v6078_v17, %v2323_v18  ;;  %vm2330_vm6 = vweird.f32 %v6078_v17 }
 0x9d0   :  { %6079 = vrcp.f32 %v2363_v53  ;;  %vm2331_vm8 = vmor %vm2329_vm7, %vm2330_vm6  ;;  %v2375_v21 = vand.u32 2147483648, %v2363_v53  ;;  %v2373_v52 = vand.u32 2147483647, %v2363_v53  ;;  %vm2369_vm11 = vweird.f32 %v2363_v53 }
 0x9d1   :  { %v2326_v27 = vsub.f32 1.0, %v2325_v3  ;;  %v2353_v13 = vmul.f32 %v2352_v49, %v7653_v6 }
 0x9d2   :  { %v2376_v14 = vor.u32 1.1754944e-38, %v2375_v21  ;;  %vm2374_vm14 = vcmp.eq.f32.partialorder %v2373_v52, 8.507059e+37 }
 0x9d3   :  { %v2327_v63 = vmul.f32 %v6078_v17, %v2326_v27 }
 0x9d5   :  { %v2328_v58 = vadd.f32 %v6078_v17, %v2327_v63 }
 0x9d6   :  { %v6080_v40 = vpop.eup %6079 }
 0x9d7   :  { %v2332_v50 = vsel %vm2331_vm8, %v6078_v17, %v2328_v58  ;;  %v2365_v60 = vmul.f32 %v6080_v40, %v2363_v53  ;;  %vm2370_vm10 = vweird.f32 %v6080_v40 }
 0x9d8   :  { %v2337_v46 = vsel %vm2334_vm9, %v2336_v7, %v2332_v50  ;;  %vm2371_vm12 = vmor %vm2369_vm11, %vm2370_vm10 }
 0x9d9   :  { %v2366_v29 = vsub.f32 1.0, %v2365_v60  ;;  %v2338_v25 = vmul.f32 %v2337_v46, %v2313_v35 }
 0x9db   :  { %v2367_v22 = vmul.f32 %v6080_v40, %v2366_v29  ;;  %v5446_v37 = vclamps-f32 %v2338_v25, 1.0 }
 0x9dd   :  { %v2368_v16 = vadd.f32 %v6080_v40, %v2367_v22  ;;  %v2465_v36 = vadd.f32 1.0, %v5446_v37 }
 0x9df   :  { %v2372_v54 = vsel %vm2371_vm12, %v6080_v40, %v2368_v16  ;;  %v2473_v26 = vmul.f32 %v2465_v36, %v2129_v38 }
 0x9e0   :  { %v2377_v41 = vsel %vm2374_vm14, %v2376_v14, %v2372_v54 }
 0x9e1   :  { %v2378_v61 = vmul.f32 %v2377_v41, %v2353_v13 }
 0x9e3   :  { %v5447_v31 = vclamps-f32 %v2378_v61, 1.0 }
 0x9e5   :  { %v2466_v56 = vadd.f32 1.0, %v5447_v31 }
 0x9e7   :  { %v2474_v45 = vmul.f32 %v2466_v56, %v2130_v8 }
 0x9e9   :  { %v2479_v55 = vpack.c.bf16 %v2474_v45, %v2473_v26 }
 0x9eb   :  { %2567 = vmatmul.bf16.gmra.mxu0 %v2479_v55 }
 0x9f9   :  { %v2120_v18 = vpop.f32.mrf.mxu3 }
 0x9fa   :  { %v7667_v33 = vadd.f32 %v7429_v20, %v2120_v18 }
 0x9fc   :  { %v7670_v6 = vmul.f32 0.70710677, %v7667_v33 }
 0x9fe   :  { %v2381_v2 = vmul.f32 %v7670_v6, %v7670_v6 }
 0xa00   :  { %v2382_v12 = vmin.f32 %v2381_v2, 16.0 }
 0xa01   :  { %v2122_v1 = vpop.f32.mrf.mxu3 }
 0xa02   :  { %v2383_v42 = vmul.f32 2.1237322e-06, %v2382_v12  ;;  %v2394_v0 = vmul.f32 3.8918573e-05, %v2382_v12  ;;  %v7675_v34 = vadd.f32 %v7429_v20, %v2122_v1 }
 0xa04   :  { %v2384_v43 = vadd.f32 0.00028619796, %v2383_v42  ;;  %v2395_v10 = vadd.f32 0.001143296, %v2394_v0  ;;  %v7678_v17 = vmul.f32 0.70710677, %v7675_v34 }
 0xa06   :  { %v2396_v23 = vmul.f32 %v2395_v10, %v2382_v12  ;;  %v2421_v3 = vmul.f32 %v7678_v17, %v7678_v17  ;;  %v2385_v24 = vmul.f32 %v2384_v43, %v2382_v12 }
 0xa08   :  { %v2397_v53 = vadd.f32 0.014752088, %v2396_v23  ;;  %v2422_v27 = vmin.f32 %v2421_v3, 16.0  ;;  %v2386_v28 = vadd.f32 0.0036580483, %v2385_v24 }
 0xa0a   :  { %v2398_v51 = vmul.f32 %v2397_v53, %v2382_v12  ;;  %v2423_v63 = vmul.f32 2.1237322e-06, %v2422_v27  ;;  %v2434_v62 = vmul.f32 3.8918573e-05, %v2422_v27  ;;  %v2387_v7 = vmul.f32 %v2386_v28, %v2382_v12 }
 0xa0c   :  { %v2399_v15 = vadd.f32 0.112945676, %v2398_v51  ;;  %v2424_v58 = vadd.f32 0.00028619796, %v2423_v63  ;;  %v2435_v20 = vadd.f32 0.001143296, %v2434_v62 }
 0xa0d   :  { %v2388_v49 = vadd.f32 0.05243302, %v2387_v7 }
 0xa0e   :  { %v2400_v5 = vmul.f32 %v2399_v15, %v2382_v12  ;;  %v2425_v40 = vmul.f32 %v2424_v58, %v2422_v27  ;;  %v2436_v50 = vmul.f32 %v2435_v20, %v2422_v27 }
 0xa0f   :  { %v2389_v37 = vmul.f32 %v2388_v49, %v2382_v12 }
 0xa10   :  { %v2401_v19 = vadd.f32 0.4994258, %v2400_v5  ;;  %v2426_v60 = vadd.f32 0.0036580483, %v2425_v40  ;;  %v2437_v46 = vadd.f32 0.014752088, %v2436_v50 }
 0xa11   :  { %v2390_v38 = vadd.f32 0.18741608, %v2389_v37 }
 0xa12   :  { %v2402_v35 = vmul.f32 %v2401_v19, %v2382_v12  ;;  %v2438_v29 = vmul.f32 %v2437_v46, %v2422_v27  ;;  %v2427_v25 = vmul.f32 %v2426_v60, %v2422_v27 }
 0xa13   :  { %v2391_v2 = vmul.f32 %v2390_v38, %v2382_v12 }
 0xa14   :  { %v2403_v21 = vadd.f32 1.0, %v2402_v35  ;;  %v2439_v22 = vadd.f32 0.112945676, %v2438_v29  ;;  %v2428_v13 = vadd.f32 0.05243302, %v2427_v25 }
 0xa15   :  { %v2592_v52 = vpop.xlane.xlu0 %2591  ;;  %v2392_v24 = vadd.f32 1.1283791, %v2391_v2 }
 0xa16   :  { %6081 = vrcp.f32 %v2403_v21  ;;  %v2440_v16 = vmul.f32 %v2439_v22, %v2422_v27  ;;  %v2614_v14 = vmul.f32 %v2592_v52, %v6439_v30  ;;  %v2429_v56 = vmul.f32 %v2428_v13, %v2422_v27 }
 0xa17   :  { %v2415_v0 = vand.u32 2147483648, %v2403_v21  ;;  %v2413_v10 = vand.u32 2147483647, %v2403_v21  ;;  %vm2409_vm3 = vweird.f32 %v2403_v21  ;;  %v2393_v20 = vmul.f32 %v2392_v24, %v7670_v6 }
 0xa18   :  { %v2441_v54 = vadd.f32 0.4994258, %v2440_v16  ;;  %v7684_v41 = vsub.f32 %v7624_v59, %v2614_v14  ;;  %v2430_v43 = vadd.f32 0.18741608, %v2429_v56 }
 0xa19   :  { %v2416_v12 = vor.u32 1.1754944e-38, %v2415_v0  ;;  %vm2414_vm5 = vcmp.eq.f32.partialorder %v2413_v10, 8.507059e+37  ;;  %v5519_v10 = vld [vmem:[%s9003_s5 + $0x70] sm:$0xf] }
 0xa1a   :  { %v2442_v61 = vmul.f32 %v2441_v54, %v2422_v27  ;;  %v2630_v36 = vmul.f32 %v7684_v41, %v7684_v41  ;;  %v2431_v62 = vmul.f32 %v2430_v43, %v2422_v27 }
 0xa1c   :  { %v6082_v31 = vpop.eup %6081  ;;  %v2443_v26 = vadd.f32 1.0, %v2442_v61  ;;  %v2638_v45 = vsel %vm171_vm1, %v2630_v36, 0.0  ;;  %v2432_v40 = vadd.f32 1.1283791, %v2431_v62  ;;  %v2131_v36 = vmul.f32 0.5, %v7667_v33 }
 0xa1d   :  { %v2405_v8 = vmul.f32 %v6082_v31, %v2403_v21  ;;  %v2595_v55 = vpop.xlane.xlu1 %2594  ;;  %2639 = vadd.xlane.f32.xlu1 %v2638_v45  ;;  %vm2410_vm2 = vweird.f32 %v6082_v31  ;;  %v5738_v62 = vld [vmem:[%s9003_s5 + $0x64] sm:$0xf0] }
 0xa1e   :  { %6083 = vrcp.f32 %v2443_v26  ;;  %v2615_v1 = vmul.f32 %v2595_v55, %v6439_v30  ;;  %vm2411_vm4 = vmor %vm2409_vm3, %vm2410_vm2  ;;  %v2455_v50 = vand.u32 2147483648, %v2443_v26  ;;  %v2453_v60 = vand.u32 2147483647, %v2443_v26 }
 0xa1f   :  { %v2406_v18 = vsub.f32 1.0, %v2405_v8  ;;  %vm2449_vm7 = vweird.f32 %v2443_v26  ;;  %v2433_v6 = vmul.f32 %v2432_v40, %v7678_v17  ;;  %v5503_v40 = vld [vmem:[%s9003_s5 + $0x50] sm:$0xf] }
 0xa20   :  { %v7691_v23 = vsub.f32 %v7630_v32, %v2615_v1  ;;  %v2456_v27 = vor.u32 1.1754944e-38, %v2455_v50  ;;  %vm2454_vm9 = vcmp.eq.f32.partialorder %v2453_v60, 8.507059e+37  ;;  %v5736_v50 = vld [vmem:[%s9003_s5 + $0x54] sm:$0xf0]  ;;  %v5505_v60 = vld [vmem:[%s9003_s5 + $0x58] sm:$0xf0] }
 0xa21   :  { %v2407_v42 = vmul.f32 %v6082_v31, %v2406_v18 }
 0xa22   :  { %v2631_v53 = vmul.f32 %v7691_v23, %v7691_v23 }
 0xa23   :  { %v2408_v3 = vadd.f32 %v6082_v31, %v2407_v42 }
 0xa24   :  { %v6084_v51 = vpop.eup %6083  ;;  %v2641_v15 = vsel %vm171_vm1, %v2631_v53, 0.0 }
 0xa25   :  { %v2412_v63 = vsel %vm2411_vm4, %v6082_v31, %v2408_v3  ;;  %v2445_v28 = vmul.f32 %v6084_v51, %v2443_v26  ;;  %2642 = vadd.xlane.f32.xlu2 %v2641_v15  ;;  %vm2450_vm6 = vweird.f32 %v6084_v51  ;;  %v2598_v46 = vpop.xlane.xlu2 %2597  ;;  %v2132_v31 = vmul.f32 0.5, %v7675_v34  ;;  %v5739_v3 = vld [vmem:[%s9003_s5 + $0x74] sm:$0xf] }
 0xa26   :  { %v2417_v58 = vsel %vm2414_vm5, %v2416_v12, %v2412_v63  ;;  %v2616_v35 = vmul.f32 %v2598_v46, %v6439_v30  ;;  %vm2451_vm8 = vmor %vm2449_vm7, %vm2450_vm6  ;;  %v5511_v12 = vld [vmem:[%s9003_s5 + $0x60] sm:$0xf] }
 0xa27   :  { %v2446_v5 = vsub.f32 1.0, %v2445_v28  ;;  %v2418_v7 = vmul.f32 %v2417_v58, %v2393_v20  ;;  %v5737_v28 = vld [vmem:[%s9003_s5 + $0x64] sm:$0xf]  ;;  %v5512_v58 = vor.u32 %v5738_v62, %v5511_v12  ;;  %v5513_v20 = vld [vmem:[%s9003_s5 + $0x68] sm:$0xf0] }
 0xa28   :  { %v7699_v49 = vsub.f32 %v7642_v57, %v2616_v35 }
 0xa29   :  { %v2447_v19 = vmul.f32 %v6084_v51, %v2446_v5  ;;  %v5448_v21 = vclamps-f32 %v2418_v7, 1.0  ;;  %v5516_v5 = vor.u32 %v5737_v28, %v5513_v20  ;;  %v5735_v7 = vld [vmem:[%s9003_s5 + $0x54] sm:$0xf] }
 0xa2a   :  { %v2632_v52 = vmul.f32 %v7699_v49, %v7699_v49  ;;  %v5508_v35 = vor.u32 %v5735_v7, %v5505_v60 }
 0xa2b   :  { %v2448_v29 = vadd.f32 %v6084_v51, %v2447_v19  ;;  %v2467_v37 = vadd.f32 1.0, %v5448_v21  ;;  %v5504_v19 = vor.u32 %v5736_v50, %v5503_v40  ;;  %v5734_v21 = vld [vmem:[%s9003_s5 + $0x44] sm:$0xf0] }
 0xa2c   :  { %v2644_v14 = vsel %vm171_vm1, %v2632_v52, 0.0 }
 0xa2d   :  { %v2452_v25 = vsel %vm2451_vm8, %v6084_v51, %v2448_v29  ;;  %2645 = vadd.xlane.f32.xlu0 %v2644_v14  ;;  %v2601_v54 = vpop.xlane.xlu0 %2600  ;;  %v2475_v8 = vmul.f32 %v2467_v37, %v2131_v36 }
 0xa2e   :  { %v2457_v22 = vsel %vm2454_vm9, %v2456_v27, %v2452_v25  ;;  %v2617_v61 = vmul.f32 %v2601_v54, %v6439_v30  ;;  %v5495_v27 = vld [vmem:[%s9003_s5 + $0x40] sm:$0xf] }
 0xa2f   :  { %v2458_v16 = vmul.f32 %v2457_v22, %v2433_v6  ;;  %v5733_v6 = vld [vmem:[%s9003_s5 + $0x44] sm:$0xf]  ;;  %v5496_v52 = vor.u32 %v5734_v21, %v5495_v27 }
 0xa30   :  { %v7709_v38 = vsub.f32 %v7656_v39, %v2617_v61 }
 0xa31   :  { %v5449_v13 = vclamps-f32 %v2458_v16, 1.0  ;;  %v5497_v16 = vld [vmem:[%s9003_s5 + $0x48] sm:$0xf0] }
 0xa32   :  { %v2633_v26 = vmul.f32 %v7709_v38, %v7709_v38  ;;  %v5500_v37 = vor.u32 %v5733_v6, %v5497_v16 }
 0xa33   :  { %v2468_v17 = vadd.f32 1.0, %v5449_v13 }
 0xa34   :  { %v2647_v55 = vsel %vm171_vm1, %v2633_v26, 0.0 }
 0xa35   :  { %v2476_v56 = vmul.f32 %v2468_v17, %v2132_v31  ;;  %2648 = vadd.xlane.f32.xlu1 %v2647_v55 }
 0xa37   :  { %v2480_v45 = vpack.c.bf16 %v2476_v56, %v2475_v8 }
 0xa39   :  { %2572 = vmatmul.bf16.gmra.mxu0 %v2480_v45 }
 0xa68   :  { %v2568_v18 = vpop.f32.mrf.mxu0 }
 0xa69   :  { %v2569_v2 = vadd.f32 %v7620_v44, %v2568_v18 }
 0xa6b   :  { %v7716_v33 = vadd.f32 %v2569_v2, %v7343_v47  ;;  %v5740_v47 = vld [vmem:[%s9003_s5 + $0x74] sm:$0xf0] }
 0xa6c   :  { %v5520_v24 = vor.u32 %v5740_v47, %v5519_v10 }
 0xa6d   :  { %v2602_v34 = vsel %vm171_vm1, %v7716_v33, 0.0 }
 0xa6e   :  { %2603 = vadd.xlane.f32.xlu2 %v2602_v34  ;;  %2864 = vmatpush.bf16.msrb.mxu1 %v5520_v24  ;;  %v7780_v34 = vld [vmem:[%s9035_s23 + $0x1] ss:$0 sm:$0xff] }
 0xa70   :  { %v2570_v1 = vpop.f32.mrf.mxu0 }
 0xa71   :  { %v2571_v42 = vadd.f32 %v7620_v44, %v2570_v1 }
 0xa72   :  { %2865 = vmatpush.bf16.msrb.mxu1 %v5512_v58 }
 0xa73   :  { %v7722_v0 = vadd.f32 %v2571_v42, %v7349_v9  ;;  %v5521_v9 = vld [vmem:[%s9003_s5 + $0x78] sm:$0xf0] }
 0xa74   :  { %v5524_v51 = vor.u32 %v5739_v3, %v5521_v9  ;;  %v7787_v9 = vld [vmem:[%s9002_s4 + $0x1] ss:$0 sm:$0xff] }
 0xa75   :  { %v2605_v43 = vsel %vm171_vm1, %v7722_v0, 0.0 }
 0xa76   :  { %2606 = vadd.xlane.f32.xlu0 %v2605_v43  ;;  %2893 = vmatpush.bf16.msrb.mxu2 %v5524_v51 }
 0xa77   :  { %2866 = vmatpush.bf16.msrb.mxu1 %v5504_v19 }
 0xa7a   :  { %2894 = vmatpush.bf16.msrb.mxu2 %v5516_v5 }
 0xa7b   :  { %2867 = vmatpush.bf16.msrb.mxu1 %v5496_v52 }
 0xa7e   :  { %2895 = vmatpush.bf16.msrb.mxu2 %v5508_v35 }
 0xa82   :  { %2896 = vmatpush.bf16.msrb.mxu2 %v5500_v37 }
 0xa90   :  { %v2640_v53 = vpop.xlane.xlu1 %2639 }
 0xa91   :  { %v2662_v63 = vmul.f32 %v2640_v53, %v6439_v30 }
 0xa93   :  { %v2670_v15 = vadd.f32 1e-06, %v2662_v63 }
 0xa95   :  { %6085 = vrsqrt.f32 %v2670_v15  ;;  %vm2684_vm11 = vweird.f32 %v2670_v15 }
 0xa98   :  { %v2643_v46 = vpop.xlane.xlu2 %2642 }
 0xa99   :  { %v2663_v29 = vmul.f32 %v2643_v46, %v6439_v30 }
 0xa9b   :  { %v6086_v25 = vpop.eup %6085  ;;  %v2671_v22 = vadd.f32 1e-06, %v2663_v29 }
 0xa9c   :  { %v2679_v14 = vmul.f32 %v6086_v25, %v2670_v15  ;;  %vm2685_vm10 = vweird.f32 %v6086_v25 }
 0xa9d   :  { %6087 = vrsqrt.f32 %v2671_v22  ;;  %vm2686_vm12 = vmor %vm2684_vm11, %vm2685_vm10  ;;  %vm2694_vm2 = vweird.f32 %v2671_v22 }
 0xa9e   :  { %v2680_v13 = vmul.f32 %v6086_v25, %v2679_v14 }
 0xaa0   :  { %v2681_v54 = vmul.f32 0.5, %v2680_v13  ;;  %v2646_v31 = vpop.xlane.xlu0 %2645 }
 0xaa1   :  { %v2664_v56 = vmul.f32 %v2646_v31, %v6439_v30 }
 0xaa2   :  { %v2682_v61 = vsub.f32 1.5, %v2681_v54 }
 0xaa3   :  { %v6088_v36 = vpop.eup %6087  ;;  %v2672_v45 = vadd.f32 1e-06, %v2664_v56 }
 0xaa4   :  { %v2683_v17 = vmul.f32 %v6086_v25, %v2682_v61  ;;  %v2689_v8 = vmul.f32 %v6088_v36, %v2671_v22  ;;  %vm2695_vm14 = vweird.f32 %v6088_v36 }
 0xaa5   :  { %6089 = vrsqrt.f32 %v2672_v45  ;;  %vm2696_vm3 = vmor %vm2694_vm2, %vm2695_vm14  ;;  %vm2704_vm5 = vweird.f32 %v2672_v45 }
 0xaa6   :  { %v2690_v26 = vmul.f32 %v6088_v36, %v2689_v8  ;;  %v2687_v55 = vsel %vm2686_vm12, %v6086_v25, %v2683_v17 }
 0xaa7   :  { %v2758_v1 = vmul.f32 %v2687_v55, %v7684_v41 }
 0xaa8   :  { %v2691_v18 = vmul.f32 0.5, %v2690_v26  ;;  %v2649_v42 = vpop.xlane.xlu1 %2648 }
 0xaa9   :  { %v2665_v10 = vmul.f32 %v2649_v42, %v6439_v30  ;;  %v2769_v53 = vmul.f32 %v7780_v34, %v2758_v1 }
 0xaaa   :  { %v2692_v2 = vsub.f32 1.5, %v2691_v18 }
 0xaab   :  { %v6090_v47 = vpop.eup %6089  ;;  %v2673_v24 = vadd.f32 1e-06, %v2665_v10  ;;  %v2780_v62 = vadd.f32 %v7787_v9, %v2769_v53 }
 0xaac   :  { %v2693_v43 = vmul.f32 %v6088_v36, %v2692_v2  ;;  %v2699_v63 = vmul.f32 %v6090_v47, %v2672_v45  ;;  %vm2705_vm4 = vweird.f32 %v6090_v47 }
 0xaad   :  { %6091 = vrsqrt.f32 %v2673_v24  ;;  %vm2706_vm6 = vmor %vm2704_vm5, %vm2705_vm4  ;;  %vm2714_vm8 = vweird.f32 %v2673_v24 }
 0xaae   :  { %v2697_v3 = vsel %vm2696_vm3, %v6088_v36, %v2693_v43  ;;  %v2700_v12 = vmul.f32 %v6090_v47, %v2699_v63 }
 0xaaf   :  { %v2759_v51 = vmul.f32 %v2697_v3, %v7691_v23 }
 0xab0   :  { %v2701_v15 = vmul.f32 0.5, %v2700_v12 }
 0xab1   :  { %v2770_v41 = vmul.f32 %v7780_v34, %v2759_v51 }
 0xab2   :  { %v2702_v20 = vsub.f32 1.5, %v2701_v15 }
 0xab3   :  { %v2781_v28 = vadd.f32 %v7787_v9, %v2770_v41  ;;  %v6092_v40 = vpop.eup %6091 }
 0xab4   :  { %v2703_v7 = vmul.f32 %v6090_v47, %v2702_v20  ;;  %v2709_v19 = vmul.f32 %v6092_v40, %v2673_v24  ;;  %vm2715_vm7 = vweird.f32 %v6092_v40 }
 0xab5   :  { %v2788_v58 = vpack.c.bf16 %v2781_v28, %v2780_v62  ;;  %vm2716_vm9 = vmor %vm2714_vm8, %vm2715_vm7 }
 0xab6   :  { %v2573_v5 = vpop.f32.mrf.mxu0  ;;  %v2710_v60 = vmul.f32 %v6092_v40, %v2709_v19  ;;  %v2707_v35 = vsel %vm2706_vm6, %v6090_v47, %v2703_v7  ;;  %v5492_v47 = vld [vmem:[%s9004_s6 + $0x2] sm:$0x3]  ;;  %s9038_s6 = smov 32  }
 0xab7   :  { %v2574_v50 = vadd.f32 %v7620_v44, %v2573_v5  ;;  %5525 = vmatmul.msk.bf16.vlgmr.msrb.gmra.mxu1 %vm171_vm1, %v2788_v58  ;;  %5529 = vmatmul.msk.bf16.vlgmr.msrb.gmra.mxu2 %vm171_vm1, %v2788_v58  ;;  %v2760_v6 = vmul.f32 %v2707_v35, %v7699_v49  ;;  %v7844_v53 = vperm.slane %v5492_v47, 0  ;;  %v7856_v35 = vperm.slane %v5492_v47, 1 }
 0xab8   :  { %v2711_v29 = vmul.f32 0.5, %v2710_v60 }
 0xab9   :  { %v7798_v23 = vadd.f32 %v2574_v50, %v7388_v48  ;;  %v2771_v37 = vmul.f32 %v7780_v34, %v2760_v6 }
 0xaba   :  { %v2712_v27 = vsub.f32 1.5, %v2711_v29 }
 0xabb   :  { %v2608_v46 = vsel %vm171_vm1, %v7798_v23, 0.0  ;;  %v2782_v49 = vadd.f32 %v7787_v9, %v2771_v37 }
 0xabc   :  { %2609 = vadd.xlane.f32.xlu1 %v2608_v46  ;;  %v2713_v22 = vmul.f32 %v6092_v40, %v2712_v27 }
 0xabe   :  { %v2575_v21 = vpop.f32.mrf.mxu0  ;;  %v2717_v52 = vsel %vm2716_vm9, %v6092_v40, %v2713_v22 }
 0xabf   :  { %v2576_v25 = vadd.f32 %v7620_v44, %v2575_v21  ;;  %v2761_v16 = vmul.f32 %v2717_v52, %v7709_v38 }
 0xac1   :  { %v7805_v48 = vadd.f32 %v2576_v25, %v7398_v11  ;;  %v2772_v13 = vmul.f32 %v7780_v34, %v2761_v16 }
 0xac3   :  { %v2611_v14 = vsel %vm171_vm1, %v7805_v48, 0.0  ;;  %v2783_v44 = vadd.f32 %v7787_v9, %v2772_v13 }
 0xac4   :  { %2612 = vadd.xlane.f32.xlu2 %v2611_v14 }
 0xac5   :  { %v2789_v54 = vpack.c.bf16 %v2783_v44, %v2782_v49 }
 0xac7   :  { %5526 = vmatmul.msk.bf16.gmra.mxu1 %vm171_vm1, %v2789_v54  ;;  %5530 = vmatmul.msk.bf16.gmra.mxu2 %vm171_vm1, %v2789_v54 }
 0xae1   :  { %v2604_v11 = vpop.xlane.xlu2 %2603 }
 0xae2   :  { %v2618_v38 = vmul.f32 %v2604_v11, %v6439_v30 }
 0xae4   :  { %v7818_v61 = vsub.f32 %v7716_v33, %v2618_v38 }
 0xae6   :  { %v2634_v36 = vmul.f32 %v7818_v61, %v7818_v61 }
 0xae8   :  { %v2650_v31 = vsel %vm171_vm1, %v2634_v36, 0.0 }
 0xae9   :  { %v2607_v17 = vpop.xlane.xlu0 %2606  ;;  %2651 = vadd.xlane.f32.xlu0 %v2650_v31 }
 0xaea   :  { %v2619_v8 = vmul.f32 %v2607_v17, %v6439_v30 }
 0xaec   :  { %v7825_v56 = vsub.f32 %v7722_v0, %v2619_v8 }
 0xaee   :  { %v2635_v26 = vmul.f32 %v7825_v56, %v7825_v56 }
 0xaf0   :  { %v2653_v45 = vsel %vm171_vm1, %v2635_v26, 0.0 }
 0xaf1   :  { %2654 = vadd.xlane.f32.xlu1 %v2653_v45 }
 0xb2f   :  { %v2610_v55 = vpop.xlane.xlu1 %2609 }
 0xb30   :  { %v2620_v18 = vmul.f32 %v2610_v55, %v6439_v30 }
 0xb32   :  { %v7832_v2 = vsub.f32 %v7798_v23, %v2620_v18 }
 0xb34   :  { %v2636_v1 = vmul.f32 %v7832_v2, %v7832_v2  ;;  %v2869_v42 = vpop.f32.mrf.mxu1 }
 0xb35   :  { %v2870_v28 = vadd.f32 %v2869_v42, %v7844_v53 }
 0xb36   :  { %v2656_v43 = vsel %vm171_vm1, %v2636_v1, 0.0 }
 0xb37   :  { %v2613_v10 = vpop.xlane.xlu2 %2612  ;;  %2657 = vadd.xlane.f32.xlu0 %v2656_v43  ;;  %v2918_v58 = vpack.c.bf16 %v2870_v28, %v2870_v28 }
 0xb38   :  { %v2621_v3 = vmul.f32 %v2613_v10, %v6439_v30 }
 0xb39   :  { %v2930_v40 = vunpack.c.l.b16 %v2918_v58 }
 0xb3a   :  { %v7842_v24 = vsub.f32 %v7805_v48, %v2621_v3  ;;  %v2898_v51 = vpop.f32.mrf.mxu2 }
 0xb3b   :  { %v2899_v11 = vadd.f32 %v2898_v51, %v7856_v35 }
 0xb3c   :  { %v2637_v63 = vmul.f32 %v7842_v24, %v7842_v24  ;;  %v2871_v41 = vpop.f32.mrf.mxu1 }
 0xb3d   :  { %v2872_v12 = vadd.f32 %v2871_v41, %v7844_v53  ;;  %v3672_v31 = vpack.c.bf16 %v2899_v11, %v2899_v11 }
 0xb3e   :  { %v2659_v62 = vsel %vm171_vm1, %v2637_v63, 0.0 }
 0xb3f   :  { %2660 = vadd.xlane.f32.xlu1 %v2659_v62  ;;  %v2919_v15 = vpack.c.bf16 %v2872_v12, %v2872_v12  ;;  %v3694_v55 = vunpack.c.l.b16 %v3672_v31 }
 0xb41   :  { %v2931_v5 = vunpack.c.l.b16 %v2919_v15 }
 0xb42   :  { %v2900_v20 = vpop.f32.mrf.mxu2 }
 0xb43   :  { %v7851_v7 = vpack.c.b16 %v2931_v5, %v2930_v40  ;;  %v2901_v49 = vadd.f32 %v2900_v20, %v7856_v35 }
 0xb44   :  { %v2874_v50 = vpop.f32.mrf.mxu1 }
 0xb45   :  { %v2875_v19 = vadd.f32 %v2874_v50, %v7844_v53  ;;  %v3673_v36 = vpack.c.bf16 %v2901_v49, %v2901_v49 }
 0xb47   :  { %v2920_v29 = vpack.c.bf16 %v2875_v19, %v2875_v19  ;;  %v3695_v26 = vunpack.c.l.b16 %v3673_v36 }
 0xb49   :  { %v2932_v25 = vunpack.c.l.b16 %v2920_v29  ;;  %v7880_v18 = vpack.c.b16 %v3695_v26, %v3694_v55 }
 0xb4a   :  { %v2903_v60 = vpop.f32.mrf.mxu2 }
 0xb4b   :  { %2936 = vrot.lane.b32.xlu0 %v7851_v7, %s6278_s27  ;;  %v2904_v21 = vadd.f32 %v2903_v60, %v7856_v35 }
 0xb4c   :  { %v2876_v46 = vpop.f32.mrf.mxu1 }
 0xb4d   :  { %v2877_v27 = vadd.f32 %v2876_v46, %v7844_v53  ;;  %v3674_v16 = vpack.c.bf16 %v2904_v21, %v2904_v21 }
 0xb4f   :  { %v2921_v6 = vpack.c.bf16 %v2877_v27, %v2877_v27  ;;  %v3696_v44 = vunpack.c.l.b16 %v3674_v16 }
 0xb51   :  { %v2933_v22 = vunpack.c.l.b16 %v2921_v6 }
 0xb52   :  { %v2905_v52 = vpop.f32.mrf.mxu2 }
 0xb53   :  { %3214 = vrot.lane.b32.xlu0 %v7851_v7, %s6280_s29  ;;  %v7862_v14 = vpack.c.b16 %v2933_v22, %v2932_v25  ;;  %v2906_v37 = vadd.f32 %v2905_v52, %v7856_v35 }
 0xb55   :  { %v3675_v13 = vpack.c.bf16 %v2906_v37, %v2906_v37  ;;  %2938 = vrot.lane.b32.xlu2 %v7862_v14, %s6278_s27 }
 0xb57   :  { %v3697_v54 = vunpack.c.l.b16 %v3675_v13 }
 0xb58   :  { %3210 = vrot.lane.b32.xlu1 %v7851_v7, %s6279_s28 }
 0xb59   :  { %v7871_v38 = vpack.c.b16 %v3697_v54, %v3696_v44 }
 0xb5b   :  { %3780 = vrot.lane.b32.xlu0 %v7871_v38, %s6283_s20 }
 0xb5c   :  { %v2652_v17 = vpop.xlane.xlu0 %2651 }
 0xb5d   :  { %3138 = vrot.lane.b32.xlu2 %v7851_v7, %s6283_s20  ;;  %v2666_v8 = vmul.f32 %v2652_v17, %v6439_v30 }
 0xb5f   :  { %v2674_v45 = vadd.f32 1e-06, %v2666_v8 }
 0xb60   :  { %3486 = vrot.lane.b32.xlu1 %v7851_v7, %s6282_s30 }
 0xb61   :  { %6093 = vrsqrt.f32 %v2674_v45  ;;  %vm2724_vm11 = vweird.f32 %v2674_v45 }
 0xb64   :  { %v2655_v1 = vpop.xlane.xlu1 %2654 }
 0xb65   :  { %3774 = vrot.lane.b32.xlu2 %v7880_v18, %s6278_s27  ;;  %v2667_v42 = vmul.f32 %v2655_v1, %v6439_v30 }
 0xb67   :  { %v6094_v43 = vpop.eup %6093  ;;  %v2675_v10 = vadd.f32 1e-06, %v2667_v42 }
 0xb68   :  { %3482 = vrot.lane.b32.xlu1 %v7851_v7, %s9038_s6  ;;  %v2719_v47 = vmul.f32 %v6094_v43, %v2674_v45  ;;  %vm2725_vm10 = vweird.f32 %v6094_v43 }
 0xb69   :  { %6095 = vrsqrt.f32 %v2675_v10  ;;  %vm2726_vm12 = vmor %vm2724_vm11, %vm2725_vm10  ;;  %vm2734_vm2 = vweird.f32 %v2675_v10 }
 0xb6a   :  { %v2720_v3 = vmul.f32 %v6094_v43, %v2719_v47 }
 0xb6c   :  { %v2721_v51 = vmul.f32 0.5, %v2720_v3 }
 0xb6d   :  { %3216 = vrot.lane.b32.xlu2 %v7862_v14, %s6280_s29 }
 0xb6e   :  { %v2722_v63 = vsub.f32 1.5, %v2721_v51 }
 0xb6f   :  { %v6096_v41 = vpop.eup %6095 }
 0xb70   :  { %3778 = vrot.lane.b32.xlu1 %v7880_v18, %s6283_s20  ;;  %v2723_v12 = vmul.f32 %v6094_v43, %v2722_v63  ;;  %v2729_v62 = vmul.f32 %v6096_v41, %v2675_v10  ;;  %vm2735_vm14 = vweird.f32 %v6096_v41 }
 0xb71   :  { %vm2736_vm3 = vmor %vm2734_vm2, %vm2735_vm14 }
 0xb72   :  { %v2730_v28 = vmul.f32 %v6096_v41, %v2729_v62  ;;  %v2727_v15 = vsel %vm2726_vm12, %v6094_v43, %v2723_v12 }
 0xb73   :  { %v2762_v5 = vmul.f32 %v2727_v15, %v7818_v61 }
 0xb74   :  { %v2731_v58 = vmul.f32 0.5, %v2730_v28 }
 0xb75   :  { %3140 = vrot.lane.b32.xlu2 %v7862_v14, %s6283_s20  ;;  %v2773_v60 = vmul.f32 %v7780_v34, %v2762_v5 }
 0xb76   :  { %v2732_v20 = vsub.f32 1.5, %v2731_v58 }
 0xb77   :  { %v2784_v29 = vadd.f32 %v7787_v9, %v2773_v60 }
 0xb78   :  { %3212 = vrot.lane.b32.xlu1 %v7862_v14, %s6279_s28  ;;  %v2733_v40 = vmul.f32 %v6096_v41, %v2732_v20 }
 0xb7a   :  { %v2737_v50 = vsel %vm2736_vm3, %v6096_v41, %v2733_v40 }
 0xb7b   :  { %v2763_v19 = vmul.f32 %v2737_v50, %v7825_v56 }
 0xb7d   :  { %3488 = vrot.lane.b32.xlu2 %v7862_v14, %s6282_s30  ;;  %v2774_v46 = vmul.f32 %v7780_v34, %v2763_v19 }
 0xb7f   :  { %v2785_v27 = vadd.f32 %v7787_v9, %v2774_v46 }
 0xb81   :  { %v2790_v21 = vpack.c.bf16 %v2785_v27, %v2784_v29 }
 0xb83   :  { %5527 = vmatmul.msk.bf16.gmra.mxu1 %vm171_vm1, %v2790_v21  ;;  %5531 = vmatmul.msk.bf16.gmra.mxu2 %vm171_vm1, %v2790_v21 }
 0xb85   :  { %3484 = vrot.lane.b32.xlu2 %v7862_v14, %s9038_s6 }
 0xbaa   :  { %v2658_v61 = vpop.xlane.xlu0 %2657 }
 0xbab   :  { %v2668_v56 = vmul.f32 %v2658_v61, %v6439_v30 }
 0xbad   :  { %v2676_v6 = vadd.f32 1e-06, %v2668_v56 }
 0xbaf   :  { %6097 = vrsqrt.f32 %v2676_v6  ;;  %v2939_v22 = vpop.permute.xlu2 %2938  ;;  %vm2744_vm5 = vweird.f32 %v2676_v6 }
 0xbb0   :  { %v2950_v16 = vsel %vm527_vm13, %v2939_v22, 0 }
 0xbb1   :  { %2958 = vmatpush.bf16.xpose.msra.mxu3 %v2950_v16 }
 0xbb2   :  { %v2661_v25 = vpop.xlane.xlu1 %2660 }
 0xbb3   :  { %v2669_v52 = vmul.f32 %v2661_v25, %v6439_v30 }
 0xbb5   :  { %v6098_v37 = vpop.eup %6097  ;;  %v2677_v13 = vadd.f32 1e-06, %v2669_v52 }
 0xbb6   :  { %v2739_v49 = vmul.f32 %v6098_v37, %v2676_v6  ;;  %vm2745_vm4 = vweird.f32 %v6098_v37 }
 0xbb7   :  { %6099 = vrsqrt.f32 %v2677_v13  ;;  %v3139_v11 = vpop.permute.xlu2 %3138  ;;  %vm2746_vm6 = vmor %vm2744_vm5, %vm2745_vm4  ;;  %vm2754_vm8 = vweird.f32 %v2677_v13 }
 0xbb8   :  { %v2740_v44 = vmul.f32 %v6098_v37, %v2739_v49 }
 0xbba   :  { %v2741_v54 = vmul.f32 0.5, %v2740_v44 }
 0xbbc   :  { %v2742_v36 = vsub.f32 1.5, %v2741_v54 }
 0xbbd   :  { %v6100_v31 = vpop.eup %6099  ;;  %v2937_v17 = vpop.permute.xlu0 %2936 }
 0xbbe   :  { %v2743_v8 = vmul.f32 %v6098_v37, %v2742_v36  ;;  %v2749_v26 = vmul.f32 %v6100_v31, %v2677_v13  ;;  %v2947_v45 = vsel %vm527_vm13, %v2937_v17, 0  ;;  %vm2755_vm7 = vweird.f32 %v6100_v31 }
 0xbbf   :  { %2959 = vmatpush.bf16.xpose.msra.mxu3 %v2947_v45  ;;  %v7911_v43 = vpop.permute.xlu2 %3774  ;;  %vm2756_vm9 = vmor %vm2754_vm8, %vm2755_vm7 }
 0xbc0   :  { %v2750_v55 = vmul.f32 %v6100_v31, %v2749_v26  ;;  %v2747_v1 = vsel %vm2746_vm6, %v6098_v37, %v2743_v8 }
 0xbc1   :  { %v2764_v47 = vmul.f32 %v2747_v1, %v7832_v2 }
 0xbc2   :  { %v2751_v42 = vmul.f32 0.5, %v2750_v55 }
 0xbc3   :  { %v2775_v41 = vmul.f32 %v7780_v34, %v2764_v47 }
 0xbc4   :  { %v2752_v10 = vsub.f32 1.5, %v2751_v42 }
 0xbc5   :  { %v2786_v28 = vadd.f32 %v7787_v9, %v2775_v41 }
 0xbc6   :  { %v2753_v3 = vmul.f32 %v6100_v31, %v2752_v10  ;;  %5533 = vmatmul.msk.bf16.vlgmr.msra.gmra.mxu3 %vm527_vm13, %v7851_v7 }
 0xbc7   :  { %v7918_v12 = vpop.permute.xlu2 %3216 }
 0xbc8   :  { %v2757_v51 = vsel %vm2756_vm9, %v6100_v31, %v2753_v3 }
 0xbc9   :  { %v2765_v63 = vmul.f32 %v2757_v51, %v7842_v24 }
 0xbcb   :  { %v2776_v62 = vmul.f32 %v7780_v34, %v2765_v63 }
 0xbcd   :  { %v2787_v15 = vadd.f32 %v7787_v9, %v2776_v62 }
 0xbcf   :  { %v2791_v2 = vpack.c.bf16 %v2787_v15, %v2786_v28  ;;  %v3141_v58 = vpop.permute.xlu2 %3140  ;;  %v3211_v15 = vpop.permute.xlu1 %3210 }
 0xbd0   :  { %3156 = vmatpush.bf16.msra.mxu1 %v3141_v58 }
 0xbd1   :  { %5528 = vmatmul.msk.bf16.gmra.mxu1 %vm171_vm1, %v2791_v2  ;;  %5532 = vmatmul.msk.bf16.gmra.mxu2 %vm171_vm1, %v2791_v2 }
 0xbd4   :  { %3157 = vmatpush.bf16.msra.mxu1 %v3139_v11 }
 0xbd6   :  { %5534 = vmatmul.msk.bf16.gmra.mxu3 %vm527_vm13, %v7862_v14 }
 0xc00   :  { %v2879_v24 = vpop.f32.mrf.mxu1 }
 0xc01   :  { %v2880_v20 = vadd.f32 %v2879_v24, %v7844_v53 }
 0xc03   :  { %v2922_v40 = vpack.c.bf16 %v2880_v20, %v2880_v20 }
 0xc05   :  { %v2975_v60 = vunpack.c.l.b16 %v2922_v40 }
 0xc06   :  { %v2908_v5 = vpop.f32.mrf.mxu2 }
 0xc07   :  { %v2909_v9 = vadd.f32 %v2908_v5, %v7856_v35 }
 0xc08   :  { %v2881_v34 = vpop.f32.mrf.mxu1 }
 0xc09   :  { %v2882_v50 = vadd.f32 %v2881_v34, %v7844_v53  ;;  %v3676_v27 = vpack.c.bf16 %v2909_v9, %v2909_v9  ;;  %v3487_v34 = vpop.permute.xlu1 %3486 }
 0xc0b   :  { %v2923_v19 = vpack.c.bf16 %v2882_v50, %v2882_v50  ;;  %v3741_v6 = vunpack.c.l.b16 %v3676_v27 }
 0xc0d   :  { %v2976_v46 = vunpack.c.l.b16 %v2923_v19 }
 0xc0e   :  { %v2910_v29 = vpop.f32.mrf.mxu2 }
 0xc0f   :  { %v7930_v21 = vpack.c.b16 %v2976_v46, %v2975_v60  ;;  %v2911_v61 = vadd.f32 %v2910_v29, %v7856_v35  ;;  %v3215_v60 = vpop.permute.xlu0 %3214 }
 0xc11   :  { %v3677_v56 = vpack.c.bf16 %v2911_v61, %v2911_v61  ;;  %3525 = vrot.lane.b32.xlu2 %v7930_v21, %s6282_s30  ;;  %3253 = vrot.lane.b32.xlu0 %v7930_v21, %s6280_s29  ;;  %v7976_v9 = vpop.permute.xlu1 %3482 }
 0xc12   :  { %2981 = vrot.lane.b32.xlu1 %v7930_v21, %s6278_s27 }
 0xc13   :  { %v3742_v25 = vunpack.c.l.b16 %v3677_v56 }
 0xc15   :  { %v7939_v22 = vpack.c.b16 %v3742_v25, %v3741_v6 }
 0xc17   :  { %v3781_v29 = vpop.permute.xlu0 %3780 }
 0xc19   :  { %3521 = vrot.lane.b32.xlu0 %v7930_v21, %s9038_s6  ;;  %v3779_v19 = vpop.permute.xlu1 %3778 }
 0xc1a   :  { %3249 = vrot.lane.b32.xlu1 %v7930_v21, %s6279_s28 }
 0xc21   :  { %v3213_v46 = vpop.permute.xlu1 %3212 }
 0xc49   :  { %v2961_v52 = vpop.f32.mrf.mxu3 }
 0xc4a   :  { %v3016_v62 = vmul.f32 0.25, %v2961_v52 }
 0xc4c   :  { %v3024_v28 = vadd.f32 %v3016_v62, %v6758_v4 }
 0xc4e   :  { %v2884_v16 = vpop.f32.mrf.mxu1  ;;  %v3032_v58 = vsel %vm620_vm15, %v3024_v28, -inf }
 0xc4f   :  { %v2885_v13 = vadd.f32 %v2884_v16, %v7844_v53 }
 0xc51   :  { %v2963_v37 = vpop.f32.mrf.mxu3  ;;  %v2924_v44 = vpack.c.bf16 %v2885_v13, %v2885_v13 }
 0xc52   :  { %v3017_v2 = vmul.f32 0.25, %v2963_v37 }
 0xc53   :  { %v2977_v17 = vunpack.c.l.b16 %v2924_v44  ;;  %v3228_v44 = vsel %vm527_vm13, %v7918_v12, 0 }
 0xc54   :  { %v2913_v26 = vpop.f32.mrf.mxu2 }
 0xc55   :  { %v2914_v10 = vadd.f32 %v2913_v26, %v7856_v35  ;;  %v3792_v26 = vsel %vm527_vm13, %v3781_v29, 0 }
 0xc56   :  { %v2886_v49 = vpop.f32.mrf.mxu1 }
 0xc57   :  { %v2887_v54 = vadd.f32 %v2886_v49, %v7844_v53  ;;  %v3678_v3 = vpack.c.bf16 %v2914_v10, %v2914_v10 }
 0xc59   :  { %v2925_v11 = vpack.c.bf16 %v2887_v54, %v2887_v54  ;;  %v2966_v36 = vpop.f32.mrf.mxu3  ;;  %v3743_v63 = vunpack.c.l.b16 %v3678_v3  ;;  %v3489_v54 = vpop.permute.xlu2 %3488  ;;  %v3789_v3 = vsel %vm527_vm13, %v3779_v19, 0 }
 0xc5a   :  { %v3018_v31 = vmul.f32 0.25, %v2966_v36  ;;  %v3500_v36 = vsel %vm527_vm13, %v3489_v54, 0 }
 0xc5b   :  { %v2978_v8 = vunpack.c.l.b16 %v2925_v11  ;;  %v3225_v11 = vsel %vm527_vm13, %v3215_v60, 0 }
 0xc5c   :  { %v7948_v45 = vadd.f32 %v3018_v31, %v6758_v4  ;;  %v2915_v53 = vpop.f32.mrf.mxu2  ;;  %v3497_v31 = vsel %vm527_vm13, %v3487_v34, 0 }
 0xc5d   :  { %v7950_v55 = vpack.c.b16 %v2978_v8, %v2977_v17  ;;  %v2916_v42 = vadd.f32 %v2915_v53, %v7856_v35  ;;  %v3025_v35 = vadd.f32 %v3017_v2, %v6758_v4 }
 0xc5e   :  { %v3038_v1 = vsel %vm620_vm15, %v7948_v45, -inf }
 0xc5f   :  { %3039 = vmax.xlane.f32.xlu2 %v3038_v1  ;;  %3255 = vrot.lane.b32.xlu1 %v7950_v55, %s6280_s29  ;;  %v3679_v47 = vpack.c.bf16 %v2916_v42, %v2916_v42  ;;  %v3035_v5 = vsel %vm620_vm15, %v3025_v35, -inf }
 0xc60   :  { %2983 = vrot.lane.b32.xlu0 %v7950_v55, %s6278_s27 }
 0xc61   :  { %v3744_v51 = vunpack.c.l.b16 %v3679_v47  ;;  %v2968_v24 = vpop.f32.mrf.mxu3  ;;  %v3485_v17 = vpop.permute.xlu2 %3484 }
 0xc62   :  { %v3019_v20 = vmul.f32 0.25, %v2968_v24 }
 0xc63   :  { %v7966_v41 = vpack.c.b16 %v3744_v51, %v3743_v63 }
 0xc64   :  { %v3027_v40 = vadd.f32 %v3019_v20, %v6758_v4 }
 0xc66   :  { %v3041_v50 = vsel %vm620_vm15, %v3027_v40, -inf }
 0xc67   :  { %3527 = vrot.lane.b32.xlu1 %v7950_v55, %s6282_s30 }
 0xc68   :  { %3251 = vrot.lane.b32.xlu0 %v7950_v55, %s6279_s28 }
 0xc6b   :  { %v7997_v12 = vpop.permute.xlu2 %3525 }
 0xc70   :  { %3776 = vrot.lane.b32.xlu0 %v7871_v38, %s6278_s27 }
 0xc77   :  { %3819 = vrot.lane.b32.xlu2 %v7966_v41, %s6283_s20 }
 0xc83   :  { %v3254_v61 = vpop.permute.xlu0 %3253 }
 0xc84   :  { %v2982_v27 = vpop.permute.xlu1 %2981  ;;  %v3264_v13 = vsel %vm527_vm13, %v3254_v61, 0 }
 0xc85   :  { %v2992_v49 = vsel %vm527_vm13, %v2982_v27, 0 }
 0xc8b   :  { %v7982_v6 = vpop.permute.xlu0 %3521 }
 0xc8c   :  { %v7980_v56 = vpop.permute.xlu1 %3249 }
 0xc91   :  { %3033 = vmax.xlane.f32.xlu1 %v3032_v58 }
 0xc99   :  { %3036 = vmax.xlane.f32.xlu1 %v3035_v5 }
 0xca1   :  { %3042 = vmax.xlane.f32.xlu1 %v3041_v50 }
 0xcba   :  { %3523 = vrot.lane.b32.xlu1 %v7950_v55, %s9038_s6 }
 0xcd1   :  { %v3256_v25 = vpop.permute.xlu1 %3255 }
 0xcd2   :  { %v2984_v52 = vpop.permute.xlu0 %2983  ;;  %v3267_v16 = vsel %vm527_vm13, %v3256_v25, 0  ;;  %v3040_v1 = vpop.xlane.xlu2 %3039 }
 0xcd3   :  { %v2995_v37 = vsel %vm527_vm13, %v2984_v52, 0  ;;  %3275 = vmatpush.bf16.xpose.msrb.mxu1 %v3267_v16  ;;  %v3058_v10 = vsub.f32 %v7948_v45, %v3040_v1 }
 0xcd4   :  { %3003 = vmatpush.bf16.xpose.msra.mxu0 %v2995_v37 }
 0xcd5   :  { %v3068_v51 = vmul.f32 1.442695, %v3058_v10 }
 0xcd9   :  { %v7999_v8 = vpop.permute.xlu1 %3527 }
 0xcdb   :  { %3276 = vmatpush.bf16.xpose.msrb.mxu1 %v3264_v13 }
 0xcdc   :  { %3004 = vmatpush.bf16.xpose.msra.mxu0 %v2992_v49 }
 0xce3   :  { %5535 = vmatmul.msk.bf16.vlgmr.msra.gmra.mxu0 %vm527_vm13, %v7930_v21 }
 0xce4   :  { %3236 = vmatpush.bf16.xpose.msrb.mxu0 %v3228_v44 }
 0xcec   :  { %3237 = vmatpush.bf16.xpose.msrb.mxu0 %v3225_v11 }
 0xcf3   :  { %5536 = vmatmul.msk.bf16.gmra.mxu0 %vm527_vm13, %v7950_v55 }
 0xcf4   :  { %3508 = vmatpush.bf16.xpose.msra.mxu0 %v3500_v36 }
 0xcfc   :  { %3509 = vmatpush.bf16.xpose.msra.mxu0 %v3497_v31 }
 0xd03   :  { %5541 = vmatmul.msk.bf16.vlgmr.msrb.gmra.mxu0 %vm527_vm13, %v3211_v15 }
 0xd04   :  { %3800 = vmatpush.bf16.xpose.msrb.mxu0 %v3792_v26  ;;  %v3034_v53 = vpop.xlane.xlu1 %3033 }
 0xd05   :  { %v3056_v42 = vsub.f32 %v3024_v28, %v3034_v53 }
 0xd07   :  { %v3064_v47 = vmul.f32 1.442695, %v3056_v42 }
 0xd09   :  { %6101 = vpow2.f32 %v3064_v47 }
 0xd0a   :  { %6103 = vpow2.f32 %v3068_v51 }
 0xd0c   :  { %3801 = vmatpush.bf16.xpose.msrb.mxu0 %v3789_v3  ;;  %v3037_v63 = vpop.xlane.xlu1 %3036  ;;  %v8064_v3 = vpop.permute.xlu2 %3819 }
 0xd0d   :  { %v3057_v62 = vsub.f32 %v3025_v35, %v3037_v63 }
 0xd0f   :  { %v8005_v2 = vpop.eup %6101  ;;  %v3066_v58 = vmul.f32 1.442695, %v3057_v62 }
 0xd10   :  { %v3080_v15 = vsel %vm620_vm15, %v8005_v2, 0.0  ;;  %v8010_v28 = vpop.eup %6103 }
 0xd11   :  { %6105 = vpow2.f32 %v3066_v58  ;;  %3081 = vadd.xlane.f32.xlu0 %v3080_v15  ;;  %v3086_v35 = vsel %vm620_vm15, %v8010_v28, 0.0 }
 0xd13   :  { %5542 = vmatmul.msk.bf16.gmra.mxu0 %vm527_vm13, %v3213_v46 }
 0xd14   :  { %v3043_v45 = vpop.xlane.xlu1 %3042 }
 0xd15   :  { %v3059_v24 = vsub.f32 %v3027_v40, %v3043_v45  ;;  %v8033_v40 = vpop.permute.xlu0 %3251 }
 0xd17   :  { %v8012_v20 = vpop.eup %6105  ;;  %v3070_v5 = vmul.f32 1.442695, %v3059_v24 }
 0xd18   :  { %v3083_v34 = vsel %vm620_vm15, %v8012_v20, 0.0 }
 0xd19   :  { %6107 = vpow2.f32 %v3070_v5  ;;  %3087 = vadd.xlane.f32.xlu0 %v3086_v35  ;;  %3084 = vadd.xlane.f32.xlu1 %v3083_v34 }
 0xd1d   :  { %v3777_v60 = vpop.permute.xlu0 %3776 }
 0xd1f   :  { %v8018_v50 = vpop.eup %6107 }
 0xd20   :  { %v3089_v19 = vsel %vm620_vm15, %v8018_v50, 0.0 }
 0xd21   :  { %3090 = vadd.xlane.f32.xlu2 %v3089_v19 }
 0xd23   :  { %5549 = vmatmul.msk.bf16.vlgmr.msra.gmra.mxu0 %vm527_vm13, %v7976_v9 }
 0xd2c   :  { %v8054_v31 = vpop.permute.xlu1 %3523 }
 0xd2d   :  { %3813 = vrot.lane.b32.xlu0 %v7939_v22, %s6278_s27 }
 0xd32   :  { %3817 = vrot.lane.b32.xlu1 %v7939_v22, %s6283_s20 }
 0xd33   :  { %5550 = vmatmul.msk.bf16.gmra.mxu0 %vm527_vm13, %v3485_v17 }
 0xd39   :  { %3815 = vrot.lane.b32.xlu2 %v7966_v41, %s6278_s27  ;;  %s9039_s27 = smov 48  }
 0xd43   :  { %5557 = vmatmul.msk.bf16.vlgmr.msrb.gmra.mxu0 %vm527_vm13, %v7911_v43 }
 0xd53   :  { %5558 = vmatmul.msk.bf16.gmra.mxu0 %vm527_vm13, %v3777_v60 }
 0xd60   :  { %v3006_v9 = vpop.f32.mrf.mxu0 }
 0xd61   :  { %v3020_v46 = vmul.f32 0.25, %v3006_v9 }
 0xd63   :  { %v8037_v29 = vadd.f32 %v3020_v46, %v6758_v4 }
 0xd65   :  { %v3044_v27 = vsel %vm620_vm15, %v8037_v29, -inf }
 0xd66   :  { %3045 = vmax.xlane.f32.xlu1 %v3044_v27 }
 0xd68   :  { %v3008_v61 = vpop.f32.mrf.mxu0 }
 0xd69   :  { %v3021_v25 = vmul.f32 0.25, %v3008_v61 }
 0xd6b   :  { %v8042_v52 = vadd.f32 %v3021_v25, %v6758_v4 }
 0xd6d   :  { %v3047_v43 = vsel %vm620_vm15, %v8042_v52, -inf }
 0xd6e   :  { %3048 = vmax.xlane.f32.xlu0 %v3047_v43 }
 0xd70   :  { %v3011_v16 = vpop.f32.mrf.mxu0 }
 0xd71   :  { %v3022_v37 = vmul.f32 0.25, %v3011_v16 }
 0xd73   :  { %v8047_v13 = vadd.f32 %v3022_v37, %v6758_v4 }
 0xd75   :  { %v3050_v49 = vsel %vm620_vm15, %v8047_v13, -inf }
 0xd76   :  { %3051 = vmax.xlane.f32.xlu0 %v3050_v49 }
 0xd78   :  { %v3013_v44 = vpop.f32.mrf.mxu0 }
 0xd79   :  { %v3023_v17 = vmul.f32 0.25, %v3013_v44  ;;  %v3539_v44 = vsel %vm527_vm13, %v7999_v8, 0  ;;  %v3536_v8 = vsel %vm527_vm13, %v7997_v12, 0 }
 0xd7b   :  { %v8059_v42 = vadd.f32 %v3023_v17, %v6758_v4 }
 0xd7d   :  { %v3053_v62 = vsel %vm620_vm15, %v8059_v42, -inf }
 0xd80   :  { %v3239_v54 = vpop.f32.mrf.mxu0 }
 0xd81   :  { %v3288_v11 = vmul.f32 0.25, %v3239_v54 }
 0xd83   :  { %v8052_v36 = vadd.f32 %v3288_v11, %v6758_v4 }
 0xd84   :  { %v3082_v26 = vpop.xlane.xlu0 %3081 }
 0xd85   :  { %v3304_v1 = vsel %vm620_vm15, %v8052_v36, -inf  ;;  %6109 = vrcp.f32 %v3082_v26 }
 0xd86   :  { %3305 = vmax.xlane.f32.xlu2 %v3304_v1 }
 0xd88   :  { %v3241_v53 = vpop.f32.mrf.mxu0 }
 0xd89   :  { %v3289_v10 = vmul.f32 0.25, %v3241_v53 }
 0xd8b   :  { %v8062_v47 = vadd.f32 %v3289_v10, %v6758_v4  ;;  %v6110_v58 = vpop.eup %6109 }
 0xd8c   :  { %v3085_v51 = vpop.xlane.xlu1 %3084  ;;  %v3112_v45 = vmul.f32 %v6110_v58, %v8005_v2  ;;  %v3088_v60 = vpop.xlane.xlu0 %3087 }
 0xd8d   :  { %v3307_v63 = vsel %vm620_vm15, %v8062_v47, -inf  ;;  %6111 = vrcp.f32 %v3085_v51 }
 0xd8e   :  { %3308 = vmax.xlane.f32.xlu1 %v3307_v63  ;;  %3054 = vmax.xlane.f32.xlu2 %v3053_v62  ;;  %v3120_v19 = vpack.c.bf16 %v3112_v45, %v3112_v45 }
 0xd90   :  { %v3244_v15 = vpop.f32.mrf.mxu0  ;;  %v3132_v25 = vunpack.c.l.b16 %v3120_v19 }
 0xd91   :  { %v3290_v24 = vmul.f32 0.25, %v3244_v15 }
 0xd93   :  { %v8072_v5 = vadd.f32 %v3290_v24, %v6758_v4  ;;  %v6112_v35 = vpop.eup %6111 }
 0xd94   :  { %v3091_v34 = vpop.xlane.xlu2 %3090  ;;  %v3113_v9 = vmul.f32 %v6112_v35, %v8012_v20 }
 0xd95   :  { %v3310_v46 = vsel %vm620_vm15, %v8072_v5, -inf  ;;  %6113 = vrcp.f32 %v3091_v34 }
 0xd96   :  { %3311 = vmax.xlane.f32.xlu1 %v3310_v46  ;;  %v3121_v27 = vpack.c.bf16 %v3113_v9, %v3113_v9  ;;  %6115 = vrcp.f32 %v3088_v60 }
 0xd98   :  { %v3246_v61 = vpop.f32.mrf.mxu0  ;;  %v3133_v2 = vunpack.c.l.b16 %v3121_v27  ;;  %v3831_v27 = vsel %vm527_vm13, %v8064_v3, 0 }
 0xd99   :  { %v3291_v43 = vmul.f32 0.25, %v3246_v61 }
 0xd9a   :  { %v3136_v16 = vpack.c.b16 %v3133_v2, %v3132_v25 }
 0xd9b   :  { %v8078_v37 = vadd.f32 %v3291_v43, %v6758_v4  ;;  %v6114_v49 = vpop.eup %6113 }
 0xd9c   :  { %5537 = vmatmul.msk.bf16.vlgmr.msra.gmra.mxu1 %vm620_vm15, %v3136_v16  ;;  %v6116_v54 = vpop.eup %6115  ;;  %v3115_v11 = vmul.f32 %v6114_v49, %v8018_v50 }
 0xd9d   :  { %v3313_v20 = vsel %vm620_vm15, %v8078_v37, -inf  ;;  %3547 = vmatpush.bf16.xpose.msra.mxu1 %v3539_v44  ;;  %v3114_v26 = vmul.f32 %v6116_v54, %v8010_v28 }
 0xd9e   :  { %3314 = vmax.xlane.f32.xlu0 %v3313_v20  ;;  %v3123_v53 = vpack.c.bf16 %v3115_v11, %v3115_v11  ;;  %v3816_v11 = vpop.permute.xlu2 %3815 }
 0xd9f   :  { %v3122_v51 = vpack.c.bf16 %v3114_v26, %v3114_v26  ;;  %v3814_v20 = vpop.permute.xlu0 %3813 }
 0xda0   :  { %v3511_v17 = vpop.f32.mrf.mxu0  ;;  %v3135_v62 = vunpack.c.l.b16 %v3123_v53 }
 0xda1   :  { %v3560_v1 = vmul.f32 0.25, %v3511_v17  ;;  %v3134_v50 = vunpack.c.l.b16 %v3122_v51 }
 0xda3   :  { %v8088_v10 = vadd.f32 %v3560_v1, %v6758_v4  ;;  %v3137_v45 = vpack.c.b16 %v3135_v62, %v3134_v50 }
 0xda4   :  { %v3818_v43 = vpop.permute.xlu1 %3817 }
 0xda5   :  { %v3576_v63 = vsel %vm620_vm15, %v8088_v10, -inf  ;;  %3548 = vmatpush.bf16.xpose.msra.mxu1 %v3536_v8  ;;  %v3828_v49 = vsel %vm527_vm13, %v3818_v43, 0 }
 0xda6   :  { %3577 = vmax.xlane.f32.xlu0 %v3576_v63 }
 0xda8   :  { %v3513_v58 = vpop.f32.mrf.mxu0 }
 0xda9   :  { %v3561_v15 = vmul.f32 0.25, %v3513_v58 }
 0xdab   :  { %v8095_v28 = vadd.f32 %v3561_v15, %v6758_v4 }
 0xdac   :  { %5538 = vmatmul.msk.bf16.gmra.mxu1 %vm620_vm15, %v3137_v45 }
 0xdad   :  { %v3579_v24 = vsel %vm620_vm15, %v8095_v28, -inf }
 0xdae   :  { %3580 = vmax.xlane.f32.xlu2 %v3579_v24 }
 0xdb0   :  { %v3516_v12 = vpop.f32.mrf.mxu0 }
 0xdb1   :  { %v3562_v35 = vmul.f32 0.25, %v3516_v12 }
 0xdb3   :  { %v8101_v34 = vadd.f32 %v3562_v35, %v6758_v4 }
 0xdb5   :  { %v3582_v19 = vsel %vm620_vm15, %v8101_v34, -inf }
 0xdb6   :  { %3583 = vmax.xlane.f32.xlu2 %v3582_v19 }
 0xdb8   :  { %v3518_v60 = vpop.f32.mrf.mxu0 }
 0xdb9   :  { %v3563_v9 = vmul.f32 0.25, %v3518_v60 }
 0xdbb   :  { %v8106_v46 = vadd.f32 %v3563_v9, %v6758_v4 }
 0xdbc   :  { %5543 = vmatmul.msk.bf16.vlgmr.msrb.gmra.mxu1 %vm527_vm13, %v7980_v56 }
 0xdbd   :  { %v3585_v61 = vsel %vm620_vm15, %v8106_v46, -inf  ;;  %3839 = vmatpush.bf16.xpose.msrb.mxu1 %v3831_v27 }
 0xdbe   :  { %3586 = vmax.xlane.f32.xlu1 %v3585_v61 }
 0xdc0   :  { %v3803_v25 = vpop.f32.mrf.mxu0 }
 0xdc1   :  { %v3852_v2 = vmul.f32 0.25, %v3803_v25 }
 0xdc3   :  { %v8115_v16 = vadd.f32 %v3852_v2, %v6758_v4 }
 0xdc5   :  { %v3868_v44 = vsel %vm620_vm15, %v8115_v16, -inf  ;;  %3840 = vmatpush.bf16.xpose.msrb.mxu1 %v3828_v49 }
 0xdc6   :  { %3869 = vmax.xlane.f32.xlu0 %v3868_v44 }
 0xdc8   :  { %v3805_v56 = vpop.f32.mrf.mxu0 }
 0xdcc   :  { %5544 = vmatmul.msk.bf16.gmra.mxu1 %vm527_vm13, %v8033_v40  ;;  %v3853_v40 = vmul.f32 0.25, %v3805_v56 }
 0xdce   :  { %3181 = vrot.lane.b32.xlu2 %v7950_v55, %s6283_s20 }
 0xdd0   :  { %v3808_v3 = vpop.f32.mrf.mxu0 }
 0xdd1   :  { %v3854_v50 = vmul.f32 0.25, %v3808_v3 }
 0xdd3   :  { %v8156_v60 = vadd.f32 %v3854_v50, %v6758_v4 }
 0xdd5   :  { %v3874_v25 = vsel %vm620_vm15, %v8156_v60, -inf }
 0xdd7   :  { %3412 = vrot.lane.b32.xlu1 %v7862_v14, %s9039_s27  ;;  %v8135_v14 = vadd.f32 %v3853_v40, %v6758_v4 }
 0xdd8   :  { %v3810_v26 = vpop.f32.mrf.mxu0 }
 0xdd9   :  { %v3046_v54 = vpop.xlane.xlu1 %3045  ;;  %v3855_v1 = vmul.f32 0.25, %v3810_v26  ;;  %v3871_v8 = vsel %vm620_vm15, %v8135_v14, -inf }
 0xdda   :  { %3410 = vrot.lane.b32.xlu0 %v7851_v7, %s9039_s27  ;;  %v3060_v7 = vsub.f32 %v8037_v29, %v3046_v54 }
 0xddb   :  { %v8142_v63 = vadd.f32 %v3855_v1, %v6758_v4 }
 0xddc   :  { %5551 = vmatmul.msk.bf16.vlgmr.msra.gmra.mxu1 %vm527_vm13, %v7982_v6  ;;  %v3072_v53 = vmul.f32 1.442695, %v3060_v7 }
 0xddd   :  { %v3877_v29 = vsel %vm620_vm15, %v8142_v63, -inf }
 0xdde   :  { %6117 = vpow2.f32 %v3072_v53 }
 0xddf   :  { %3179 = vrot.lane.b32.xlu1 %v7930_v21, %s6283_s20 }
 0xde1   :  { %v3049_v17 = vpop.xlane.xlu0 %3048 }
 0xde2   :  { %v3061_v6 = vsub.f32 %v8042_v52, %v3049_v17 }
 0xde4   :  { %v3074_v51 = vmul.f32 1.442695, %v3061_v6  ;;  %v8148_v58 = vpop.eup %6117 }
 0xde5   :  { %v3092_v19 = vsel %vm620_vm15, %v8148_v58, 0.0 }
 0xde6   :  { %6119 = vpow2.f32 %v3074_v51 }
 0xde9   :  { %v3052_v62 = vpop.xlane.xlu0 %3051 }
 0xdea   :  { %v3062_v52 = vsub.f32 %v8047_v13, %v3052_v62 }
 0xdec   :  { %5552 = vmatmul.msk.bf16.gmra.mxu1 %vm527_vm13, %v8054_v31  ;;  %v8151_v12 = vpop.eup %6119  ;;  %v3076_v35 = vmul.f32 1.442695, %v3062_v52 }
 0xded   :  { %v3095_v27 = vsel %vm620_vm15, %v8151_v12, 0.0 }
 0xdf7   :  { %3872 = vmax.xlane.f32.xlu2 %v3871_v8 }
 0xdf9   :  { %v3306_v31 = vpop.xlane.xlu2 %3305 }
 0xdfc   :  { %5559 = vmatmul.msk.bf16.vlgmr.msrb.gmra.mxu1 %vm527_vm13, %v3814_v20 }
 0xdff   :  { %3878 = vmax.xlane.f32.xlu2 %v3877_v29 }
 0xe01   :  { %v3055_v15 = vpop.xlane.xlu2 %3054  ;;  %v3309_v45 = vpop.xlane.xlu1 %3308 }
 0xe02   :  { %v3063_v24 = vsub.f32 %v8059_v42, %v3055_v15  ;;  %v3329_v13 = vsub.f32 %v8062_v47, %v3309_v45  ;;  %v3328_v42 = vsub.f32 %v8052_v36, %v3306_v31 }
 0xe04   :  { %v3078_v9 = vmul.f32 1.442695, %v3063_v24  ;;  %3093 = vadd.xlane.f32.xlu0 %v3092_v19  ;;  %v3338_v61 = vmul.f32 1.442695, %v3329_v13  ;;  %v3336_v49 = vmul.f32 1.442695, %v3328_v42 }
 0xe06   :  { %6121 = vpow2.f32 %v3078_v9 }
 0xe07   :  { %6123 = vpow2.f32 %v3076_v35  ;;  %3096 = vadd.xlane.f32.xlu2 %v3095_v27 }
 0xe08   :  { %6125 = vpow2.f32 %v3338_v61 }
 0xe09   :  { %3875 = vmax.xlane.f32.xlu1 %v3874_v25  ;;  %v3312_v2 = vpop.xlane.xlu1 %3311 }
 0xe0a   :  { %v3330_v43 = vsub.f32 %v8072_v5, %v3312_v2 }
 0xe0c   :  { %v8165_v44 = vpop.eup %6121  ;;  %v3340_v47 = vmul.f32 1.442695, %v3330_v43  ;;  %5560 = vmatmul.msk.bf16.gmra.mxu1 %vm527_vm13, %v3816_v11 }
 0xe0d   :  { %v8167_v56 = vpop.eup %6123  ;;  %v3101_v36 = vsel %vm620_vm15, %v8165_v44, 0.0 }
 0xe0e   :  { %6127 = vpow2.f32 %v3340_v47  ;;  %3102 = vadd.xlane.f32.xlu0 %v3101_v36  ;;  %v3098_v3 = vsel %vm620_vm15, %v8167_v56, 0.0  ;;  %v8174_v5 = vpop.eup %6125 }
 0xe0f   :  { %6129 = vpow2.f32 %v3336_v49  ;;  %v3355_v11 = vsel %vm620_vm15, %v8174_v5, 0.0 }
 0xe11   :  { %v3315_v20 = vpop.xlane.xlu0 %3314  ;;  %3099 = vadd.xlane.f32.xlu1 %v3098_v3 }
 0xe12   :  { %v3331_v40 = vsub.f32 %v8078_v37, %v3315_v20 }
 0xe14   :  { %v8177_v54 = vpop.eup %6127  ;;  %v3342_v7 = vmul.f32 1.442695, %v3331_v40 }
 0xe15   :  { %v8179_v17 = vpop.eup %6129  ;;  %v3358_v26 = vsel %vm620_vm15, %v8177_v54, 0.0 }
 0xe16   :  { %6131 = vpow2.f32 %v3342_v7  ;;  %3356 = vadd.xlane.f32.xlu0 %v3355_v11  ;;  %3359 = vadd.xlane.f32.xlu2 %v3358_v26  ;;  %v3352_v6 = vsel %vm620_vm15, %v8179_v17, 0.0 }
 0xe19   :  { %v3578_v1 = vpop.xlane.xlu0 %3577  ;;  %3353 = vadd.xlane.f32.xlu1 %v3352_v6  ;;  %v8188_v53 = vpop.f32.mrf.mxu1 }
 0xe1a   :  { %v3600_v37 = vsub.f32 %v8088_v10, %v3578_v1 }
 0xe1c   :  { %v8190_v8 = vpop.eup %6131  ;;  %v3608_v51 = vmul.f32 1.442695, %v3600_v37 }
 0xe1d   :  { %v3361_v31 = vsel %vm620_vm15, %v8190_v8, 0.0 }
 0xe1e   :  { %6133 = vpow2.f32 %v3608_v51  ;;  %3362 = vadd.xlane.f32.xlu2 %v3361_v31 }
 0xe21   :  { %v3581_v62 = vpop.xlane.xlu2 %3580  ;;  %v8195_v52 = vpop.f32.mrf.mxu1 }
 0xe22   :  { %v3601_v29 = vsub.f32 %v8095_v28, %v3581_v62 }
 0xe24   :  { %v8197_v50 = vpop.eup %6133  ;;  %v3610_v15 = vmul.f32 1.442695, %v3601_v29 }
 0xe25   :  { %v3624_v10 = vsel %vm620_vm15, %v8197_v50, 0.0 }
 0xe26   :  { %6135 = vpow2.f32 %v3610_v15  ;;  %3625 = vadd.xlane.f32.xlu2 %v3624_v10 }
 0xe29   :  { %v8201_v45 = vpop.xlane.xlu2 %3583  ;;  %v8203_v24 = vpop.f32.mrf.mxu1 }
 0xe2c   :  { %v8205_v35 = vpop.eup %6135 }
 0xe2d   :  { %v3627_v19 = vsel %vm620_vm15, %v8205_v35, 0.0 }
 0xe2e   :  { %3628 = vadd.xlane.f32.xlu0 %v3627_v19 }
 0xe31   :  { %v3182_v28 = vpop.permute.xlu2 %3181  ;;  %v3587_v9 = vpop.xlane.xlu1 %3586 }
 0xe32   :  { %v3603_v13 = vsub.f32 %v8106_v46, %v3587_v9  ;;  %v8210_v27 = vpop.f32.mrf.mxu1  ;;  %3197 = vmatpush.bf16.msrb.mxu3 %v3182_v28 }
 0xe34   :  { %v3614_v42 = vmul.f32 1.442695, %v3603_v13 }
 0xe36   :  { %6137 = vpow2.f32 %v3614_v42 }
 0xe39   :  { %v3870_v61 = vpop.xlane.xlu0 %3869 }
 0xe3a   :  { %v3892_v25 = vsub.f32 %v8115_v16, %v3870_v61  ;;  %v3278_v2 = vpop.f32.mrf.mxu1 }
 0xe3b   :  { %v3292_v43 = vmul.f32 0.25, %v3278_v2 }
 0xe3c   :  { %v8213_v49 = vpop.eup %6137  ;;  %v3900_v47 = vmul.f32 1.442695, %v3892_v25 }
 0xe3d   :  { %v8216_v36 = vadd.f32 %v3292_v43, %v6758_v4  ;;  %v3633_v3 = vsel %vm620_vm15, %v8213_v49, 0.0 }
 0xe3e   :  { %6139 = vpow2.f32 %v3900_v47  ;;  %3634 = vadd.xlane.f32.xlu0 %v3633_v3 }
 0xe3f   :  { %v3316_v46 = vsel %vm620_vm15, %v8216_v36, -inf }
 0xe40   :  { %3317 = vmax.xlane.f32.xlu2 %v3316_v46 }
 0xe42   :  { %v3280_v20 = vpop.f32.mrf.mxu1 }
 0xe43   :  { %v3293_v40 = vmul.f32 0.25, %v3280_v20 }
 0xe44   :  { %v8222_v16 = vpop.eup %6139 }
 0xe45   :  { %v8225_v7 = vadd.f32 %v3293_v40, %v6758_v4  ;;  %v3916_v11 = vsel %vm620_vm15, %v8222_v16, 0.0 }
 0xe46   :  { %3917 = vadd.xlane.f32.xlu0 %v3916_v11 }
 0xe47   :  { %v3319_v26 = vsel %vm620_vm15, %v8225_v7, -inf }
 0xe48   :  { %3320 = vmax.xlane.f32.xlu1 %v3319_v26  ;;  %v3602_v26 = vsub.f32 %v8101_v34, %v8201_v45 }
 0xe49   :  { %v3413_v6 = vpop.permute.xlu1 %3412 }
 0xe4a   :  { %v3283_v1 = vpop.f32.mrf.mxu1  ;;  %3428 = vmatpush.bf16.msra.mxu2 %v3413_v6 }
 0xe4b   :  { %v3294_v37 = vmul.f32 0.25, %v3283_v1 }
 0xe4c   :  { %v3411_v51 = vpop.permute.xlu0 %3410 }
 0xe4d   :  { %v8232_v31 = vadd.f32 %v3294_v37, %v6758_v4 }
 0xe4e   :  { %3429 = vmatpush.bf16.msra.mxu2 %v3411_v51 }
 0xe4f   :  { %v3322_v62 = vsel %vm620_vm15, %v8232_v31, -inf }
 0xe50   :  { %3323 = vmax.xlane.f32.xlu1 %v3322_v62 }
 0xe51   :  { %v3180_v29 = vpop.permute.xlu1 %3179 }
 0xe52   :  { %3714 = vmatpush.bf16.msrb.mxu2 %v7871_v38  ;;  %3198 = vmatpush.bf16.msrb.mxu3 %v3180_v29  ;;  %v3285_v15 = vpop.f32.mrf.mxu1 }
 0xe53   :  { %v3295_v47 = vmul.f32 0.25, %v3285_v15 }
 0xe56   :  { %3715 = vmatpush.bf16.msrb.mxu2 %v7880_v18 }
 0xe58   :  { %3451 = vrot.lane.b32.xlu2 %v7930_v21, %s9039_s27 }
 0xe5a   :  { %v3550_v10 = vpop.f32.mrf.mxu1  ;;  %3976 = vrot.lane.b32.xlu0 %v7871_v38, %s6279_s28 }
 0xe5b   :  { %v3564_v62 = vmul.f32 0.25, %v3550_v10 }
 0xe62   :  { %v3552_v19 = vpop.f32.mrf.mxu1 }
 0xe69   :  { %3453 = vrot.lane.b32.xlu1 %v7950_v55, %s9039_s27  ;;  %v8252_v55 = vadd.f32 %v3295_v47, %v6758_v4 }
 0xe6a   :  { %v3873_v28 = vpop.xlane.xlu2 %3872  ;;  %v8244_v9 = vpop.f32.mrf.mxu1 }
 0xe6b   :  { %v3325_v29 = vsel %vm620_vm15, %v8252_v55, -inf }
 0xe72   :  { %v3879_v13 = vpop.xlane.xlu2 %3878  ;;  %v3557_v42 = vpop.f32.mrf.mxu1 }
 0xe73   :  { %v3567_v25 = vmul.f32 0.25, %v3557_v42 }
 0xe75   :  { %v8247_v21 = vadd.f32 %v3567_v25, %v6758_v4  ;;  %v8266_v25 = vadd.f32 %v3564_v62, %v6758_v4 }
 0xe77   :  { %v3094_v61 = vpop.xlane.xlu0 %3093  ;;  %v3597_v40 = vsel %vm620_vm15, %v8247_v21, -inf }
 0xe78   :  { %6141 = vrcp.f32 %v3094_v61  ;;  %v3612_v61 = vmul.f32 1.442695, %v3602_v26 }
 0xe7a   :  { %v3097_v2 = vpop.xlane.xlu2 %3096  ;;  %v3842_v43 = vpop.f32.mrf.mxu1 }
 0xe7b   :  { %6143 = vrcp.f32 %v3097_v2  ;;  %v3856_v20 = vmul.f32 0.25, %v3842_v43  ;;  %v3893_v43 = vsub.f32 %v8135_v14, %v3873_v28 }
 0xe7c   :  { %v8249_v38 = vpop.xlane.xlu1 %3875 }
 0xe7d   :  { %v3902_v14 = vmul.f32 1.442695, %v3893_v43 }
 0xe7e   :  { %v6142_v3 = vpop.eup %6141 }
 0xe7f   :  { %v3116_v46 = vmul.f32 %v6142_v3, %v8148_v58  ;;  %v8263_v58 = vadd.f32 %v3856_v20, %v6758_v4 }
 0xe81   :  { %v6144_v11 = vpop.eup %6143  ;;  %v3103_v6 = vpop.xlane.xlu0 %3102  ;;  %3598 = vmax.xlane.f32.xlu2 %v3597_v40  ;;  %v3124_v1 = vpack.c.bf16 %v3116_v46, %v3116_v46  ;;  %v3880_v2 = vsel %vm620_vm15, %v8263_v58, -inf }
 0xe82   :  { %v3117_v37 = vmul.f32 %v6144_v11, %v8151_v12  ;;  %v3844_v51 = vpop.f32.mrf.mxu1  ;;  %6145 = vrcp.f32 %v3103_v6  ;;  %v3895_v12 = vsub.f32 %v8142_v63, %v3879_v13  ;;  %v3565_v11 = vmul.f32 0.25, %v3552_v19 }
 0xe83   :  { %v3173_v34 = vunpack.c.l.b16 %v3124_v1  ;;  %v3588_v63 = vsel %vm620_vm15, %v8266_v25, -inf }
 0xe84   :  { %v3125_v15 = vpack.c.bf16 %v3117_v37, %v3117_v37  ;;  %3326 = vmax.xlane.f32.xlu0 %v3325_v29  ;;  %v3100_v42 = vpop.xlane.xlu1 %3099  ;;  %v3906_v26 = vmul.f32 1.442695, %v3895_v12  ;;  %v8283_v19 = vadd.f32 %v3565_v11, %v6758_v4  ;;  %v3857_v12 = vmul.f32 0.25, %v3844_v51 }
 0xe85   :  { %6147 = vrcp.f32 %v3100_v42 }
 0xe86   :  { %v3174_v45 = vunpack.c.l.b16 %v3125_v15  ;;  %6149 = vpow2.f32 %v3612_v61  ;;  %v8298_v11 = vadd.f32 %v3857_v12, %v6758_v4 }
 0xe88   :  { %v3177_v10 = vpack.c.b16 %v3174_v45, %v3173_v34  ;;  %v6146_v46 = vpop.eup %6145 }
 0xe89   :  { %v3357_v47 = vpop.xlane.xlu0 %3356  ;;  %3881 = vmax.xlane.f32.xlu2 %v3880_v2  ;;  %v3360_v3 = vpop.xlane.xlu2 %3359  ;;  %v3119_v37 = vmul.f32 %v6146_v46, %v8165_v44 }
 0xe8a   :  { %6151 = vrcp.f32 %v3357_v47  ;;  %5539 = vmatmul.msk.bf16.vlgmr.msrb.gmra.mxu3 %vm620_vm15, %v3177_v10  ;;  %v3847_v20 = vpop.f32.mrf.mxu1  ;;  %v3591_v10 = vsel %vm620_vm15, %v8283_v19, -inf }
 0xe8b   :  { %v6148_v40 = vpop.eup %6147  ;;  %v3858_v6 = vmul.f32 0.25, %v3847_v20  ;;  %v3127_v61 = vpack.c.bf16 %v3119_v37, %v3119_v37 }
 0xe8c   :  { %v3118_v13 = vmul.f32 %v6148_v40, %v8167_v56  ;;  %3589 = vmax.xlane.f32.xlu0 %v3588_v63  ;;  %v3354_v1 = vpop.xlane.xlu1 %3353  ;;  %v8280_v62 = vpop.eup %6149 }
 0xe8d   :  { %v8277_v28 = vadd.f32 %v3858_v6, %v6758_v4  ;;  %6153 = vrcp.f32 %v3354_v1  ;;  %v3630_v44 = vsel %vm620_vm15, %v8280_v62, 0.0 }
 0xe8e   :  { %6155 = vpow2.f32 %v3906_v26  ;;  %v3126_v56 = vpack.c.bf16 %v3118_v13, %v3118_v13 }
 0xe8f   :  { %v3886_v29 = vsel %vm620_vm15, %v8277_v28, -inf  ;;  %6157 = vpow2.f32 %v3902_v14 }
 0xe90   :  { %v6152_v15 = vpop.eup %6151  ;;  %v3175_v2 = vunpack.c.l.b16 %v3126_v56 }
 0xe91   :  { %v3385_v42 = vmul.f32 %v6152_v15, %v8174_v5  ;;  %3887 = vmax.xlane.f32.xlu2 %v3886_v29  ;;  %v3363_v34 = vpop.xlane.xlu2 %3362  ;;  %v3176_v5 = vunpack.c.l.b16 %v3127_v61 }
 0xe92   :  { %6159 = vrcp.f32 %v3363_v34  ;;  %v3849_v6 = vpop.f32.mrf.mxu1 }
 0xe93   :  { %v6154_v45 = vpop.eup %6153  ;;  %3631 = vadd.xlane.f32.xlu1 %v3630_v44  ;;  %v3393_v43 = vpack.c.bf16 %v3385_v42, %v3385_v42  ;;  %6161 = vrcp.f32 %v3360_v3  ;;  %v3178_v13 = vpack.c.b16 %v3176_v5, %v3175_v2  ;;  %v3859_v29 = vmul.f32 0.25, %v3849_v6 }
 0xe94   :  { %v3384_v47 = vmul.f32 %v6154_v45, %v8179_v17  ;;  %3592 = vmax.xlane.f32.xlu0 %v3591_v10  ;;  %v8293_v46 = vpop.eup %6155  ;;  %v3566_v17 = vmul.f32 0.25, %v8244_v9  ;;  %v3883_v3 = vsel %vm620_vm15, %v8298_v11, -inf }
 0xe95   :  { %v8295_v40 = vpop.eup %6157  ;;  %v3405_v51 = vunpack.c.l.b16 %v3393_v43  ;;  %v3925_v63 = vsel %vm620_vm15, %v8293_v46, 0.0  ;;  %v8314_v42 = vadd.f32 %v3859_v29, %v6758_v4 }
 0xe96   :  { %v3392_v20 = vpack.c.bf16 %v3384_v47, %v3384_v47  ;;  %v3919_v14 = vsel %vm620_vm15, %v8295_v40, 0.0  ;;  %v8310_v56 = vadd.f32 %v3566_v17, %v6758_v4 }
 0xe97   :  { %v3889_v12 = vsel %vm620_vm15, %v8314_v42, -inf }
 0xe98   :  { %v3404_v26 = vunpack.c.l.b16 %v3392_v20  ;;  %v6160_v37 = vpop.eup %6159  ;;  %v3594_v45 = vsel %vm620_vm15, %v8310_v56, -inf }
 0xe99   :  { %3926 = vadd.xlane.f32.xlu2 %v3925_v63  ;;  %v6162_v15 = vpop.eup %6161  ;;  %v3387_v9 = vmul.f32 %v6160_v37, %v8190_v8  ;;  %v3626_v2 = vpop.xlane.xlu2 %3625 }
 0xe9a   :  { %v3408_v1 = vpack.c.b16 %v3405_v51, %v3404_v26  ;;  %5540 = vmatmul.msk.bf16.gmra.mxu3 %vm620_vm15, %v3178_v13  ;;  %v3386_v61 = vmul.f32 %v6162_v15, %v8177_v54 }
 0xe9b   :  { %3920 = vadd.xlane.f32.xlu1 %v3919_v14  ;;  %v3395_v34 = vpack.c.bf16 %v3387_v9, %v3387_v9 }
 0xe9c   :  { %3884 = vmax.xlane.f32.xlu0 %v3883_v3  ;;  %5545 = vmatmul.msk.bf16.vlgmr.msra.gmra.mxu2 %vm620_vm15, %v3408_v1  ;;  %v3394_v10 = vpack.c.bf16 %v3386_v61, %v3386_v61 }
 0xe9d   :  { %v3407_v43 = vunpack.c.l.b16 %v3395_v34 }
 0xe9e   :  { %v3406_v8 = vunpack.c.l.b16 %v3394_v10 }
 0xea0   :  { %v3409_v4 = vpack.c.b16 %v3407_v43, %v3406_v8 }
 0xea1   :  { %v3629_v44 = vpop.xlane.xlu0 %3628 }
 0xea2   :  { %6163 = vrcp.f32 %v3629_v44 }
 0xea3   :  { %3595 = vmax.xlane.f32.xlu1 %v3594_v45  ;;  %6165 = vrcp.f32 %v3626_v2 }
 0xea4   :  { %3890 = vmax.xlane.f32.xlu0 %v3889_v12 }
 0xea8   :  { %v6164_v47 = vpop.eup %6163 }
 0xea9   :  { %v6166_v54 = vpop.eup %6165  ;;  %v3657_v5 = vmul.f32 %v6164_v47, %v8205_v35 }
 0xeaa   :  { %v3656_v20 = vmul.f32 %v6166_v54, %v8197_v50 }
 0xeab   :  { %v3665_v51 = vpack.c.bf16 %v3657_v5, %v3657_v5 }
 0xeac   :  { %5546 = vmatmul.msk.bf16.gmra.mxu2 %vm620_vm15, %v3409_v4  ;;  %v3664_v6 = vpack.c.bf16 %v3656_v20, %v3656_v20 }
 0xead   :  { %v3685_v13 = vunpack.c.l.b16 %v3665_v51 }
 0xeae   :  { %v3684_v1 = vunpack.c.l.b16 %v3664_v6 }
 0xeb0   :  { %v3688_v14 = vpack.c.b16 %v3685_v13, %v3684_v1 }
 0xeb1   :  { %v3635_v37 = vpop.xlane.xlu0 %3634 }
 0xeb3   :  { %v3318_v26 = vpop.xlane.xlu2 %3317 }
 0xeb4   :  { %v3332_v63 = vsub.f32 %v8216_v36, %v3318_v26 }
 0xeb6   :  { %v3344_v17 = vmul.f32 1.442695, %v3332_v63 }
 0xeb8   :  { %6167 = vpow2.f32 %v3344_v17 }
 0xeb9   :  { %v8331_v9 = vpop.xlane.xlu0 %3917 }
 0xebb   :  { %v3321_v29 = vpop.xlane.xlu1 %3320  ;;  %v3452_v43 = vpop.permute.xlu2 %3451 }
 0xebc   :  { %v3333_v3 = vsub.f32 %v8225_v7, %v3321_v29  ;;  %5553 = vmatmul.msk.bf16.vlgmr.msrb.gmra.mxu2 %vm620_vm15, %v3688_v14 }
 0xebe   :  { %v8327_v15 = vpop.eup %6167  ;;  %v3346_v35 = vmul.f32 1.442695, %v3333_v3 }
 0xebf   :  { %v3364_v50 = vsel %vm620_vm15, %v8327_v15, 0.0 }
 0xec0   :  { %6169 = vpow2.f32 %v3346_v35  ;;  %3365 = vadd.xlane.f32.xlu0 %v3364_v50 }
 0xec3   :  { %v3324_v36 = vpop.xlane.xlu1 %3323 }
 0xec4   :  { %v3334_v61 = vsub.f32 %v8232_v31, %v3324_v36 }
 0xec6   :  { %v8334_v34 = vpop.eup %6169  ;;  %v3348_v44 = vmul.f32 1.442695, %v3334_v61 }
 0xec7   :  { %v3367_v7 = vsel %vm620_vm15, %v8334_v34, 0.0 }
 0xec8   :  { %6171 = vpow2.f32 %v3348_v44  ;;  %3368 = vadd.xlane.f32.xlu1 %v3367_v7 }
 0xecc   :  { %v3977_v45 = vpop.permute.xlu0 %3976 }
 0xecd   :  { %3992 = vmatpush.bf16.msra.mxu2 %v3977_v45 }
 0xece   :  { %v8338_v12 = vpop.eup %6171 }
 0xecf   :  { %v3370_v10 = vsel %vm620_vm15, %v8338_v12, 0.0 }
 0xed0   :  { %3371 = vadd.xlane.f32.xlu0 %v3370_v10 }
 0xedb   :  { %v3454_v2 = vpop.permute.xlu1 %3453 }
 0xedc   :  { %3469 = vmatpush.bf16.msra.mxu3 %v3454_v2 }
 0xee0   :  { %3470 = vmatpush.bf16.msra.mxu3 %v3452_v43 }
 0xee1   :  { %3974 = vrot.lane.b32.xlu1 %v7880_v18, %s6279_s28 }
 0xee4   :  { %3761 = vmatpush.bf16.msrb.mxu3 %v7966_v41 }
 0xee8   :  { %3762 = vmatpush.bf16.msrb.mxu3 %v7939_v22 }
 0xef4   :  { %v3599_v31 = vpop.xlane.xlu2 %3598 }
 0xef7   :  { %v3327_v8 = vpop.xlane.xlu0 %3326 }
 0xef8   :  { %v3335_v4 = vsub.f32 %v8252_v55, %v3327_v8 }
 0xefa   :  { %v3350_v47 = vmul.f32 1.442695, %v3335_v4 }
 0xefc   :  { %6173 = vpow2.f32 %v3350_v47  ;;  %v3882_v54 = vpop.xlane.xlu2 %3881 }
 0xefd   :  { %v3896_v5 = vsub.f32 %v8263_v58, %v3882_v54  ;;  %6175 = vrcp.f32 %v3635_v37  ;;  %v3607_v54 = vsub.f32 %v8247_v21, %v3599_v31 }
 0xeff   :  { %v3908_v20 = vmul.f32 1.442695, %v3896_v5  ;;  %v3590_v51 = vpop.xlane.xlu0 %3589 }
 0xf00   :  { %v3604_v26 = vsub.f32 %v8266_v25, %v3590_v51  ;;  %v3894_v25 = vsub.f32 %v8156_v60, %v8249_v38 }
 0xf01   :  { %6177 = vpow2.f32 %v3908_v20 }
 0xf02   :  { %v8349_v18 = vpop.eup %6173  ;;  %v3616_v6 = vmul.f32 1.442695, %v3604_v26  ;;  %v3904_v36 = vmul.f32 1.442695, %v3894_v25  ;;  %v3622_v26 = vmul.f32 1.442695, %v3607_v54 }
 0xf03   :  { %v3373_v63 = vsel %vm620_vm15, %v8349_v18, 0.0  ;;  %v6176_v55 = vpop.eup %6175 }
 0xf04   :  { %6179 = vpow2.f32 %v3616_v6  ;;  %3374 = vadd.xlane.f32.xlu0 %v3373_v63  ;;  %v3659_v37 = vmul.f32 %v6176_v55, %v8213_v49 }
 0xf06   :  { %v3632_v13 = vpop.xlane.xlu1 %3631 }
 0xf07   :  { %v8353_v17 = vpop.eup %6177  ;;  %6181 = vrcp.f32 %v3632_v13  ;;  %v3593_v58 = vpop.xlane.xlu0 %3592 }
 0xf08   :  { %v3605_v1 = vsub.f32 %v8283_v19, %v3593_v58  ;;  %v3928_v3 = vsel %vm620_vm15, %v8353_v17, 0.0  ;;  %v3667_v19 = vpack.c.bf16 %v3659_v37, %v3659_v37 }
 0xf0a   :  { %v8356_v14 = vpop.eup %6179  ;;  %v3618_v29 = vmul.f32 1.442695, %v3605_v1  ;;  %v3687_v49 = vunpack.c.l.b16 %v3667_v19 }
 0xf0b   :  { %3929 = vadd.xlane.f32.xlu1 %v3928_v3  ;;  %v3636_v35 = vsel %vm620_vm15, %v8356_v14, 0.0 }
 0xf0c   :  { %6183 = vpow2.f32 %v3618_v29  ;;  %3637 = vadd.xlane.f32.xlu0 %v3636_v35 }
 0xf0d   :  { %v6182_v50 = vpop.eup %6181  ;;  %6185 = vpow2.f32 %v3904_v36 }
 0xf0e   :  { %v3658_v61 = vmul.f32 %v6182_v50, %v8280_v62  ;;  %v3921_v44 = vpop.xlane.xlu1 %3920 }
 0xf0f   :  { %v3885_v7 = vpop.xlane.xlu0 %3884 }
 0xf10   :  { %v3666_v60 = vpack.c.bf16 %v3658_v61, %v3658_v61 }
 0xf12   :  { %v8366_v38 = vpop.eup %6183  ;;  %v3686_v45 = vunpack.c.l.b16 %v3666_v60 }
 0xf13   :  { %v3639_v10 = vsel %vm620_vm15, %v8366_v38, 0.0  ;;  %v8372_v62 = vpop.eup %6185 }
 0xf14   :  { %3640 = vadd.xlane.f32.xlu0 %v3639_v10  ;;  %v3689_v2 = vpack.c.b16 %v3687_v49, %v3686_v45  ;;  %v3922_v51 = vsel %vm620_vm15, %v8372_v62, 0.0 }
 0xf16   :  { %5554 = vmatmul.msk.bf16.gmra.mxu2 %vm620_vm15, %v3689_v2  ;;  %v3596_v43 = vpop.xlane.xlu1 %3595 }
 0xf17   :  { %v3606_v8 = vsub.f32 %v8310_v56, %v3596_v43  ;;  %v3891_v4 = vpop.xlane.xlu0 %3890  ;;  %v3897_v56 = vsub.f32 %v8298_v11, %v3885_v7 }
 0xf18   :  { %v3899_v47 = vsub.f32 %v8314_v42, %v3891_v4 }
 0xf19   :  { %v3620_v5 = vmul.f32 1.442695, %v3606_v8  ;;  %v3910_v31 = vmul.f32 1.442695, %v3897_v56 }
 0xf1a   :  { %v3914_v20 = vmul.f32 1.442695, %v3899_v47 }
 0xf1b   :  { %6187 = vpow2.f32 %v3620_v5 }
 0xf1c   :  { %6189 = vpow2.f32 %v3914_v20  ;;  %3923 = vadd.xlane.f32.xlu0 %v3922_v51 }
 0xf1d   :  { %6191 = vpow2.f32 %v3622_v26 }
 0xf1e   :  { %6193 = vpow2.f32 %v3910_v31 }
 0xf1f   :  { %v3431_v6 = vpop.f32.mrf.mxu2 }
 0xf21   :  { %v8378_v63 = vpop.eup %6187 }
 0xf22   :  { %v8381_v55 = vpop.eup %6189  ;;  %v3642_v21 = vsel %vm620_vm15, %v8378_v63, 0.0 }
 0xf23   :  { %3643 = vadd.xlane.f32.xlu2 %v3642_v21  ;;  %v3937_v42 = vsel %vm620_vm15, %v8381_v55, 0.0  ;;  %v8387_v13 = vpop.eup %6191 }
 0xf24   :  { %3938 = vadd.xlane.f32.xlu1 %v3937_v42  ;;  %v3645_v1 = vsel %vm620_vm15, %v8387_v13, 0.0  ;;  %v8391_v11 = vpop.eup %6193 }
 0xf25   :  { %v3931_v37 = vsel %vm620_vm15, %v8391_v11, 0.0 }
 0xf27   :  { %v3433_v58 = vpop.f32.mrf.mxu2 }
 0xf28   :  { %v5830_v50 = vpack.i.bf16 %v3433_v58, %v3431_v6 }
 0xf2b   :  { %3646 = vadd.xlane.f32.xlu2 %v3645_v1 }
 0xf2f   :  { %v8393_v25 = vpop.f32.mrf.mxu2 }
 0xf30   :  { %4015 = vrot.lane.b32.xlu0 %v7939_v22, %s6279_s28 }
 0xf33   :  { %v3366_v29 = vpop.xlane.xlu0 %3365  ;;  %3932 = vadd.xlane.f32.xlu2 %v3931_v37 }
 0xf34   :  { %6195 = vrcp.f32 %v3366_v29 }
 0xf37   :  { %v8399_v3 = vpop.f32.mrf.mxu2 }
 0xf38   :  { %v5845_v35 = vpack.i.bf16 %v8399_v3, %v8393_v25 }
 0xf3a   :  { %v6196_v19 = vpop.eup %6195 }
 0xf3b   :  { %v3369_v36 = vpop.xlane.xlu1 %3368  ;;  %v3388_v61 = vmul.f32 %v6196_v19, %v8327_v15 }
 0xf3c   :  { %6197 = vrcp.f32 %v3369_v36 }
 0xf3d   :  { %5831 = vrot.lane.b32.xlu1 %v5830_v50, %s6282_s30  ;;  %6199 = vrcp.f32 %v3921_v44  ;;  %v3396_v60 = vpack.c.bf16 %v3388_v61, %v3388_v61 }
 0xf3e   :  { %6201 = vrcp.f32 %v8331_v9 }
 0xf3f   :  { %v3717_v22 = vpop.f32.mrf.mxu2  ;;  %v3445_v2 = vunpack.c.l.b16 %v3396_v60 }
 0xf42   :  { %v6198_v7 = vpop.eup %6197 }
 0xf43   :  { %v3389_v49 = vmul.f32 %v6198_v7, %v8334_v34  ;;  %v6200_v10 = vpop.eup %6199 }
 0xf44   :  { %v6202_v4 = vpop.eup %6201  ;;  %v3949_v54 = vmul.f32 %v6200_v10, %v8295_v40  ;;  %v3888_v40 = vpop.xlane.xlu2 %3887 }
 0xf45   :  { %v3397_v45 = vpack.c.bf16 %v3389_v49, %v3389_v49  ;;  %v3948_v15 = vmul.f32 %v6202_v4, %v8222_v16  ;;  %v3898_v6 = vsub.f32 %v8277_v28, %v3888_v40  ;;  %v3372_v16 = vpop.xlane.xlu0 %3371 }
 0xf46   :  { %v3957_v9 = vpack.c.bf16 %v3949_v54, %v3949_v54 }
 0xf47   :  { %v3446_v43 = vunpack.c.l.b16 %v3397_v45  ;;  %v3719_v8 = vpop.f32.mrf.mxu2  ;;  %v3956_v34 = vpack.c.bf16 %v3948_v15, %v3948_v15  ;;  %v3912_v56 = vmul.f32 1.442695, %v3898_v6 }
 0xf48   :  { %v5835_v47 = vpack.i.bf16 %v3719_v8, %v3717_v22  ;;  %v3969_v44 = vunpack.c.l.b16 %v3957_v9 }
 0xf49   :  { %v3449_v5 = vpack.c.b16 %v3446_v43, %v3445_v2  ;;  %v3968_v20 = vunpack.c.l.b16 %v3956_v34  ;;  %6203 = vpow2.f32 %v3912_v56 }
 0xf4a   :  { %5836 = vrot.lane.b32.xlu0 %v5835_v47, %s9038_s6  ;;  %6205 = vrcp.f32 %v3372_v16 }
 0xf4b   :  { %4017 = vrot.lane.b32.xlu2 %v7966_v41, %s6279_s28  ;;  %5547 = vmatmul.msk.bf16.vlgmr.msra.gmra.mxu3 %vm620_vm15, %v3449_v5  ;;  %v3972_v26 = vpack.c.b16 %v3969_v44, %v3968_v20 }
 0xf4c   :  { %v3927_v22 = vpop.xlane.xlu2 %3926 }
 0xf4f   :  { %v8415_v21 = vpop.eup %6203 }
 0xf50   :  { %v3934_v41 = vsel %vm620_vm15, %v8415_v21, 0.0  ;;  %v6206_v31 = vpop.eup %6205 }
 0xf51   :  { %v3390_v58 = vmul.f32 %v6206_v31, %v8338_v12 }
 0xf53   :  { %v3975_v51 = vpop.permute.xlu1 %3974  ;;  %v3398_v37 = vpack.c.bf16 %v3390_v58, %v3390_v58 }
 0xf54   :  { %3993 = vmatpush.bf16.msra.mxu2 %v3975_v51 }
 0xf55   :  { %v3447_v36 = vunpack.c.l.b16 %v3398_v37 }
 0xf57   :  { %5561 = vmatmul.msk.bf16.vlgmr.msra.gmra.mxu2 %vm620_vm15, %v3972_v26 }
 0xf74   :  { %3935 = vadd.xlane.f32.xlu2 %v3934_v41 }
 0xf77   :  { %v3375_v42 = vpop.xlane.xlu0 %3374 }
 0xf78   :  { %6207 = vrcp.f32 %v3375_v42 }
 0xf7e   :  { %v6208_v1 = vpop.eup %6207  ;;  %v3930_v16 = vpop.xlane.xlu1 %3929 }
 0xf7f   :  { %v3391_v29 = vmul.f32 %v6208_v1, %v8349_v18  ;;  %v3638_v28 = vpop.xlane.xlu0 %3637 }
 0xf80   :  { %6209 = vrcp.f32 %v3638_v28 }
 0xf81   :  { %v3399_v50 = vpack.c.bf16 %v3391_v29, %v3391_v29 }
 0xf83   :  { %v3448_v19 = vunpack.c.l.b16 %v3399_v50 }
 0xf85   :  { %v3450_v61 = vpack.c.b16 %v3448_v19, %v3447_v36 }
 0xf86   :  { %v6210_v60 = vpop.eup %6209 }
 0xf87   :  { %v3641_v7 = vpop.xlane.xlu0 %3640  ;;  %5548 = vmatmul.msk.bf16.gmra.mxu3 %vm620_vm15, %v3450_v61  ;;  %v3660_v49 = vmul.f32 %v6210_v60, %v8356_v14 }
 0xf88   :  { %6211 = vrcp.f32 %v3641_v7 }
 0xf89   :  { %6213 = vrcp.f32 %v3927_v22  ;;  %v3668_v45 = vpack.c.bf16 %v3660_v49, %v3660_v49 }
 0xf8b   :  { %v3731_v4 = vunpack.c.l.b16 %v3668_v45 }
 0xf8e   :  { %v6212_v12 = vpop.eup %6211 }
 0xf8f   :  { %v3661_v10 = vmul.f32 %v6212_v12, %v8366_v38  ;;  %v3924_v18 = vpop.xlane.xlu0 %3923  ;;  %v6214_v2 = vpop.eup %6213 }
 0xf90   :  { %6215 = vrcp.f32 %v3924_v18  ;;  %v3951_v8 = vmul.f32 %v6214_v2, %v8293_v46  ;;  %v8435_v12 = vpop.f32.mrf.mxu3 }
 0xf91   :  { %v3669_v43 = vpack.c.bf16 %v3661_v10, %v3661_v10 }
 0xf92   :  { %v3959_v9 = vpack.c.bf16 %v3951_v8, %v3951_v8 }
 0xf93   :  { %v3732_v47 = vunpack.c.l.b16 %v3669_v43 }
 0xf94   :  { %v3971_v38 = vunpack.c.l.b16 %v3959_v9 }
 0xf95   :  { %v3735_v54 = vpack.c.b16 %v3732_v47, %v3731_v4 }
 0xf96   :  { %v6216_v5 = vpop.eup %6215  ;;  %v3644_v15 = vpop.xlane.xlu2 %3643 }
 0xf97   :  { %v3950_v34 = vmul.f32 %v6216_v5, %v8372_v62  ;;  %5555 = vmatmul.msk.bf16.vlgmr.msrb.gmra.mxu3 %vm620_vm15, %v3735_v54  ;;  %6217 = vrcp.f32 %v3644_v15 }
 0xf98   :  { %v8437_v45 = vpop.f32.mrf.mxu3 }
 0xf99   :  { %v3958_v14 = vpack.c.bf16 %v3950_v34, %v3950_v34  ;;  %v3722_v44 = vpop.f32.mrf.mxu2 }
 0xf9b   :  { %v3970_v20 = vunpack.c.l.b16 %v3958_v14 }
 0xf9d   :  { %v3973_v51 = vpack.c.b16 %v3971_v38, %v3970_v20  ;;  %v6218_v40 = vpop.eup %6217 }
 0xf9e   :  { %v3647_v26 = vpop.xlane.xlu2 %3646  ;;  %v3662_v6 = vmul.f32 %v6218_v40, %v8378_v63 }
 0xf9f   :  { %6219 = vrcp.f32 %v3647_v26  ;;  %5562 = vmatmul.msk.bf16.gmra.mxu2 %vm620_vm15, %v3973_v51 }
 0xfa0   :  { %v3670_v41 = vpack.c.bf16 %v3662_v6, %v3662_v6  ;;  %v8439_v10 = vpop.f32.mrf.mxu3  ;;  %v5743_v6 = vld [vmem:[%s9005_s7 + $0x30] sm:$0xff] }
 0xfa1   :  { %v3724_v46 = vpop.f32.mrf.mxu2 }
 0xfa2   :  { %v5850_v56 = vpack.i.bf16 %v3724_v46, %v3722_v44  ;;  %v3733_v1 = vunpack.c.l.b16 %v3670_v41  ;;  %v4016_v61 = vpop.permute.xlu0 %4015 }
 0xfa4   :  { %5851 = vrot.lane.b32.xlu2 %v5850_v56, %s9038_s6 }
 0xfa5   :  { %v6220_v62 = vpop.eup %6219 }
 0xfa6   :  { %v3663_v42 = vmul.f32 %v6220_v62, %v8387_v13  ;;  %v3933_v31 = vpop.xlane.xlu2 %3932 }
 0xfa7   :  { %6221 = vrcp.f32 %v3933_v31  ;;  %v5741_v31 = vld [vmem:[%s9005_s7 + $0x20] sm:$0xff] }
 0xfa8   :  { %v3671_v58 = vpack.c.bf16 %v3663_v42, %v3663_v42  ;;  %6223 = vrcp.f32 %v3930_v16  ;;  %v8441_v2 = vpop.f32.mrf.mxu3  ;;  %v5742_v16 = vld [vmem:[%s9005_s7 + $0x28] sm:$0xff] }
 0xfaa   :  { %v3734_v37 = vunpack.c.l.b16 %v3671_v58 }
 0xfac   :  { %v3736_v29 = vpack.c.b16 %v3734_v37, %v3733_v1 }
 0xfad   :  { %v6222_v28 = vpop.eup %6221 }
 0xfae   :  { %v4018_v50 = vpop.permute.xlu2 %4017  ;;  %5556 = vmatmul.msk.bf16.gmra.mxu3 %vm620_vm15, %v3736_v29  ;;  %v6224_v63 = vpop.eup %6223  ;;  %v3953_v36 = vmul.f32 %v6222_v28, %v8391_v11 }
 0xfaf   :  { %4033 = vmatpush.bf16.msra.mxu3 %v4018_v50  ;;  %v3952_v19 = vmul.f32 %v6224_v63, %v8353_v17  ;;  %v3939_v11 = vpop.xlane.xlu1 %3938 }
 0xfb0   :  { %v3961_v13 = vpack.c.bf16 %v3953_v36, %v3953_v36  ;;  %6225 = vrcp.f32 %v3939_v11 }
 0xfb1   :  { %v3960_v22 = vpack.c.bf16 %v3952_v19, %v3952_v19 }
 0xfb2   :  { %v4010_v7 = vunpack.c.l.b16 %v3961_v13 }
 0xfb3   :  { %4034 = vmatpush.bf16.msra.mxu3 %v4016_v61  ;;  %v4009_v60 = vunpack.c.l.b16 %v3960_v22 }
 0xfb5   :  { %v4013_v49 = vpack.c.b16 %v4010_v7, %v4009_v60 }
 0xfb6   :  { %v6226_v47 = vpop.eup %6225 }
 0xfb7   :  { %v3955_v54 = vmul.f32 %v6226_v47, %v8381_v55  ;;  %v5832_v28 = vpop.permute.xlu1 %5831 }
 0xfb8   :  { %v5834_v63 = vunpack.i.h.bf16 %v5832_v28  ;;  %v5833_v36 = vunpack.i.l.bf16 %v5832_v28 }
 0xfb9   :  { %v3963_v15 = vpack.c.bf16 %v3955_v54, %v3955_v54 }
 0xfba   :  { %v4143_v22 = vsel %vm527_vm13, %v8195_v52, %v5834_v63  ;;  %v4142_v7 = vsel %vm527_vm13, %v8188_v53, %v5833_v36 }
 0xfbb   :  { %v4012_v44 = vunpack.c.l.b16 %v3963_v15 }
 0xfbc   :  { %v5837_v29 = vpop.permute.xlu0 %5836 }
 0xfbd   :  { %v5839_v19 = vunpack.i.h.bf16 %v5837_v29  ;;  %v5838_v61 = vunpack.i.l.bf16 %v5837_v29 }
 0xfbe   :  { %5563 = vmatmul.msk.bf16.vlgmr.msra.gmra.mxu3 %vm620_vm15, %v4013_v49 }
 0xfbf   :  { %v4151_v11 = vsel %vm620_vm15, %v4143_v22, %v5839_v19 }
 0xfce   :  { %v3472_v8 = vpop.f32.mrf.mxu3 }
 0xfd6   :  { %v3474_v34 = vpop.f32.mrf.mxu3 }
 0xfd7   :  { %v5860_v38 = vpack.i.bf16 %v3474_v34, %v3472_v8 }
 0xfda   :  { %v3995_v18 = vpop.f32.mrf.mxu2 }
 0xfe2   :  { %v3997_v17 = vpop.f32.mrf.mxu2 }
 0xfe3   :  { %v5840_v43 = vpack.i.bf16 %v3997_v17, %v3995_v18  ;;  %v4150_v18 = vsel %vm620_vm15, %v4142_v7, %v5838_v61 }
 0xfe5   :  { %5841 = vrot.lane.b32.xlu0 %v5840_v43, %s9039_s27 }
 0xfe7   :  { %v3936_v4 = vpop.xlane.xlu2 %3935 }
 0xfe8   :  { %6227 = vrcp.f32 %v3936_v4 }
 0xfed   :  { %5846 = vrot.lane.b32.xlu0 %v5845_v35, %s6282_s30 }
 0xfee   :  { %v6228_v5 = vpop.eup %6227 }
 0xfef   :  { %v3954_v9 = vmul.f32 %v6228_v5, %v8415_v21  ;;  %v5744_v21 = vld [vmem:[%s9005_s7 + $0x38] sm:$0xff] }
 0xff0   :  { %4224 = vmatpush.bf16.msra.mxu0 %v5744_v21 }
 0xff1   :  { %v3962_v14 = vpack.c.bf16 %v3954_v9, %v3954_v9 }
 0xff3   :  { %v4011_v20 = vunpack.c.l.b16 %v3962_v14 }
 0xff4   :  { %4225 = vmatpush.bf16.msra.mxu0 %v5743_v6 }
 0xff5   :  { %5861 = vrot.lane.b32.xlu0 %v5860_v38, %s6282_s30  ;;  %v4014_v51 = vpack.c.b16 %v4012_v44, %v4011_v20 }
 0xff7   :  { %5564 = vmatmul.msk.bf16.gmra.mxu3 %vm620_vm15, %v4014_v51 }
 0xff8   :  { %4226 = vmatpush.bf16.msra.mxu0 %v5742_v16 }
 0xffc   :  { %4227 = vmatpush.bf16.msra.mxu0 %v5741_v31 }
 0xffe   :  { %v5852_v15 = vpop.permute.xlu2 %5851 }
 0xfff   :  { %v5854_v14 = vunpack.i.h.bf16 %v5852_v15  ;;  %v5853_v44 = vunpack.i.l.bf16 %v5852_v15 }
0x100a   :  { %v3477_v55 = vpop.f32.mrf.mxu3 }
0x1012   :  { %v3479_v26 = vpop.f32.mrf.mxu3 }
0x1013   :  { %v5875_v42 = vpack.i.bf16 %v3479_v26, %v3477_v55 }
0x101a   :  { %v3764_v40 = vpop.f32.mrf.mxu3 }
0x1022   :  { %v4000_v46 = vpop.f32.mrf.mxu2  ;;  %v3766_v25 = vpop.f32.mrf.mxu3 }
0x1023   :  { %v5865_v62 = vpack.i.bf16 %v3766_v25, %v3764_v40 }
0x102a   :  { %v4002_v3 = vpop.f32.mrf.mxu2 }
0x102b   :  { %v5855_v35 = vpack.i.bf16 %v4002_v3, %v4000_v46 }
0x102d   :  { %5856 = vrot.lane.b32.xlu1 %v5855_v35, %s9039_s27 }
0x1031   :  { %v3769_v56 = vpop.f32.mrf.mxu3 }
0x1035   :  { %5866 = vrot.lane.b32.xlu1 %v5865_v62, %s9038_s6 }
0x1039   :  { %v3771_v41 = vpop.f32.mrf.mxu3 }
0x103a   :  { %v5880_v50 = vpack.i.bf16 %v3771_v41, %v3769_v56 }
0x103d   :  { %5876 = vrot.lane.b32.xlu1 %v5875_v42, %s6282_s30 }
0x1041   :  { %v4036_v58 = vpop.f32.mrf.mxu3 }
0x1049   :  { %v4038_v1 = vpop.f32.mrf.mxu3 }
0x104a   :  { %v5870_v37 = vpack.i.bf16 %v4038_v1, %v4036_v58 }
0x104c   :  { %5871 = vrot.lane.b32.xlu0 %v5870_v37, %s9039_s27 }
0x1054   :  { %5881 = vrot.lane.b32.xlu0 %v5880_v50, %s9038_s6 }
0x1057   :  { %v5842_v13 = vpop.permute.xlu0 %5841 }
0x1058   :  { %v5844_v60 = vunpack.i.h.bf16 %v5842_v13  ;;  %v5843_v49 = vunpack.i.l.bf16 %v5842_v13 }
0x105a   :  { %v4158_v17 = vsel %vm123_vm0, %v4150_v18, %v5843_v49  ;;  %v4159_v43 = vsel %vm123_vm0, %v4151_v11, %v5844_v60 }
0x105b   :  { %v4166_v8 = vpack.c.bf16 %v4159_v43, %v4158_v17 }
0x105d   :  { %5590 = vmatmul.msk.bf16.vlgmr.msra.gmra.mxu0 %vm171_vm1, %v4166_v8 }
0x105f   :  { %v5847_v52 = vpop.permute.xlu0 %5846 }
0x1060   :  { %v5849_v53 = vunpack.i.h.bf16 %v5847_v52  ;;  %v5848_v5 = vunpack.i.l.bf16 %v5847_v52 }
0x1062   :  { %v4145_v9 = vsel %vm527_vm13, %v8210_v27, %v5849_v53  ;;  %v4144_v34 = vsel %vm527_vm13, %v8203_v24, %v5848_v5 }
0x1063   :  { %v4152_v55 = vsel %vm620_vm15, %v4144_v34, %v5853_v44  ;;  %v4153_v26 = vsel %vm620_vm15, %v4145_v9, %v5854_v14 }
0x1067   :  { %v5862_v27 = vpop.permute.xlu0 %5861 }
0x1068   :  { %v5864_v35 = vunpack.i.h.bf16 %v5862_v27  ;;  %v5863_v24 = vunpack.i.l.bf16 %v5862_v27 }
0x106a   :  { %v4147_v62 = vsel %vm527_vm13, %v8437_v45, %v5864_v35  ;;  %v4146_v16 = vsel %vm527_vm13, %v8435_v12, %v5863_v24  ;;  %v8500_v45 = vld [vmem:[%s9006_s8 + $0x1] ss:$0 sm:$0xff] }
0x107a   :  { %v4041_v4 = vpop.f32.mrf.mxu3 }
0x1082   :  { %v4043_v47 = vpop.f32.mrf.mxu3 }
0x1083   :  { %v5885_v54 = vpack.i.bf16 %v4043_v47, %v4041_v4 }
0x1085   :  { %5886 = vrot.lane.b32.xlu2 %v5885_v54, %s9039_s27 }
0x109f   :  { %v5857_v38 = vpop.permute.xlu1 %5856 }
0x10a0   :  { %v5859_v20 = vunpack.i.h.bf16 %v5857_v38  ;;  %v5858_v51 = vunpack.i.l.bf16 %v5857_v38 }
0x10a2   :  { %v4161_v40 = vsel %vm123_vm0, %v4153_v26, %v5859_v20  ;;  %v4160_v46 = vsel %vm123_vm0, %v4152_v55, %v5858_v51 }
0x10a3   :  { %v4167_v25 = vpack.c.bf16 %v4161_v40, %v4160_v46 }
0x10a5   :  { %5591 = vmatmul.msk.bf16.gmra.mxu0 %vm171_vm1, %v4167_v25 }
0x10a7   :  { %v5867_v3 = vpop.permute.xlu1 %5866 }
0x10a8   :  { %v5869_v21 = vunpack.i.h.bf16 %v5867_v3  ;;  %v5868_v6 = vunpack.i.l.bf16 %v5867_v3 }
0x10aa   :  { %v4155_v31 = vsel %vm620_vm15, %v4147_v62, %v5869_v21  ;;  %v4154_v58 = vsel %vm620_vm15, %v4146_v16, %v5868_v6 }
0x10af   :  { %v5877_v28 = vpop.permute.xlu1 %5876 }
0x10b0   :  { %v5879_v36 = vunpack.i.h.bf16 %v5877_v28  ;;  %v5878_v19 = vunpack.i.l.bf16 %v5877_v28 }
0x10b2   :  { %v4149_v49 = vsel %vm527_vm13, %v8441_v2, %v5879_v36  ;;  %v4148_v18 = vsel %vm527_vm13, %v8439_v10, %v5878_v19 }
0x10be   :  { %v5872_v56 = vpop.permute.xlu0 %5871 }
0x10bf   :  { %v5874_v41 = vunpack.i.h.bf16 %v5872_v56  ;;  %v5873_v42 = vunpack.i.l.bf16 %v5872_v56 }
0x10c1   :  { %v4162_v1 = vsel %vm123_vm0, %v4154_v58, %v5873_v42  ;;  %v4163_v37 = vsel %vm123_vm0, %v4155_v31, %v5874_v41 }
0x10c2   :  { %v4168_v29 = vpack.c.bf16 %v4163_v37, %v4162_v1 }
0x10c4   :  { %5592 = vmatmul.msk.bf16.gmra.mxu0 %vm171_vm1, %v4168_v29 }
0x10c6   :  { %v5882_v12 = vpop.permute.xlu0 %5881 }
0x10c7   :  { %v5884_v61 = vunpack.i.h.bf16 %v5882_v12  ;;  %v5883_v13 = vunpack.i.l.bf16 %v5882_v12 }
0x10c9   :  { %v4156_v43 = vsel %vm620_vm15, %v4148_v18, %v5883_v13  ;;  %v4157_v8 = vsel %vm620_vm15, %v4149_v49, %v5884_v61 }
0x10da   :  { %v4229_v50 = vpop.f32.mrf.mxu0 }
0x10db   :  { %v4230_v63 = vadd.f32 %v8500_v45, %v4229_v50 }
0x10dd   :  { %v8504_v22 = vadd.f32 %v4230_v63, %v7624_v59 }
0x10df   :  { %v5887_v7 = vpop.permute.xlu2 %5886  ;;  %v4261_v60 = vsel %vm171_vm1, %v8504_v22, 0.0 }
0x10e0   :  { %v5889_v11 = vunpack.i.h.bf16 %v5887_v7  ;;  %v5888_v17 = vunpack.i.l.bf16 %v5887_v7  ;;  %4262 = vadd.xlane.f32.xlu1 %v4261_v60 }
0x10e2   :  { %v4164_v59 = vsel %vm123_vm0, %v4156_v43, %v5888_v17  ;;  %v4165_v4 = vsel %vm123_vm0, %v4157_v8, %v5889_v11  ;;  %v4231_v47 = vpop.f32.mrf.mxu0  ;;  %v5748_v8 = vld [vmem:[%s9009_s11 + $0x38] sm:$0xff] }
0x10e3   :  { %v4169_v54 = vpack.c.bf16 %v4165_v4, %v4164_v59  ;;  %v4232_v52 = vadd.f32 %v8500_v45, %v4231_v47  ;;  %4517 = vmatpush.bf16.msra.mxu1 %v5748_v8 }
0x10e5   :  { %v8518_v2 = vadd.f32 %v4232_v52, %v7630_v32  ;;  %5593 = vmatmul.msk.bf16.gmra.mxu0 %vm171_vm1, %v4169_v54  ;;  %v5747_v54 = vld [vmem:[%s9009_s11 + $0x30] sm:$0xff]  ;;  %v5746_v52 = vld [vmem:[%s9009_s11 + $0x28] sm:$0xff] }
0x10e7   :  { %v4264_v10 = vsel %vm171_vm1, %v8518_v2, 0.0  ;;  %4518 = vmatpush.bf16.msra.mxu1 %v5747_v54 }
0x10e8   :  { %4265 = vadd.xlane.f32.xlu0 %v4264_v10 }
0x10eb   :  { %4519 = vmatpush.bf16.msra.mxu1 %v5746_v52 }
0x1122   :  { %v4234_v53 = vpop.f32.mrf.mxu0 }
0x1123   :  { %v4235_v5 = vadd.f32 %v8500_v45, %v4234_v53 }
0x1125   :  { %v8525_v15 = vadd.f32 %v4235_v5, %v7642_v57  ;;  %v5745_v5 = vld [vmem:[%s9009_s11 + $0x20] sm:$0xff] }
0x1126   :  { %4520 = vmatpush.bf16.msra.mxu1 %v5745_v5 }
0x1127   :  { %v4267_v9 = vsel %vm171_vm1, %v8525_v15, 0.0 }
0x1128   :  { %4268 = vadd.xlane.f32.xlu2 %v4267_v9 }
0x112a   :  { %v4236_v34 = vpop.f32.mrf.mxu0 }
0x112b   :  { %v4237_v32 = vadd.f32 %v8500_v45, %v4236_v34 }
0x112d   :  { %v8531_v14 = vadd.f32 %v4237_v32, %v7656_v39 }
0x112f   :  { %v4270_v44 = vsel %vm171_vm1, %v8531_v14, 0.0 }
0x1130   :  { %4271 = vadd.xlane.f32.xlu1 %v4270_v44 }
0x1141   :  { %v4239_v38 = vpop.f32.mrf.mxu0 }
0x1142   :  { %v4240_v20 = vadd.f32 %v8500_v45, %v4239_v38 }
0x1144   :  { %v8537_v57 = vadd.f32 %v4240_v20, %v7716_v33 }
0x1146   :  { %v4273_v51 = vsel %vm171_vm1, %v8537_v57, 0.0 }
0x1147   :  { %4274 = vadd.xlane.f32.xlu0 %v4273_v51 }
0x1149   :  { %v4241_v55 = vpop.f32.mrf.mxu0 }
0x114a   :  { %v4242_v26 = vadd.f32 %v8500_v45, %v4241_v55 }
0x114c   :  { %v8543_v39 = vadd.f32 %v4242_v26, %v7722_v0 }
0x114e   :  { %v4276_v40 = vsel %vm171_vm1, %v8543_v39, 0.0 }
0x114f   :  { %4277 = vadd.xlane.f32.xlu2 %v4276_v40 }
0x1153   :  { %v4263_v46 = vpop.xlane.xlu1 %4262 }
0x1154   :  { %v4285_v25 = vmul.f32 %v4263_v46, %v6439_v30 }
0x1156   :  { %v8549_v33 = vsub.f32 %v8504_v22, %v4285_v25 }
0x1158   :  { %v4301_v27 = vmul.f32 %v8549_v33, %v8549_v33 }
0x115a   :  { %v4309_v3 = vsel %vm171_vm1, %v4301_v27, 0.0 }
0x115b   :  { %v4266_v35 = vpop.xlane.xlu0 %4265  ;;  %4310 = vadd.xlane.f32.xlu1 %v4309_v3 }
0x115c   :  { %v4286_v0 = vmul.f32 %v4266_v35, %v6439_v30 }
0x115e   :  { %v8556_v24 = vsub.f32 %v8518_v2, %v4286_v0 }
0x1160   :  { %v4302_v21 = vmul.f32 %v8556_v24, %v8556_v24 }
0x1162   :  { %v4244_v6 = vpop.f32.mrf.mxu0  ;;  %v4312_v56 = vsel %vm171_vm1, %v4302_v21, 0.0 }
0x1163   :  { %v4245_v62 = vadd.f32 %v8500_v45, %v4244_v6  ;;  %4313 = vadd.xlane.f32.xlu0 %v4312_v56 }
0x1165   :  { %v8563_v16 = vadd.f32 %v4245_v62, %v7798_v23 }
0x1167   :  { %v4279_v41 = vsel %vm171_vm1, %v8563_v16, 0.0 }
0x1168   :  { %4280 = vadd.xlane.f32.xlu2 %v4279_v41 }
0x116a   :  { %v4246_v42 = vpop.f32.mrf.mxu0 }
0x116b   :  { %v4247_v31 = vadd.f32 %v8500_v45, %v4246_v42 }
0x116d   :  { %v8569_v58 = vadd.f32 %v4247_v31, %v7805_v48  ;;  %v8631_v31 = vld [vmem:[%s9007_s9 + $0x1] ss:$0 sm:$0xff] }
0x116f   :  { %v4282_v1 = vsel %vm171_vm1, %v8569_v58, 0.0 }
0x1170   :  { %4283 = vadd.xlane.f32.xlu1 %v4282_v1 }
0x119b   :  { %v4269_v37 = vpop.xlane.xlu2 %4268 }
0x119c   :  { %v4287_v29 = vmul.f32 %v4269_v37, %v6439_v30 }
0x119e   :  { %v8575_v23 = vsub.f32 %v8525_v15, %v4287_v29 }
0x11a0   :  { %v4303_v28 = vmul.f32 %v8575_v23, %v8575_v23 }
0x11a2   :  { %v4315_v12 = vsel %vm171_vm1, %v4303_v28, 0.0 }
0x11a3   :  { %4316 = vadd.xlane.f32.xlu0 %v4315_v12  ;;  %v4272_v45 = vpop.xlane.xlu1 %4271  ;;  %v8638_v12 = vld [vmem:[%s9008_s10 + $0x1] ss:$0 sm:$0xff] }
0x11a4   :  { %v4288_v48 = vmul.f32 %v4272_v45, %v6439_v30 }
0x11a6   :  { %v8582_v50 = vsub.f32 %v8531_v14, %v4288_v48 }
0x11a8   :  { %v4304_v63 = vmul.f32 %v8582_v50, %v8582_v50 }
0x11aa   :  { %v4318_v36 = vsel %vm171_vm1, %v4304_v63, 0.0 }
0x11ab   :  { %4319 = vadd.xlane.f32.xlu2 %v4318_v36 }
0x11ba   :  { %v4275_v19 = vpop.xlane.xlu0 %4274 }
0x11bb   :  { %v4289_v61 = vmul.f32 %v4275_v19, %v6439_v30 }
0x11bd   :  { %v8589_v13 = vsub.f32 %v8537_v57, %v4289_v61 }
0x11bf   :  { %v4305_v7 = vmul.f32 %v8589_v13, %v8589_v13 }
0x11c1   :  { %v4321_v60 = vsel %vm171_vm1, %v4305_v7, 0.0 }
0x11c2   :  { %v4278_v49 = vpop.xlane.xlu2 %4277  ;;  %4322 = vadd.xlane.f32.xlu1 %v4321_v60 }
0x11c3   :  { %v4290_v18 = vmul.f32 %v4278_v49, %v6439_v30 }
0x11c5   :  { %v8596_v11 = vsub.f32 %v8543_v39, %v4290_v18 }
0x11c7   :  { %v4306_v17 = vmul.f32 %v8596_v11, %v8596_v11 }
0x11c9   :  { %v4324_v43 = vsel %vm171_vm1, %v4306_v17, 0.0 }
0x11ca   :  { %4325 = vadd.xlane.f32.xlu0 %v4324_v43 }
0x11ce   :  { %v4311_v59 = vpop.xlane.xlu1 %4310 }
0x11cf   :  { %v4333_v4 = vmul.f32 %v4311_v59, %v6439_v30 }
0x11d1   :  { %v4341_v47 = vadd.f32 1e-06, %v4333_v4 }
0x11d3   :  { %6229 = vrsqrt.f32 %v4341_v47  ;;  %vm4355_vm13 = vweird.f32 %v4341_v47 }
0x11d6   :  { %v4314_v10 = vpop.xlane.xlu0 %4313 }
0x11d7   :  { %v4334_v53 = vmul.f32 %v4314_v10, %v6439_v30 }
0x11d9   :  { %v6230_v9 = vpop.eup %6229  ;;  %v4342_v34 = vadd.f32 1e-06, %v4334_v53 }
0x11da   :  { %v4350_v32 = vmul.f32 %v6230_v9, %v4341_v47  ;;  %vm4356_vm0 = vweird.f32 %v6230_v9 }
0x11db   :  { %6231 = vrsqrt.f32 %v4342_v34  ;;  %v4281_v44 = vpop.xlane.xlu2 %4280  ;;  %vm4357_vm15 = vmor %vm4355_vm13, %vm4356_vm0  ;;  %vm4365_vm11 = vweird.f32 %v4342_v34 }
0x11dc   :  { %v4351_v38 = vmul.f32 %v6230_v9, %v4350_v32  ;;  %v4291_v20 = vmul.f32 %v4281_v44, %v6439_v30 }
0x11de   :  { %v4352_v51 = vmul.f32 0.5, %v4351_v38  ;;  %v8617_v55 = vsub.f32 %v8563_v16, %v4291_v20 }
0x11e0   :  { %v4353_v26 = vsub.f32 1.5, %v4352_v51  ;;  %v4307_v40 = vmul.f32 %v8617_v55, %v8617_v55 }
0x11e1   :  { %v6232_v46 = vpop.eup %6231 }
0x11e2   :  { %v4354_v25 = vmul.f32 %v6230_v9, %v4353_v26  ;;  %v4360_v27 = vmul.f32 %v6232_v46, %v4342_v34  ;;  %v4327_v3 = vsel %vm171_vm1, %v4307_v40, 0.0  ;;  %vm4366_vm10 = vweird.f32 %v6232_v46 }
0x11e3   :  { %4328 = vadd.xlane.f32.xlu2 %v4327_v3  ;;  %v4284_v35 = vpop.xlane.xlu1 %4283  ;;  %vm4367_vm12 = vmor %vm4365_vm11, %vm4366_vm10 }
0x11e4   :  { %v4361_v0 = vmul.f32 %v6232_v46, %v4360_v27  ;;  %v4292_v21 = vmul.f32 %v4284_v35, %v6439_v30  ;;  %v4358_v6 = vsel %vm4357_vm15, %v6230_v9, %v4354_v25 }
0x11e5   :  { %v4429_v1 = vmul.f32 %v4358_v6, %v8549_v33 }
0x11e6   :  { %v4362_v56 = vmul.f32 0.5, %v4361_v0  ;;  %v8624_v62 = vsub.f32 %v8569_v58, %v4292_v21 }
0x11e7   :  { %v4440_v45 = vmul.f32 %v8631_v31, %v4429_v1 }
0x11e8   :  { %v4363_v41 = vsub.f32 1.5, %v4362_v56  ;;  %v4308_v42 = vmul.f32 %v8624_v62, %v8624_v62 }
0x11e9   :  { %v4451_v33 = vadd.f32 %v8638_v12, %v4440_v45 }
0x11ea   :  { %v4364_v37 = vmul.f32 %v6232_v46, %v4363_v41  ;;  %v4330_v29 = vsel %vm171_vm1, %v4308_v42, 0.0 }
0x11eb   :  { %4331 = vadd.xlane.f32.xlu1 %v4330_v29 }
0x11ec   :  { %v4368_v28 = vsel %vm4367_vm12, %v6232_v46, %v4364_v37 }
0x11ed   :  { %v4430_v48 = vmul.f32 %v4368_v28, %v8556_v24 }
0x11ef   :  { %v4441_v63 = vmul.f32 %v8631_v31, %v4430_v48 }
0x11f1   :  { %v4452_v36 = vadd.f32 %v8638_v12, %v4441_v63 }
0x11f3   :  { %v4459_v19 = vpack.c.bf16 %v4452_v36, %v4451_v33 }
0x11f5   :  { %5621 = vmatmul.msk.bf16.vlgmr.msra.gmra.mxu1 %vm171_vm1, %v4459_v19 }
0x1216   :  { %v4317_v61 = vpop.xlane.xlu0 %4316 }
0x1217   :  { %v4335_v7 = vmul.f32 %v4317_v61, %v6439_v30 }
0x1219   :  { %v4343_v60 = vadd.f32 1e-06, %v4335_v7 }
0x121b   :  { %6233 = vrsqrt.f32 %v4343_v60  ;;  %vm4375_vm2 = vweird.f32 %v4343_v60 }
0x121e   :  { %v4320_v49 = vpop.xlane.xlu2 %4319 }
0x121f   :  { %v4336_v18 = vmul.f32 %v4320_v49, %v6439_v30 }
0x1221   :  { %v6234_v17 = vpop.eup %6233  ;;  %v4344_v43 = vadd.f32 1e-06, %v4336_v18 }
0x1222   :  { %v4370_v24 = vmul.f32 %v6234_v17, %v4343_v60  ;;  %vm4376_vm14 = vweird.f32 %v6234_v17 }
0x1223   :  { %6235 = vrsqrt.f32 %v4344_v43  ;;  %vm4377_vm3 = vmor %vm4375_vm2, %vm4376_vm14  ;;  %vm4385_vm5 = vweird.f32 %v4344_v43 }
0x1224   :  { %v4371_v8 = vmul.f32 %v6234_v17, %v4370_v24 }
0x1226   :  { %v4372_v59 = vmul.f32 0.5, %v4371_v8 }
0x1228   :  { %v4373_v4 = vsub.f32 1.5, %v4372_v59 }
0x1229   :  { %v6236_v47 = vpop.eup %6235 }
0x122a   :  { %v4374_v54 = vmul.f32 %v6234_v17, %v4373_v4  ;;  %v4380_v52 = vmul.f32 %v6236_v47, %v4344_v43  ;;  %vm4386_vm4 = vweird.f32 %v6236_v47 }
0x122b   :  { %vm4387_vm6 = vmor %vm4385_vm5, %vm4386_vm4 }
0x122c   :  { %v4381_v10 = vmul.f32 %v6236_v47, %v4380_v52  ;;  %v4378_v53 = vsel %vm4377_vm3, %v6234_v17, %v4374_v54 }
0x122d   :  { %v4431_v34 = vmul.f32 %v4378_v53, %v8575_v23 }
0x122e   :  { %v4382_v5 = vmul.f32 0.5, %v4381_v10 }
0x122f   :  { %v4442_v51 = vmul.f32 %v8631_v31, %v4431_v34 }
0x1230   :  { %v4383_v9 = vsub.f32 1.5, %v4382_v5 }
0x1231   :  { %v4453_v25 = vadd.f32 %v8638_v12, %v4442_v51 }
0x1232   :  { %v4384_v32 = vmul.f32 %v6236_v47, %v4383_v9 }
0x1234   :  { %v4388_v44 = vsel %vm4387_vm6, %v6236_v47, %v4384_v32 }
0x1235   :  { %v4432_v38 = vmul.f32 %v4388_v44, %v8582_v50  ;;  %v4323_v20 = vpop.xlane.xlu1 %4322  ;;  %v8669_v44 = vld [vmem:[%s9010_s12 + $0x1] ss:$0 sm:$0xff] }
0x1236   :  { %v4337_v26 = vmul.f32 %v4323_v20, %v6439_v30 }
0x1237   :  { %v4443_v40 = vmul.f32 %v8631_v31, %v4432_v38 }
0x1238   :  { %v4345_v46 = vadd.f32 1e-06, %v4337_v26 }
0x1239   :  { %v4454_v27 = vadd.f32 %v8638_v12, %v4443_v40 }
0x123a   :  { %6237 = vrsqrt.f32 %v4345_v46  ;;  %vm4395_vm8 = vweird.f32 %v4345_v46 }
0x123b   :  { %v4460_v23 = vpack.c.bf16 %v4454_v27, %v4453_v25 }
0x123d   :  { %v4326_v3 = vpop.xlane.xlu0 %4325  ;;  %5622 = vmatmul.msk.bf16.gmra.mxu1 %vm171_vm1, %v4460_v23 }
0x123e   :  { %v4338_v35 = vmul.f32 %v4326_v3, %v6439_v30 }
0x1240   :  { %v6238_v50 = vpop.eup %6237  ;;  %v4346_v0 = vadd.f32 1e-06, %v4338_v35 }
0x1241   :  { %v4390_v21 = vmul.f32 %v6238_v50, %v4345_v46  ;;  %vm4396_vm7 = vweird.f32 %v6238_v50 }
0x1242   :  { %6239 = vrsqrt.f32 %v4346_v0  ;;  %vm4397_vm9 = vmor %vm4395_vm8, %vm4396_vm7  ;;  %vm4405_vm13 = vweird.f32 %v4346_v0 }
0x1243   :  { %v4391_v6 = vmul.f32 %v6238_v50, %v4390_v21 }
0x1245   :  { %v4392_v56 = vmul.f32 0.5, %v4391_v6 }
0x1247   :  { %v4393_v41 = vsub.f32 1.5, %v4392_v56 }
0x1248   :  { %v6240_v42 = vpop.eup %6239 }
0x1249   :  { %v4394_v1 = vmul.f32 %v6238_v50, %v4393_v41  ;;  %v4400_v37 = vmul.f32 %v6240_v42, %v4346_v0  ;;  %vm4406_vm0 = vweird.f32 %v6240_v42 }
0x124a   :  { %vm4407_vm15 = vmor %vm4405_vm13, %vm4406_vm0 }
0x124b   :  { %v4401_v29 = vmul.f32 %v6240_v42, %v4400_v37  ;;  %v4398_v28 = vsel %vm4397_vm9, %v6238_v50, %v4394_v1  ;;  %v5755_v37 = vld [vmem:[%s9011_s13 + $0x70] sm:$0xff] }
0x124c   :  { %v4433_v63 = vmul.f32 %v4398_v28, %v8589_v13 }
0x124d   :  { %v4402_v45 = vmul.f32 0.5, %v4401_v29 }
0x124e   :  { %v4444_v61 = vmul.f32 %v8631_v31, %v4433_v63 }
0x124f   :  { %v4403_v48 = vsub.f32 1.5, %v4402_v45 }
0x1250   :  { %v4455_v18 = vadd.f32 %v8638_v12, %v4444_v61 }
0x1251   :  { %v4404_v33 = vmul.f32 %v6240_v42, %v4403_v48 }
0x1253   :  { %v4408_v36 = vsel %vm4407_vm15, %v6240_v42, %v4404_v33  ;;  %v5754_v33 = vld [vmem:[%s9011_s13 + $0x68] sm:$0xff] }
0x1254   :  { %v4434_v19 = vmul.f32 %v4408_v36, %v8596_v11 }
0x1256   :  { %v4329_v7 = vpop.xlane.xlu2 %4328  ;;  %v4445_v60 = vmul.f32 %v8631_v31, %v4434_v19 }
0x1257   :  { %v4339_v49 = vmul.f32 %v4329_v7, %v6439_v30 }
0x1258   :  { %v4456_v17 = vadd.f32 %v8638_v12, %v4445_v60 }
0x1259   :  { %v4347_v43 = vadd.f32 1e-06, %v4339_v49 }
0x125a   :  { %v4461_v24 = vpack.c.bf16 %v4456_v17, %v4455_v18  ;;  %v5753_v17 = vld [vmem:[%s9011_s13 + $0x60] sm:$0xff] }
0x125b   :  { %6241 = vrsqrt.f32 %v4347_v43  ;;  %vm4415_vm11 = vweird.f32 %v4347_v43 }
0x125c   :  { %5623 = vmatmul.msk.bf16.gmra.mxu1 %vm171_vm1, %v4461_v24 }
0x125e   :  { %v4332_v13 = vpop.xlane.xlu1 %4331 }
0x125f   :  { %v4340_v8 = vmul.f32 %v4332_v13, %v6439_v30 }
0x1261   :  { %v6242_v11 = vpop.eup %6241  ;;  %v4348_v59 = vadd.f32 1e-06, %v4340_v8 }
0x1262   :  { %v4410_v4 = vmul.f32 %v6242_v11, %v4347_v43  ;;  %vm4416_vm10 = vweird.f32 %v6242_v11 }
0x1263   :  { %6243 = vrsqrt.f32 %v4348_v59  ;;  %vm4417_vm12 = vmor %vm4415_vm11, %vm4416_vm10  ;;  %vm4425_vm2 = vweird.f32 %v4348_v59 }
0x1264   :  { %v4411_v47 = vmul.f32 %v6242_v11, %v4410_v4 }
0x1266   :  { %v4412_v54 = vmul.f32 0.5, %v4411_v47  ;;  %v5752_v47 = vld [vmem:[%s9011_s13 + $0x58] sm:$0xff] }
0x1268   :  { %v4413_v52 = vsub.f32 1.5, %v4412_v54 }
0x1269   :  { %v6244_v10 = vpop.eup %6243 }
0x126a   :  { %v4414_v53 = vmul.f32 %v6242_v11, %v4413_v52  ;;  %v4420_v5 = vmul.f32 %v6244_v10, %v4348_v59  ;;  %vm4426_vm14 = vweird.f32 %v6244_v10 }
0x126b   :  { %vm4427_vm3 = vmor %vm4425_vm2, %vm4426_vm14 }
0x126c   :  { %v4421_v9 = vmul.f32 %v6244_v10, %v4420_v5  ;;  %v4418_v34 = vsel %vm4417_vm12, %v6242_v11, %v4414_v53 }
0x126d   :  { %v4435_v20 = vmul.f32 %v4418_v34, %v8617_v55  ;;  %v5751_v34 = vld [vmem:[%s9011_s13 + $0x50] sm:$0xff] }
0x126e   :  { %v4422_v32 = vmul.f32 0.5, %v4421_v9 }
0x126f   :  { %v4446_v23 = vmul.f32 %v8631_v31, %v4435_v20  ;;  %v5750_v20 = vld [vmem:[%s9011_s13 + $0x48] sm:$0xff] }
0x1270   :  { %v4423_v38 = vsub.f32 1.5, %v4422_v32 }
0x1271   :  { %v4457_v50 = vadd.f32 %v8638_v12, %v4446_v23 }
0x1272   :  { %v4424_v51 = vmul.f32 %v6244_v10, %v4423_v38  ;;  %v4522_v26 = vpop.f32.mrf.mxu1 }
0x1273   :  { %v8673_v40 = vadd.f32 %v8669_v44, %v4522_v26 }
0x1274   :  { %v4428_v46 = vsel %vm4427_vm3, %v6244_v10, %v4424_v51 }
0x1275   :  { %v4436_v25 = vmul.f32 %v4428_v46, %v8624_v62  ;;  %v8677_v27 = vmul.f32 0.70710677, %v8673_v40  ;;  %v5756_v62 = vld [vmem:[%s9011_s13 + $0x78] sm:$0xff] }
0x1276   :  { %4968 = vmatpush.bf16.msrb.mxu2 %v5756_v62 }
0x1277   :  { %v4558_v3 = vmul.f32 %v8677_v27, %v8677_v27  ;;  %v4447_v55 = vmul.f32 %v8631_v31, %v4436_v25  ;;  %v5749_v25 = vld [vmem:[%s9011_s13 + $0x40] sm:$0xff] }
0x1279   :  { %v8683_v35 = vmin.f32 %v4558_v3, 16.0  ;;  %v4458_v0 = vadd.f32 %v8638_v12, %v4447_v55 }
0x127a   :  { %v4524_v21 = vpop.f32.mrf.mxu1  ;;  %4969 = vmatpush.bf16.msrb.mxu2 %v5755_v37 }
0x127b   :  { %v4560_v6 = vmul.f32 2.1237322e-06, %v8683_v35  ;;  %v4571_v56 = vmul.f32 3.8918573e-05, %v8683_v35  ;;  %v8693_v41 = vadd.f32 %v8669_v44, %v4524_v21  ;;  %v4462_v42 = vpack.c.bf16 %v4458_v0, %v4457_v50 }
0x127d   :  { %v4561_v31 = vadd.f32 0.00028619796, %v4560_v6  ;;  %v4572_v1 = vadd.f32 0.001143296, %v4571_v56  ;;  %5624 = vmatmul.msk.bf16.gmra.mxu1 %vm171_vm1, %v4462_v42  ;;  %v8697_v12 = vmul.f32 0.70710677, %v8693_v41 }
0x127e   :  { %4970 = vmatpush.bf16.msrb.mxu2 %v5754_v33 }
0x127f   :  { %v4573_v29 = vmul.f32 %v4572_v1, %v8683_v35  ;;  %v4598_v28 = vmul.f32 %v8697_v12, %v8697_v12  ;;  %v4562_v45 = vmul.f32 %v4561_v31, %v8683_v35 }
0x1281   :  { %v4574_v48 = vadd.f32 0.014752088, %v4573_v29  ;;  %v4599_v63 = vmin.f32 %v4598_v28, 16.0  ;;  %v4563_v7 = vadd.f32 0.0036580483, %v4562_v45 }
0x1282   :  { %4971 = vmatpush.bf16.msrb.mxu2 %v5753_v17 }
0x1283   :  { %v4575_v36 = vmul.f32 %v4574_v48, %v8683_v35  ;;  %v4600_v19 = vmul.f32 2.1237322e-06, %v4599_v63  ;;  %v4611_v61 = vmul.f32 3.8918573e-05, %v4599_v63  ;;  %v4564_v8 = vmul.f32 %v4563_v7, %v8683_v35 }
0x1285   :  { %v4576_v60 = vadd.f32 0.112945676, %v4575_v36  ;;  %v4601_v49 = vadd.f32 0.00028619796, %v4600_v19  ;;  %v4612_v18 = vadd.f32 0.001143296, %v4611_v61 }
0x1286   :  { %4972 = vmatpush.bf16.msrb.mxu2 %v5752_v47  ;;  %v4565_v10 = vadd.f32 0.05243302, %v4564_v8  ;;  %v4543_v47 = vmul.f32 0.5, %v8693_v41 }
0x1287   :  { %v4577_v43 = vmul.f32 %v4576_v60, %v8683_v35  ;;  %v4602_v24 = vmul.f32 %v4601_v49, %v4599_v63  ;;  %v4613_v13 = vmul.f32 %v4612_v18, %v4599_v63 }
0x1288   :  { %v4566_v38 = vmul.f32 %v4565_v10, %v8683_v35 }
0x1289   :  { %v4578_v11 = vadd.f32 0.4994258, %v4577_v43  ;;  %v4603_v59 = vadd.f32 0.0036580483, %v4602_v24  ;;  %v4614_v4 = vadd.f32 0.014752088, %v4613_v13 }
0x128a   :  { %4973 = vmatpush.bf16.msrb.mxu2 %v5751_v34  ;;  %v4567_v3 = vadd.f32 0.18741608, %v4566_v38 }
0x128b   :  { %v4579_v54 = vmul.f32 %v4578_v11, %v8683_v35  ;;  %v4615_v52 = vmul.f32 %v4614_v4, %v4599_v63  ;;  %v4604_v5 = vmul.f32 %v4603_v59, %v4599_v63  ;;  %v4542_v4 = vmul.f32 0.5, %v8673_v40 }
0x128c   :  { %v4568_v62 = vmul.f32 %v4567_v3, %v8683_v35 }
0x128d   :  { %v4580_v53 = vadd.f32 1.0, %v4579_v54  ;;  %v4616_v9 = vadd.f32 0.112945676, %v4615_v52  ;;  %v4605_v51 = vadd.f32 0.05243302, %v4604_v5 }
0x128e   :  { %4974 = vmatpush.bf16.msrb.mxu2 %v5750_v20  ;;  %v4569_v37 = vadd.f32 1.1283791, %v4568_v62 }
0x128f   :  { %6245 = vrcp.f32 %v4580_v53  ;;  %v4617_v32 = vmul.f32 %v4616_v9, %v4599_v63  ;;  %v4606_v50 = vmul.f32 %v4605_v51, %v4599_v63  ;;  %v4592_v56 = vand.u32 2147483648, %v4580_v53 }
0x1290   :  { %v4590_v31 = vand.u32 2147483647, %v4580_v53  ;;  %vm4586_vm5 = vweird.f32 %v4580_v53  ;;  %v4570_v19 = vmul.f32 %v4569_v37, %v8677_v27 }
0x1291   :  { %v4618_v26 = vadd.f32 0.4994258, %v4617_v32  ;;  %v4607_v42 = vadd.f32 0.18741608, %v4606_v50  ;;  %v4593_v45 = vor.u32 1.1754944e-38, %v4592_v56 }
0x1292   :  { %4975 = vmatpush.bf16.msrb.mxu2 %v5749_v25  ;;  %vm4591_vm7 = vcmp.eq.f32.partialorder %v4590_v31, 8.507059e+37 }
0x1293   :  { %v4619_v46 = vmul.f32 %v4618_v26, %v4599_v63  ;;  %v4608_v48 = vmul.f32 %v4607_v42, %v4599_v63 }
0x1295   :  { %v6246_v23 = vpop.eup %6245  ;;  %v4620_v0 = vadd.f32 1.0, %v4619_v46  ;;  %v4609_v35 = vadd.f32 1.1283791, %v4608_v48 }
0x1296   :  { %v4582_v55 = vmul.f32 %v6246_v23, %v4580_v53  ;;  %vm4587_vm4 = vweird.f32 %v6246_v23 }
0x1297   :  { %6247 = vrcp.f32 %v4620_v0  ;;  %vm4588_vm6 = vmor %vm4586_vm5, %vm4587_vm4  ;;  %v4632_v7 = vand.u32 2147483648, %v4620_v0  ;;  %v4630_v18 = vand.u32 2147483647, %v4620_v0  ;;  %vm4626_vm9 = vweird.f32 %v4620_v0 }
0x1298   :  { %v4583_v21 = vsub.f32 1.0, %v4582_v55  ;;  %v4610_v13 = vmul.f32 %v4609_v35, %v8697_v12 }
0x1299   :  { %v4633_v43 = vor.u32 1.1754944e-38, %v4632_v7  ;;  %vm4631_vm13 = vcmp.eq.f32.partialorder %v4630_v18, 8.507059e+37 }
0x129a   :  { %v4584_v6 = vmul.f32 %v6246_v23, %v4583_v21 }
0x129c   :  { %v4585_v1 = vadd.f32 %v6246_v23, %v4584_v6 }
0x129d   :  { %v6248_v29 = vpop.eup %6247 }
0x129e   :  { %v4589_v28 = vsel %vm4588_vm6, %v6246_v23, %v4585_v1  ;;  %v4622_v33 = vmul.f32 %v6248_v29, %v4620_v0  ;;  %vm4627_vm8 = vweird.f32 %v6248_v29 }
0x129f   :  { %v4594_v36 = vsel %vm4591_vm7, %v4593_v45, %v4589_v28  ;;  %vm4628_vm0 = vmor %vm4626_vm9, %vm4627_vm8 }
0x12a0   :  { %v4623_v61 = vsub.f32 1.0, %v4622_v33  ;;  %v4595_v60 = vmul.f32 %v4594_v36, %v4570_v19 }
0x12a2   :  { %v4624_v49 = vmul.f32 %v6248_v29, %v4623_v61  ;;  %v5625_v24 = vclamps-f32 %v4595_v60, 1.0 }
0x12a4   :  { %v4625_v17 = vadd.f32 %v6248_v29, %v4624_v49  ;;  %v4878_v59 = vadd.f32 1.0, %v5625_v24 }
0x12a6   :  { %v4629_v63 = vsel %vm4628_vm0, %v6248_v29, %v4625_v17  ;;  %v4886_v52 = vmul.f32 %v4878_v59, %v4542_v4 }
0x12a7   :  { %v4634_v8 = vsel %vm4631_vm13, %v4633_v43, %v4629_v63 }
0x12a8   :  { %v4635_v11 = vmul.f32 %v4634_v8, %v4610_v13 }
0x12aa   :  { %v5626_v27 = vclamps-f32 %v4635_v11, 1.0 }
0x12ac   :  { %v4879_v54 = vadd.f32 1.0, %v5626_v27 }
0x12ae   :  { %v4887_v10 = vmul.f32 %v4879_v54, %v4543_v47 }
0x12b0   :  { %v4894_v53 = vpack.c.bf16 %v4887_v10, %v4886_v52 }
0x12b2   :  { %4976 = vmatmul.bf16.vlgmr.msrb.gmra.mxu2 %v4894_v53 }
0x12ba   :  { %v4527_v5 = vpop.f32.mrf.mxu1 }
0x12bb   :  { %v8735_v9 = vadd.f32 %v8669_v44, %v4527_v5 }
0x12bd   :  { %v8738_v12 = vmul.f32 0.70710677, %v8735_v9 }
0x12bf   :  { %v4638_v34 = vmul.f32 %v8738_v12, %v8738_v12 }
0x12c1   :  { %v4639_v32 = vmin.f32 %v4638_v34, 16.0 }
0x12c2   :  { %v4529_v38 = vpop.f32.mrf.mxu1 }
0x12c3   :  { %v4640_v40 = vmul.f32 2.1237322e-06, %v4639_v32  ;;  %v4651_v20 = vmul.f32 3.8918573e-05, %v4639_v32  ;;  %v8743_v41 = vadd.f32 %v8669_v44, %v4529_v38 }
0x12c5   :  { %v4641_v51 = vadd.f32 0.00028619796, %v4640_v40  ;;  %v4652_v26 = vadd.f32 0.001143296, %v4651_v20  ;;  %v8746_v46 = vmul.f32 0.70710677, %v8743_v41 }
0x12c7   :  { %v4653_v25 = vmul.f32 %v4652_v26, %v4639_v32  ;;  %v4678_v23 = vmul.f32 %v8746_v46, %v8746_v46  ;;  %v4642_v3 = vmul.f32 %v4641_v51, %v4639_v32 }
0x12c9   :  { %v4654_v55 = vadd.f32 0.014752088, %v4653_v25  ;;  %v4679_v50 = vmin.f32 %v4678_v23, 16.0  ;;  %v4643_v6 = vadd.f32 0.0036580483, %v4642_v3 }
0x12cb   :  { %v4655_v0 = vmul.f32 %v4654_v55, %v4639_v32  ;;  %v4680_v21 = vmul.f32 2.1237322e-06, %v4679_v50  ;;  %v4691_v62 = vmul.f32 3.8918573e-05, %v4679_v50  ;;  %v4644_v28 = vmul.f32 %v4643_v6, %v4639_v32 }
0x12cd   :  { %v4656_v56 = vadd.f32 0.112945676, %v4655_v0  ;;  %v4681_v42 = vadd.f32 0.00028619796, %v4680_v21  ;;  %v4692_v31 = vadd.f32 0.001143296, %v4691_v62 }
0x12ce   :  { %v4645_v61 = vadd.f32 0.05243302, %v4644_v28 }
0x12cf   :  { %v4657_v1 = vmul.f32 %v4656_v56, %v4639_v32  ;;  %v4682_v37 = vmul.f32 %v4681_v42, %v4679_v50  ;;  %v4693_v29 = vmul.f32 %v4692_v31, %v4679_v50 }
0x12d0   :  { %v4646_v18 = vmul.f32 %v4645_v61, %v4639_v32 }
0x12d1   :  { %v4658_v45 = vadd.f32 0.4994258, %v4657_v1  ;;  %v4683_v48 = vadd.f32 0.0036580483, %v4682_v37  ;;  %v4694_v33 = vadd.f32 0.014752088, %v4693_v29 }
0x12d2   :  { %v4647_v59 = vadd.f32 0.18741608, %v4646_v18 }
0x12d3   :  { %v4659_v36 = vmul.f32 %v4658_v45, %v4639_v32  ;;  %v4695_v19 = vmul.f32 %v4694_v33, %v4679_v50  ;;  %v4684_v7 = vmul.f32 %v4683_v48, %v4679_v50 }
0x12d4   :  { %v4648_v10 = vmul.f32 %v4647_v59, %v4639_v32 }
0x12d5   :  { %v4660_v35 = vadd.f32 1.0, %v4659_v36  ;;  %v4696_v60 = vadd.f32 0.112945676, %v4695_v19  ;;  %v4685_v17 = vadd.f32 0.05243302, %v4684_v7 }
0x12d6   :  { %v4649_v32 = vadd.f32 1.1283791, %v4648_v10 }
0x12d7   :  { %6249 = vrcp.f32 %v4660_v35  ;;  %v4697_v49 = vmul.f32 %v4696_v60, %v4679_v50  ;;  %v4686_v27 = vmul.f32 %v4685_v17, %v4679_v50  ;;  %v4672_v40 = vand.u32 2147483648, %v4660_v35 }
0x12d8   :  { %v4670_v51 = vand.u32 2147483647, %v4660_v35  ;;  %vm4666_vm10 = vweird.f32 %v4660_v35  ;;  %v4650_v45 = vmul.f32 %v4649_v32, %v8738_v12 }
0x12d9   :  { %v4532_v43 = vpop.f32.mrf.mxu1  ;;  %v4698_v24 = vadd.f32 0.4994258, %v4697_v49  ;;  %v4687_v53 = vadd.f32 0.18741608, %v4686_v27  ;;  %v4673_v56 = vor.u32 1.1754944e-38, %v4672_v40 }
0x12da   :  { %v8751_v13 = vadd.f32 %v8669_v44, %v4532_v43  ;;  %vm4671_vm12 = vcmp.eq.f32.partialorder %v4670_v51, 8.507059e+37 }
0x12db   :  { %v4699_v63 = vmul.f32 %v4698_v24, %v4679_v50  ;;  %v4688_v55 = vmul.f32 %v4687_v53, %v4679_v50 }
0x12dc   :  { %v8754_v8 = vmul.f32 0.70710677, %v8751_v13 }
0x12dd   :  { %v6250_v11 = vpop.eup %6249  ;;  %v4700_v47 = vadd.f32 1.0, %v4699_v63  ;;  %v4689_v50 = vadd.f32 1.1283791, %v4688_v55  ;;  %v4545_v55 = vmul.f32 0.5, %v8743_v41 }
0x12de   :  { %v4662_v4 = vmul.f32 %v6250_v11, %v4660_v35  ;;  %v4718_v54 = vmul.f32 %v8754_v8, %v8754_v8  ;;  %vm4667_vm15 = vweird.f32 %v6250_v11 }
0x12df   :  { %6251 = vrcp.f32 %v4700_v47  ;;  %vm4668_vm11 = vmor %vm4666_vm10, %vm4667_vm15  ;;  %v4710_v33 = vand.u32 2147483647, %v4700_v47  ;;  %v4712_v36 = vand.u32 2147483648, %v4700_v47  ;;  %vm4706_vm2 = vweird.f32 %v4700_v47 }
0x12e0   :  { %v4663_v52 = vsub.f32 1.0, %v4662_v4  ;;  %v8758_v5 = vmin.f32 %v4718_v54, 16.0  ;;  %v4690_v12 = vmul.f32 %v4689_v50, %v8746_v46 }
0x12e1   :  { %v4534_v34 = vpop.f32.mrf.mxu1  ;;  %v4713_v63 = vor.u32 1.1754944e-38, %v4712_v36  ;;  %vm4711_vm4 = vcmp.eq.f32.partialorder %v4710_v33, 8.507059e+37 }
0x12e2   :  { %v4664_v38 = vmul.f32 %v6250_v11, %v4663_v52  ;;  %v8761_v20 = vadd.f32 %v8669_v44, %v4534_v34  ;;  %v4720_v26 = vmul.f32 2.1237322e-06, %v8758_v5  ;;  %v4731_v25 = vmul.f32 3.8918573e-05, %v8758_v5 }
0x12e4   :  { %v4665_v23 = vadd.f32 %v6250_v11, %v4664_v38  ;;  %v8766_v3 = vmul.f32 0.70710677, %v8761_v20  ;;  %v4721_v0 = vadd.f32 0.00028619796, %v4720_v26  ;;  %v4732_v21 = vadd.f32 0.001143296, %v4731_v25 }
0x12e5   :  { %v6252_v62 = vpop.eup %6251  ;;  %v4544_v25 = vmul.f32 0.5, %v8735_v9 }
0x12e6   :  { %v4669_v6 = vsel %vm4668_vm11, %v6250_v11, %v4665_v23  ;;  %v4758_v42 = vmul.f32 %v8766_v3, %v8766_v3  ;;  %v4702_v31 = vmul.f32 %v6252_v62, %v4700_v47  ;;  %v4722_v37 = vmul.f32 %v4721_v0, %v8758_v5 }
0x12e7   :  { %v4674_v1 = vsel %vm4671_vm12, %v4673_v56, %v4669_v6  ;;  %v4733_v29 = vmul.f32 %v4732_v21, %v8758_v5  ;;  %vm4707_vm14 = vweird.f32 %v6252_v62 }
0x12e8   :  { %v8772_v28 = vmin.f32 %v4758_v42, 16.0  ;;  %v4703_v48 = vsub.f32 1.0, %v4702_v31  ;;  %v4675_v35 = vmul.f32 %v4674_v1, %v4650_v45  ;;  %v4723_v49 = vadd.f32 0.0036580483, %v4722_v37  ;;  %vm4708_vm3 = vmor %vm4706_vm2, %vm4707_vm14 }
0x12e9   :  { %v4734_v19 = vadd.f32 0.014752088, %v4733_v29 }
0x12ea   :  { %v4760_v61 = vmul.f32 2.1237322e-06, %v8772_v28  ;;  %v4704_v7 = vmul.f32 %v6252_v62, %v4703_v48  ;;  %v4771_v60 = vmul.f32 3.8918573e-05, %v8772_v28  ;;  %v5627_v27 = vclamps-f32 %v4675_v35, 1.0 }
0x12eb   :  { %v4735_v18 = vmul.f32 %v4734_v19, %v8758_v5  ;;  %v4724_v10 = vmul.f32 %v4723_v49, %v8758_v5 }
0x12ec   :  { %v4761_v17 = vadd.f32 0.00028619796, %v4760_v61  ;;  %v4705_v43 = vadd.f32 %v6252_v62, %v4704_v7  ;;  %v4772_v24 = vadd.f32 0.001143296, %v4771_v60  ;;  %v4880_v46 = vadd.f32 1.0, %v5627_v27 }
0x12ed   :  { %v4736_v11 = vadd.f32 0.112945676, %v4735_v18  ;;  %v4725_v23 = vadd.f32 0.05243302, %v4724_v10 }
0x12ee   :  { %v4762_v59 = vmul.f32 %v4761_v17, %v8772_v28  ;;  %v4709_v4 = vsel %vm4708_vm3, %v6252_v62, %v4705_v43  ;;  %v4773_v54 = vmul.f32 %v4772_v24, %v8772_v28  ;;  %v4888_v56 = vmul.f32 %v4880_v46, %v4544_v25 }
0x12ef   :  { %v4714_v52 = vsel %vm4711_vm4, %v4713_v63, %v4709_v4  ;;  %v4737_v53 = vmul.f32 %v4736_v11, %v8758_v5  ;;  %v4726_v1 = vmul.f32 %v4725_v23, %v8758_v5 }
0x12f0   :  { %v4715_v34 = vmul.f32 %v4714_v52, %v4690_v12  ;;  %v4763_v47 = vadd.f32 0.0036580483, %v4762_v59  ;;  %v4774_v38 = vadd.f32 0.014752088, %v4773_v54 }
0x12f1   :  { %v4738_v40 = vadd.f32 0.4994258, %v4737_v53  ;;  %v4727_v48 = vadd.f32 0.18741608, %v4726_v1 }
0x12f2   :  { %v5628_v51 = vclamps-f32 %v4715_v34, 1.0  ;;  %v4775_v26 = vmul.f32 %v4774_v38, %v8772_v28  ;;  %v4764_v21 = vmul.f32 %v4763_v47, %v8772_v28 }
0x12f3   :  { %v4739_v32 = vmul.f32 %v4738_v40, %v8758_v5  ;;  %v4728_v7 = vmul.f32 %v4727_v48, %v8758_v5 }
0x12f4   :  { %v4881_v0 = vadd.f32 1.0, %v5628_v51  ;;  %v4776_v62 = vadd.f32 0.112945676, %v4775_v26  ;;  %v4765_v37 = vadd.f32 0.05243302, %v4764_v21 }
0x12f5   :  { %v4740_v6 = vadd.f32 1.0, %v4739_v32  ;;  %v4729_v59 = vadd.f32 1.1283791, %v4728_v7 }
0x12f6   :  { %v4889_v42 = vmul.f32 %v4881_v0, %v4545_v55  ;;  %v4777_v31 = vmul.f32 %v4776_v62, %v8772_v28  ;;  %v4766_v33 = vmul.f32 %v4765_v37, %v8772_v28 }
0x12f7   :  { %6253 = vrcp.f32 %v4740_v6  ;;  %v4752_v17 = vand.u32 2147483648, %v4740_v6  ;;  %v4750_v63 = vand.u32 2147483647, %v4740_v6  ;;  %vm4746_vm6 = vweird.f32 %v4740_v6 }
0x12f8   :  { %v4778_v29 = vadd.f32 0.4994258, %v4777_v31  ;;  %v4895_v9 = vpack.c.bf16 %v4889_v42, %v4888_v56  ;;  %v4767_v18 = vadd.f32 0.18741608, %v4766_v33 }
0x12f9   :  { %v4753_v53 = vor.u32 1.1754944e-38, %v4752_v17  ;;  %vm4751_vm8 = vcmp.eq.f32.partialorder %v4750_v63, 8.507059e+37 }
0x12fa   :  { %v4537_v45 = vpop.f32.mrf.mxu1  ;;  %v4779_v50 = vmul.f32 %v4778_v29, %v8772_v28  ;;  %4981 = vmatmul.bf16.gmra.mxu2 %v4895_v9  ;;  %v4768_v52 = vmul.f32 %v4767_v18, %v8772_v28  ;;  %v4730_v28 = vmul.f32 %v4729_v59, %v8754_v8  ;;  %v4547_v59 = vmul.f32 0.5, %v8761_v20 }
0x12fb   :  { %v8792_v41 = vadd.f32 %v8669_v44, %v4537_v45 }
0x12fc   :  { %v4780_v36 = vadd.f32 1.0, %v4779_v50  ;;  %v4769_v23 = vadd.f32 1.1283791, %v4768_v52 }
0x12fd   :  { %v8796_v19 = vmul.f32 0.70710677, %v8792_v41  ;;  %v6254_v61 = vpop.eup %6253 }
0x12fe   :  { %v4742_v35 = vmul.f32 %v6254_v61, %v4740_v6  ;;  %6255 = vrcp.f32 %v4780_v36  ;;  %vm4747_vm5 = vweird.f32 %v6254_v61  ;;  %v4792_v32 = vand.u32 2147483648, %v4780_v36 }
0x12ff   :  { %v4798_v60 = vmul.f32 %v8796_v19, %v8796_v19  ;;  %vm4748_vm7 = vmor %vm4746_vm6, %vm4747_vm5  ;;  %v4790_v21 = vand.u32 2147483647, %v4780_v36  ;;  %vm4786_vm0 = vweird.f32 %v4780_v36  ;;  %v4770_v45 = vmul.f32 %v4769_v23, %v8766_v3 }
0x1300   :  { %v4743_v49 = vsub.f32 1.0, %v4742_v35  ;;  %v4793_v8 = vor.u32 1.1754944e-38, %v4792_v32 }
0x1301   :  { %v8801_v43 = vmin.f32 %v4798_v60, 16.0  ;;  %vm4791_vm15 = vcmp.eq.f32.partialorder %v4790_v21, 8.507059e+37 }
0x1302   :  { %v4539_v24 = vpop.f32.mrf.mxu1  ;;  %v4744_v12 = vmul.f32 %v6254_v61, %v4743_v49 }
0x1303   :  { %v8804_v11 = vadd.f32 %v8669_v44, %v4539_v24  ;;  %v4800_v27 = vmul.f32 2.1237322e-06, %v8801_v43  ;;  %v4811_v5 = vmul.f32 3.8918573e-05, %v8801_v43 }
0x1304   :  { %v6256_v4 = vpop.eup %6255  ;;  %v4745_v54 = vadd.f32 %v6254_v61, %v4744_v12 }
0x1305   :  { %v8810_v10 = vmul.f32 0.70710677, %v8804_v11  ;;  %v4782_v34 = vmul.f32 %v6256_v4, %v4780_v36  ;;  %v4801_v47 = vadd.f32 0.00028619796, %v4800_v27  ;;  %v4812_v38 = vadd.f32 0.001143296, %v4811_v5 }
0x1306   :  { %v4749_v44 = vsel %vm4748_vm7, %v6254_v61, %v4745_v54  ;;  %vm4787_vm9 = vweird.f32 %v6256_v4  ;;  %v4546_v54 = vmul.f32 0.5, %v8751_v13 }
0x1307   :  { %v4838_v40 = vmul.f32 %v8810_v10, %v8810_v10  ;;  %v4754_v46 = vsel %vm4751_vm8, %v4753_v53, %v4749_v44  ;;  %v4783_v51 = vsub.f32 1.0, %v4782_v34  ;;  %v4802_v26 = vmul.f32 %v4801_v47, %v8801_v43  ;;  %vm4788_vm13 = vmor %vm4786_vm0, %vm4787_vm9 }
0x1308   :  { %v4813_v25 = vmul.f32 %v4812_v38, %v8801_v43  ;;  %v4755_v6 = vmul.f32 %v4754_v46, %v4730_v28 }
0x1309   :  { %v8817_v55 = vmin.f32 %v4838_v40, 16.0  ;;  %v4784_v0 = vmul.f32 %v6256_v4, %v4783_v51  ;;  %v4803_v1 = vadd.f32 0.0036580483, %v4802_v26 }
0x130a   :  { %v4814_v62 = vadd.f32 0.014752088, %v4813_v25  ;;  %v5629_v33 = vclamps-f32 %v4755_v6, 1.0 }
0x130b   :  { %v4840_v56 = vmul.f32 2.1237322e-06, %v8817_v55  ;;  %v4851_v42 = vmul.f32 3.8918573e-05, %v8817_v55  ;;  %v4785_v31 = vadd.f32 %v6256_v4, %v4784_v0  ;;  %v4804_v36 = vmul.f32 %v4803_v1, %v8801_v43 }
0x130c   :  { %v4815_v37 = vmul.f32 %v4814_v62, %v8801_v43  ;;  %v4882_v63 = vadd.f32 1.0, %v5629_v33 }
0x130d   :  { %v4841_v29 = vadd.f32 0.00028619796, %v4840_v56  ;;  %v4852_v9 = vadd.f32 0.001143296, %v4851_v42  ;;  %v4789_v50 = vsel %vm4788_vm13, %v6256_v4, %v4785_v31  ;;  %v4805_v5 = vadd.f32 0.05243302, %v4804_v36 }
0x130e   :  { %v4816_v48 = vadd.f32 0.112945676, %v4815_v37  ;;  %v4794_v61 = vsel %vm4791_vm15, %v4793_v8, %v4789_v50  ;;  %v4890_v38 = vmul.f32 %v4882_v63, %v4546_v54 }
0x130f   :  { %v4842_v35 = vmul.f32 %v4841_v29, %v8817_v55  ;;  %v4853_v7 = vmul.f32 %v4852_v9, %v8817_v55  ;;  %v4795_v60 = vmul.f32 %v4794_v61, %v4770_v45  ;;  %v4806_v40 = vmul.f32 %v4805_v5, %v8801_v43 }
0x1310   :  { %v4817_v49 = vmul.f32 %v4816_v48, %v8801_v43 }
0x1311   :  { %v4843_v18 = vadd.f32 0.0036580483, %v4842_v35  ;;  %v4854_v17 = vadd.f32 0.014752088, %v4853_v7  ;;  %v5630_v24 = vclamps-f32 %v4795_v60, 1.0 }
0x1312   :  { %v4818_v12 = vadd.f32 0.4994258, %v4817_v49  ;;  %v4807_v25 = vadd.f32 0.18741608, %v4806_v40 }
0x1313   :  { %v4855_v3 = vmul.f32 %v4854_v17, %v8817_v55  ;;  %v4883_v27 = vadd.f32 1.0, %v5630_v24  ;;  %v4844_v52 = vmul.f32 %v4843_v18, %v8817_v55 }
0x1314   :  { %v4819_v4 = vmul.f32 %v4818_v12, %v8801_v43  ;;  %v4808_v0 = vmul.f32 %v4807_v25, %v8801_v43 }
0x1315   :  { %v4856_v53 = vadd.f32 0.112945676, %v4855_v3  ;;  %v4891_v34 = vmul.f32 %v4883_v27, %v4547_v59  ;;  %v4845_v46 = vadd.f32 0.05243302, %v4844_v52  ;;  %v5903_v3 = vld [vmem:[%s9012_s14 + $0x1] ss:$0 sm:$0xff] }
0x1316   :  { %v4820_v47 = vadd.f32 1.0, %v4819_v4  ;;  %v4809_v31 = vadd.f32 1.1283791, %v4808_v0  ;;  %v4548_v59 = vmul.f32 0.5, %v8792_v41  ;;  %v4549_v27 = vmul.f32 0.5, %v8804_v11 }
0x1317   :  { %v4857_v44 = vmul.f32 %v4856_v53, %v8817_v55  ;;  %v4896_v20 = vpack.c.bf16 %v4891_v34, %v4890_v38  ;;  %v4846_v13 = vmul.f32 %v4845_v46, %v8817_v55 }
0x1318   :  { %6257 = vrcp.f32 %v4820_v47  ;;  %v4832_v6 = vand.u32 2147483648, %v4820_v47  ;;  %v4830_v42 = vand.u32 2147483647, %v4820_v47  ;;  %vm4826_vm11 = vweird.f32 %v4820_v47 }
0x1319   :  { %v4858_v51 = vadd.f32 0.4994258, %v4857_v44  ;;  %4986 = vmatmul.bf16.gmra.mxu2 %v4896_v20  ;;  %v4847_v62 = vadd.f32 0.18741608, %v4846_v13  ;;  %v4810_v50 = vmul.f32 %v4809_v31, %v8796_v19 }
0x131a   :  { %v4833_v29 = vor.u32 1.1754944e-38, %v4832_v6  ;;  %vm4831_vm14 = vcmp.eq.f32.partialorder %v4830_v42, 8.507059e+37 }
0x131b   :  { %v4859_v26 = vmul.f32 %v4858_v51, %v8817_v55  ;;  %v4848_v8 = vmul.f32 %v4847_v62, %v8817_v55 }
0x131d   :  { %v4860_v28 = vadd.f32 1.0, %v4859_v26  ;;  %v4849_v33 = vadd.f32 1.1283791, %v4848_v8 }
0x131e   :  { %v6258_v23 = vpop.eup %6257 }
0x131f   :  { %v4822_v32 = vmul.f32 %v6258_v23, %v4820_v47  ;;  %6259 = vrcp.f32 %v4860_v28  ;;  %vm4827_vm10 = vweird.f32 %v6258_v23  ;;  %v4872_v61 = vand.u32 2147483648, %v4860_v28 }
0x1320   :  { %vm4828_vm12 = vmor %vm4826_vm11, %vm4827_vm10  ;;  %v4870_v60 = vand.u32 2147483647, %v4860_v28  ;;  %vm4866_vm3 = vweird.f32 %v4860_v28  ;;  %v4850_v18 = vmul.f32 %v4849_v33, %v8810_v10 }
0x1321   :  { %v4823_v21 = vsub.f32 1.0, %v4822_v32  ;;  %v4873_v49 = vor.u32 1.1754944e-38, %v4872_v61 }
0x1322   :  { %vm4871_vm5 = vcmp.eq.f32.partialorder %v4870_v60, 8.507059e+37 }
0x1323   :  { %v4824_v56 = vmul.f32 %v6258_v23, %v4823_v21 }
0x1325   :  { %v6260_v1 = vpop.eup %6259  ;;  %v4825_v37 = vadd.f32 %v6258_v23, %v4824_v56 }
0x1326   :  { %v4862_v9 = vmul.f32 %v6260_v1, %v4860_v28  ;;  %vm4867_vm2 = vweird.f32 %v6260_v1 }
0x1327   :  { %v4829_v45 = vsel %vm4828_vm12, %v6258_v23, %v4825_v37  ;;  %vm4868_vm4 = vmor %vm4866_vm3, %vm4867_vm2 }
0x1328   :  { %v4834_v43 = vsel %vm4831_vm14, %v4833_v29, %v4829_v45  ;;  %v4863_v48 = vsub.f32 1.0, %v4862_v9 }
0x1329   :  { %v4835_v35 = vmul.f32 %v4834_v43, %v4810_v50 }
0x132a   :  { %v4864_v7 = vmul.f32 %v6260_v1, %v4863_v48 }
0x132b   :  { %v5631_v55 = vclamps-f32 %v4835_v35, 1.0 }
0x132c   :  { %v4865_v36 = vadd.f32 %v6260_v1, %v4864_v7 }
0x132d   :  { %v4884_v19 = vadd.f32 1.0, %v5631_v55 }
0x132e   :  { %v4869_v17 = vsel %vm4868_vm4, %v6260_v1, %v4865_v36 }
0x132f   :  { %v4874_v24 = vsel %vm4871_vm5, %v4873_v49, %v4869_v17  ;;  %v4892_v4 = vmul.f32 %v4884_v19, %v4548_v59 }
0x1330   :  { %v4875_v12 = vmul.f32 %v4874_v24, %v4850_v18 }
0x1332   :  { %v5632_v63 = vclamps-f32 %v4875_v12, 1.0 }
0x1334   :  { %v4885_v5 = vadd.f32 1.0, %v5632_v63 }
0x1335   :  { %v4977_v52 = vpop.f32.mrf.mxu2 }
0x1336   :  { %v4893_v54 = vmul.f32 %v4885_v5, %v4549_v27  ;;  %v4978_v53 = vadd.f32 %v5903_v3, %v4977_v52  ;;  %v5760_v52 = vld [vmem:[%s9015_s17 + $0x18] sm:$0xff] }
0x1337   :  { %5261 = vmatpush.bf16.msrb.mxu3 %v5760_v52 }
0x1338   :  { %v4897_v10 = vpack.c.bf16 %v4893_v54, %v4892_v4  ;;  %v4997_v34 = vadd.f32 %v4978_v53, %v8504_v22 }
0x133a   :  { %4991 = vmatmul.bf16.gmra.mxu2 %v4897_v10  ;;  %v5007_v47 = vsel %vm171_vm1, %v4997_v34, 0.0 }
0x133b   :  { %5008 = vadd.xlane.f32.xlu0 %v5007_v47 }
0x133d   :  { %v4979_v38 = vpop.f32.mrf.mxu2 }
0x133e   :  { %v4980_v44 = vadd.f32 %v5903_v3, %v4979_v38  ;;  %v5758_v38 = vld [vmem:[%s9015_s17 + $0x8] sm:$0xff] }
0x1340   :  { %v4998_v40 = vadd.f32 %v4980_v44, %v8518_v2 }
0x1342   :  { %v5010_v41 = vsel %vm171_vm1, %v4998_v40, 0.0 }
0x1343   :  { %5011 = vadd.xlane.f32.xlu2 %v5010_v41 }
0x137d   :  { %v4982_v11 = vpop.f32.mrf.mxu2 }
0x137e   :  { %v4983_v46 = vadd.f32 %v5903_v3, %v4982_v11 }
0x1380   :  { %v4999_v51 = vadd.f32 %v4983_v46, %v8525_v15 }
0x1382   :  { %v5013_v20 = vsel %vm171_vm1, %v4999_v51, 0.0 }
0x1383   :  { %5014 = vadd.xlane.f32.xlu1 %v5013_v20 }
0x1385   :  { %v4984_v26 = vpop.f32.mrf.mxu2 }
0x1386   :  { %v4985_v22 = vadd.f32 %v5903_v3, %v4984_v26 }
0x1388   :  { %v5000_v25 = vadd.f32 %v4985_v22, %v8531_v14 }
0x138a   :  { %v5016_v13 = vsel %vm171_vm1, %v5000_v25, 0.0 }
0x138b   :  { %5017 = vadd.xlane.f32.xlu0 %v5016_v13 }
0x139c   :  { %v4987_v28 = vpop.f32.mrf.mxu2 }
0x139d   :  { %v4988_v23 = vadd.f32 %v5903_v3, %v4987_v28 }
0x139f   :  { %v5001_v2 = vadd.f32 %v4988_v23, %v8537_v57 }
0x13a1   :  { %v5019_v32 = vsel %vm171_vm1, %v5001_v2, 0.0 }
0x13a2   :  { %5020 = vadd.xlane.f32.xlu2 %v5019_v32 }
0x13a4   :  { %v4989_v0 = vpop.f32.mrf.mxu2 }
0x13a5   :  { %v4990_v21 = vadd.f32 %v5903_v3, %v4989_v0 }
0x13a7   :  { %v5002_v15 = vadd.f32 %v4990_v21, %v8543_v39 }
0x13a9   :  { %v5022_v62 = vsel %vm171_vm1, %v5002_v15, 0.0 }
0x13aa   :  { %5023 = vadd.xlane.f32.xlu1 %v5022_v62 }
0x13ae   :  { %v5009_v6 = vpop.xlane.xlu0 %5008 }
0x13af   :  { %v5031_v14 = vmul.f32 %v5009_v6, %v6439_v30 }
0x13b1   :  { %v8858_v56 = vsub.f32 %v4997_v34, %v5031_v14  ;;  %v5759_v34 = vld [vmem:[%s9015_s17 + $0x10] sm:$0xff] }
0x13b2   :  { %5262 = vmatpush.bf16.msrb.mxu3 %v5759_v34 }
0x13b3   :  { %v5047_v42 = vmul.f32 %v8858_v56, %v8858_v56 }
0x13b5   :  { %v5055_v57 = vsel %vm171_vm1, %v5047_v42, 0.0 }
0x13b6   :  { %v5012_v31 = vpop.xlane.xlu2 %5011  ;;  %5056 = vadd.xlane.f32.xlu0 %v5055_v57  ;;  %5263 = vmatpush.bf16.msrb.mxu3 %v5758_v38 }
0x13b7   :  { %v5032_v1 = vmul.f32 %v5012_v31, %v6439_v30 }
0x13b9   :  { %v8864_v37 = vsub.f32 %v4998_v40, %v5032_v1  ;;  %v5757_v40 = vld [vmem:[%s9015_s17] sm:$0xff] }
0x13ba   :  { %5264 = vmatpush.bf16.msrb.mxu3 %v5757_v40 }
0x13bb   :  { %v5048_v39 = vmul.f32 %v8864_v37, %v8864_v37 }
0x13bd   :  { %v4992_v8 = vpop.f32.mrf.mxu2  ;;  %v5058_v9 = vsel %vm171_vm1, %v5048_v39, 0.0  ;;  %v8929_v39 = vld [vmem:[%s9013_s15] ss:$0 sm:$0xff] }
0x13be   :  { %v4993_v29 = vadd.f32 %v5903_v3, %v4992_v8  ;;  %5059 = vadd.xlane.f32.xlu2 %v5058_v9 }
0x13c0   :  { %v5003_v45 = vadd.f32 %v4993_v29, %v8563_v16 }
0x13c2   :  { %v5025_v50 = vsel %vm171_vm1, %v5003_v45, 0.0 }
0x13c3   :  { %5026 = vadd.xlane.f32.xlu1 %v5025_v50  ;;  %v8936_v50 = vld [vmem:[%s9014_s16] ss:$0 sm:$0xff] }
0x13c5   :  { %v4994_v43 = vpop.f32.mrf.mxu2 }
0x13c6   :  { %v4995_v48 = vadd.f32 %v5903_v3, %v4994_v43 }
0x13c8   :  { %v8872_v33 = vadd.f32 %v4995_v48, %v8569_v58 }
0x13ca   :  { %v5028_v61 = vsel %vm171_vm1, %v8872_v33, 0.0 }
0x13cb   :  { %5029 = vadd.xlane.f32.xlu0 %v5028_v61 }
0x13f6   :  { %v5015_v35 = vpop.xlane.xlu1 %5014 }
0x13f7   :  { %v5033_v7 = vmul.f32 %v5015_v35, %v6439_v30 }
0x13f9   :  { %v8877_v60 = vsub.f32 %v4999_v51, %v5033_v7 }
0x13fb   :  { %v5049_v16 = vmul.f32 %v8877_v60, %v8877_v60 }
0x13fd   :  { %v5061_v36 = vsel %vm171_vm1, %v5049_v16, 0.0 }
0x13fe   :  { %v5018_v49 = vpop.xlane.xlu0 %5017  ;;  %5062 = vadd.xlane.f32.xlu2 %v5061_v36 }
0x13ff   :  { %v5034_v55 = vmul.f32 %v5018_v49, %v6439_v30 }
0x1401   :  { %v8883_v58 = vsub.f32 %v5000_v25, %v5034_v55 }
0x1403   :  { %v5050_v18 = vmul.f32 %v8883_v58, %v8883_v58 }
0x1405   :  { %v5064_v17 = vsel %vm171_vm1, %v5050_v18, 0.0 }
0x1406   :  { %5065 = vadd.xlane.f32.xlu1 %v5064_v17 }
0x1415   :  { %v5021_v24 = vpop.xlane.xlu2 %5020 }
0x1416   :  { %v5035_v12 = vmul.f32 %v5021_v24, %v6439_v30 }
0x1418   :  { %v8889_v19 = vsub.f32 %v5001_v2, %v5035_v12 }
0x141a   :  { %v5051_v63 = vmul.f32 %v8889_v19, %v8889_v19 }
0x141c   :  { %v5067_v3 = vsel %vm171_vm1, %v5051_v63, 0.0 }
0x141d   :  { %5068 = vadd.xlane.f32.xlu0 %v5067_v3  ;;  %v5024_v59 = vpop.xlane.xlu1 %5023 }
0x141e   :  { %v5036_v27 = vmul.f32 %v5024_v59, %v6439_v30 }
0x1420   :  { %v8895_v5 = vsub.f32 %v5002_v15, %v5036_v27 }
0x1422   :  { %v5052_v4 = vmul.f32 %v8895_v5, %v8895_v5 }
0x1424   :  { %v5070_v54 = vsel %vm171_vm1, %v5052_v4, 0.0 }
0x1425   :  { %5071 = vadd.xlane.f32.xlu2 %v5070_v54 }
0x1429   :  { %v5057_v53 = vpop.xlane.xlu0 %5056 }
0x142a   :  { %v5079_v10 = vmul.f32 %v5057_v53, %v6439_v30 }
0x142c   :  { %v5087_v47 = vadd.f32 1e-06, %v5079_v10 }
0x142e   :  { %6261 = vrsqrt.f32 %v5087_v47  ;;  %vm5101_vm7 = vweird.f32 %v5087_v47 }
0x1431   :  { %v5060_v44 = vpop.xlane.xlu2 %5059 }
0x1432   :  { %v5080_v41 = vmul.f32 %v5060_v44, %v6439_v30 }
0x1434   :  { %v6262_v11 = vpop.eup %6261  ;;  %v5088_v46 = vadd.f32 1e-06, %v5080_v41 }
0x1435   :  { %v5096_v51 = vmul.f32 %v6262_v11, %v5087_v47  ;;  %vm5102_vm6 = vweird.f32 %v6262_v11 }
0x1436   :  { %v5027_v20 = vpop.xlane.xlu1 %5026  ;;  %6263 = vrsqrt.f32 %v5088_v46  ;;  %vm5103_vm8 = vmor %vm5101_vm7, %vm5102_vm6  ;;  %vm5111_vm0 = vweird.f32 %v5088_v46 }
0x1437   :  { %v5037_v26 = vmul.f32 %v5027_v20, %v6439_v30  ;;  %v5097_v22 = vmul.f32 %v6262_v11, %v5096_v51 }
0x1439   :  { %v8915_v25 = vsub.f32 %v5003_v45, %v5037_v26  ;;  %v5098_v13 = vmul.f32 0.5, %v5097_v22 }
0x143b   :  { %v5053_v28 = vmul.f32 %v8915_v25, %v8915_v25  ;;  %v5099_v23 = vsub.f32 1.5, %v5098_v13 }
0x143c   :  { %v6264_v2 = vpop.eup %6263 }
0x143d   :  { %v5073_v32 = vsel %vm171_vm1, %v5053_v28, 0.0  ;;  %v5100_v0 = vmul.f32 %v6262_v11, %v5099_v23  ;;  %v5106_v21 = vmul.f32 %v6264_v2, %v5088_v46  ;;  %vm5112_vm9 = vweird.f32 %v6264_v2 }
0x143e   :  { %v5030_v15 = vpop.xlane.xlu0 %5029  ;;  %5074 = vadd.xlane.f32.xlu1 %v5073_v32  ;;  %vm5113_vm13 = vmor %vm5111_vm0, %vm5112_vm9 }
0x143f   :  { %v5038_v62 = vmul.f32 %v5030_v15, %v6439_v30  ;;  %v5107_v6 = vmul.f32 %v6264_v2, %v5106_v21  ;;  %v5104_v42 = vsel %vm5103_vm8, %v6262_v11, %v5100_v0 }
0x1440   :  { %v5175_v8 = vmul.f32 %v5104_v42, %v8858_v56 }
0x1441   :  { %v8922_v14 = vsub.f32 %v8872_v33, %v5038_v62  ;;  %v5108_v57 = vmul.f32 0.5, %v5107_v6 }
0x1442   :  { %v5186_v43 = vmul.f32 %v8929_v39, %v5175_v8 }
0x1443   :  { %v5054_v31 = vmul.f32 %v8922_v14, %v8922_v14  ;;  %v5109_v1 = vsub.f32 1.5, %v5108_v57 }
0x1444   :  { %v5197_v56 = vadd.f32 %v8936_v50, %v5186_v43 }
0x1445   :  { %v5076_v29 = vsel %vm171_vm1, %v5054_v31, 0.0  ;;  %v5110_v9 = vmul.f32 %v6264_v2, %v5109_v1 }
0x1446   :  { %5077 = vadd.xlane.f32.xlu0 %v5076_v29 }
0x1447   :  { %v5114_v45 = vsel %vm5113_vm13, %v6264_v2, %v5110_v9 }
0x1448   :  { %v5176_v48 = vmul.f32 %v5114_v45, %v8864_v37 }
0x144a   :  { %v5187_v33 = vmul.f32 %v8929_v39, %v5176_v48 }
0x144c   :  { %v5198_v61 = vadd.f32 %v8936_v50, %v5187_v33 }
0x144e   :  { %v5205_v35 = vpack.c.bf16 %v5198_v61, %v5197_v56 }
0x1450   :  { %5698 = vmatmul.msk.bf16.vlgmr.msrb.gmra.mxu3 %vm171_vm1, %v5205_v35 }
0x1471   :  { %v5063_v7 = vpop.xlane.xlu2 %5062 }
0x1472   :  { %v5081_v16 = vmul.f32 %v5063_v7, %v6439_v30 }
0x1474   :  { %v5089_v36 = vadd.f32 1e-06, %v5081_v16 }
0x1476   :  { %6265 = vrsqrt.f32 %v5089_v36  ;;  %vm5121_vm10 = vweird.f32 %v5089_v36 }
0x1479   :  { %v5066_v49 = vpop.xlane.xlu1 %5065 }
0x147a   :  { %v5082_v55 = vmul.f32 %v5066_v49, %v6439_v30 }
0x147c   :  { %v6266_v18 = vpop.eup %6265  ;;  %v5090_v17 = vadd.f32 1e-06, %v5082_v55 }
0x147d   :  { %v5116_v37 = vmul.f32 %v6266_v18, %v5089_v36  ;;  %vm5122_vm15 = vweird.f32 %v6266_v18 }
0x147e   :  { %6267 = vrsqrt.f32 %v5090_v17  ;;  %vm5123_vm11 = vmor %vm5121_vm10, %vm5122_vm15  ;;  %vm5131_vm14 = vweird.f32 %v5090_v17 }
0x147f   :  { %v5117_v24 = vmul.f32 %v6266_v18, %v5116_v37 }
0x1481   :  { %v5118_v12 = vmul.f32 0.5, %v5117_v24 }
0x1483   :  { %v5119_v63 = vsub.f32 1.5, %v5118_v12 }
0x1484   :  { %v6268_v3 = vpop.eup %6267 }
0x1485   :  { %v5120_v59 = vmul.f32 %v6266_v18, %v5119_v63  ;;  %v5126_v27 = vmul.f32 %v6268_v3, %v5090_v17  ;;  %vm5132_vm12 = vweird.f32 %v6268_v3 }
0x1486   :  { %vm5133_vm2 = vmor %vm5131_vm14, %vm5132_vm12 }
0x1487   :  { %v5127_v4 = vmul.f32 %v6268_v3, %v5126_v27  ;;  %v5124_v54 = vsel %vm5123_vm11, %v6266_v18, %v5120_v59 }
0x1488   :  { %v5177_v10 = vmul.f32 %v5124_v54, %v8877_v60 }
0x1489   :  { %v5128_v52 = vmul.f32 0.5, %v5127_v4 }
0x148a   :  { %v5188_v44 = vmul.f32 %v8929_v39, %v5177_v10 }
0x148b   :  { %v5129_v53 = vsub.f32 1.5, %v5128_v52 }
0x148c   :  { %v5199_v51 = vadd.f32 %v8936_v50, %v5188_v44 }
0x148d   :  { %v5130_v34 = vmul.f32 %v6268_v3, %v5129_v53  ;;  %v5906_v53 = vld [vmem:[%s9016_s18] ss:$0 sm:$0xff] }
0x148f   :  { %v5134_v47 = vsel %vm5133_vm2, %v6268_v3, %v5130_v34 }
0x1490   :  { %v5178_v38 = vmul.f32 %v5134_v47, %v8883_v58  ;;  %v5069_v40 = vpop.xlane.xlu0 %5068 }
0x1491   :  { %v5083_v41 = vmul.f32 %v5069_v40, %v6439_v30 }
0x1492   :  { %v5189_v11 = vmul.f32 %v8929_v39, %v5178_v38 }
0x1493   :  { %v5091_v46 = vadd.f32 1e-06, %v5083_v41 }
0x1494   :  { %v5200_v20 = vadd.f32 %v8936_v50, %v5189_v11 }
0x1495   :  { %6269 = vrsqrt.f32 %v5091_v46  ;;  %vm5141_vm4 = vweird.f32 %v5091_v46 }
0x1496   :  { %v5206_v60 = vpack.c.bf16 %v5200_v20, %v5199_v51 }
0x1498   :  { %5699 = vmatmul.msk.bf16.gmra.mxu3 %vm171_vm1, %v5206_v60  ;;  %v5072_v26 = vpop.xlane.xlu2 %5071 }
0x1499   :  { %v5084_v22 = vmul.f32 %v5072_v26, %v6439_v30 }
0x149b   :  { %v6270_v58 = vpop.eup %6269  ;;  %v5092_v13 = vadd.f32 1e-06, %v5084_v22 }
0x149c   :  { %v5136_v28 = vmul.f32 %v6270_v58, %v5091_v46  ;;  %vm5142_vm3 = vweird.f32 %v6270_v58 }
0x149d   :  { %6271 = vrsqrt.f32 %v5092_v13  ;;  %vm5143_vm5 = vmor %vm5141_vm4, %vm5142_vm3  ;;  %vm5151_vm7 = vweird.f32 %v5092_v13 }
0x149e   :  { %v5137_v23 = vmul.f32 %v6270_v58, %v5136_v28 }
0x14a0   :  { %v5138_v2 = vmul.f32 0.5, %v5137_v23 }
0x14a2   :  { %v5139_v32 = vsub.f32 1.5, %v5138_v2 }
0x14a3   :  { %v6272_v0 = vpop.eup %6271 }
0x14a4   :  { %v5140_v21 = vmul.f32 %v6270_v58, %v5139_v32  ;;  %v5146_v15 = vmul.f32 %v6272_v0, %v5092_v13  ;;  %vm5152_vm6 = vweird.f32 %v6272_v0 }
0x14a5   :  { %vm5153_vm8 = vmor %vm5151_vm7, %vm5152_vm6 }
0x14a6   :  { %v5147_v62 = vmul.f32 %v6272_v0, %v5146_v15  ;;  %v5144_v6 = vsel %vm5143_vm5, %v6270_v58, %v5140_v21 }
0x14a7   :  { %v5179_v31 = vmul.f32 %v5144_v6, %v8889_v19 }
0x14a8   :  { %v5148_v42 = vmul.f32 0.5, %v5147_v62 }
0x14a9   :  { %v5190_v45 = vmul.f32 %v8929_v39, %v5179_v31 }
0x14aa   :  { %v5149_v57 = vsub.f32 1.5, %v5148_v42 }
0x14ab   :  { %v5201_v56 = vadd.f32 %v8936_v50, %v5190_v45 }
0x14ac   :  { %v5150_v1 = vmul.f32 %v6272_v0, %v5149_v57 }
0x14ae   :  { %v5154_v8 = vsel %vm5153_vm8, %v6272_v0, %v5150_v1 }
0x14af   :  { %v5180_v29 = vmul.f32 %v5154_v8, %v8895_v5 }
0x14b1   :  { %v5075_v9 = vpop.xlane.xlu1 %5074  ;;  %v5191_v48 = vmul.f32 %v8929_v39, %v5180_v29 }
0x14b2   :  { %v5085_v43 = vmul.f32 %v5075_v9, %v6439_v30 }
0x14b3   :  { %v5202_v61 = vadd.f32 %v8936_v50, %v5191_v48 }
0x14b4   :  { %v5093_v33 = vadd.f32 1e-06, %v5085_v43 }
0x14b5   :  { %v5207_v19 = vpack.c.bf16 %v5202_v61, %v5201_v56 }
0x14b6   :  { %6273 = vrsqrt.f32 %v5093_v33  ;;  %vm5161_vm0 = vweird.f32 %v5093_v33 }
0x14b7   :  { %5700 = vmatmul.msk.bf16.gmra.mxu3 %vm171_vm1, %v5207_v19 }
0x14b9   :  { %v5078_v35 = vpop.xlane.xlu0 %5077 }
0x14ba   :  { %v5086_v7 = vmul.f32 %v5078_v35, %v6439_v30 }
0x14bc   :  { %v6274_v5 = vpop.eup %6273  ;;  %v5094_v16 = vadd.f32 1e-06, %v5086_v7 }
0x14bd   :  { %v5156_v36 = vmul.f32 %v6274_v5, %v5093_v33  ;;  %vm5162_vm9 = vweird.f32 %v6274_v5 }
0x14be   :  { %6275 = vrsqrt.f32 %v5094_v16  ;;  %vm5163_vm13 = vmor %vm5161_vm0, %vm5162_vm9  ;;  %vm5171_vm10 = vweird.f32 %v5094_v16 }
0x14bf   :  { %v5157_v49 = vmul.f32 %v6274_v5, %v5156_v36 }
0x14c1   :  { %v5158_v55 = vmul.f32 0.5, %v5157_v49 }
0x14c3   :  { %v5159_v18 = vsub.f32 1.5, %v5158_v55 }
0x14c4   :  { %v6276_v17 = vpop.eup %6275 }
0x14c5   :  { %v5160_v37 = vmul.f32 %v6274_v5, %v5159_v18  ;;  %v5166_v24 = vmul.f32 %v6276_v17, %v5094_v16  ;;  %vm5172_vm15 = vweird.f32 %v6276_v17 }
0x14c6   :  { %vm5173_vm11 = vmor %vm5171_vm10, %vm5172_vm15 }
0x14c7   :  { %v5167_v12 = vmul.f32 %v6276_v17, %v5166_v24  ;;  %v5164_v63 = vsel %vm5163_vm13, %v6274_v5, %v5160_v37 }
0x14c8   :  { %v5181_v30 = vmul.f32 %v5164_v63, %v8915_v25 }
0x14c9   :  { %v5168_v3 = vmul.f32 0.5, %v5167_v12 }
0x14ca   :  { %v5192_v52 = vmul.f32 %v8929_v39, %v5181_v30 }
0x14cb   :  { %v5169_v59 = vsub.f32 1.5, %v5168_v3 }
0x14cc   :  { %v5203_v47 = vadd.f32 %v8936_v50, %v5192_v52 }
0x14cd   :  { %v5170_v27 = vmul.f32 %v6276_v17, %v5169_v59 }
0x14cf   :  { %v5174_v4 = vsel %vm5173_vm11, %v6276_v17, %v5170_v27 }
0x14d0   :  { %v5182_v54 = vmul.f32 %v5174_v4, %v8922_v14 }
0x14d2   :  { %v5193_v10 = vmul.f32 %v8929_v39, %v5182_v54 }
0x14d3   :  { %v5266_v34 = vpop.f32.mrf.mxu3 }
0x14d4   :  { %v5204_v38 = vadd.f32 %v8936_v50, %v5193_v10  ;;  %v5267_v25 = vadd.f32 %v5906_v53, %v5266_v34 }
0x14d6   :  { %v5208_v44 = vpack.c.bf16 %v5204_v38, %v5203_v47  ;;  %5286 = vst [vmem:[%s9017_s19] sm:$0xff] %v5267_v25 }
0x14d8   :  { %5701 = vmatmul.msk.bf16.gmra.mxu3 %vm171_vm1, %v5208_v44 }
0x14db   :  { %v5268_v14 = vpop.f32.mrf.mxu3 }
0x14dc   :  { %v5269_v40 = vadd.f32 %v5906_v53, %v5268_v14 }
0x14de   :  { %5287 = vst [vmem:[%s9017_s19 + $0x8] sm:$0xff] %v5269_v40 }
0x151b   :  { %v5271_v39 = vpop.f32.mrf.mxu3 }
0x151c   :  { %v5272_v41 = vadd.f32 %v5906_v53, %v5271_v39 }
0x151e   :  { %5288 = vst [vmem:[%s9017_s19 + $0x10] sm:$0xff] %v5272_v41 }
0x1523   :  { %v5273_v50 = vpop.f32.mrf.mxu3 }
0x1524   :  { %v5274_v11 = vadd.f32 %v5906_v53, %v5273_v50 }
0x1526   :  { %5289 = vst [vmem:[%s9017_s19 + $0x18] sm:$0xff] %v5274_v11 }
0x153a   :  { %v5276_v46 = vpop.f32.mrf.mxu3 }
0x153b   :  { %v5277_v51 = vadd.f32 %v5906_v53, %v5276_v46 }
0x153d   :  { %5290 = vst [vmem:[%s9017_s19 + $0x20] sm:$0xff] %v5277_v51 }
0x1542   :  { %v5278_v20 = vpop.f32.mrf.mxu3 }
0x1543   :  { %v5279_v60 = vadd.f32 %v5906_v53, %v5278_v20 }
0x1545   :  { %5291 = vst [vmem:[%s9017_s19 + $0x28] sm:$0xff] %v5279_v60 }
0x155b   :  { %v5281_v26 = vpop.f32.mrf.mxu3 }
0x155c   :  { %v5282_v22 = vadd.f32 %v5906_v53, %v5281_v26 }
0x155e   :  { %5292 = vst [vmem:[%s9017_s19 + $0x30] sm:$0xff] %v5282_v22 }
0x1563   :  { %v5283_v58 = vpop.f32.mrf.mxu3 }
0x1564   :  { %v5284_v13 = vadd.f32 %v5906_v53, %v5283_v58 }
0x1566   :  { %5293 = vst [vmem:[%s9017_s19 + $0x38] sm:$0xff] %v5284_v13 }

</bundles_post_ra>
